<compile_context>
chip_gen: v7x
topology: tpu7x:2x2x1
jax: 0.10.0
libtpu: 0.0.40
codegen_flags: <defaults>
</compile_context>

<pallas_src>
import functools

import numpy as np
import jax
import jax.numpy as jnp
from jax.experimental import pallas as pl
from jax.experimental.pallas import tpu as pltpu

C1 = 16        # conv1 out channels, padded 10 -> 16
C2 = 32        # conv2 out channels, padded 20 -> 32
F1 = 256       # fc1 width
NCLS = 62      # real classes
NCP = 128      # padded class dim (lane-dense output)
MAX_TB = 64    # images per grid step (can be raised to 128 on v5e/v6e)


# ------------------------------- fused kernel --------------------------------

def _fused_kernel(x_ref, t1_ref, b1_ref, t2_ref, b2_ref,
                  wf1_ref, bf1_ref, wf2_ref, bf2_ref, out_ref,
                  acc_e_ref, acc_o_ref, pool_ref, acc2_ref, c2_ref, h1_ref):
    TB = out_ref.shape[0]
    N1 = 12 * C1          # 192: conv1 lanes = (xp, c1)
    N2 = 8 * C2           # 256: conv2 lanes = (w, c2)

    # ---- conv1 as width-Toeplitz matmuls (f32, K=28, N=192) ------------------
    # x_ref rows are (yin, n); each kh term is a contiguous row-slice.
    # One accumulator per x-parity so the 2x2 maxpool needs no lane shuffles.
    for pw, acc in ((0, acc_e_ref), (1, acc_o_ref)):
        acc[...] = jnp.dot(x_ref[pl.ds(0, 24 * TB), :], t1_ref[pw * 5 + 0],
                           preferred_element_type=jnp.float32)
        for kh in range(1, 5):
            acc[...] += jnp.dot(x_ref[pl.ds(kh * TB, 24 * TB), :],
                                t1_ref[pw * 5 + kh],
                                preferred_element_type=jnp.float32)

    # ---- maxpool 2x2 (+bias, relu); bias is per-channel so order is exact ----
    m = jnp.maximum(acc_e_ref[...], acc_o_ref[...]) + b1_ref[...]   # pool over x
    m = m.reshape(12, 2 * TB, N1)
    m = jnp.maximum(m[:, :TB, :], m[:, TB:, :])                     # pool over y
    pool_ref[...] = (jnp.maximum(m, 0.0)
                     .reshape(12 * TB, N1).astype(jnp.bfloat16))    # cast once

    # ---- conv2 as width-Toeplitz matmuls (bf16, K=192, N=256) ----------------
    acc2_ref[...] = jnp.dot(pool_ref[pl.ds(0, 8 * TB), :], t2_ref[0],
                            preferred_element_type=jnp.float32)
    for kh in range(1, 5):
        acc2_ref[...] += jnp.dot(pool_ref[pl.ds(kh * TB, 8 * TB), :], t2_ref[kh],
                                 preferred_element_type=jnp.float32)
    c2_ref[...] = (jnp.maximum(acc2_ref[...] + b2_ref[...], 0.0)
                   .astype(jnp.bfloat16))                           # cast once

    # ---- fc1: 8 accumulating matmuls with K=256 ------------------------------
    h1_ref[...] = jnp.dot(c2_ref[pl.ds(0, TB), :], wf1_ref[0],
                          preferred_element_type=jnp.float32)
    for h in range(1, 8):
        h1_ref[...] += jnp.dot(c2_ref[pl.ds(h * TB, TB), :], wf1_ref[h],
                               preferred_element_type=jnp.float32)
    h1 = jnp.maximum(h1_ref[...] + bf1_ref[...], 0.0).astype(jnp.bfloat16)

    # ---- fc2 + log_softmax (padded classes carry a -1e30 bias -> exp()==0) ---
    z = jnp.dot(h1, wf2_ref[...], preferred_element_type=jnp.float32) + bf2_ref[...]
    zmax = jnp.max(z, axis=-1, keepdims=True)
    lse = zmax + jnp.log(jnp.sum(jnp.exp(z - zmax), axis=-1, keepdims=True))
    out_ref[...] = (z - lse).astype(out_ref.dtype)


# ------------------------- one-time host-side weight prep --------------------

def prepare_params(params):
    """Build padded / Toeplitz / bf16 kernel weights.  Call ONCE, outside jit."""
    w1 = np.asarray(params["w_conv1"], np.float32)   # (10,1,5,5)  [c,0,kh,kw]
    b1 = np.asarray(params["b_conv1"], np.float32)
    w2 = np.asarray(params["w_conv2"], np.float32)   # (20,10,5,5) [c2,c1,kh,kw]
    b2 = np.asarray(params["b_conv2"], np.float32)
    wf1 = np.asarray(params["w_fc1"], np.float32)    # (1280,256) torch weight.T
    bf1 = np.asarray(params["b_fc1"], np.float32)
    wf2 = np.asarray(params["w_fc2"], np.float32)    # (256,62)   torch weight.T
    bf2 = np.asarray(params["b_fc2"], np.float32)

    # conv1 width-Toeplitz: T1[pw*5+kh, xin, xp*16+c] = w1[c,0,kh,xin-(2*xp+pw)]
    T1 = np.zeros((2, 5, 28, 12, C1), np.float32)
    for kh in range(5):
        for pw in range(2):
            for xp in range(12):
                x = 2 * xp + pw
                T1[pw, kh, x:x + 5, xp, :10] = w1[:, 0, kh, :].T      # [kw, c]
    T1 = T1.reshape(10, 28, 12 * C1)
    b1r = np.zeros((12, C1), np.float32)
    b1r[:, :10] = b1
    b1r = b1r.reshape(1, 12 * C1)

    # conv2 width-Toeplitz: T2[kh, xp*16+c1, w*32+c2] = w2[c2,c1,kh,xp-w]
    T2 = np.zeros((5, 12, C1, 8, C2), np.float32)
    for kh in range(5):
        for w in range(8):
            T2[kh, w:w + 5, :10, w, :20] = np.transpose(w2[:, :, kh, :],
                                                        (2, 1, 0))   # [kw,c1,c2]
    T2 = T2.reshape(5, 12 * C1, 8 * C2)
    b2r = np.zeros((8, C2), np.float32)
    b2r[:, :20] = b2
    b2r = b2r.reshape(1, 8 * C2)

    # fc1 regrouped for K=256 passes, folding the NCHW flatten (j=c2*64+h*8+w):
    # WF1[h, w*32+c2, f] = wf1[c2*64 + h*8 + w, f]
    WF1 = np.zeros((8, 8, C2, F1), np.float32)
    WF1[:, :, :20, :] = np.transpose(wf1.reshape(20, 8, 8, F1), (1, 2, 0, 3))
    WF1 = WF1.reshape(8, 8 * C2, F1)
    bf1r = bf1.reshape(1, F1)

    # fc2: pad classes 62 -> 128; padded logits get a -1e30 bias.
    WF2 = np.zeros((F1, NCP), np.float32)
    WF2[:, :NCLS] = wf2
    bf2r = np.full((1, NCP), -1e30, np.float32)
    bf2r[0, :NCLS] = bf2

    return {
        "T1": jnp.asarray(T1, jnp.float32),   "b1": jnp.asarray(b1r),
        "T2": jnp.asarray(T2, jnp.bfloat16),  "b2": jnp.asarray(b2r),
        "WF1": jnp.asarray(WF1, jnp.bfloat16), "bf1": jnp.asarray(bf1r),
        "WF2": jnp.asarray(WF2, jnp.bfloat16), "bf2": jnp.asarray(bf2r),
    }


# --------------------------------- forward -----------------------------------

def _pick_tb(n):
    """Batch tile: multiple of 16, <= MAX_TB, aiming for >=2 grid steps."""
    n16 = ((n + 15) // 16) * 16
    return max(16, min(MAX_TB, (n16 // 2) // 16 * 16))


@jax.jit
def cnn_emnist_forward(x_nchw, prepped):
    """Forward of CNN_EMnist.  x_nchw: (N,1,28,28) f32 -> (N,62) log-probs."""
    n = x_nchw.shape[0]
    TB = _pick_tb(n)
    n_pad = ((n + TB - 1) // TB) * TB
    nblk = n_pad // TB

    # Input relayout: rows = (block, yin, n), lanes = xin   -> (nblk*28*TB, 28)
    xr = jnp.pad(x_nchw[:, 0].astype(jnp.float32),
                 ((0, n_pad - n), (0, 0), (0, 0)))
    xr = (xr.reshape(nblk, TB, 28, 28).transpose(0, 2, 1, 3)
            .reshape(nblk * 28 * TB, 28))

    in_specs = [
        pl.BlockSpec((28 * TB, 28), lambda b: (b, 0)),            # raw images
        pl.BlockSpec((10, 28, 12 * C1), lambda b: (0, 0, 0)),     # conv1 Toeplitz
        pl.BlockSpec((1, 12 * C1), lambda b: (0, 0)),
        pl.BlockSpec((5, 12 * C1, 8 * C2), lambda b: (0, 0, 0)),  # conv2 Toeplitz
        pl.BlockSpec((1, 8 * C2), lambda b: (0, 0)),
        pl.BlockSpec((8, 8 * C2, F1), lambda b: (0, 0, 0)),       # fc1 (K=256 groups)
        pl.BlockSpec((1, F1), lambda b: (0, 0)),
        pl.BlockSpec((F1, NCP), lambda b: (0, 0)),                # fc2
        pl.BlockSpec((1, NCP), lambda b: (0, 0)),
    ]
    out_spec = pl.BlockSpec((TB, NCP), lambda b: (b, 0))
    scratch = [
        pltpu.VMEM((24 * TB, 12 * C1), jnp.float32),   # conv1 acc, even x
        pltpu.VMEM((24 * TB, 12 * C1), jnp.float32),   # conv1 acc, odd x
        pltpu.VMEM((12 * TB, 12 * C1), jnp.bfloat16),  # pooled (relu, bf16)
        pltpu.VMEM((8 * TB, 8 * C2), jnp.float32),     # conv2 acc
        pltpu.VMEM((8 * TB, 8 * C2), jnp.bfloat16),    # conv2 out (relu, bf16)
        pltpu.VMEM((TB, F1), jnp.float32),             # fc1 acc
    ]

    out_padded = pl.pallas_call(
        _fused_kernel,
        out_shape=jax.ShapeDtypeStruct((n_pad, NCP), jnp.float32),
        grid_spec=pltpu.PrefetchScalarGridSpec(
            num_scalar_prefetch=0,
            grid=(nblk,),
            in_specs=in_specs,
            out_specs=out_spec,
            scratch_shapes=scratch,
        ),
        compiler_params=pltpu.CompilerParams(
            dimension_semantics=("parallel",),
            vmem_limit_bytes=48 * 1024 * 1024,
        ),
    )(xr, prepped["T1"], prepped["b1"], prepped["T2"], prepped["b2"],
      prepped["WF1"], prepped["bf1"], prepped["WF2"], prepped["bf2"])
    return out_padded[:n, :NCLS]


# ---------------------------- reference & params -----------------------------

def _reference_forward(x, params):
    """Pure-JAX/XLA reference matching the PyTorch module exactly (f32)."""
    dn = ("NCHW", "OIHW", "NCHW")
    y = jax.lax.conv_general_dilated(x, params["w_conv1"], (1, 1), "VALID",
                                     dimension_numbers=dn)
    y = y + params["b_conv1"][None, :, None, None]
    y = jax.lax.reduce_window(y, -jnp.inf, jax.lax.max,
                              (1, 1, 2, 2), (1, 1, 2, 2), "VALID")
    y = jnp.maximum(y, 0.0)
    y = jax.lax.conv_general_dilated(y, params["w_conv2"], (1, 1), "VALID",
                                     dimension_numbers=dn)
    y = jnp.maximum(y + params["b_conv2"][None, :, None, None], 0.0)
    y = y.reshape(y.shape[0], -1)                       # (N, 1280) NCHW flatten
    y = jnp.maximum(y @ params["w_fc1"] + params["b_fc1"], 0.0)
    z = y @ params["w_fc2"] + params["b_fc2"]
    return jax.nn.log_softmax(z, axis=-1)


def init_params(key):
    """Deterministic synthetic parameters with the module's shapes."""
    ks = jax.random.split(key, 8)
    s = 0.05
    return {
        "w_conv1": s * jax.random.normal(ks[0], (10, 1, 5, 5), jnp.float32),
        "b_conv1": s * jax.random.normal(ks[1], (10,), jnp.float32),
        "w_conv2": s * jax.random.normal(ks[2], (20, 10, 5, 5), jnp.float32),
        "b_conv2": s * jax.random.normal(ks[3], (20,), jnp.float32),
        "w_fc1":   s * jax.random.normal(ks[4], (1280, 256), jnp.float32),  # torch weight.T
        "b_fc1":   s * jax.random.normal(ks[5], (256,), jnp.float32),
        "w_fc2":   s * jax.random.normal(ks[6], (256, 62), jnp.float32),    # torch weight.T
        "b_fc2":   s * jax.random.normal(ks[7], (62,), jnp.float32),
    }


if __name__ == "__main__":
    key = jax.random.PRNGKey(0)
    k_in, k_par, k_in2 = jax.random.split(key, 3)
    params = init_params(k_par)
    prepped = prepare_params(params)    # hoisted one-time weight prep

    # small-batch path (TB=16, single grid step)
    x = jax.random.normal(k_in, (2, 1, 28, 28), jnp.float32)
    out = jax.block_until_ready(cnn_emnist_forward(x, prepped))
    assert out.shape == (2, NCLS) and out.dtype == jnp.float32
    assert bool(jnp.all(jnp.abs(jnp.sum(jnp.exp(out), axis=1) - 1.0) < 1e-3))
    ref = _reference_forward(x, params)
    assert bool(jnp.max(jnp.abs(out - ref)) < 5e-2)

    # large-batch path (TB=64, 2 "parallel" grid steps) — the perf configuration
    x_big = jax.random.normal(k_in2, (128, 1, 28, 28), jnp.float32)
    out_big = jax.block_until_ready(cnn_emnist_forward(x_big, prepped))
    assert out_big.shape == (128, NCLS)
    assert bool(jnp.all(jnp.abs(jnp.sum(jnp.exp(out_big), axis=1) - 1.0) < 1e-3))
    ref_big = _reference_forward(x_big, params)
    assert bool(jnp.max(jnp.abs(out_big - ref_big)) < 1e-1)

    print("KERNEL_OK")
</pallas_src>

<mosaic_0001>
module attributes {stable_mosaic.version = 11 : i64} {
  func.func @_fused_kernel(%arg0: i32, %arg1: memref<448x28xf32, #tpu.memory_space<vmem>>, %arg2: memref<10x28x192xf32, #tpu.memory_space<vmem>>, %arg3: memref<1x192xf32, #tpu.memory_space<vmem>>, %arg4: memref<5x192x256xbf16, #tpu.memory_space<vmem>>, %arg5: memref<1x256xf32, #tpu.memory_space<vmem>>, %arg6: memref<8x256x256xbf16, #tpu.memory_space<vmem>>, %arg7: memref<1x256xf32, #tpu.memory_space<vmem>>, %arg8: memref<256x128xbf16, #tpu.memory_space<vmem>>, %arg9: memref<1x128xf32, #tpu.memory_space<vmem>>, %arg10: memref<16x128xf32, #tpu.memory_space<vmem>>, %arg11: memref<384x192xf32, #tpu.memory_space<vmem>>, %arg12: memref<384x192xf32, #tpu.memory_space<vmem>>, %arg13: memref<192x192xbf16, #tpu.memory_space<vmem>>, %arg14: memref<128x256xf32, #tpu.memory_space<vmem>>, %arg15: memref<128x256xbf16, #tpu.memory_space<vmem>>, %arg16: memref<16x256xf32, #tpu.memory_space<vmem>>) attributes {dimension_semantics = [#tpu.dimension_semantics<parallel>], iteration_bounds = array<i64: 1>, scalar_prefetch = 0 : i64, scratch_operands = 6 : i64, tpu.core_type = #tpu.core_type<tc>, window_params = [{transform_indices = @transform_0, window_bounds = array<i64: 448, 28>}, {pipeline_mode = #tpu.pipeline_mode<synchronous>, transform_indices = @transform_1, window_bounds = array<i64: 10, 28, 192>}, {pipeline_mode = #tpu.pipeline_mode<synchronous>, transform_indices = @transform_2, window_bounds = array<i64: 1, 192>}, {pipeline_mode = #tpu.pipeline_mode<synchronous>, transform_indices = @transform_3, window_bounds = array<i64: 5, 192, 256>}, {pipeline_mode = #tpu.pipeline_mode<synchronous>, transform_indices = @transform_4, window_bounds = array<i64: 1, 256>}, {pipeline_mode = #tpu.pipeline_mode<synchronous>, transform_indices = @transform_5, window_bounds = array<i64: 8, 256, 256>}, {pipeline_mode = #tpu.pipeline_mode<synchronous>, transform_indices = @transform_6, window_bounds = array<i64: 1, 256>}, {pipeline_mode = #tpu.pipeline_mode<synchronous>, transform_indices = @transform_7, window_bounds = array<i64: 256, 128>}, {pipeline_mode = #tpu.pipeline_mode<synchronous>, transform_indices = @transform_8, window_bounds = array<i64: 1, 128>}, {transform_indices = @transform_9, window_bounds = array<i64: 16, 128>}]} {
    %c0 = arith.constant 0 : index
    %c0_0 = arith.constant 0 : index
    %0 = vector.load %arg1[%c0, %c0_0] : memref<448x28xf32, #tpu.memory_space<vmem>>, vector<384x28xf32>
    %c0_1 = arith.constant 0 : index
    %c0_2 = arith.constant 0 : index
    %c0_3 = arith.constant 0 : index
    %1 = vector.load %arg2[%c0_1, %c0_2, %c0_3] : memref<10x28x192xf32, #tpu.memory_space<vmem>>, vector<1x28x192xf32>
    %2 = vector.shape_cast %1 : vector<1x28x192xf32> to vector<28x192xf32>
    %cst = arith.constant dense<0.000000e+00> : vector<384x192xf32>
    %3 = tpu.matmul %0, %2, %cst {dimension_numbers = #tpu.dot_dimension_numbers<[1], [0], [0], [1], [0, 0, 1, 1], [], []>} : vector<384x28xf32>, vector<28x192xf32>, vector<384x192xf32> -> vector<384x192xf32>
    %c0_4 = arith.constant 0 : index
    %c0_5 = arith.constant 0 : index
    %4 = vector.load %arg11[%c0_4, %c0_5] : memref<384x192xf32, #tpu.memory_space<vmem>>, vector<384x192xf32>
    tpu.vector_store %arg11[%c0_4, %c0_5], %3 {strides = array<i32>} : memref<384x192xf32, #tpu.memory_space<vmem>>, vector<384x192xf32>,
    %c0_6 = arith.constant 0 : index
    %c0_7 = arith.constant 0 : index
    %5 = vector.load %arg11[%c0_6, %c0_7] : memref<384x192xf32, #tpu.memory_space<vmem>>, vector<384x192xf32>
    %c16 = arith.constant 16 : index
    %c0_8 = arith.constant 0 : index
    %6 = vector.load %arg1[%c16, %c0_8] : memref<448x28xf32, #tpu.memory_space<vmem>>, vector<384x28xf32>
    %c1 = arith.constant 1 : index
    %c0_9 = arith.constant 0 : index
    %c0_10 = arith.constant 0 : index
    %7 = vector.load %arg2[%c1, %c0_9, %c0_10] : memref<10x28x192xf32, #tpu.memory_space<vmem>>, vector<1x28x192xf32>
    %8 = vector.shape_cast %7 : vector<1x28x192xf32> to vector<28x192xf32>
    %cst_11 = arith.constant dense<0.000000e+00> : vector<384x192xf32>
    %9 = tpu.matmul %6, %8, %cst_11 {dimension_numbers = #tpu.dot_dimension_numbers<[1], [0], [0], [1], [0, 0, 1, 1], [], []>} : vector<384x28xf32>, vector<28x192xf32>, vector<384x192xf32> -> vector<384x192xf32>
    %10 = arith.addf %5, %9 : vector<384x192xf32>
    %c0_12 = arith.constant 0 : index
    %c0_13 = arith.constant 0 : index
    %11 = vector.load %arg11[%c0_12, %c0_13] : memref<384x192xf32, #tpu.memory_space<vmem>>, vector<384x192xf32>
    tpu.vector_store %arg11[%c0_12, %c0_13], %10 {strides = array<i32>} : memref<384x192xf32, #tpu.memory_space<vmem>>, vector<384x192xf32>,
    %c0_14 = arith.constant 0 : index
    %c0_15 = arith.constant 0 : index
    %12 = vector.load %arg11[%c0_14, %c0_15] : memref<384x192xf32, #tpu.memory_space<vmem>>, vector<384x192xf32>
    %c32 = arith.constant 32 : index
    %c0_16 = arith.constant 0 : index
    %13 = vector.load %arg1[%c32, %c0_16] : memref<448x28xf32, #tpu.memory_space<vmem>>, vector<384x28xf32>
    %c2 = arith.constant 2 : index
    %c0_17 = arith.constant 0 : index
    %c0_18 = arith.constant 0 : index
    %14 = vector.load %arg2[%c2, %c0_17, %c0_18] : memref<10x28x192xf32, #tpu.memory_space<vmem>>, vector<1x28x192xf32>
    %15 = vector.shape_cast %14 : vector<1x28x192xf32> to vector<28x192xf32>
    %cst_19 = arith.constant dense<0.000000e+00> : vector<384x192xf32>
    %16 = tpu.matmul %13, %15, %cst_19 {dimension_numbers = #tpu.dot_dimension_numbers<[1], [0], [0], [1], [0, 0, 1, 1], [], []>} : vector<384x28xf32>, vector<28x192xf32>, vector<384x192xf32> -> vector<384x192xf32>
    %17 = arith.addf %12, %16 : vector<384x192xf32>
    %c0_20 = arith.constant 0 : index
    %c0_21 = arith.constant 0 : index
    %18 = vector.load %arg11[%c0_20, %c0_21] : memref<384x192xf32, #tpu.memory_space<vmem>>, vector<384x192xf32>
    tpu.vector_store %arg11[%c0_20, %c0_21], %17 {strides = array<i32>} : memref<384x192xf32, #tpu.memory_space<vmem>>, vector<384x192xf32>,
    %c0_22 = arith.constant 0 : index
    %c0_23 = arith.constant 0 : index
    %19 = vector.load %arg11[%c0_22, %c0_23] : memref<384x192xf32, #tpu.memory_space<vmem>>, vector<384x192xf32>
    %c48 = arith.constant 48 : index
    %c0_24 = arith.constant 0 : index
    %20 = vector.load %arg1[%c48, %c0_24] : memref<448x28xf32, #tpu.memory_space<vmem>>, vector<384x28xf32>
    %c3 = arith.constant 3 : index
    %c0_25 = arith.constant 0 : index
    %c0_26 = arith.constant 0 : index
    %21 = vector.load %arg2[%c3, %c0_25, %c0_26] : memref<10x28x192xf32, #tpu.memory_space<vmem>>, vector<1x28x192xf32>
    %22 = vector.shape_cast %21 : vector<1x28x192xf32> to vector<28x192xf32>
    %cst_27 = arith.constant dense<0.000000e+00> : vector<384x192xf32>
    %23 = tpu.matmul %20, %22, %cst_27 {dimension_numbers = #tpu.dot_dimension_numbers<[1], [0], [0], [1], [0, 0, 1, 1], [], []>} : vector<384x28xf32>, vector<28x192xf32>, vector<384x192xf32> -> vector<384x192xf32>
    %24 = arith.addf %19, %23 : vector<384x192xf32>
    %c0_28 = arith.constant 0 : index
    %c0_29 = arith.constant 0 : index
    %25 = vector.load %arg11[%c0_28, %c0_29] : memref<384x192xf32, #tpu.memory_space<vmem>>, vector<384x192xf32>
    tpu.vector_store %arg11[%c0_28, %c0_29], %24 {strides = array<i32>} : memref<384x192xf32, #tpu.memory_space<vmem>>, vector<384x192xf32>,
    %c0_30 = arith.constant 0 : index
    %c0_31 = arith.constant 0 : index
    %26 = vector.load %arg11[%c0_30, %c0_31] : memref<384x192xf32, #tpu.memory_space<vmem>>, vector<384x192xf32>
    %c64 = arith.constant 64 : index
    %c0_32 = arith.constant 0 : index
    %27 = vector.load %arg1[%c64, %c0_32] : memref<448x28xf32, #tpu.memory_space<vmem>>, vector<384x28xf32>
    %c4 = arith.constant 4 : index
    %c0_33 = arith.constant 0 : index
    %c0_34 = arith.constant 0 : index
    %28 = vector.load %arg2[%c4, %c0_33, %c0_34] : memref<10x28x192xf32, #tpu.memory_space<vmem>>, vector<1x28x192xf32>
    %29 = vector.shape_cast %28 : vector<1x28x192xf32> to vector<28x192xf32>
    %cst_35 = arith.constant dense<0.000000e+00> : vector<384x192xf32>
    %30 = tpu.matmul %27, %29, %cst_35 {dimension_numbers = #tpu.dot_dimension_numbers<[1], [0], [0], [1], [0, 0, 1, 1], [], []>} : vector<384x28xf32>, vector<28x192xf32>, vector<384x192xf32> -> vector<384x192xf32>
    %31 = arith.addf %26, %30 : vector<384x192xf32>
    %c0_36 = arith.constant 0 : index
    %c0_37 = arith.constant 0 : index
    %32 = vector.load %arg11[%c0_36, %c0_37] : memref<384x192xf32, #tpu.memory_space<vmem>>, vector<384x192xf32>
    tpu.vector_store %arg11[%c0_36, %c0_37], %31 {strides = array<i32>} : memref<384x192xf32, #tpu.memory_space<vmem>>, vector<384x192xf32>,
    %c0_38 = arith.constant 0 : index
    %c0_39 = arith.constant 0 : index
    %33 = vector.load %arg1[%c0_38, %c0_39] : memref<448x28xf32, #tpu.memory_space<vmem>>, vector<384x28xf32>
    %c5 = arith.constant 5 : index
    %c0_40 = arith.constant 0 : index
    %c0_41 = arith.constant 0 : index
    %34 = vector.load %arg2[%c5, %c0_40, %c0_41] : memref<10x28x192xf32, #tpu.memory_space<vmem>>, vector<1x28x192xf32>
    %35 = vector.shape_cast %34 : vector<1x28x192xf32> to vector<28x192xf32>
    %cst_42 = arith.constant dense<0.000000e+00> : vector<384x192xf32>
    %36 = tpu.matmul %33, %35, %cst_42 {dimension_numbers = #tpu.dot_dimension_numbers<[1], [0], [0], [1], [0, 0, 1, 1], [], []>} : vector<384x28xf32>, vector<28x192xf32>, vector<384x192xf32> -> vector<384x192xf32>
    %c0_43 = arith.constant 0 : index
    %c0_44 = arith.constant 0 : index
    %37 = vector.load %arg12[%c0_43, %c0_44] : memref<384x192xf32, #tpu.memory_space<vmem>>, vector<384x192xf32>
    tpu.vector_store %arg12[%c0_43, %c0_44], %36 {strides = array<i32>} : memref<384x192xf32, #tpu.memory_space<vmem>>, vector<384x192xf32>,
    %c0_45 = arith.constant 0 : index
    %c0_46 = arith.constant 0 : index
    %38 = vector.load %arg12[%c0_45, %c0_46] : memref<384x192xf32, #tpu.memory_space<vmem>>, vector<384x192xf32>
    %c16_47 = arith.constant 16 : index
    %c0_48 = arith.constant 0 : index
    %39 = vector.load %arg1[%c16_47, %c0_48] : memref<448x28xf32, #tpu.memory_space<vmem>>, vector<384x28xf32>
    %c6 = arith.constant 6 : index
    %c0_49 = arith.constant 0 : index
    %c0_50 = arith.constant 0 : index
    %40 = vector.load %arg2[%c6, %c0_49, %c0_50] : memref<10x28x192xf32, #tpu.memory_space<vmem>>, vector<1x28x192xf32>
    %41 = vector.shape_cast %40 : vector<1x28x192xf32> to vector<28x192xf32>
    %cst_51 = arith.constant dense<0.000000e+00> : vector<384x192xf32>
    %42 = tpu.matmul %39, %41, %cst_51 {dimension_numbers = #tpu.dot_dimension_numbers<[1], [0], [0], [1], [0, 0, 1, 1], [], []>} : vector<384x28xf32>, vector<28x192xf32>, vector<384x192xf32> -> vector<384x192xf32>
    %43 = arith.addf %38, %42 : vector<384x192xf32>
    %c0_52 = arith.constant 0 : index
    %c0_53 = arith.constant 0 : index
    %44 = vector.load %arg12[%c0_52, %c0_53] : memref<384x192xf32, #tpu.memory_space<vmem>>, vector<384x192xf32>
    tpu.vector_store %arg12[%c0_52, %c0_53], %43 {strides = array<i32>} : memref<384x192xf32, #tpu.memory_space<vmem>>, vector<384x192xf32>,
    %c0_54 = arith.constant 0 : index
    %c0_55 = arith.constant 0 : index
    %45 = vector.load %arg12[%c0_54, %c0_55] : memref<384x192xf32, #tpu.memory_space<vmem>>, vector<384x192xf32>
    %c32_56 = arith.constant 32 : index
    %c0_57 = arith.constant 0 : index
    %46 = vector.load %arg1[%c32_56, %c0_57] : memref<448x28xf32, #tpu.memory_space<vmem>>, vector<384x28xf32>
    %c7 = arith.constant 7 : index
    %c0_58 = arith.constant 0 : index
    %c0_59 = arith.constant 0 : index
    %47 = vector.load %arg2[%c7, %c0_58, %c0_59] : memref<10x28x192xf32, #tpu.memory_space<vmem>>, vector<1x28x192xf32>
    %48 = vector.shape_cast %47 : vector<1x28x192xf32> to vector<28x192xf32>
    %cst_60 = arith.constant dense<0.000000e+00> : vector<384x192xf32>
    %49 = tpu.matmul %46, %48, %cst_60 {dimension_numbers = #tpu.dot_dimension_numbers<[1], [0], [0], [1], [0, 0, 1, 1], [], []>} : vector<384x28xf32>, vector<28x192xf32>, vector<384x192xf32> -> vector<384x192xf32>
    %50 = arith.addf %45, %49 : vector<384x192xf32>
    %c0_61 = arith.constant 0 : index
    %c0_62 = arith.constant 0 : index
    %51 = vector.load %arg12[%c0_61, %c0_62] : memref<384x192xf32, #tpu.memory_space<vmem>>, vector<384x192xf32>
    tpu.vector_store %arg12[%c0_61, %c0_62], %50 {strides = array<i32>} : memref<384x192xf32, #tpu.memory_space<vmem>>, vector<384x192xf32>,
    %c0_63 = arith.constant 0 : index
    %c0_64 = arith.constant 0 : index
    %52 = vector.load %arg12[%c0_63, %c0_64] : memref<384x192xf32, #tpu.memory_space<vmem>>, vector<384x192xf32>
    %c48_65 = arith.constant 48 : index
    %c0_66 = arith.constant 0 : index
    %53 = vector.load %arg1[%c48_65, %c0_66] : memref<448x28xf32, #tpu.memory_space<vmem>>, vector<384x28xf32>
    %c8 = arith.constant 8 : index
    %c0_67 = arith.constant 0 : index
    %c0_68 = arith.constant 0 : index
    %54 = vector.load %arg2[%c8, %c0_67, %c0_68] : memref<10x28x192xf32, #tpu.memory_space<vmem>>, vector<1x28x192xf32>
    %55 = vector.shape_cast %54 : vector<1x28x192xf32> to vector<28x192xf32>
    %cst_69 = arith.constant dense<0.000000e+00> : vector<384x192xf32>
    %56 = tpu.matmul %53, %55, %cst_69 {dimension_numbers = #tpu.dot_dimension_numbers<[1], [0], [0], [1], [0, 0, 1, 1], [], []>} : vector<384x28xf32>, vector<28x192xf32>, vector<384x192xf32> -> vector<384x192xf32>
    %57 = arith.addf %52, %56 : vector<384x192xf32>
    %c0_70 = arith.constant 0 : index
    %c0_71 = arith.constant 0 : index
    %58 = vector.load %arg12[%c0_70, %c0_71] : memref<384x192xf32, #tpu.memory_space<vmem>>, vector<384x192xf32>
    tpu.vector_store %arg12[%c0_70, %c0_71], %57 {strides = array<i32>} : memref<384x192xf32, #tpu.memory_space<vmem>>, vector<384x192xf32>,
    %c0_72 = arith.constant 0 : index
    %c0_73 = arith.constant 0 : index
    %59 = vector.load %arg12[%c0_72, %c0_73] : memref<384x192xf32, #tpu.memory_space<vmem>>, vector<384x192xf32>
    %c64_74 = arith.constant 64 : index
    %c0_75 = arith.constant 0 : index
    %60 = vector.load %arg1[%c64_74, %c0_75] : memref<448x28xf32, #tpu.memory_space<vmem>>, vector<384x28xf32>
    %c9 = arith.constant 9 : index
    %c0_76 = arith.constant 0 : index
    %c0_77 = arith.constant 0 : index
    %61 = vector.load %arg2[%c9, %c0_76, %c0_77] : memref<10x28x192xf32, #tpu.memory_space<vmem>>, vector<1x28x192xf32>
    %62 = vector.shape_cast %61 : vector<1x28x192xf32> to vector<28x192xf32>
    %cst_78 = arith.constant dense<0.000000e+00> : vector<384x192xf32>
    %63 = tpu.matmul %60, %62, %cst_78 {dimension_numbers = #tpu.dot_dimension_numbers<[1], [0], [0], [1], [0, 0, 1, 1], [], []>} : vector<384x28xf32>, vector<28x192xf32>, vector<384x192xf32> -> vector<384x192xf32>
    %64 = arith.addf %59, %63 : vector<384x192xf32>
    %c0_79 = arith.constant 0 : index
    %c0_80 = arith.constant 0 : index
    %65 = vector.load %arg12[%c0_79, %c0_80] : memref<384x192xf32, #tpu.memory_space<vmem>>, vector<384x192xf32>
    tpu.vector_store %arg12[%c0_79, %c0_80], %64 {strides = array<i32>} : memref<384x192xf32, #tpu.memory_space<vmem>>, vector<384x192xf32>,
    %c0_81 = arith.constant 0 : index
    %c0_82 = arith.constant 0 : index
    %66 = vector.load %arg11[%c0_81, %c0_82] : memref<384x192xf32, #tpu.memory_space<vmem>>, vector<384x192xf32>
    %c0_83 = arith.constant 0 : index
    %c0_84 = arith.constant 0 : index
    %67 = vector.load %arg12[%c0_83, %c0_84] : memref<384x192xf32, #tpu.memory_space<vmem>>, vector<384x192xf32>
    %68 = arith.maximumf %66, %67 : vector<384x192xf32>
    %c0_85 = arith.constant 0 : index
    %c0_86 = arith.constant 0 : index
    %69 = vector.load %arg3[%c0_85, %c0_86] : memref<1x192xf32, #tpu.memory_space<vmem>>, vector<1x192xf32>
    %70 = vector.broadcast %69 : vector<1x192xf32> to vector<384x192xf32>
    %71 = arith.addf %68, %70 : vector<384x192xf32>
    %72 = vector.shape_cast %71 : vector<384x192xf32> to vector<12x32x192xf32>
    %73 = vector.extract_strided_slice %72 {offsets = [0, 0, 0], sizes = [12, 16, 192], strides = [1, 1, 1]} : vector<12x32x192xf32> to vector<12x16x192xf32>
    %74 = vector.extract_strided_slice %72 {offsets = [0, 16, 0], sizes = [12, 16, 192], strides = [1, 1, 1]} : vector<12x32x192xf32> to vector<12x16x192xf32>
    %75 = arith.maximumf %73, %74 : vector<12x16x192xf32>
    %cst_87 = arith.constant 0.000000e+00 : f32
    %76 = vector.broadcast %cst_87 : f32 to vector<12x16x192xf32>
    %77 = arith.maximumf %75, %76 : vector<12x16x192xf32>
    %78 = vector.shape_cast %77 : vector<12x16x192xf32> to vector<192x192xf32>
    %79 = arith.truncf %78 : vector<192x192xf32> to vector<192x192xbf16>
    %c0_88 = arith.constant 0 : index
    %c0_89 = arith.constant 0 : index
    %80 = vector.load %arg13[%c0_88, %c0_89] : memref<192x192xbf16, #tpu.memory_space<vmem>>, vector<192x192xbf16>
    tpu.vector_store %arg13[%c0_88, %c0_89], %79 {strides = array<i32>} : memref<192x192xbf16, #tpu.memory_space<vmem>>, vector<192x192xbf16>,
    %c0_90 = arith.constant 0 : index
    %c0_91 = arith.constant 0 : index
    %81 = vector.load %arg13[%c0_90, %c0_91] : memref<192x192xbf16, #tpu.memory_space<vmem>>, vector<128x192xbf16>
    %c0_92 = arith.constant 0 : index
    %c0_93 = arith.constant 0 : index
    %c0_94 = arith.constant 0 : index
    %82 = vector.load %arg4[%c0_92, %c0_93, %c0_94] : memref<5x192x256xbf16, #tpu.memory_space<vmem>>, vector<1x192x256xbf16>
    %83 = vector.shape_cast %82 : vector<1x192x256xbf16> to vector<192x256xbf16>
    %cst_95 = arith.constant dense<0.000000e+00> : vector<128x256xf32>
    %84 = tpu.matmul %81, %83, %cst_95 {dimension_numbers = #tpu.dot_dimension_numbers<[1], [0], [0], [1], [0, 0, 1, 1], [], []>} : vector<128x192xbf16>, vector<192x256xbf16>, vector<128x256xf32> -> vector<128x256xf32>
    %c0_96 = arith.constant 0 : index
    %c0_97 = arith.constant 0 : index
    %85 = vector.load %arg14[%c0_96, %c0_97] : memref<128x256xf32, #tpu.memory_space<vmem>>, vector<128x256xf32>
    tpu.vector_store %arg14[%c0_96, %c0_97], %84 {strides = array<i32>} : memref<128x256xf32, #tpu.memory_space<vmem>>, vector<128x256xf32>,
    %c0_98 = arith.constant 0 : index
    %c0_99 = arith.constant 0 : index
    %86 = vector.load %arg14[%c0_98, %c0_99] : memref<128x256xf32, #tpu.memory_space<vmem>>, vector<128x256xf32>
    %c16_100 = arith.constant 16 : index
    %c0_101 = arith.constant 0 : index
    %87 = vector.load %arg13[%c16_100, %c0_101] : memref<192x192xbf16, #tpu.memory_space<vmem>>, vector<128x192xbf16>
    %c1_102 = arith.constant 1 : index
    %c0_103 = arith.constant 0 : index
    %c0_104 = arith.constant 0 : index
    %88 = vector.load %arg4[%c1_102, %c0_103, %c0_104] : memref<5x192x256xbf16, #tpu.memory_space<vmem>>, vector<1x192x256xbf16>
    %89 = vector.shape_cast %88 : vector<1x192x256xbf16> to vector<192x256xbf16>
    %cst_105 = arith.constant dense<0.000000e+00> : vector<128x256xf32>
    %90 = tpu.matmul %87, %89, %cst_105 {dimension_numbers = #tpu.dot_dimension_numbers<[1], [0], [0], [1], [0, 0, 1, 1], [], []>} : vector<128x192xbf16>, vector<192x256xbf16>, vector<128x256xf32> -> vector<128x256xf32>
    %91 = arith.addf %86, %90 : vector<128x256xf32>
    %c0_106 = arith.constant 0 : index
    %c0_107 = arith.constant 0 : index
    %92 = vector.load %arg14[%c0_106, %c0_107] : memref<128x256xf32, #tpu.memory_space<vmem>>, vector<128x256xf32>
    tpu.vector_store %arg14[%c0_106, %c0_107], %91 {strides = array<i32>} : memref<128x256xf32, #tpu.memory_space<vmem>>, vector<128x256xf32>,
    %c0_108 = arith.constant 0 : index
    %c0_109 = arith.constant 0 : index
    %93 = vector.load %arg14[%c0_108, %c0_109] : memref<128x256xf32, #tpu.memory_space<vmem>>, vector<128x256xf32>
    %c32_110 = arith.constant 32 : index
    %c0_111 = arith.constant 0 : index
    %94 = vector.load %arg13[%c32_110, %c0_111] : memref<192x192xbf16, #tpu.memory_space<vmem>>, vector<128x192xbf16>
    %c2_112 = arith.constant 2 : index
    %c0_113 = arith.constant 0 : index
    %c0_114 = arith.constant 0 : index
    %95 = vector.load %arg4[%c2_112, %c0_113, %c0_114] : memref<5x192x256xbf16, #tpu.memory_space<vmem>>, vector<1x192x256xbf16>
    %96 = vector.shape_cast %95 : vector<1x192x256xbf16> to vector<192x256xbf16>
    %cst_115 = arith.constant dense<0.000000e+00> : vector<128x256xf32>
    %97 = tpu.matmul %94, %96, %cst_115 {dimension_numbers = #tpu.dot_dimension_numbers<[1], [0], [0], [1], [0, 0, 1, 1], [], []>} : vector<128x192xbf16>, vector<192x256xbf16>, vector<128x256xf32> -> vector<128x256xf32>
    %98 = arith.addf %93, %97 : vector<128x256xf32>
    %c0_116 = arith.constant 0 : index
    %c0_117 = arith.constant 0 : index
    %99 = vector.load %arg14[%c0_116, %c0_117] : memref<128x256xf32, #tpu.memory_space<vmem>>, vector<128x256xf32>
    tpu.vector_store %arg14[%c0_116, %c0_117], %98 {strides = array<i32>} : memref<128x256xf32, #tpu.memory_space<vmem>>, vector<128x256xf32>,
    %c0_118 = arith.constant 0 : index
    %c0_119 = arith.constant 0 : index
    %100 = vector.load %arg14[%c0_118, %c0_119] : memref<128x256xf32, #tpu.memory_space<vmem>>, vector<128x256xf32>
    %c48_120 = arith.constant 48 : index
    %c0_121 = arith.constant 0 : index
    %101 = vector.load %arg13[%c48_120, %c0_121] : memref<192x192xbf16, #tpu.memory_space<vmem>>, vector<128x192xbf16>
    %c3_122 = arith.constant 3 : index
    %c0_123 = arith.constant 0 : index
    %c0_124 = arith.constant 0 : index
    %102 = vector.load %arg4[%c3_122, %c0_123, %c0_124] : memref<5x192x256xbf16, #tpu.memory_space<vmem>>, vector<1x192x256xbf16>
    %103 = vector.shape_cast %102 : vector<1x192x256xbf16> to vector<192x256xbf16>
    %cst_125 = arith.constant dense<0.000000e+00> : vector<128x256xf32>
    %104 = tpu.matmul %101, %103, %cst_125 {dimension_numbers = #tpu.dot_dimension_numbers<[1], [0], [0], [1], [0, 0, 1, 1], [], []>} : vector<128x192xbf16>, vector<192x256xbf16>, vector<128x256xf32> -> vector<128x256xf32>
    %105 = arith.addf %100, %104 : vector<128x256xf32>
    %c0_126 = arith.constant 0 : index
    %c0_127 = arith.constant 0 : index
    %106 = vector.load %arg14[%c0_126, %c0_127] : memref<128x256xf32, #tpu.memory_space<vmem>>, vector<128x256xf32>
    tpu.vector_store %arg14[%c0_126, %c0_127], %105 {strides = array<i32>} : memref<128x256xf32, #tpu.memory_space<vmem>>, vector<128x256xf32>,
    %c0_128 = arith.constant 0 : index
    %c0_129 = arith.constant 0 : index
    %107 = vector.load %arg14[%c0_128, %c0_129] : memref<128x256xf32, #tpu.memory_space<vmem>>, vector<128x256xf32>
    %c64_130 = arith.constant 64 : index
    %c0_131 = arith.constant 0 : index
    %108 = vector.load %arg13[%c64_130, %c0_131] : memref<192x192xbf16, #tpu.memory_space<vmem>>, vector<128x192xbf16>
    %c4_132 = arith.constant 4 : index
    %c0_133 = arith.constant 0 : index
    %c0_134 = arith.constant 0 : index
    %109 = vector.load %arg4[%c4_132, %c0_133, %c0_134] : memref<5x192x256xbf16, #tpu.memory_space<vmem>>, vector<1x192x256xbf16>
    %110 = vector.shape_cast %109 : vector<1x192x256xbf16> to vector<192x256xbf16>
    %cst_135 = arith.constant dense<0.000000e+00> : vector<128x256xf32>
    %111 = tpu.matmul %108, %110, %cst_135 {dimension_numbers = #tpu.dot_dimension_numbers<[1], [0], [0], [1], [0, 0, 1, 1], [], []>} : vector<128x192xbf16>, vector<192x256xbf16>, vector<128x256xf32> -> vector<128x256xf32>
    %112 = arith.addf %107, %111 : vector<128x256xf32>
    %c0_136 = arith.constant 0 : index
    %c0_137 = arith.constant 0 : index
    %113 = vector.load %arg14[%c0_136, %c0_137] : memref<128x256xf32, #tpu.memory_space<vmem>>, vector<128x256xf32>
    tpu.vector_store %arg14[%c0_136, %c0_137], %112 {strides = array<i32>} : memref<128x256xf32, #tpu.memory_space<vmem>>, vector<128x256xf32>,
    %c0_138 = arith.constant 0 : index
    %c0_139 = arith.constant 0 : index
    %114 = vector.load %arg14[%c0_138, %c0_139] : memref<128x256xf32, #tpu.memory_space<vmem>>, vector<128x256xf32>
    %c0_140 = arith.constant 0 : index
    %c0_141 = arith.constant 0 : index
    %115 = vector.load %arg5[%c0_140, %c0_141] : memref<1x256xf32, #tpu.memory_space<vmem>>, vector<1x256xf32>
    %116 = vector.broadcast %115 : vector<1x256xf32> to vector<128x256xf32>
    %117 = arith.addf %114, %116 : vector<128x256xf32>
    %cst_142 = arith.constant 0.000000e+00 : f32
    %118 = vector.broadcast %cst_142 : f32 to vector<128x256xf32>
    %119 = arith.maximumf %117, %118 : vector<128x256xf32>
    %120 = arith.truncf %119 : vector<128x256xf32> to vector<128x256xbf16>
    %c0_143 = arith.constant 0 : index
    %c0_144 = arith.constant 0 : index
    %121 = vector.load %arg15[%c0_143, %c0_144] : memref<128x256xbf16, #tpu.memory_space<vmem>>, vector<128x256xbf16>
    tpu.vector_store %arg15[%c0_143, %c0_144], %120 {strides = array<i32>} : memref<128x256xbf16, #tpu.memory_space<vmem>>, vector<128x256xbf16>,
    %c0_145 = arith.constant 0 : index
    %c0_146 = arith.constant 0 : index
    %122 = vector.load %arg15[%c0_145, %c0_146] : memref<128x256xbf16, #tpu.memory_space<vmem>>, vector<16x256xbf16>
    %c0_147 = arith.constant 0 : index
    %c0_148 = arith.constant 0 : index
    %c0_149 = arith.constant 0 : index
    %123 = vector.load %arg6[%c0_147, %c0_148, %c0_149] : memref<8x256x256xbf16, #tpu.memory_space<vmem>>, vector<1x256x256xbf16>
    %124 = vector.shape_cast %123 : vector<1x256x256xbf16> to vector<256x256xbf16>
    %cst_150 = arith.constant dense<0.000000e+00> : vector<16x256xf32>
    %125 = tpu.matmul %122, %124, %cst_150 {dimension_numbers = #tpu.dot_dimension_numbers<[1], [0], [0], [1], [0, 0, 1, 1], [], []>} : vector<16x256xbf16>, vector<256x256xbf16>, vector<16x256xf32> -> vector<16x256xf32>
    %c0_151 = arith.constant 0 : index
    %c0_152 = arith.constant 0 : index
    %126 = vector.load %arg16[%c0_151, %c0_152] : memref<16x256xf32, #tpu.memory_space<vmem>>, vector<16x256xf32>
    tpu.vector_store %arg16[%c0_151, %c0_152], %125 {strides = array<i32>} : memref<16x256xf32, #tpu.memory_space<vmem>>, vector<16x256xf32>,
    %c0_153 = arith.constant 0 : index
    %c0_154 = arith.constant 0 : index
    %127 = vector.load %arg16[%c0_153, %c0_154] : memref<16x256xf32, #tpu.memory_space<vmem>>, vector<16x256xf32>
    %c16_155 = arith.constant 16 : index
    %c0_156 = arith.constant 0 : index
    %128 = vector.load %arg15[%c16_155, %c0_156] : memref<128x256xbf16, #tpu.memory_space<vmem>>, vector<16x256xbf16>
    %c1_157 = arith.constant 1 : index
    %c0_158 = arith.constant 0 : index
    %c0_159 = arith.constant 0 : index
    %129 = vector.load %arg6[%c1_157, %c0_158, %c0_159] : memref<8x256x256xbf16, #tpu.memory_space<vmem>>, vector<1x256x256xbf16>
    %130 = vector.shape_cast %129 : vector<1x256x256xbf16> to vector<256x256xbf16>
    %cst_160 = arith.constant dense<0.000000e+00> : vector<16x256xf32>
    %131 = tpu.matmul %128, %130, %cst_160 {dimension_numbers = #tpu.dot_dimension_numbers<[1], [0], [0], [1], [0, 0, 1, 1], [], []>} : vector<16x256xbf16>, vector<256x256xbf16>, vector<16x256xf32> -> vector<16x256xf32>
    %132 = arith.addf %127, %131 : vector<16x256xf32>
    %c0_161 = arith.constant 0 : index
    %c0_162 = arith.constant 0 : index
    %133 = vector.load %arg16[%c0_161, %c0_162] : memref<16x256xf32, #tpu.memory_space<vmem>>, vector<16x256xf32>
    tpu.vector_store %arg16[%c0_161, %c0_162], %132 {strides = array<i32>} : memref<16x256xf32, #tpu.memory_space<vmem>>, vector<16x256xf32>,
    %c0_163 = arith.constant 0 : index
    %c0_164 = arith.constant 0 : index
    %134 = vector.load %arg16[%c0_163, %c0_164] : memref<16x256xf32, #tpu.memory_space<vmem>>, vector<16x256xf32>
    %c32_165 = arith.constant 32 : index
    %c0_166 = arith.constant 0 : index
    %135 = vector.load %arg15[%c32_165, %c0_166] : memref<128x256xbf16, #tpu.memory_space<vmem>>, vector<16x256xbf16>
    %c2_167 = arith.constant 2 : index
    %c0_168 = arith.constant 0 : index
    %c0_169 = arith.constant 0 : index
    %136 = vector.load %arg6[%c2_167, %c0_168, %c0_169] : memref<8x256x256xbf16, #tpu.memory_space<vmem>>, vector<1x256x256xbf16>
    %137 = vector.shape_cast %136 : vector<1x256x256xbf16> to vector<256x256xbf16>
    %cst_170 = arith.constant dense<0.000000e+00> : vector<16x256xf32>
    %138 = tpu.matmul %135, %137, %cst_170 {dimension_numbers = #tpu.dot_dimension_numbers<[1], [0], [0], [1], [0, 0, 1, 1], [], []>} : vector<16x256xbf16>, vector<256x256xbf16>, vector<16x256xf32> -> vector<16x256xf32>
    %139 = arith.addf %134, %138 : vector<16x256xf32>
    %c0_171 = arith.constant 0 : index
    %c0_172 = arith.constant 0 : index
    %140 = vector.load %arg16[%c0_171, %c0_172] : memref<16x256xf32, #tpu.memory_space<vmem>>, vector<16x256xf32>
    tpu.vector_store %arg16[%c0_171, %c0_172], %139 {strides = array<i32>} : memref<16x256xf32, #tpu.memory_space<vmem>>, vector<16x256xf32>,
    %c0_173 = arith.constant 0 : index
    %c0_174 = arith.constant 0 : index
    %141 = vector.load %arg16[%c0_173, %c0_174] : memref<16x256xf32, #tpu.memory_space<vmem>>, vector<16x256xf32>
    %c48_175 = arith.constant 48 : index
    %c0_176 = arith.constant 0 : index
    %142 = vector.load %arg15[%c48_175, %c0_176] : memref<128x256xbf16, #tpu.memory_space<vmem>>, vector<16x256xbf16>
    %c3_177 = arith.constant 3 : index
    %c0_178 = arith.constant 0 : index
    %c0_179 = arith.constant 0 : index
    %143 = vector.load %arg6[%c3_177, %c0_178, %c0_179] : memref<8x256x256xbf16, #tpu.memory_space<vmem>>, vector<1x256x256xbf16>
    %144 = vector.shape_cast %143 : vector<1x256x256xbf16> to vector<256x256xbf16>
    %cst_180 = arith.constant dense<0.000000e+00> : vector<16x256xf32>
    %145 = tpu.matmul %142, %144, %cst_180 {dimension_numbers = #tpu.dot_dimension_numbers<[1], [0], [0], [1], [0, 0, 1, 1], [], []>} : vector<16x256xbf16>, vector<256x256xbf16>, vector<16x256xf32> -> vector<16x256xf32>
    %146 = arith.addf %141, %145 : vector<16x256xf32>
    %c0_181 = arith.constant 0 : index
    %c0_182 = arith.constant 0 : index
    %147 = vector.load %arg16[%c0_181, %c0_182] : memref<16x256xf32, #tpu.memory_space<vmem>>, vector<16x256xf32>
    tpu.vector_store %arg16[%c0_181, %c0_182], %146 {strides = array<i32>} : memref<16x256xf32, #tpu.memory_space<vmem>>, vector<16x256xf32>,
    %c0_183 = arith.constant 0 : index
    %c0_184 = arith.constant 0 : index
    %148 = vector.load %arg16[%c0_183, %c0_184] : memref<16x256xf32, #tpu.memory_space<vmem>>, vector<16x256xf32>
    %c64_185 = arith.constant 64 : index
    %c0_186 = arith.constant 0 : index
    %149 = vector.load %arg15[%c64_185, %c0_186] : memref<128x256xbf16, #tpu.memory_space<vmem>>, vector<16x256xbf16>
    %c4_187 = arith.constant 4 : index
    %c0_188 = arith.constant 0 : index
    %c0_189 = arith.constant 0 : index
    %150 = vector.load %arg6[%c4_187, %c0_188, %c0_189] : memref<8x256x256xbf16, #tpu.memory_space<vmem>>, vector<1x256x256xbf16>
    %151 = vector.shape_cast %150 : vector<1x256x256xbf16> to vector<256x256xbf16>
    %cst_190 = arith.constant dense<0.000000e+00> : vector<16x256xf32>
    %152 = tpu.matmul %149, %151, %cst_190 {dimension_numbers = #tpu.dot_dimension_numbers<[1], [0], [0], [1], [0, 0, 1, 1], [], []>} : vector<16x256xbf16>, vector<256x256xbf16>, vector<16x256xf32> -> vector<16x256xf32>
    %153 = arith.addf %148, %152 : vector<16x256xf32>
    %c0_191 = arith.constant 0 : index
    %c0_192 = arith.constant 0 : index
    %154 = vector.load %arg16[%c0_191, %c0_192] : memref<16x256xf32, #tpu.memory_space<vmem>>, vector<16x256xf32>
    tpu.vector_store %arg16[%c0_191, %c0_192], %153 {strides = array<i32>} : memref<16x256xf32, #tpu.memory_space<vmem>>, vector<16x256xf32>,
    %c0_193 = arith.constant 0 : index
    %c0_194 = arith.constant 0 : index
    %155 = vector.load %arg16[%c0_193, %c0_194] : memref<16x256xf32, #tpu.memory_space<vmem>>, vector<16x256xf32>
    %c80 = arith.constant 80 : index
    %c0_195 = arith.constant 0 : index
    %156 = vector.load %arg15[%c80, %c0_195] : memref<128x256xbf16, #tpu.memory_space<vmem>>, vector<16x256xbf16>
    %c5_196 = arith.constant 5 : index
    %c0_197 = arith.constant 0 : index
    %c0_198 = arith.constant 0 : index
    %157 = vector.load %arg6[%c5_196, %c0_197, %c0_198] : memref<8x256x256xbf16, #tpu.memory_space<vmem>>, vector<1x256x256xbf16>
    %158 = vector.shape_cast %157 : vector<1x256x256xbf16> to vector<256x256xbf16>
    %cst_199 = arith.constant dense<0.000000e+00> : vector<16x256xf32>
    %159 = tpu.matmul %156, %158, %cst_199 {dimension_numbers = #tpu.dot_dimension_numbers<[1], [0], [0], [1], [0, 0, 1, 1], [], []>} : vector<16x256xbf16>, vector<256x256xbf16>, vector<16x256xf32> -> vector<16x256xf32>
    %160 = arith.addf %155, %159 : vector<16x256xf32>
    %c0_200 = arith.constant 0 : index
    %c0_201 = arith.constant 0 : index
    %161 = vector.load %arg16[%c0_200, %c0_201] : memref<16x256xf32, #tpu.memory_space<vmem>>, vector<16x256xf32>
    tpu.vector_store %arg16[%c0_200, %c0_201], %160 {strides = array<i32>} : memref<16x256xf32, #tpu.memory_space<vmem>>, vector<16x256xf32>,
    %c0_202 = arith.constant 0 : index
    %c0_203 = arith.constant 0 : index
    %162 = vector.load %arg16[%c0_202, %c0_203] : memref<16x256xf32, #tpu.memory_space<vmem>>, vector<16x256xf32>
    %c96 = arith.constant 96 : index
    %c0_204 = arith.constant 0 : index
    %163 = vector.load %arg15[%c96, %c0_204] : memref<128x256xbf16, #tpu.memory_space<vmem>>, vector<16x256xbf16>
    %c6_205 = arith.constant 6 : index
    %c0_206 = arith.constant 0 : index
    %c0_207 = arith.constant 0 : index
    %164 = vector.load %arg6[%c6_205, %c0_206, %c0_207] : memref<8x256x256xbf16, #tpu.memory_space<vmem>>, vector<1x256x256xbf16>
    %165 = vector.shape_cast %164 : vector<1x256x256xbf16> to vector<256x256xbf16>
    %cst_208 = arith.constant dense<0.000000e+00> : vector<16x256xf32>
    %166 = tpu.matmul %163, %165, %cst_208 {dimension_numbers = #tpu.dot_dimension_numbers<[1], [0], [0], [1], [0, 0, 1, 1], [], []>} : vector<16x256xbf16>, vector<256x256xbf16>, vector<16x256xf32> -> vector<16x256xf32>
    %167 = arith.addf %162, %166 : vector<16x256xf32>
    %c0_209 = arith.constant 0 : index
    %c0_210 = arith.constant 0 : index
    %168 = vector.load %arg16[%c0_209, %c0_210] : memref<16x256xf32, #tpu.memory_space<vmem>>, vector<16x256xf32>
    tpu.vector_store %arg16[%c0_209, %c0_210], %167 {strides = array<i32>} : memref<16x256xf32, #tpu.memory_space<vmem>>, vector<16x256xf32>,
    %c0_211 = arith.constant 0 : index
    %c0_212 = arith.constant 0 : index
    %169 = vector.load %arg16[%c0_211, %c0_212] : memref<16x256xf32, #tpu.memory_space<vmem>>, vector<16x256xf32>
    %c112 = arith.constant 112 : index
    %c0_213 = arith.constant 0 : index
    %170 = vector.load %arg15[%c112, %c0_213] : memref<128x256xbf16, #tpu.memory_space<vmem>>, vector<16x256xbf16>
    %c7_214 = arith.constant 7 : index
    %c0_215 = arith.constant 0 : index
    %c0_216 = arith.constant 0 : index
    %171 = vector.load %arg6[%c7_214, %c0_215, %c0_216] : memref<8x256x256xbf16, #tpu.memory_space<vmem>>, vector<1x256x256xbf16>
    %172 = vector.shape_cast %171 : vector<1x256x256xbf16> to vector<256x256xbf16>
    %cst_217 = arith.constant dense<0.000000e+00> : vector<16x256xf32>
    %173 = tpu.matmul %170, %172, %cst_217 {dimension_numbers = #tpu.dot_dimension_numbers<[1], [0], [0], [1], [0, 0, 1, 1], [], []>} : vector<16x256xbf16>, vector<256x256xbf16>, vector<16x256xf32> -> vector<16x256xf32>
    %174 = arith.addf %169, %173 : vector<16x256xf32>
    %c0_218 = arith.constant 0 : index
    %c0_219 = arith.constant 0 : index
    %175 = vector.load %arg16[%c0_218, %c0_219] : memref<16x256xf32, #tpu.memory_space<vmem>>, vector<16x256xf32>
    tpu.vector_store %arg16[%c0_218, %c0_219], %174 {strides = array<i32>} : memref<16x256xf32, #tpu.memory_space<vmem>>, vector<16x256xf32>,
    %c0_220 = arith.constant 0 : index
    %c0_221 = arith.constant 0 : index
    %176 = vector.load %arg16[%c0_220, %c0_221] : memref<16x256xf32, #tpu.memory_space<vmem>>, vector<16x256xf32>
    %c0_222 = arith.constant 0 : index
    %c0_223 = arith.constant 0 : index
    %177 = vector.load %arg7[%c0_222, %c0_223] : memref<1x256xf32, #tpu.memory_space<vmem>>, vector<1x256xf32>
    %178 = vector.broadcast %177 : vector<1x256xf32> to vector<16x256xf32>
    %179 = arith.addf %176, %178 : vector<16x256xf32>
    %cst_224 = arith.constant 0.000000e+00 : f32
    %180 = vector.broadcast %cst_224 : f32 to vector<16x256xf32>
    %181 = arith.maximumf %179, %180 : vector<16x256xf32>
    %182 = arith.truncf %181 : vector<16x256xf32> to vector<16x256xbf16>
    %c0_225 = arith.constant 0 : index
    %c0_226 = arith.constant 0 : index
    %183 = vector.load %arg8[%c0_225, %c0_226] : memref<256x128xbf16, #tpu.memory_space<vmem>>, vector<256x128xbf16>
    %cst_227 = arith.constant dense<0.000000e+00> : vector<16x128xf32>
    %184 = tpu.matmul %182, %183, %cst_227 {dimension_numbers = #tpu.dot_dimension_numbers<[1], [0], [0], [1], [0, 0, 1, 1], [], []>} : vector<16x256xbf16>, vector<256x128xbf16>, vector<16x128xf32> -> vector<16x128xf32>
    %c0_228 = arith.constant 0 : index
    %c0_229 = arith.constant 0 : index
    %185 = vector.load %arg9[%c0_228, %c0_229] : memref<1x128xf32, #tpu.memory_space<vmem>>, vector<1x128xf32>
    %186 = vector.broadcast %185 : vector<1x128xf32> to vector<16x128xf32>
    %187 = arith.addf %184, %186 : vector<16x128xf32>
    %cst_230 = arith.constant dense<0xFF800000> : vector<16xf32>
    %188 = vector.multi_reduction <maximumf>, %187, %cst_230 [1] : vector<16x128xf32> to vector<16xf32>
    %189 = vector.shape_cast %188 : vector<16xf32> to vector<16x1xf32>
    %190 = vector.broadcast %189 : vector<16x1xf32> to vector<16x128xf32>
    %191 = arith.subf %187, %190 : vector<16x128xf32>
    %192 = math.exp %191 : vector<16x128xf32>
    %cst_231 = arith.constant dense<0.000000e+00> : vector<16xf32>
    %193 = vector.multi_reduction <add>, %192, %cst_231 [1] : vector<16x128xf32> to vector<16xf32>
    %194 = vector.shape_cast %193 : vector<16xf32> to vector<16x1xf32>
    %195 = math.log %194 : vector<16x1xf32>
    %196 = arith.addf %189, %195 : vector<16x1xf32>
    %197 = vector.broadcast %196 : vector<16x1xf32> to vector<16x128xf32>
    %198 = arith.subf %187, %197 : vector<16x128xf32>
    %c0_232 = arith.constant 0 : index
    %c0_233 = arith.constant 0 : index
    %199 = vector.load %arg10[%c0_232, %c0_233] : memref<16x128xf32, #tpu.memory_space<vmem>>, vector<16x128xf32>
    tpu.vector_store %arg10[%c0_232, %c0_233], %198 {strides = array<i32>} : memref<16x128xf32, #tpu.memory_space<vmem>>, vector<16x128xf32>,
    return
  }
  func.func @transform_0(%arg0: i32) -> (i32, i32) {
    %c0_i32 = arith.constant 0 : i32
    %c0_i32_0 = arith.constant 0 : i32
    return %arg0, %c0_i32 : i32, i32
  }
  func.func @transform_1(%arg0: i32) -> (i32, i32, i32) {
    %c0_i32 = arith.constant 0 : i32
    %c0_i32_0 = arith.constant 0 : i32
    %c0_i32_1 = arith.constant 0 : i32
    %c0_i32_2 = arith.constant 0 : i32
    return %c0_i32, %c0_i32_0, %c0_i32_1 : i32, i32, i32
  }
  func.func @transform_2(%arg0: i32) -> (i32, i32) {
    %c0_i32 = arith.constant 0 : i32
    %c0_i32_0 = arith.constant 0 : i32
    %c0_i32_1 = arith.constant 0 : i32
    return %c0_i32, %c0_i32_0 : i32, i32
  }
  func.func @transform_3(%arg0: i32) -> (i32, i32, i32) {
    %c0_i32 = arith.constant 0 : i32
    %c0_i32_0 = arith.constant 0 : i32
    %c0_i32_1 = arith.constant 0 : i32
    %c0_i32_2 = arith.constant 0 : i32
    return %c0_i32, %c0_i32_0, %c0_i32_1 : i32, i32, i32
  }
  func.func @transform_4(%arg0: i32) -> (i32, i32) {
    %c0_i32 = arith.constant 0 : i32
    %c0_i32_0 = arith.constant 0 : i32
    %c0_i32_1 = arith.constant 0 : i32
    return %c0_i32, %c0_i32_0 : i32, i32
  }
  func.func @transform_5(%arg0: i32) -> (i32, i32, i32) {
    %c0_i32 = arith.constant 0 : i32
    %c0_i32_0 = arith.constant 0 : i32
    %c0_i32_1 = arith.constant 0 : i32
    %c0_i32_2 = arith.constant 0 : i32
    return %c0_i32, %c0_i32_0, %c0_i32_1 : i32, i32, i32
  }
  func.func @transform_6(%arg0: i32) -> (i32, i32) {
    %c0_i32 = arith.constant 0 : i32
    %c0_i32_0 = arith.constant 0 : i32
    %c0_i32_1 = arith.constant 0 : i32
    return %c0_i32, %c0_i32_0 : i32, i32
  }
  func.func @transform_7(%arg0: i32) -> (i32, i32) {
    %c0_i32 = arith.constant 0 : i32
    %c0_i32_0 = arith.constant 0 : i32
    %c0_i32_1 = arith.constant 0 : i32
    return %c0_i32, %c0_i32_0 : i32, i32
  }
  func.func @transform_8(%arg0: i32) -> (i32, i32) {
    %c0_i32 = arith.constant 0 : i32
    %c0_i32_0 = arith.constant 0 : i32
    %c0_i32_1 = arith.constant 0 : i32
    return %c0_i32, %c0_i32_0 : i32, i32
  }
  func.func @transform_9(%arg0: i32) -> (i32, i32) {
    %c0_i32 = arith.constant 0 : i32
    %c0_i32_0 = arith.constant 0 : i32
    return %arg0, %c0_i32 : i32, i32
  }
}

</mosaic_0001>

<bundles_post_ra>
// kernel: cnn_emnist_forward.1
= control target key start
LH: loop header
LB: loop body
LE: loop exit
PB: predicated region body
PF: predicated region fallthrough
CT: control target
= control target key end

     0   :  { %14 = vsyncpa [#allocation9], 0  ;;  %s19783_s0 = inlined_call_operand.vmem [shape: f32[448,28], index: 0, kind: input, shape index: {}]   ;;  %s19784_s1 = inlined_call_operand.hbm [shape: f32[10,28,192], index: 1, kind: input, shape index: {}]   ;;  %s19785_s2 = inlined_call_operand.vmem [shape: f32[1,192], index: 2, kind: input, shape index: {}]   ;;  %s19786_s3 = inlined_call_operand.hbm [shape: bf16[5,192,256], index: 3, kind: input, shape index: {}]   ;;  %s19787_s4 = inlined_call_operand.vmem [shape: f32[1,256], index: 4, kind: input, shape index: {}]   ;;  %s19788_s5 = inlined_call_operand.hbm [shape: bf16[8,256,256], index: 5, kind: input, shape index: {}]   ;;  %s19789_s6 = inlined_call_operand.vmem [shape: f32[1,256], index: 6, kind: input, shape index: {}]   ;;  %s19790_s7 = inlined_call_operand.vmem [shape: bf16[256,128], index: 7, kind: input, shape index: {}]   ;;  %s19791_s8 = inlined_call_operand.vmem [shape: f32[1,128], index: 8, kind: input, shape index: {}]   ;;  %s19792_s9 = inlined_call_operand.vmem [shape: f32[16,128], index: 9, kind: output, shape index: {}]  }
   0x1   :  { %15 = vsyncpa [#allocation11], 0  ;;  %s14983_s30 = smov [#allocation10]   ;;  %s14913_s13 = scalar_lea.hbm %s19786_s3, 15360 }
   0x2   :  { %s37_s10 = sshll.u32 %s14983_s30, 4  ;;  %p14914_p0 = scmp.ne.s32.totalorder %s19786_s3, %s14913_s13  ;;  %s38_s10 = int_to_ptr.vmem [resolvable:$true] %s37_s10 }
   0x3   :  { %p14917_p1 = scmp.lt.u32.totalorder %s14913_s13, %s19786_s3 }
   0x5   :  { %p14919_p2 = pnand %p14917_p1, %p14914_p0 }
   0x7   :  { %14922 = shalt.err (!%p14919_p2)
}
   0x8   :  { %s14923_s18 = scalar_lea.vmem %s38_s10, 15360  ;;  %p14928_p4 = scmp.lt.s32.totalorder %s38_s10, %s38_s10 }
   0x9   :  { %p14924_p3 = scmp.ne.s32.totalorder %s38_s10, %s14923_s18  ;;  %p14929_p5 = scmp.lt.s32.totalorder %s14923_s18, %s14923_s18 }
   0xb   :  { %p14930_p6 = por %p14929_p5, %p14928_p4 }
   0xd   :  { %p14931_p7 = pnand %p14930_p6, %p14924_p3 }
   0xf   :  { %14934 = shalt.err (!%p14931_p7)
}
  0x10   :  { %s14984_s19 = smov 128   ;;  %s14985_s20 = smov 8  }
  0x11   :  { %43 = dma.hbm_to_vmem [thread:$0]  %s19786_s3, 15360, %s38_s10, [#allocation11], %s14984_s19, %s14984_s19, %s14985_s20  }
  0x12   :  { %s14986_s23 = smov [#allocation8]   ;;  %s14935_s27 = scalar_lea.hbm %s19784_s1, 10240 }
  0x13   :  { %s23_s24 = sshll.u32 %s14986_s23, 4  ;;  %p14936_p8 = scmp.ne.s32.totalorder %s19784_s1, %s14935_s27  ;;  %s24_s24 = int_to_ptr.vmem [resolvable:$true] %s23_s24 }
  0x14   :  { %p14939_p9 = scmp.lt.u32.totalorder %s14935_s27, %s19784_s1 }
  0x16   :  { %p14941_p10 = pnand %p14939_p9, %p14936_p8 }
  0x18   :  { %14944 = shalt.err (!%p14941_p10)
}
  0x19   :  { %s14945_s12 = scalar_lea.vmem %s24_s24, 10240  ;;  %p14950_p12 = scmp.lt.s32.totalorder %s24_s24, %s24_s24 }
  0x1a   :  { %p14946_p11 = scmp.ne.s32.totalorder %s24_s24, %s14945_s12  ;;  %p14951_p13 = scmp.lt.s32.totalorder %s14945_s12, %s14945_s12 }
  0x1c   :  { %p14952_p0 = por %p14951_p13, %p14950_p12 }
  0x1e   :  { %p14953_p1 = pnand %p14952_p0, %p14946_p11 }
  0x20   :  { %14956 = shalt.err (!%p14953_p1)
}
  0x21   :  { %s14987_s3 = smov 256   ;;  %s14988_s10 = smov 16  }
  0x22   :  { %29 = dma.hbm_to_vmem [thread:$0]  %s19784_s1, 10240, %s24_s24, [#allocation9], %s14987_s3, %s14987_s3, %s14988_s10  }
  0x23   :  { %s14989_s15 = smov [#allocation12]   ;;  %s14957_s21 = scalar_lea.hbm %s19788_s5, 32768 }
  0x24   :  { %s51_s16 = sshll.u32 %s14989_s15, 4  ;;  %p14958_p2 = scmp.ne.s32.totalorder %s19788_s5, %s14957_s21  ;;  %s52_s16 = int_to_ptr.vmem [resolvable:$true] %s51_s16 }
  0x25   :  { %p14961_p3 = scmp.lt.u32.totalorder %s14957_s21, %s19788_s5 }
  0x27   :  { %p14963_p4 = pnand %p14961_p3, %p14958_p2 }
  0x29   :  { %14966 = shalt.err (!%p14963_p4)
}
  0x2a   :  { %s14967_s27 = scalar_lea.vmem %s52_s16, 32768  ;;  %p14972_p6 = scmp.lt.s32.totalorder %s52_s16, %s52_s16 }
  0x2b   :  { %p14968_p5 = scmp.ne.s32.totalorder %s52_s16, %s14967_s27  ;;  %p14973_p7 = scmp.lt.s32.totalorder %s14967_s27, %s14967_s27 }
  0x2d   :  { %p14974_p8 = por %p14973_p7, %p14972_p6 }
  0x2f   :  { %p14975_p9 = pnand %p14974_p8, %p14968_p5 }
  0x31   :  { %14978 = shalt.err (!%p14975_p9)
}
  0x32   :  { %57 = dma.hbm_to_vmem [thread:$0]  %s19788_s5, 32768, %s52_s16, [#allocation11], %s14984_s19, %s14984_s19, %s14985_s20  }
  0x33   :  { %14979 = dma.done.wait [#allocation9], 10240  }
  0x34   :  { %14980 = vsyncadd [#allocation9], 4294957056 }
  0x35   :  { %14981 = dma.done.wait [#allocation11], 48128  }
  0x36   :  { %14982 = vsyncadd [#allocation11], 4294919168  ;;  %v19814_v0 = vmov 0.0   ;;  %vm275_vm0 = vcmask 1043456   ;;  %v123_v1 = vld [vmem:[#allocation8 + $0x8] sm:$0xff]  ;;  %v125_v2 = vld [vmem:[#allocation8 + $0x18] sm:$0xff] }
  0x37   :  { %346 = vmatprep.mubr.f32.mxu0 %v19814_v0  ;;  %1195 = vmatprep.mubr.f32.mxu1 %v19814_v0  ;;  %v122_v3 = vld [vmem:[#allocation8] sm:$0xff]  ;;  %v13935_v4 = vpack.c.bf16 %v125_v2, %v123_v1  ;;  %v124_v5 = vld [vmem:[#allocation8 + $0x10] sm:$0xff]  ;;  %v127_v6 = vld [vmem:[#allocation8 + $0x28] sm:$0xff]  ;;  %vm14991_vm1 = vmmov 1   ;;  %v19820_v10 = vmov 0  ;;  %vm130_vm3 = vcmask 228352  }
  0x38   :  { %v129_v7 = vld [vmem:[#allocation8 + $0x38] sm:$0xf]  ;;  %v13937_v8 = vpack.c.bf16 %v124_v5, %v122_v3  ;;  %vm15086_vm2 = vmpackc.low %vm275_vm0, %vm14991_vm1  ;;  %v126_v11 = vld [vmem:[#allocation8 + $0x20] sm:$0xff]  ;;  %vm636_vm4 = vcmask 523264  }
  0x39   :  { %v13939_v9 = vpack.c.bf16 %v129_v7, %v127_v6  ;;  %v19821_v10 = vsel %vm15086_vm2, 4294967295, %v19820_v10  ;;  %v128_v12 = vld [vmem:[#allocation8 + $0x30] sm:$0xf]  ;;  %13936 = vmatprep.subr.bf16.mxu0 %v13935_v4  ;;  %v878_v13 = vld [vmem:[#allocation8 + $0x48] sm:$0xff]  ;;  %v880_v14 = vld [vmem:[#allocation8 + $0x58] sm:$0xff] }
  0x3a   :  { %19822 = vst [vmem:[#allocation15_spill] sm:$0xff] %v19821_v10  ;;  %v877_v15 = vld [vmem:[#allocation8 + $0x40] sm:$0xff]  ;;  %13938 = vmatpush1.bf16.msra.mxu0 %v13937_v8  ;;  %v13942_v16 = vpack.c.bf16 %v128_v12, %v126_v11  ;;  %v13945_v17 = vpack.c.bf16 %v880_v14, %v878_v13  ;;  %v879_v18 = vld [vmem:[#allocation8 + $0x50] sm:$0xff]  ;;  %v882_v21 = vld [vmem:[#allocation8 + $0x68] sm:$0xff] }
  0x3b   :  { %13941 = vmatprep.subr.msk.bf16.mxu0 %vm15086_vm2, %v13939_v9  ;;  %v13947_v19 = vpack.c.bf16 %v879_v18, %v877_v15  ;;  %v74_v20 = vld [vmem:[%s19783_s0] sm:$0xff]  ;;  %v884_v22 = vld [vmem:[#allocation8 + $0x78] sm:$0xf]  ;;  %v883_v25 = vld [vmem:[#allocation8 + $0x70] sm:$0xf] }
  0x3c   :  { %14035 = vmatprep.subr.bf16.mxu1 %v13945_v17  ;;  %v881_v23 = vld [vmem:[#allocation8 + $0x60] sm:$0xff]  ;;  %v13949_v24 = vpack.c.bf16 %v884_v22, %v882_v21  ;;  %v75_v26 = vld [vmem:[%s19783_s0 + $0x8] sm:$0xff]  ;;  %v15111_v28 = vld [vmem:[%s19783_s0 + $0x90] sm:$0xff] }
  0x3d   :  { %14037 = vmatpush1.bf16.msra.mxu1 %v13947_v19  ;;  %v13952_v27 = vpack.c.bf16 %v883_v25, %v881_v23  ;;  %v76_v29 = vld [vmem:[%s19783_s0 + $0x10] sm:$0xff]  ;;  %v77_v30 = vld [vmem:[%s19783_s0 + $0x18] sm:$0xff]  ;;  %v2574_v32 = vld [vmem:[#allocation8 + $0xc8] sm:$0xff] }
  0x3e   :  { %13944 = vmatpush1.bf16.msk.msra.mxu0 %vm15086_vm2, %v13942_v16  ;;  %14036 = vmatprep.subr.msk.bf16.mxu1 %vm15086_vm2, %v13949_v24  ;;  %v15129_v31 = vld [vmem:[%s19783_s0 + $0x98] sm:$0xff]  ;;  %v2573_v35 = vld [vmem:[#allocation8 + $0xc0] sm:$0xff]  ;;  %v2575_v36 = vld [vmem:[#allocation8 + $0xd0] sm:$0xff] }
  0x3f   :  { %13946 = vmatprep.subr.bf16.mxu0 %v13945_v17  ;;  %v2576_v33 = vld [vmem:[#allocation8 + $0xd8] sm:$0xff]  ;;  %v13967_v37 = vpack.c.bf16 %v2575_v36, %v2573_v35  ;;  %v78_v38 = vld [vmem:[%s19783_s0 + $0x20] sm:$0xff]  ;;  %v79_v40 = vld [vmem:[%s19783_s0 + $0x28] sm:$0xff] }
  0x40   :  { %v13965_v34 = vpack.c.bf16 %v2576_v33, %v2574_v32  ;;  %v15142_v39 = vld [vmem:[%s19783_s0 + $0xa0] sm:$0xff]  ;;  %v15155_v41 = vld [vmem:[%s19783_s0 + $0xa8] sm:$0xff]  ;;  %v15164_v42 = vld [vmem:[%s19783_s0 + $0x30] sm:$0xff] }
  0x41   :  { %12982 = vmatmul.mubr.msk.f32.vlgmr.msra.gmra.mrb[0].mxu0 %vm130_vm3, %v74_v20  ;;  %14038 = vmatpush1.bf16.msk.msra.mxu1 %vm15086_vm2, %v13952_v27  ;;  %v15170_v43 = vld [vmem:[%s19783_s0 + $0xb0] sm:$0xff]  ;;  %v15179_v44 = vld [vmem:[%s19783_s0 + $0x38] sm:$0xff]  ;;  %v15195_v46 = vld [vmem:[%s19783_s0 + $0x40] sm:$0xff] }
  0x42   :  { %13948 = vmatpush1.bf16.msra.mxu0 %v13947_v19  ;;  %352 = vmatprep.mubr.f32.mxu0 %v19814_v0  ;;  %v15185_v45 = vld [vmem:[%s19783_s0 + $0xb8] sm:$0xff]  ;;  %v15201_v47 = vld [vmem:[%s19783_s0 + $0xc0] sm:$0xff]  ;;  %v15211_v48 = vld [vmem:[%s19783_s0 + $0x48] sm:$0xff] }
  0x43   :  { %13951 = vmatprep.subr.msk.bf16.mxu0 %vm15086_vm2, %v13949_v24  ;;  %13966 = vmatprep.subr.bf16.mxu1 %v13965_v34  ;;  %v15217_v49 = vld [vmem:[%s19783_s0 + $0xc8] sm:$0xff]  ;;  %v15227_v50 = vld [vmem:[%s19783_s0 + $0x50] sm:$0xff]  ;;  %v15243_v52 = vld [vmem:[%s19783_s0 + $0x58] sm:$0xff] }
  0x44   :  { %13048 = vmatmul.mubr.msk.f32.vlgmr.msra.gmra.mrb[0].mxu1 %vm130_vm3, %v15111_v28  ;;  %v15233_v51 = vld [vmem:[%s19783_s0 + $0xd0] sm:$0xff]  ;;  %v15249_v53 = vld [vmem:[%s19783_s0 + $0xd8] sm:$0xff]  ;;  %v15259_v54 = vld [vmem:[%s19783_s0 + $0x60] sm:$0xff] }
  0x45   :  { %12983 = vmatmul.mubr.msk.f32.gmra.mrb[2].mxu0 %vm130_vm3, %v75_v26  ;;  %1201 = vmatprep.mubr.f32.mxu1 %v19814_v0  ;;  %v15265_v55 = vld [vmem:[%s19783_s0 + $0xe0] sm:$0xff]  ;;  %v15275_v56 = vld [vmem:[%s19783_s0 + $0x68] sm:$0xff]  ;;  %v15291_v58 = vld [vmem:[%s19783_s0 + $0x70] sm:$0xff] }
  0x46   :  { %358 = vmatprep.mubr.f32.mxu0 %v19814_v0  ;;  %13954 = vmatpush1.bf16.msk.msra.mxu0 %vm15086_vm2, %v13952_v27  ;;  %v15281_v57 = vld [vmem:[%s19783_s0 + $0xe8] sm:$0xff]  ;;  %v15297_v59 = vld [vmem:[%s19783_s0 + $0xf0] sm:$0xff]  ;;  %v15307_v60 = vld [vmem:[%s19783_s0 + $0x78] sm:$0xff] }
  0x47   :  { %13968 = vmatpush1.bf16.msra.mxu1 %v13967_v37  ;;  %v15313_v61 = vld [vmem:[%s19783_s0 + $0xf8] sm:$0xff]  ;;  %v90_v62 = vld [vmem:[%s19783_s0 + $0x80] sm:$0xff]  ;;  %v15335_v1 = vld [vmem:[%s19783_s0 + $0x108] sm:$0xff] }
  0x48   :  { %13049 = vmatmul.mubr.msk.f32.gmra.mrb[2].mxu1 %vm130_vm3, %v15129_v31  ;;  %v15327_v63 = vld [vmem:[%s19783_s0 + $0x100] sm:$0xff]  ;;  %v91_v2 = vld [vmem:[%s19783_s0 + $0x88] sm:$0xff]  ;;  %v1728_v4 = vld [vmem:[#allocation8 + $0x98] sm:$0xff] }
  0x49   :  { %12984 = vmatmul.mubr.msk.f32.gmra.mrb[4].mxu0 %vm130_vm3, %v76_v29  ;;  %1207 = vmatprep.mubr.f32.mxu1 %v19814_v0  ;;  %v1726_v3 = vld [vmem:[#allocation8 + $0x88] sm:$0xff]  ;;  %v15348_v5 = vld [vmem:[%s19783_s0 + $0x110] sm:$0xff]  ;;  %v15358_v7 = vld [vmem:[%s19783_s0 + $0x118] sm:$0xff] }
  0x4a   :  { %364 = vmatprep.mubr.f32.mxu0 %v19814_v0  ;;  %v13955_v6 = vpack.c.bf16 %v1728_v4, %v1726_v3  ;;  %v2578_v8 = vld [vmem:[#allocation8 + $0xe8] sm:$0xff]  ;;  %v2580_v9 = vld [vmem:[#allocation8 + $0xf8] sm:$0xf]  ;;  %v15369_v11 = vld [vmem:[%s19783_s0 + $0x120] sm:$0xff] }
  0x4b   :  { %v13969_v12 = vpack.c.bf16 %v2580_v9, %v2578_v8  ;;  %v2577_v13 = vld [vmem:[#allocation8 + $0xe0] sm:$0xff]  ;;  %v2579_v14 = vld [vmem:[#allocation8 + $0xf0] sm:$0xf]  ;;  %v15384_v16 = vld [vmem:[%s19783_s0 + $0x128] sm:$0xff] }
  0x4c   :  { %13050 = vmatmul.mubr.msk.f32.gmra.mrb[4].mxu1 %vm130_vm3, %v15142_v39  ;;  %13956 = vmatprep.subr.bf16.mxu0 %v13955_v6  ;;  %v13972_v15 = vpack.c.bf16 %v2579_v14, %v2577_v13  ;;  %v15395_v17 = vld [vmem:[%s19783_s0 + $0x130] sm:$0xff]  ;;  %v15406_v18 = vld [vmem:[%s19783_s0 + $0x138] sm:$0xff]  ;;  %v15417_v19 = vld [vmem:[%s19783_s0 + $0x140] sm:$0xff] }
  0x4d   :  { %12985 = vmatmul.mubr.msk.f32.gmra.mrb[6].mxu0 %vm130_vm3, %v77_v30  ;;  %1213 = vmatprep.mubr.f32.mxu1 %v19814_v0  ;;  %v15428_v20 = vld [vmem:[%s19783_s0 + $0x148] sm:$0xff]  ;;  %v15441_v21 = vld [vmem:[%s19783_s0 + $0x150] sm:$0xff]  ;;  %v15450_v22 = vld [vmem:[%s19783_s0 + $0x158] sm:$0xff] }
  0x4e   :  { %370 = vmatprep.mubr.f32.mxu0 %v19814_v0  ;;  %13971 = vmatprep.subr.msk.bf16.mxu1 %vm15086_vm2, %v13969_v12  ;;  %v15461_v23 = vld [vmem:[%s19783_s0 + $0x160] sm:$0xff]  ;;  %v15472_v24 = vld [vmem:[%s19783_s0 + $0x168] sm:$0xff]  ;;  %v15483_v25 = vld [vmem:[%s19783_s0 + $0x170] sm:$0xff] }
  0x4f   :  { %13974 = vmatpush1.bf16.msk.msra.mxu1 %vm15086_vm2, %v13972_v15  ;;  %v15494_v26 = vld [vmem:[%s19783_s0 + $0x178] sm:$0xff]  ;;  %v874_v27 = vld [vmem:[%s19783_s0 + $0x180] sm:$0xff]  ;;  %v4174_v29 = vld [vmem:[#allocation8 + $0x148] sm:$0xff] }
  0x50   :  { %13051 = vmatmul.mubr.msk.f32.gmra.mrb[6].mxu1 %vm130_vm3, %v15155_v41  ;;  %v4176_v30 = vld [vmem:[#allocation8 + $0x158] sm:$0xff]  ;;  %v4173_v32 = vld [vmem:[#allocation8 + $0x140] sm:$0xff]  ;;  %v4175_v33 = vld [vmem:[#allocation8 + $0x150] sm:$0xff] }
  0x51   :  { %12986 = vmatmul.mubr.msk.f32.gmra.mrb[8].mxu0 %vm130_vm3, %v78_v38  ;;  %1219 = vmatprep.mubr.f32.mxu1 %v19814_v0  ;;  %v13987_v34 = vpack.c.bf16 %v4175_v33, %v4173_v32  ;;  %v2534_v35 = vld [vmem:[%s19783_s0 + $0x80] sm:$0xff]  ;;  %v15591_v36 = vld [vmem:[%s19783_s0 + $0x88] sm:$0xff]  ;;  %v15602_v37 = vld [vmem:[%s19783_s0 + $0x90] sm:$0xff] }
  0x52   :  { %376 = vmatprep.mubr.f32.mxu0 %v19814_v0  ;;  %v15613_v38 = vld [vmem:[%s19783_s0 + $0x98] sm:$0xff]  ;;  %v15736_v6 = vld [vmem:[%s19783_s0 + $0x40] sm:$0xff]  ;;  %v15757_v13 = vld [vmem:[%s19783_s0 + $0x48] sm:$0xff] }
  0x53   :  { %v15730_v4 = vld [vmem:[%s19783_s0 + $0xd8] sm:$0xff] }
  0x54   :  { %13052 = vmatmul.mubr.msk.f32.gmra.mrb[8].mxu1 %vm130_vm3, %v15170_v43 }
  0x55   :  { %12987 = vmatmul.mubr.msk.f32.gmra.mrb[10].mxu0 %vm130_vm3, %v79_v40  ;;  %1225 = vmatprep.mubr.f32.mxu1 %v19814_v0  ;;  %v1727_v40 = vld [vmem:[#allocation8 + $0x90] sm:$0xff] }
  0x56   :  { %382 = vmatprep.mubr.f32.mxu0 %v19814_v0 }
  0x58   :  { %13053 = vmatmul.mubr.msk.f32.gmra.mrb[10].mxu1 %vm130_vm3, %v15185_v45 }
  0x59   :  { %12988 = vmatmul.mubr.msk.f32.gmra.mrb[12].mxu0 %vm130_vm3, %v15164_v42  ;;  %1231 = vmatprep.mubr.f32.mxu1 %v19814_v0 }
  0x5a   :  { %388 = vmatprep.mubr.f32.mxu0 %v19814_v0 }
  0x5c   :  { %13054 = vmatmul.mubr.msk.f32.gmra.mrb[12].mxu1 %vm130_vm3, %v15201_v47 }
  0x5d   :  { %12989 = vmatmul.mubr.msk.f32.gmra.mrb[14].mxu0 %vm130_vm3, %v15179_v44  ;;  %1237 = vmatprep.mubr.f32.mxu1 %v19814_v0 }
  0x5e   :  { %394 = vmatprep.mubr.f32.mxu0 %v19814_v0 }
  0x60   :  { %13055 = vmatmul.mubr.msk.f32.gmra.mrb[14].mxu1 %vm130_vm3, %v15217_v49 }
  0x61   :  { %12990 = vmatmul.mubr.msk.f32.gmra.mrb[16].mxu0 %vm130_vm3, %v15195_v46  ;;  %1243 = vmatprep.mubr.f32.mxu1 %v19814_v0 }
  0x62   :  { %400 = vmatprep.mubr.f32.mxu0 %v19814_v0 }
  0x64   :  { %13056 = vmatmul.mubr.msk.f32.gmra.mrb[16].mxu1 %vm130_vm3, %v15233_v51 }
  0x65   :  { %12991 = vmatmul.mubr.msk.f32.gmra.mrb[18].mxu0 %vm130_vm3, %v15211_v48  ;;  %1249 = vmatprep.mubr.f32.mxu1 %v19814_v0 }
  0x66   :  { %406 = vmatprep.mubr.f32.mxu0 %v19814_v0 }
  0x68   :  { %13057 = vmatmul.mubr.msk.f32.gmra.mrb[18].mxu1 %vm130_vm3, %v15249_v53 }
  0x69   :  { %12992 = vmatmul.mubr.msk.f32.gmra.mrb[20].mxu0 %vm130_vm3, %v15227_v50  ;;  %1255 = vmatprep.mubr.f32.mxu1 %v19814_v0 }
  0x6a   :  { %412 = vmatprep.mubr.f32.mxu0 %v19814_v0 }
  0x6c   :  { %13058 = vmatmul.mubr.msk.f32.gmra.mrb[20].mxu1 %vm130_vm3, %v15265_v55 }
  0x6d   :  { %12993 = vmatmul.mubr.msk.f32.gmra.mrb[22].mxu0 %vm130_vm3, %v15243_v52  ;;  %1261 = vmatprep.mubr.f32.mxu1 %v19814_v0 }
  0x6e   :  { %418 = vmatprep.mubr.f32.mxu0 %v19814_v0 }
  0x70   :  { %13059 = vmatmul.mubr.msk.f32.gmra.mrb[22].mxu1 %vm130_vm3, %v15281_v57 }
  0x71   :  { %12994 = vmatmul.mubr.msk.f32.gmra.mrb[24].mxu0 %vm130_vm3, %v15259_v54  ;;  %1267 = vmatprep.mubr.f32.mxu1 %v19814_v0 }
  0x72   :  { %424 = vmatprep.mubr.f32.mxu0 %v19814_v0 }
  0x74   :  { %13060 = vmatmul.mubr.msk.f32.gmra.mrb[24].mxu1 %vm130_vm3, %v15297_v59 }
  0x75   :  { %12995 = vmatmul.mubr.msk.f32.gmra.mrb[26].mxu0 %vm130_vm3, %v15275_v56  ;;  %1273 = vmatprep.mubr.f32.mxu1 %v19814_v0 }
  0x76   :  { %430 = vmatprep.mubr.f32.mxu0 %v19814_v0 }
  0x78   :  { %13061 = vmatmul.mubr.msk.f32.gmra.mrb[26].mxu1 %vm130_vm3, %v15313_v61 }
  0x79   :  { %12996 = vmatmul.mubr.msk.f32.gmra.mrb[28].mxu0 %vm130_vm3, %v15291_v58  ;;  %1279 = vmatprep.mubr.f32.mxu1 %v19814_v0 }
  0x7a   :  { %436 = vmatprep.mubr.f32.mxu0 %v19814_v0 }
  0x7c   :  { %13062 = vmatmul.mubr.msk.f32.gmra.mrb[28].mxu1 %vm130_vm3, %v15327_v63 }
  0x7d   :  { %12997 = vmatmul.mubr.msk.f32.gmra.mrb[30].mxu0 %vm130_vm3, %v15307_v60  ;;  %1285 = vmatprep.mubr.f32.mxu1 %v19814_v0 }
  0x7e   :  { %442 = vmatprep.mubr.f32.mxu0 %v19814_v0 }
  0x80   :  { %13063 = vmatmul.mubr.msk.f32.gmra.mrb[30].mxu1 %vm130_vm3, %v15335_v1 }
  0x81   :  { %12998 = vmatmul.mubr.msk.f32.gmra.mrb[32].mxu0 %vm130_vm3, %v90_v62  ;;  %1291 = vmatprep.mubr.f32.mxu1 %v19814_v0 }
  0x82   :  { %448 = vmatprep.mubr.f32.mxu0 %v19814_v0 }
  0x84   :  { %13064 = vmatmul.mubr.msk.f32.gmra.mrb[32].mxu1 %vm130_vm3, %v15348_v5 }
  0x85   :  { %12999 = vmatmul.mubr.msk.f32.gmra.mrb[34].mxu0 %vm130_vm3, %v91_v2  ;;  %1297 = vmatprep.mubr.f32.mxu1 %v19814_v0  ;;  %v15719_v2 = vld [vmem:[%s19783_s0 + $0x38] sm:$0xff] }
  0x86   :  { %454 = vmatprep.mubr.f32.mxu0 %v19814_v0 }
  0x88   :  { %13065 = vmatmul.mubr.msk.f32.gmra.mrb[34].mxu1 %vm130_vm3, %v15358_v7 }
  0x89   :  { %13000 = vmatmul.mubr.msk.f32.gmra.mrb[36].mxu0 %vm130_vm3, %v15111_v28  ;;  %1303 = vmatprep.mubr.f32.mxu1 %v19814_v0  ;;  %v875_v28 = vld [vmem:[%s19783_s0 + $0x188] sm:$0xff] }
  0x8a   :  { %460 = vmatprep.mubr.f32.mxu0 %v19814_v0 }
  0x8c   :  { %13066 = vmatmul.mubr.msk.f32.gmra.mrb[36].mxu1 %vm130_vm3, %v15369_v11 }
  0x8d   :  { %13001 = vmatmul.mubr.msk.f32.gmra.mrb[38].mxu0 %vm130_vm3, %v15129_v31  ;;  %1309 = vmatprep.mubr.f32.mxu1 %v19814_v0  ;;  %v13985_v31 = vpack.c.bf16 %v4176_v30, %v4174_v29  ;;  %v15814_v29 = vld [vmem:[%s19783_s0 + $0xf8] sm:$0xff] }
  0x8e   :  { %466 = vmatprep.mubr.f32.mxu0 %v19814_v0 }
  0x8f   :  { %13986 = vmatprep.subr.bf16.mxu1 %v13985_v31  ;;  %v15820_v31 = vld [vmem:[%s19783_s0 + $0x60] sm:$0xff] }
  0x90   :  { %13067 = vmatmul.mubr.msk.f32.gmra.mrb[38].mxu1 %vm130_vm3, %v15384_v16 }
  0x91   :  { %13002 = vmatmul.mubr.msk.f32.gmra.mrb[40].mxu0 %vm130_vm3, %v15142_v39  ;;  %1315 = vmatprep.mubr.f32.mxu1 %v19814_v0  ;;  %v1725_v39 = vld [vmem:[#allocation8 + $0x80] sm:$0xff] }
  0x92   :  { %472 = vmatprep.mubr.f32.mxu0 %v19814_v0 }
  0x94   :  { %13068 = vmatmul.mubr.msk.f32.gmra.mrb[40].mxu1 %vm130_vm3, %v15395_v17 }
  0x95   :  { %13003 = vmatmul.mubr.msk.f32.gmra.mrb[42].mxu0 %vm130_vm3, %v15155_v41  ;;  %1321 = vmatprep.mubr.f32.mxu1 %v19814_v0  ;;  %v1730_v41 = vld [vmem:[#allocation8 + $0xa8] sm:$0xff] }
  0x96   :  { %478 = vmatprep.mubr.f32.mxu0 %v19814_v0 }
  0x98   :  { %13069 = vmatmul.mubr.msk.f32.gmra.mrb[42].mxu1 %vm130_vm3, %v15406_v18 }
  0x99   :  { %13004 = vmatmul.mubr.msk.f32.gmra.mrb[44].mxu0 %vm130_vm3, %v15170_v43  ;;  %1327 = vmatprep.mubr.f32.mxu1 %v19814_v0  ;;  %v15624_v43 = vld [vmem:[%s19783_s0 + $0xa0] sm:$0xff] }
  0x9a   :  { %484 = vmatprep.mubr.f32.mxu0 %v19814_v0 }
  0x9c   :  { %13070 = vmatmul.mubr.msk.f32.gmra.mrb[44].mxu1 %vm130_vm3, %v15417_v19 }
  0x9d   :  { %13005 = vmatmul.mubr.msk.f32.gmra.mrb[46].mxu0 %vm130_vm3, %v15185_v45  ;;  %1333 = vmatprep.mubr.f32.mxu1 %v19814_v0 }
  0x9e   :  { %490 = vmatprep.mubr.f32.mxu0 %v19814_v0 }
  0xa0   :  { %13071 = vmatmul.mubr.msk.f32.gmra.mrb[46].mxu1 %vm130_vm3, %v15428_v20 }
  0xa1   :  { %13006 = vmatmul.mubr.msk.f32.gmra.mrb[48].mxu0 %vm130_vm3, %v15201_v47  ;;  %1339 = vmatprep.mubr.f32.mxu1 %v19814_v0  ;;  %v1731_v47 = vld [vmem:[#allocation8 + $0xb0] sm:$0xf] }
  0xa2   :  { %496 = vmatprep.mubr.f32.mxu0 %v19814_v0 }
  0xa4   :  { %13072 = vmatmul.mubr.msk.f32.gmra.mrb[48].mxu1 %vm130_vm3, %v15441_v21 }
  0xa5   :  { %13007 = vmatmul.mubr.msk.f32.gmra.mrb[50].mxu0 %vm130_vm3, %v15217_v49  ;;  %1345 = vmatprep.mubr.f32.mxu1 %v19814_v0  ;;  %v3424_v49 = vld [vmem:[#allocation8 + $0x118] sm:$0xff] }
  0xa6   :  { %502 = vmatprep.mubr.f32.mxu0 %v19814_v0 }
  0xa8   :  { %13073 = vmatmul.mubr.msk.f32.gmra.mrb[50].mxu1 %vm130_vm3, %v15450_v22 }
  0xa9   :  { %13008 = vmatmul.mubr.msk.f32.gmra.mrb[52].mxu0 %vm130_vm3, %v15233_v51  ;;  %1351 = vmatprep.mubr.f32.mxu1 %v19814_v0  ;;  %v14792_v51 = vld [vmem:[%s19783_s0 + $0x10] sm:$0xff] }
  0xaa   :  { %508 = vmatprep.mubr.f32.mxu0 %v19814_v0 }
  0xac   :  { %13074 = vmatmul.mubr.msk.f32.gmra.mrb[52].mxu1 %vm130_vm3, %v15461_v23 }
  0xad   :  { %13009 = vmatmul.mubr.msk.f32.gmra.mrb[54].mxu0 %vm130_vm3, %v15249_v53  ;;  %1357 = vmatprep.mubr.f32.mxu1 %v19814_v0 }
  0xae   :  { %514 = vmatprep.mubr.f32.mxu0 %v19814_v0 }
  0xb0   :  { %13075 = vmatmul.mubr.msk.f32.gmra.mrb[54].mxu1 %vm130_vm3, %v15472_v24 }
  0xb1   :  { %13010 = vmatmul.mubr.msk.f32.gmra.mrb[56].mxu0 %vm130_vm3, %v15265_v55  ;;  %1363 = vmatprep.mubr.f32.mxu1 %v19814_v0  ;;  %v14793_v55 = vld [vmem:[%s19783_s0 + $0x18] sm:$0xff] }
  0xb2   :  { %520 = vmatprep.mubr.f32.mxu0 %v19814_v0 }
  0xb4   :  { %13076 = vmatmul.mubr.msk.f32.gmra.mrb[56].mxu1 %vm130_vm3, %v15483_v25 }
  0xb5   :  { %13011 = vmatmul.mubr.msk.f32.gmra.mrb[58].mxu0 %vm130_vm3, %v15281_v57  ;;  %1369 = vmatprep.mubr.f32.mxu1 %v19814_v0  ;;  %v15671_v57 = vld [vmem:[%s19783_s0 + $0x20] sm:$0xff] }
  0xb6   :  { %526 = vmatprep.mubr.f32.mxu0 %v19814_v0 }
  0xb8   :  { %13077 = vmatmul.mubr.msk.f32.gmra.mrb[58].mxu1 %vm130_vm3, %v15494_v26 }
  0xb9   :  { %13012 = vmatmul.mubr.msk.f32.gmra.mrb[60].mxu0 %vm130_vm3, %v15297_v59  ;;  %1375 = vmatprep.mubr.f32.mxu1 %v19814_v0  ;;  %v15687_v59 = vld [vmem:[%s19783_s0 + $0x28] sm:$0xff] }
  0xba   :  { %532 = vmatprep.mubr.f32.mxu0 %v19814_v0 }
  0xbc   :  { %13078 = vmatmul.mubr.msk.f32.gmra.mrb[60].mxu1 %vm130_vm3, %v874_v27 }
  0xbd   :  { %13013 = vmatmul.mubr.msk.f32.gmra.mrb[62].mxu0 %vm130_vm3, %v15313_v61  ;;  %1381 = vmatprep.mubr.f32.mxu1 %v19814_v0  ;;  %v15703_v61 = vld [vmem:[%s19783_s0 + $0x30] sm:$0xff] }
  0xbe   :  { %538 = vmatprep.mubr.f32.mxu0 %v19814_v0 }
  0xc0   :  { %13079 = vmatmul.mubr.msk.f32.gmra.mrb[62].mxu1 %vm130_vm3, %v875_v28 }
  0xc1   :  { %13014 = vmatmul.mubr.msk.f32.gmra.mrb[64].mxu0 %vm130_vm3, %v15327_v63  ;;  %2795 = vmatprep.mubr.f32.mxu1 %v19814_v0  ;;  %v15713_v63 = vld [vmem:[%s19783_s0 + $0xd0] sm:$0xff] }
  0xc2   :  { %544 = vmatprep.mubr.f32.mxu0 %v19814_v0 }
  0xc4   :  { %13132 = vmatmul.mubr.msk.f32.vlgmr.msra.gmra.mrb[64].mxu1 %vm130_vm3, %v15164_v42  ;;  %v1732_v42 = vld [vmem:[#allocation8 + $0xb8] sm:$0xf] }
  0xc5   :  { %13015 = vmatmul.mubr.msk.f32.gmra.mrb[66].mxu0 %vm130_vm3, %v15335_v1  ;;  %2801 = vmatprep.mubr.f32.mxu1 %v19814_v0  ;;  %v13959_v45 = vpack.c.bf16 %v1732_v42, %v1730_v41  ;;  %v4177_v41 = vld [vmem:[#allocation8 + $0x160] sm:$0xff] }
  0xc6   :  { %550 = vmatprep.mubr.f32.mxu0 %v19814_v0  ;;  %13988 = vmatpush1.bf16.msra.mxu1 %v13987_v34  ;;  %v15835_v34 = vld [vmem:[%s19783_s0 + $0x100] sm:$0xff] }
  0xc8   :  { %13133 = vmatmul.mubr.msk.f32.gmra.mrb[66].mxu1 %vm130_vm3, %v15179_v44  ;;  %v13957_v44 = vpack.c.bf16 %v1727_v40, %v1725_v39  ;;  %v4178_v39 = vld [vmem:[#allocation8 + $0x168] sm:$0xff]  ;;  %v4180_v40 = vld [vmem:[#allocation8 + $0x178] sm:$0xf] }
  0xc9   :  { %13016 = vmatmul.mubr.msk.f32.gmra.mrb[68].mxu0 %vm130_vm3, %v15348_v5  ;;  %2807 = vmatprep.mubr.f32.mxu1 %v19814_v0 }
  0xca   :  { %556 = vmatprep.mubr.f32.mxu0 %v19814_v0 }
  0xcc   :  { %13134 = vmatmul.mubr.msk.f32.gmra.mrb[68].mxu1 %vm130_vm3, %v15195_v46  ;;  %v1729_v46 = vld [vmem:[#allocation8 + $0xa0] sm:$0xff] }
  0xcd   :  { %13017 = vmatmul.mubr.msk.f32.gmra.mrb[70].mxu0 %vm130_vm3, %v15358_v7  ;;  %2813 = vmatprep.mubr.f32.mxu1 %v19814_v0 }
  0xce   :  { %562 = vmatprep.mubr.f32.mxu0 %v19814_v0 }
  0xd0   :  { %13135 = vmatmul.mubr.msk.f32.gmra.mrb[70].mxu1 %vm130_vm3, %v15211_v48  ;;  %v3422_v48 = vld [vmem:[#allocation8 + $0x108] sm:$0xff] }
  0xd1   :  { %13018 = vmatmul.mubr.msk.f32.gmra.mrb[72].mxu0 %vm130_vm3, %v15369_v11  ;;  %2819 = vmatprep.mubr.f32.mxu1 %v19814_v0  ;;  %v13975_v53 = vpack.c.bf16 %v3424_v49, %v3422_v48  ;;  %v15751_v11 = vld [vmem:[%s19783_s0 + $0xe0] sm:$0xff] }
  0xd2   :  { %568 = vmatprep.mubr.f32.mxu0 %v19814_v0 }
  0xd4   :  { %13136 = vmatmul.mubr.msk.f32.gmra.mrb[72].mxu1 %vm130_vm3, %v15227_v50  ;;  %v15635_v50 = vld [vmem:[%s19783_s0 + $0xa8] sm:$0xff] }
  0xd5   :  { %13019 = vmatmul.mubr.msk.f32.gmra.mrb[74].mxu0 %vm130_vm3, %v15384_v16  ;;  %2825 = vmatprep.mubr.f32.mxu1 %v19814_v0 }
  0xd6   :  { %574 = vmatprep.mubr.f32.mxu0 %v19814_v0 }
  0xd8   :  { %13137 = vmatmul.mubr.msk.f32.gmra.mrb[74].mxu1 %vm130_vm3, %v15243_v52  ;;  %v13962_v52 = vpack.c.bf16 %v1731_v47, %v1729_v46  ;;  %v4179_v46 = vld [vmem:[#allocation8 + $0x170] sm:$0xf] }
  0xd9   :  { %13020 = vmatmul.mubr.msk.f32.gmra.mrb[76].mxu0 %vm130_vm3, %v15395_v17  ;;  %2831 = vmatprep.mubr.f32.mxu1 %v19814_v0  ;;  %v15772_v17 = vld [vmem:[%s19783_s0 + $0xe8] sm:$0xff]  ;;  %v13992_v48 = vpack.c.bf16 %v4179_v46, %v4177_v41  ;;  %v3428_v46 = vld [vmem:[#allocation8 + $0x138] sm:$0xf] }
  0xda   :  { %580 = vmatprep.mubr.f32.mxu0 %v19814_v0 }
  0xdc   :  { %13138 = vmatmul.mubr.msk.f32.gmra.mrb[76].mxu1 %vm130_vm3, %v15259_v54  ;;  %v15650_v54 = vld [vmem:[%s19783_s0 + $0xb0] sm:$0xff] }
  0xdd   :  { %13021 = vmatmul.mubr.msk.f32.gmra.mrb[78].mxu0 %vm130_vm3, %v15406_v18  ;;  %2837 = vmatprep.mubr.f32.mxu1 %v19814_v0 }
  0xde   :  { %586 = vmatprep.mubr.f32.mxu0 %v19814_v0 }
  0xe0   :  { %13139 = vmatmul.mubr.msk.f32.gmra.mrb[78].mxu1 %vm130_vm3, %v15275_v56  ;;  %v15665_v56 = vld [vmem:[%s19783_s0 + $0xb8] sm:$0xff] }
  0xe1   :  { %13022 = vmatmul.mubr.msk.f32.gmra.mrb[80].mxu0 %vm130_vm3, %v15417_v19  ;;  %2843 = vmatprep.mubr.f32.mxu1 %v19814_v0  ;;  %v15778_v19 = vld [vmem:[%s19783_s0 + $0x50] sm:$0xff] }
  0xe2   :  { %592 = vmatprep.mubr.f32.mxu0 %v19814_v0 }
  0xe4   :  { %13140 = vmatmul.mubr.msk.f32.gmra.mrb[80].mxu1 %vm130_vm3, %v15291_v58  ;;  %v15681_v58 = vld [vmem:[%s19783_s0 + $0xc0] sm:$0xff] }
  0xe5   :  { %13023 = vmatmul.mubr.msk.f32.gmra.mrb[82].mxu0 %vm130_vm3, %v15428_v20  ;;  %2849 = vmatprep.mubr.f32.mxu1 %v19814_v0 }
  0xe6   :  { %598 = vmatprep.mubr.f32.mxu0 %v19814_v0 }
  0xe8   :  { %13141 = vmatmul.mubr.msk.f32.gmra.mrb[82].mxu1 %vm130_vm3, %v15307_v60  ;;  %v15697_v60 = vld [vmem:[%s19783_s0 + $0xc8] sm:$0xff] }
  0xe9   :  { %13024 = vmatmul.mubr.msk.f32.gmra.mrb[84].mxu0 %vm130_vm3, %v15441_v21  ;;  %2855 = vmatprep.mubr.f32.mxu1 %v19814_v0 }
  0xea   :  { %604 = vmatprep.mubr.f32.mxu0 %v19814_v0 }
  0xec   :  { %13142 = vmatmul.mubr.msk.f32.gmra.mrb[84].mxu1 %vm130_vm3, %v2534_v35 }
  0xed   :  { %13025 = vmatmul.mubr.msk.f32.gmra.mrb[86].mxu0 %vm130_vm3, %v15450_v22  ;;  %2861 = vmatprep.mubr.f32.mxu1 %v19814_v0 }
  0xee   :  { %610 = vmatprep.mubr.f32.mxu0 %v19814_v0 }
  0xf0   :  { %13143 = vmatmul.mubr.msk.f32.gmra.mrb[86].mxu1 %vm130_vm3, %v15591_v36 }
  0xf1   :  { %13026 = vmatmul.mubr.msk.f32.gmra.mrb[88].mxu0 %vm130_vm3, %v15461_v23  ;;  %2867 = vmatprep.mubr.f32.mxu1 %v19814_v0  ;;  %v15793_v23 = vld [vmem:[%s19783_s0 + $0xf0] sm:$0xff] }
  0xf2   :  { %616 = vmatprep.mubr.f32.mxu0 %v19814_v0 }
  0xf4   :  { %13144 = vmatmul.mubr.msk.f32.gmra.mrb[88].mxu1 %vm130_vm3, %v15602_v37 }
  0xf5   :  { %13027 = vmatmul.mubr.msk.f32.gmra.mrb[90].mxu0 %vm130_vm3, %v15472_v24  ;;  %2873 = vmatprep.mubr.f32.mxu1 %v19814_v0 }
  0xf6   :  { %622 = vmatprep.mubr.f32.mxu0 %v19814_v0 }
  0xf8   :  { %13145 = vmatmul.mubr.msk.f32.gmra.mrb[90].mxu1 %vm130_vm3, %v15613_v38 }
  0xf9   :  { %13028 = vmatmul.mubr.msk.f32.gmra.mrb[92].mxu0 %vm130_vm3, %v15483_v25  ;;  %2879 = vmatprep.mubr.f32.mxu1 %v19814_v0  ;;  %v15799_v25 = vld [vmem:[%s19783_s0 + $0x58] sm:$0xff] }
  0xfa   :  { %628 = vmatprep.mubr.f32.mxu0 %v19814_v0 }
  0xfc   :  { %13146 = vmatmul.mubr.msk.f32.gmra.mrb[92].mxu1 %vm130_vm3, %v15624_v43 }
  0xfd   :  { %13029 = vmatmul.mubr.msk.f32.gmra.mrb[94].mxu0 %vm130_vm3, %v15494_v26  ;;  %2885 = vmatprep.mubr.f32.mxu1 %v19814_v0 }
  0xfe   :  { %1099 = vmatprep.mubr.f32.mxu0 %v19814_v0 }
 0x100   :  { %13147 = vmatmul.mubr.msk.f32.gmra.mrb[94].mxu1 %vm130_vm3, %v15635_v50 }
 0x101   :  { %13032 = vmatmul.mubr.msk.f32.vlgmr.msra.gmra.mrb[96].mxu0 %vm130_vm3, %v14792_v51  ;;  %2891 = vmatprep.mubr.f32.mxu1 %v19814_v0 }
 0x102   :  { %13958 = vmatpush1.bf16.msra.mxu0 %v13957_v44  ;;  %1105 = vmatprep.mubr.f32.mxu0 %v19814_v0  ;;  %v15841_v44 = vld [vmem:[%s19783_s0 + $0x68] sm:$0xff] }
 0x103   :  { %13961 = vmatprep.subr.msk.bf16.mxu0 %vm15086_vm2, %v13959_v45  ;;  %v13989_v45 = vpack.c.bf16 %v4180_v40, %v4178_v39  ;;  %v3421_v39 = vld [vmem:[#allocation8 + $0x100] sm:$0xff]  ;;  %v3423_v40 = vld [vmem:[#allocation8 + $0x110] sm:$0xff] }
 0x104   :  { %13148 = vmatmul.mubr.msk.f32.gmra.mrb[96].mxu1 %vm130_vm3, %v15650_v54 }
 0x105   :  { %13033 = vmatmul.mubr.msk.f32.gmra.mrb[98].mxu0 %vm130_vm3, %v14793_v55  ;;  %2897 = vmatprep.mubr.f32.mxu1 %v19814_v0  ;;  %v15866_v55 = vld [vmem:[%s19783_s0 + $0x70] sm:$0xff] }
 0x106   :  { %1111 = vmatprep.mubr.f32.mxu0 %v19814_v0  ;;  %13964 = vmatpush1.bf16.msk.msra.mxu0 %vm15086_vm2, %v13962_v52  ;;  %v15860_v52 = vld [vmem:[%s19783_s0 + $0x108] sm:$0xff] }
 0x107   :  { %13976 = vmatprep.subr.bf16.mxu0 %v13975_v53  ;;  %13991 = vmatprep.subr.msk.bf16.mxu1 %vm15086_vm2, %v13989_v45  ;;  %19823 = vst [vmem:[#allocation16_spill] sm:$0xff] %v15860_v52  ;;  %v3426_v45 = vld [vmem:[#allocation8 + $0x128] sm:$0xff] }
 0x108   :  { %13149 = vmatmul.mubr.msk.f32.gmra.mrb[98].mxu1 %vm130_vm3, %v15665_v56 }
 0x109   :  { %13034 = vmatmul.mubr.msk.f32.gmra.mrb[100].mxu0 %vm130_vm3, %v15671_v57  ;;  %2903 = vmatprep.mubr.f32.mxu1 %v19814_v0 }
 0x10a   :  { %1117 = vmatprep.mubr.f32.mxu0 %v19814_v0  ;;  %13994 = vmatpush1.bf16.msk.msra.mxu1 %vm15086_vm2, %v13992_v48  ;;  %v15923_v48 = vld [vmem:[%s19783_s0 + $0x120] sm:$0xff] }
 0x10b   :  { %19826 = vst [vmem:[#allocation19_spill] sm:$0xff] %v15923_v48 }
 0x10c   :  { %13150 = vmatmul.mubr.msk.f32.gmra.mrb[100].mxu1 %vm130_vm3, %v15681_v58 }
 0x10d   :  { %13035 = vmatmul.mubr.msk.f32.gmra.mrb[102].mxu0 %vm130_vm3, %v15687_v59  ;;  %2909 = vmatprep.mubr.f32.mxu1 %v19814_v0 }
 0x10e   :  { %1123 = vmatprep.mubr.f32.mxu0 %v19814_v0 }
 0x110   :  { %13151 = vmatmul.mubr.msk.f32.gmra.mrb[102].mxu1 %vm130_vm3, %v15697_v60 }
 0x111   :  { %13036 = vmatmul.mubr.msk.f32.gmra.mrb[104].mxu0 %vm130_vm3, %v15703_v61  ;;  %2915 = vmatprep.mubr.f32.mxu1 %v19814_v0 }
 0x112   :  { %1129 = vmatprep.mubr.f32.mxu0 %v19814_v0 }
 0x114   :  { %v348_v62 = vpop.f32.mrb[0].mxu0  ;;  %13152 = vmatmul.mubr.msk.f32.gmra.mrb[104].mxu1 %vm130_vm3, %v15713_v63 }
 0x115   :  { %635 = vst [vmem:[#allocation2] sm:$0xff] %v348_v62  ;;  %v350_v1 = vpop.f32.mrb[1].mxu0  ;;  %13037 = vmatmul.mubr.msk.f32.gmra.mrb[106].mxu0 %vm130_vm3, %v15719_v2  ;;  %2921 = vmatprep.mubr.f32.mxu1 %v19814_v0 }
 0x116   :  { %637 = vst.msk [vmem:[#allocation2 + $0x8] sm:$0xff] %vm636_vm4, %v350_v1  ;;  %1135 = vmatprep.mubr.f32.mxu0 %v19814_v0 }
 0x117   :  { %v15742_v7 = vpop.f32.mrb[0].mxu1 }
 0x118   :  { %v354_v3 = vpop.f32.mrb[2].mxu0  ;;  %v15744_v8 = vpop.f32.mrb[1].mxu1  ;;  %13153 = vmatmul.mubr.msk.f32.gmra.mrb[106].mxu1 %vm130_vm3, %v15730_v4 }
 0x119   :  { %638 = vst [vmem:[#allocation2 + $0x10] sm:$0xff] %v354_v3  ;;  %v356_v5 = vpop.f32.mrb[3].mxu0  ;;  %13038 = vmatmul.mubr.msk.f32.gmra.mrb[108].mxu0 %vm130_vm3, %v15736_v6  ;;  %2927 = vmatprep.mubr.f32.mxu1 %v19814_v0 }
 0x11a   :  { %639 = vst.msk [vmem:[#allocation2 + $0x18] sm:$0xff] %vm636_vm4, %v356_v5  ;;  %1141 = vmatprep.mubr.f32.mxu0 %v19814_v0  ;;  %v15881_v5 = vld [vmem:[%s19783_s0 + $0x110] sm:$0xff] }
 0x11b   :  { %v15763_v14 = vpop.f32.mrb[2].mxu1  ;;  %19824 = vst [vmem:[#allocation17_spill] sm:$0xff] %v15881_v5 }
 0x11c   :  { %v360_v9 = vpop.f32.mrb[4].mxu0  ;;  %v15765_v15 = vpop.f32.mrb[3].mxu1  ;;  %13154 = vmatmul.mubr.msk.f32.gmra.mrb[108].mxu1 %vm130_vm3, %v15751_v11 }
 0x11d   :  { %640 = vst [vmem:[#allocation2 + $0x20] sm:$0xff] %v360_v9  ;;  %v362_v12 = vpop.f32.mrb[5].mxu0  ;;  %13039 = vmatmul.mubr.msk.f32.gmra.mrb[110].mxu0 %vm130_vm3, %v15757_v13  ;;  %2933 = vmatprep.mubr.f32.mxu1 %v19814_v0 }
 0x11e   :  { %641 = vst.msk [vmem:[#allocation2 + $0x28] sm:$0xff] %vm636_vm4, %v362_v12  ;;  %1147 = vmatprep.mubr.f32.mxu0 %v19814_v0  ;;  %v15887_v12 = vld [vmem:[%s19783_s0 + $0x78] sm:$0xff] }
 0x11f   :  { %v15784_v20 = vpop.f32.mrb[4].mxu1 }
 0x120   :  { %v366_v16 = vpop.f32.mrb[6].mxu0  ;;  %v15786_v21 = vpop.f32.mrb[5].mxu1  ;;  %13155 = vmatmul.mubr.msk.f32.gmra.mrb[110].mxu1 %vm130_vm3, %v15772_v17 }
 0x121   :  { %642 = vst [vmem:[#allocation2 + $0x30] sm:$0xff] %v366_v16  ;;  %v368_v18 = vpop.f32.mrb[7].mxu0  ;;  %13040 = vmatmul.mubr.msk.f32.gmra.mrb[112].mxu0 %vm130_vm3, %v15778_v19  ;;  %2939 = vmatprep.mubr.f32.mxu1 %v19814_v0 }
 0x122   :  { %643 = vst.msk [vmem:[#allocation2 + $0x38] sm:$0xff] %vm636_vm4, %v368_v18  ;;  %1153 = vmatprep.mubr.f32.mxu0 %v19814_v0 }
 0x123   :  { %v15805_v26 = vpop.f32.mrb[6].mxu1 }
 0x124   :  { %v372_v22 = vpop.f32.mrb[8].mxu0  ;;  %v15807_v27 = vpop.f32.mrb[7].mxu1  ;;  %13156 = vmatmul.mubr.msk.f32.gmra.mrb[112].mxu1 %vm130_vm3, %v15793_v23 }
 0x125   :  { %644 = vst [vmem:[#allocation2 + $0x40] sm:$0xff] %v372_v22  ;;  %v374_v24 = vpop.f32.mrb[9].mxu0  ;;  %13041 = vmatmul.mubr.msk.f32.gmra.mrb[114].mxu0 %vm130_vm3, %v15799_v25  ;;  %2945 = vmatprep.mubr.f32.mxu1 %v19814_v0 }
 0x126   :  { %645 = vst.msk [vmem:[#allocation2 + $0x48] sm:$0xff] %vm636_vm4, %v374_v24  ;;  %1159 = vmatprep.mubr.f32.mxu0 %v19814_v0  ;;  %v15902_v24 = vld [vmem:[%s19783_s0 + $0x118] sm:$0xff] }
 0x127   :  { %v15826_v32 = vpop.f32.mrb[8].mxu1  ;;  %19825 = vst [vmem:[#allocation18_spill] sm:$0xff] %v15902_v24 }
 0x128   :  { %v378_v28 = vpop.f32.mrb[10].mxu0  ;;  %v15828_v33 = vpop.f32.mrb[9].mxu1  ;;  %13157 = vmatmul.mubr.msk.f32.gmra.mrb[114].mxu1 %vm130_vm3, %v15814_v29 }
 0x129   :  { %646 = vst [vmem:[#allocation2 + $0x50] sm:$0xff] %v378_v28  ;;  %v380_v30 = vpop.f32.mrb[11].mxu0  ;;  %13042 = vmatmul.mubr.msk.f32.gmra.mrb[116].mxu0 %vm130_vm3, %v15820_v31  ;;  %2951 = vmatprep.mubr.f32.mxu1 %v19814_v0 }
 0x12a   :  { %647 = vst.msk [vmem:[#allocation2 + $0x58] sm:$0xff] %vm636_vm4, %v380_v30  ;;  %1165 = vmatprep.mubr.f32.mxu0 %v19814_v0  ;;  %v15908_v30 = vld [vmem:[%s19783_s0 + $0x80] sm:$0xff] }
 0x12b   :  { %v15847_v47 = vpop.f32.mrb[10].mxu1 }
 0x12c   :  { %v384_v35 = vpop.f32.mrb[12].mxu0  ;;  %v15849_v49 = vpop.f32.mrb[11].mxu1  ;;  %13158 = vmatmul.mubr.msk.f32.gmra.mrb[116].mxu1 %vm130_vm3, %v15835_v34 }
 0x12d   :  { %648 = vst [vmem:[#allocation2 + $0x60] sm:$0xff] %v384_v35  ;;  %v386_v42 = vpop.f32.mrb[13].mxu0  ;;  %13043 = vmatmul.mubr.msk.f32.gmra.mrb[118].mxu0 %vm130_vm3, %v15841_v44  ;;  %2957 = vmatprep.mubr.f32.mxu1 %v19814_v0 }
 0x12e   :  { %649 = vst.msk [vmem:[#allocation2 + $0x68] sm:$0xff] %vm636_vm4, %v386_v42  ;;  %1171 = vmatprep.mubr.f32.mxu0 %v19814_v0 }
 0x12f   :  { %v15872_v62 = vpop.f32.mrb[12].mxu1 }
 0x130   :  { %v390_v51 = vpop.f32.mrb[14].mxu0  ;;  %v15874_v1 = vpop.f32.mrb[13].mxu1  ;;  %13159 = vmatmul.mubr.msk.f32.gmra.mrb[118].mxu1 %vm130_vm3, %v15860_v52 }
 0x131   :  { %650 = vst [vmem:[#allocation2 + $0x70] sm:$0xff] %v390_v51  ;;  %v392_v53 = vpop.f32.mrb[15].mxu0  ;;  %13044 = vmatmul.mubr.msk.f32.gmra.mrb[120].mxu0 %vm130_vm3, %v15866_v55  ;;  %2963 = vmatprep.mubr.f32.mxu1 %v19814_v0 }
 0x132   :  { %651 = vst.msk [vmem:[#allocation2 + $0x78] sm:$0xff] %vm636_vm4, %v392_v53  ;;  %1177 = vmatprep.mubr.f32.mxu0 %v19814_v0  ;;  %v14807_v53 = vld [vmem:[%s19783_s0 + $0x88] sm:$0xff] }
 0x133   :  { %v15893_v16 = vpop.f32.mrb[14].mxu1 }
 0x134   :  { %v396_v3 = vpop.f32.mrb[16].mxu0  ;;  %v15895_v18 = vpop.f32.mrb[15].mxu1  ;;  %13160 = vmatmul.mubr.msk.f32.gmra.mrb[120].mxu1 %vm130_vm3, %v15881_v5  ;;  %v3427_v5 = vld [vmem:[#allocation8 + $0x130] sm:$0xf] }
 0x135   :  { %652 = vst [vmem:[#allocation2 + $0x80] sm:$0xff] %v396_v3  ;;  %v398_v9 = vpop.f32.mrb[17].mxu0  ;;  %13045 = vmatmul.mubr.msk.f32.gmra.mrb[122].mxu0 %vm130_vm3, %v15887_v12  ;;  %2969 = vmatprep.mubr.f32.mxu1 %v19814_v0  ;;  %v13977_v3 = vpack.c.bf16 %v3423_v40, %v3421_v39 }
 0x136   :  { %653 = vst.msk [vmem:[#allocation2 + $0x88] sm:$0xff] %vm636_vm4, %v398_v9  ;;  %1183 = vmatprep.mubr.f32.mxu0 %v19814_v0 }
 0x137   :  { %v15914_v35 = vpop.f32.mrb[16].mxu1 }
 0x138   :  { %v402_v22 = vpop.f32.mrb[18].mxu0  ;;  %v15916_v41 = vpop.f32.mrb[17].mxu1  ;;  %13161 = vmatmul.mubr.msk.f32.gmra.mrb[122].mxu1 %vm130_vm3, %v15902_v24  ;;  %v3425_v24 = vld [vmem:[#allocation8 + $0x120] sm:$0xff] }
 0x139   :  { %654 = vst [vmem:[#allocation2 + $0x90] sm:$0xff] %v402_v22  ;;  %v404_v28 = vpop.f32.mrb[19].mxu0  ;;  %13046 = vmatmul.mubr.msk.f32.gmra.mrb[124].mxu0 %vm130_vm3, %v15908_v30  ;;  %2975 = vmatprep.mubr.f32.mxu1 %v19814_v0 }
 0x13a   :  { %655 = vst.msk [vmem:[#allocation2 + $0x98] sm:$0xff] %vm636_vm4, %v404_v28  ;;  %1189 = vmatprep.mubr.f32.mxu0 %v19814_v0  ;;  %v13979_v28 = vpack.c.bf16 %v3428_v46, %v3426_v45  ;;  %v13982_v45 = vpack.c.bf16 %v3427_v5, %v3425_v24 }
 0x13b   :  { %v15932_v9 = vpop.f32.mrb[18].mxu1 }
 0x13c   :  { %v408_v42 = vpop.f32.mrb[20].mxu0  ;;  %v15934_v22 = vpop.f32.mrb[19].mxu1  ;;  %13162 = vmatmul.mubr.msk.f32.gmra.mrb[124].mxu1 %vm130_vm3, %v15923_v48  ;;  %v16042_v48 = vld [vmem:[%s19783_s0 + $0x158] sm:$0xff] }
 0x13d   :  { %656 = vst [vmem:[#allocation2 + $0xa0] sm:$0xff] %v408_v42  ;;  %v410_v51 = vpop.f32.mrb[21].mxu0  ;;  %13047 = vmatmul.mubr.msk.f32.gmra.mrb[126].mxu0 %vm130_vm3, %v14807_v53  ;;  %v15941_v53 = vld [vmem:[%s19783_s0 + $0x128] sm:$0xff]  ;;  %2981 = vmatprep.mubr.f32.mxu1 %v19814_v0  ;;  %19833 = vst [vmem:[#allocation26_spill] sm:$0xff] %v16042_v48 }
 0x13e   :  { %657 = vst.msk [vmem:[#allocation2 + $0xa8] sm:$0xff] %vm636_vm4, %v410_v51  ;;  %1947 = vmatprep.mubr.f32.mxu0 %v19814_v0  ;;  %19827 = vst [vmem:[#allocation20_spill] sm:$0xff] %v15941_v53 }
 0x13f   :  { %v15948_v40 = vpop.f32.mrb[20].mxu1 }
 0x140   :  { %v414_v42 = vpop.f32.mrb[22].mxu0  ;;  %v15950_v46 = vpop.f32.mrb[21].mxu1  ;;  %13163 = vmatmul.mubr.msk.f32.gmra.mrb[126].mxu1 %vm130_vm3, %v15941_v53 }
 0x141   :  { %658 = vst [vmem:[#allocation2 + $0xb0] sm:$0xff] %v414_v42  ;;  %v416_v39 = vpop.f32.mrb[23].mxu0  ;;  %13082 = vmatmul.mubr.msk.f32.vlgmr.msra.gmra.mrb[128].mxu0 %vm130_vm3, %v15671_v57  ;;  %v15959_v57 = vld [vmem:[%s19783_s0 + $0x130] sm:$0xff]  ;;  %2987 = vmatprep.mubr.f32.mxu1 %v19814_v0  ;;  %v15977_v42 = vld [vmem:[%s19783_s0 + $0x138] sm:$0xff] }
 0x142   :  { %659 = vst.msk [vmem:[#allocation2 + $0xb8] sm:$0xff] %vm636_vm4, %v416_v39  ;;  %13978 = vmatpush1.bf16.msra.mxu0 %v13977_v3  ;;  %1953 = vmatprep.mubr.f32.mxu0 %v19814_v0  ;;  %19828 = vst [vmem:[#allocation21_spill] sm:$0xff] %v15959_v57 }
 0x143   :  { %13981 = vmatprep.subr.msk.bf16.mxu0 %vm15086_vm2, %v13979_v28  ;;  %v15966_v5 = vpop.f32.mrb[22].mxu1  ;;  %19829 = vst [vmem:[#allocation22_spill] sm:$0xff] %v15977_v42 }
 0x144   :  { %v420_v51 = vpop.f32.mrb[24].mxu0  ;;  %v15970_v24 = vpop.f32.mrb[23].mxu1  ;;  %13164 = vmatmul.mubr.msk.f32.gmra.mrb[128].mxu1 %vm130_vm3, %v15959_v57 }
 0x145   :  { %660 = vst [vmem:[#allocation2 + $0xc0] sm:$0xff] %v420_v51  ;;  %v422_v3 = vpop.f32.mrb[25].mxu0  ;;  %13083 = vmatmul.mubr.msk.f32.gmra.mrb[130].mxu0 %vm130_vm3, %v15687_v59  ;;  %2993 = vmatprep.mubr.f32.mxu1 %v19814_v0 }
 0x146   :  { %661 = vst.msk [vmem:[#allocation2 + $0xc8] sm:$0xff] %vm636_vm4, %v422_v3  ;;  %1959 = vmatprep.mubr.f32.mxu0 %v19814_v0  ;;  %13984 = vmatpush1.bf16.msk.msra.mxu0 %vm15086_vm2, %v13982_v45  ;;  %v15993_v3 = vld [vmem:[%s19783_s0 + $0x140] sm:$0xff] }
 0x147   :  { %v15984_v39 = vpop.f32.mrb[24].mxu1  ;;  %19830 = vst [vmem:[#allocation23_spill] sm:$0xff] %v15993_v3 }
 0x148   :  { %v426_v28 = vpop.f32.mrb[26].mxu0  ;;  %v15986_v45 = vpop.f32.mrb[25].mxu1  ;;  %13165 = vmatmul.mubr.msk.f32.gmra.mrb[130].mxu1 %vm130_vm3, %v15977_v42 }
 0x149   :  { %662 = vst [vmem:[#allocation2 + $0xd0] sm:$0xff] %v426_v28  ;;  %v428_v59 = vpop.f32.mrb[27].mxu0  ;;  %13084 = vmatmul.mubr.msk.f32.gmra.mrb[132].mxu0 %vm130_vm3, %v15703_v61  ;;  %2999 = vmatprep.mubr.f32.mxu1 %v19814_v0 }
 0x14a   :  { %663 = vst.msk [vmem:[#allocation2 + $0xd8] sm:$0xff] %vm636_vm4, %v428_v59  ;;  %1965 = vmatprep.mubr.f32.mxu0 %v19814_v0 }
 0x14b   :  { %v16000_v28 = vpop.f32.mrb[26].mxu1 }
 0x14c   :  { %v432_v51 = vpop.f32.mrb[28].mxu0  ;;  %v16002_v59 = vpop.f32.mrb[27].mxu1  ;;  %13166 = vmatmul.mubr.msk.f32.gmra.mrb[132].mxu1 %vm130_vm3, %v15993_v3 }
 0x14d   :  { %664 = vst [vmem:[#allocation2 + $0xe0] sm:$0xff] %v432_v51  ;;  %v434_v61 = vpop.f32.mrb[29].mxu0  ;;  %13085 = vmatmul.mubr.msk.f32.gmra.mrb[134].mxu0 %vm130_vm3, %v15719_v2  ;;  %v16009_v51 = vld [vmem:[%s19783_s0 + $0x148] sm:$0xff]  ;;  %3005 = vmatprep.mubr.f32.mxu1 %v19814_v0 }
 0x14e   :  { %665 = vst.msk [vmem:[#allocation2 + $0xe8] sm:$0xff] %vm636_vm4, %v434_v61  ;;  %1971 = vmatprep.mubr.f32.mxu0 %v19814_v0  ;;  %19831 = vst [vmem:[#allocation24_spill] sm:$0xff] %v16009_v51 }
 0x14f   :  { %v16016_v61 = vpop.f32.mrb[28].mxu1 }
 0x150   :  { %v438_v10 = vpop.f32.mrb[30].mxu0  ;;  %v16018_v3 = vpop.f32.mrb[29].mxu1  ;;  %13167 = vmatmul.mubr.msk.f32.gmra.mrb[134].mxu1 %vm130_vm3, %v16009_v51 }
 0x151   :  { %666 = vst [vmem:[#allocation2 + $0xf0] sm:$0xff] %v438_v10  ;;  %v440_v2 = vpop.f32.mrb[31].mxu0  ;;  %13086 = vmatmul.mubr.msk.f32.gmra.mrb[136].mxu0 %vm130_vm3, %v15736_v6  ;;  %v16025_v10 = vld [vmem:[%s19783_s0 + $0x150] sm:$0xff]  ;;  %3011 = vmatprep.mubr.f32.mxu1 %v19814_v0 }
 0x152   :  { %667 = vst.msk [vmem:[#allocation2 + $0xf8] sm:$0xff] %vm636_vm4, %v440_v2  ;;  %1977 = vmatprep.mubr.f32.mxu0 %v19814_v0  ;;  %19832 = vst [vmem:[#allocation25_spill] sm:$0xff] %v16025_v10 }
 0x153   :  { %v16033_v57 = vpop.f32.mrb[30].mxu1 }
 0x154   :  { %v444_v42 = vpop.f32.mrb[32].mxu0  ;;  %v16035_v51 = vpop.f32.mrb[31].mxu1  ;;  %13168 = vmatmul.mubr.msk.f32.gmra.mrb[136].mxu1 %vm130_vm3, %v16025_v10  ;;  %v16059_v10 = vld [vmem:[%s19783_s0 + $0x160] sm:$0xff] }
 0x155   :  { %v446_v6 = vpop.f32.mrb[33].mxu0  ;;  %13087 = vmatmul.mubr.msk.f32.gmra.mrb[138].mxu0 %vm130_vm3, %v15757_v13  ;;  %v1420_v2 = vadd.f32 %v15742_v7, %v444_v42  ;;  %3017 = vmatprep.mubr.f32.mxu1 %v19814_v0 }
 0x156   :  { %669 = vst.msk [vmem:[#allocation2 + $0x108] sm:$0xff] %vm636_vm4, %v446_v6  ;;  %1983 = vmatprep.mubr.f32.mxu0 %v19814_v0 }
 0x157   :  { %1516 = vst [vmem:[#allocation2 + $0x100] sm:$0xff] %v1420_v2  ;;  %v16050_v42 = vpop.f32.mrb[32].mxu1 }
 0x158   :  { %v450_v53 = vpop.f32.mrb[34].mxu0  ;;  %v16052_v6 = vpop.f32.mrb[33].mxu1  ;;  %13169 = vmatmul.mubr.msk.f32.gmra.mrb[138].mxu1 %vm130_vm3, %v16042_v48 }
 0x159   :  { %v452_v7 = vpop.f32.mrb[35].mxu0  ;;  %13088 = vmatmul.mubr.msk.f32.gmra.mrb[140].mxu0 %vm130_vm3, %v15778_v19  ;;  %v1422_v13 = vadd.f32 %v15763_v14, %v450_v53  ;;  %3023 = vmatprep.mubr.f32.mxu1 %v19814_v0 }
 0x15a   :  { %671 = vst.msk [vmem:[#allocation2 + $0x118] sm:$0xff] %vm636_vm4, %v452_v7  ;;  %1989 = vmatprep.mubr.f32.mxu0 %v19814_v0 }
 0x15b   :  { %1518 = vst [vmem:[#allocation2 + $0x110] sm:$0xff] %v1422_v13  ;;  %v16068_v13 = vpop.f32.mrb[34].mxu1 }
 0x15c   :  { %v456_v2 = vpop.f32.mrb[36].mxu0  ;;  %v16070_v48 = vpop.f32.mrb[35].mxu1  ;;  %13170 = vmatmul.mubr.msk.f32.gmra.mrb[140].mxu1 %vm130_vm3, %v16059_v10 }
 0x15d   :  { %v458_v14 = vpop.f32.mrb[37].mxu0  ;;  %v765_v19 = vld [vmem:[#allocation2 + $0x108] sm:$0xff]  ;;  %13089 = vmatmul.mubr.msk.f32.gmra.mrb[142].mxu0 %vm130_vm3, %v15799_v25  ;;  %v1424_v53 = vadd.f32 %v15784_v20, %v456_v2  ;;  %3029 = vmatprep.mubr.f32.mxu1 %v19814_v0 }
 0x15e   :  { %673 = vst.msk [vmem:[#allocation2 + $0x128] sm:$0xff] %vm636_vm4, %v458_v14  ;;  %v1421_v7 = vadd.f32 %v15744_v8, %v765_v19  ;;  %1995 = vmatprep.mubr.f32.mxu0 %v19814_v0  ;;  %v16078_v20 = vld [vmem:[%s19783_s0 + $0x168] sm:$0xff] }
 0x15f   :  { %1520 = vst [vmem:[#allocation2 + $0x120] sm:$0xff] %v1424_v53  ;;  %v16087_v19 = vpop.f32.mrb[36].mxu1 }
 0x160   :  { %1517 = vst.msk [vmem:[#allocation2 + $0x108] sm:$0xff] %vm636_vm4, %v1421_v7  ;;  %v462_v52 = vpop.f32.mrb[38].mxu0  ;;  %v16089_v53 = vpop.f32.mrb[37].mxu1  ;;  %13171 = vmatmul.mubr.msk.f32.gmra.mrb[142].mxu1 %vm130_vm3, %v16078_v20 }
 0x161   :  { %v464_v8 = vpop.f32.mrb[39].mxu0  ;;  %v767_v25 = vld [vmem:[#allocation2 + $0x118] sm:$0xff]  ;;  %13090 = vmatmul.mubr.msk.f32.gmra.mrb[144].mxu0 %vm130_vm3, %v15820_v31  ;;  %v1426_v2 = vadd.f32 %v15805_v26, %v462_v52  ;;  %v16097_v26 = vld [vmem:[%s19783_s0 + $0x170] sm:$0xff]  ;;  %3035 = vmatprep.mubr.f32.mxu1 %v19814_v0 }
 0x162   :  { %675 = vst.msk [vmem:[#allocation2 + $0x138] sm:$0xff] %vm636_vm4, %v464_v8  ;;  %v1423_v14 = vadd.f32 %v15765_v15, %v767_v25  ;;  %2001 = vmatprep.mubr.f32.mxu0 %v19814_v0 }
 0x163   :  { %1522 = vst [vmem:[#allocation2 + $0x130] sm:$0xff] %v1426_v2  ;;  %v16106_v25 = vpop.f32.mrb[38].mxu1 }
 0x164   :  { %1519 = vst.msk [vmem:[#allocation2 + $0x118] sm:$0xff] %vm636_vm4, %v1423_v14  ;;  %v468_v7 = vpop.f32.mrb[40].mxu0  ;;  %v16108_v2 = vpop.f32.mrb[39].mxu1  ;;  %13172 = vmatmul.mubr.msk.f32.gmra.mrb[144].mxu1 %vm130_vm3, %v16097_v26 }
 0x165   :  { %v470_v15 = vpop.f32.mrb[41].mxu0  ;;  %v769_v31 = vld [vmem:[#allocation2 + $0x128] sm:$0xff]  ;;  %13091 = vmatmul.mubr.msk.f32.gmra.mrb[146].mxu0 %vm130_vm3, %v15841_v44  ;;  %v1428_v52 = vadd.f32 %v15826_v32, %v468_v7  ;;  %v16116_v32 = vld [vmem:[%s19783_s0 + $0x178] sm:$0xff]  ;;  %3041 = vmatprep.mubr.f32.mxu1 %v19814_v0 }
 0x166   :  { %677 = vst.msk [vmem:[#allocation2 + $0x148] sm:$0xff] %vm636_vm4, %v470_v15  ;;  %v1425_v8 = vadd.f32 %v15786_v21, %v769_v31  ;;  %2007 = vmatprep.mubr.f32.mxu0 %v19814_v0 }
 0x167   :  { %1524 = vst [vmem:[#allocation2 + $0x140] sm:$0xff] %v1428_v52  ;;  %v16125_v31 = vpop.f32.mrb[40].mxu1 }
 0x168   :  { %1521 = vst.msk [vmem:[#allocation2 + $0x128] sm:$0xff] %vm636_vm4, %v1425_v8  ;;  %v474_v14 = vpop.f32.mrb[42].mxu0  ;;  %v16127_v52 = vpop.f32.mrb[41].mxu1  ;;  %13173 = vmatmul.mubr.msk.f32.gmra.mrb[146].mxu1 %vm130_vm3, %v16116_v32 }
 0x169   :  { %v476_v21 = vpop.f32.mrb[43].mxu0  ;;  %v771_v44 = vld [vmem:[#allocation2 + $0x138] sm:$0xff]  ;;  %13092 = vmatmul.mubr.msk.f32.gmra.mrb[148].mxu0 %vm130_vm3, %v15866_v55  ;;  %v1430_v7 = vadd.f32 %v15847_v47, %v474_v14  ;;  %v16135_v47 = vld [vmem:[%s19783_s0 + $0x180] sm:$0xff]  ;;  %3047 = vmatprep.mubr.f32.mxu1 %v19814_v0 }
 0x16a   :  { %679 = vst.msk [vmem:[#allocation2 + $0x158] sm:$0xff] %vm636_vm4, %v476_v21  ;;  %v1427_v15 = vadd.f32 %v15807_v27, %v771_v44  ;;  %2013 = vmatprep.mubr.f32.mxu0 %v19814_v0 }
 0x16b   :  { %1526 = vst [vmem:[#allocation2 + $0x150] sm:$0xff] %v1430_v7  ;;  %v16144_v44 = vpop.f32.mrb[42].mxu1 }
 0x16c   :  { %1523 = vst.msk [vmem:[#allocation2 + $0x138] sm:$0xff] %vm636_vm4, %v1427_v15  ;;  %v480_v8 = vpop.f32.mrb[44].mxu0  ;;  %v16146_v7 = vpop.f32.mrb[43].mxu1  ;;  %13174 = vmatmul.mubr.msk.f32.gmra.mrb[148].mxu1 %vm130_vm3, %v16135_v47 }
 0x16d   :  { %v482_v27 = vpop.f32.mrb[45].mxu0  ;;  %v773_v55 = vld [vmem:[#allocation2 + $0x148] sm:$0xff]  ;;  %13093 = vmatmul.mubr.msk.f32.gmra.mrb[150].mxu0 %vm130_vm3, %v15887_v12  ;;  %v1432_v14 = vadd.f32 %v15872_v62, %v480_v8  ;;  %3053 = vmatprep.mubr.f32.mxu1 %v19814_v0 }
 0x16e   :  { %681 = vst.msk [vmem:[#allocation2 + $0x168] sm:$0xff] %vm636_vm4, %v482_v27  ;;  %v1429_v21 = vadd.f32 %v15828_v33, %v773_v55  ;;  %2019 = vmatprep.mubr.f32.mxu0 %v19814_v0  ;;  %v16154_v62 = vld [vmem:[%s19783_s0 + $0x188] sm:$0xff] }
 0x16f   :  { %1528 = vst [vmem:[#allocation2 + $0x160] sm:$0xff] %v1432_v14  ;;  %v16163_v55 = vpop.f32.mrb[44].mxu1 }
 0x170   :  { %1525 = vst.msk [vmem:[#allocation2 + $0x148] sm:$0xff] %vm636_vm4, %v1429_v21  ;;  %v486_v15 = vpop.f32.mrb[46].mxu0  ;;  %v16165_v14 = vpop.f32.mrb[45].mxu1  ;;  %13175 = vmatmul.mubr.msk.f32.gmra.mrb[150].mxu1 %vm130_vm3, %v16154_v62 }
 0x171   :  { %v488_v33 = vpop.f32.mrb[47].mxu0  ;;  %v775_v12 = vld [vmem:[#allocation2 + $0x158] sm:$0xff]  ;;  %13094 = vmatmul.mubr.msk.f32.gmra.mrb[152].mxu0 %vm130_vm3, %v15908_v30  ;;  %v1434_v8 = vadd.f32 %v15893_v16, %v486_v15  ;;  %v16173_v16 = vld [vmem:[%s19783_s0 + $0x190] sm:$0xff]  ;;  %3059 = vmatprep.mubr.f32.mxu1 %v19814_v0 }
 0x172   :  { %683 = vst.msk [vmem:[#allocation2 + $0x178] sm:$0xff] %vm636_vm4, %v488_v33  ;;  %v1431_v27 = vadd.f32 %v15849_v49, %v775_v12  ;;  %2025 = vmatprep.mubr.f32.mxu0 %v19814_v0 }
 0x173   :  { %1530 = vst [vmem:[#allocation2 + $0x170] sm:$0xff] %v1434_v8  ;;  %v16182_v12 = vpop.f32.mrb[46].mxu1 }
 0x174   :  { %1527 = vst.msk [vmem:[#allocation2 + $0x158] sm:$0xff] %vm636_vm4, %v1431_v27  ;;  %v492_v21 = vpop.f32.mrb[48].mxu0  ;;  %v16184_v8 = vpop.f32.mrb[47].mxu1  ;;  %13176 = vmatmul.mubr.msk.f32.gmra.mrb[152].mxu1 %vm130_vm3, %v16173_v16 }
 0x175   :  { %v494_v49 = vpop.f32.mrb[49].mxu0  ;;  %v777_v30 = vld [vmem:[#allocation2 + $0x168] sm:$0xff]  ;;  %13095 = vmatmul.mubr.msk.f32.gmra.mrb[154].mxu0 %vm130_vm3, %v15591_v36  ;;  %v1436_v15 = vadd.f32 %v15914_v35, %v492_v21  ;;  %v16192_v36 = vld [vmem:[%s19783_s0 + $0x198] sm:$0xff]  ;;  %3065 = vmatprep.mubr.f32.mxu1 %v19814_v0 }
 0x176   :  { %685 = vst.msk [vmem:[#allocation2 + $0x188] sm:$0xff] %vm636_vm4, %v494_v49  ;;  %v1433_v33 = vadd.f32 %v15874_v1, %v777_v30  ;;  %2031 = vmatprep.mubr.f32.mxu0 %v19814_v0  ;;  %19834 = vst [vmem:[#allocation27_spill] sm:$0xff] %v16192_v36 }
 0x177   :  { %1532 = vst [vmem:[#allocation2 + $0x180] sm:$0xff] %v1436_v15  ;;  %v16201_v30 = vpop.f32.mrb[48].mxu1 }
 0x178   :  { %1529 = vst.msk [vmem:[#allocation2 + $0x168] sm:$0xff] %vm636_vm4, %v1433_v33  ;;  %v498_v27 = vpop.f32.mrb[50].mxu0  ;;  %v16203_v15 = vpop.f32.mrb[49].mxu1  ;;  %13177 = vmatmul.mubr.msk.f32.gmra.mrb[154].mxu1 %vm130_vm3, %v16192_v36 }
 0x179   :  { %v500_v1 = vpop.f32.mrb[51].mxu0  ;;  %v779_v35 = vld [vmem:[#allocation2 + $0x178] sm:$0xff]  ;;  %13096 = vmatmul.mubr.msk.f32.gmra.mrb[156].mxu0 %vm130_vm3, %v15602_v37  ;;  %v1438_v21 = vadd.f32 %v15932_v9, %v498_v27  ;;  %3071 = vmatprep.mubr.f32.mxu1 %v19814_v0  ;;  %v2570_v37 = vld [vmem:[%s19783_s0 + $0x1a0] sm:$0xff] }
 0x17a   :  { %687 = vst.msk [vmem:[#allocation2 + $0x198] sm:$0xff] %vm636_vm4, %v500_v1  ;;  %v1435_v49 = vadd.f32 %v15895_v18, %v779_v35  ;;  %2037 = vmatprep.mubr.f32.mxu0 %v19814_v0 }
 0x17b   :  { %1534 = vst [vmem:[#allocation2 + $0x190] sm:$0xff] %v1438_v21  ;;  %v16218_v35 = vpop.f32.mrb[50].mxu1 }
 0x17c   :  { %1531 = vst.msk [vmem:[#allocation2 + $0x178] sm:$0xff] %vm636_vm4, %v1435_v49  ;;  %v504_v33 = vpop.f32.mrb[52].mxu0  ;;  %v16220_v21 = vpop.f32.mrb[51].mxu1  ;;  %13178 = vmatmul.mubr.msk.f32.gmra.mrb[156].mxu1 %vm130_vm3, %v2570_v37 }
 0x17d   :  { %v506_v18 = vpop.f32.mrb[53].mxu0  ;;  %v781_v9 = vld [vmem:[#allocation2 + $0x188] sm:$0xff]  ;;  %13097 = vmatmul.mubr.msk.f32.gmra.mrb[158].mxu0 %vm130_vm3, %v15613_v38  ;;  %v1440_v27 = vadd.f32 %v15948_v40, %v504_v33  ;;  %3077 = vmatprep.mubr.f32.mxu1 %v19814_v0 }
 0x17e   :  { %689 = vst.msk [vmem:[#allocation2 + $0x1a8] sm:$0xff] %vm636_vm4, %v506_v18  ;;  %v1437_v1 = vadd.f32 %v15916_v41, %v781_v9  ;;  %2043 = vmatprep.mubr.f32.mxu0 %v19814_v0  ;;  %v2571_v38 = vld [vmem:[%s19783_s0 + $0x1a8] sm:$0xff] }
 0x17f   :  { %1536 = vst [vmem:[#allocation2 + $0x1a0] sm:$0xff] %v1440_v27  ;;  %v16234_v18 = vpop.f32.mrb[52].mxu1 }
 0x180   :  { %1533 = vst.msk [vmem:[#allocation2 + $0x188] sm:$0xff] %vm636_vm4, %v1437_v1  ;;  %v510_v49 = vpop.f32.mrb[54].mxu0  ;;  %v16236_v9 = vpop.f32.mrb[53].mxu1  ;;  %13179 = vmatmul.mubr.msk.f32.gmra.mrb[158].mxu1 %vm130_vm3, %v2571_v38  ;;  %v4926_v1 = vld [vmem:[#allocation8 + $0x188] sm:$0xff] }
 0x181   :  { %v512_v40 = vpop.f32.mrb[55].mxu0  ;;  %v783_v41 = vld [vmem:[#allocation2 + $0x198] sm:$0xff]  ;;  %13098 = vmatmul.mubr.msk.f32.gmra.mrb[160].mxu0 %vm130_vm3, %v15624_v43  ;;  %v1442_v33 = vadd.f32 %v15966_v5, %v510_v49  ;;  %4395 = vmatprep.mubr.f32.mxu1 %v19814_v0 }
 0x182   :  { %691 = vst.msk [vmem:[#allocation2 + $0x1b8] sm:$0xff] %vm636_vm4, %v512_v40  ;;  %v1439_v37 = vadd.f32 %v15934_v22, %v783_v41  ;;  %2049 = vmatprep.mubr.f32.mxu0 %v19814_v0  ;;  %v4928_v43 = vld [vmem:[#allocation8 + $0x198] sm:$0xff]  ;;  %v4124_v22 = vld [vmem:[%s19783_s0] sm:$0xff] }
 0x183   :  { %1538 = vst [vmem:[#allocation2 + $0x1b0] sm:$0xff] %v1442_v33  ;;  %v13995_v41 = vpack.c.bf16 %v4928_v43, %v4926_v1  ;;  %v16250_v33 = vpop.f32.mrb[54].mxu1 }
 0x184   :  { %1535 = vst.msk [vmem:[#allocation2 + $0x198] sm:$0xff] %vm636_vm4, %v1439_v37  ;;  %v516_v27 = vpop.f32.mrb[56].mxu0  ;;  %v16252_v37 = vpop.f32.mrb[55].mxu1  ;;  %13232 = vmatmul.mubr.msk.f32.vlgmr.msra.gmra.mrb[160].mxu1 %vm130_vm3, %v4124_v22 }
 0x185   :  { %v518_v5 = vpop.f32.mrb[57].mxu0  ;;  %v785_v49 = vld [vmem:[#allocation2 + $0x1a8] sm:$0xff]  ;;  %13099 = vmatmul.mubr.msk.f32.gmra.mrb[162].mxu0 %vm130_vm3, %v15635_v50  ;;  %v1444_v40 = vadd.f32 %v15984_v39, %v516_v27  ;;  %13996 = vmatprep.subr.bf16.mxu0 %v13995_v41 }
 0x186   :  { %693 = vst.msk [vmem:[#allocation2 + $0x1c8] sm:$0xff] %vm636_vm4, %v518_v5  ;;  %v1441_v38 = vadd.f32 %v15950_v46, %v785_v49  ;;  %2055 = vmatprep.mubr.f32.mxu0 %v19814_v0  ;;  %4401 = vmatprep.mubr.f32.mxu1 %v19814_v0  ;;  %v4125_v39 = vld [vmem:[%s19783_s0 + $0x8] sm:$0xff] }
 0x187   :  { %1540 = vst [vmem:[#allocation2 + $0x1c0] sm:$0xff] %v1444_v40  ;;  %v16266_v22 = vpop.f32.mrb[56].mxu1  ;;  %v5774_v40 = vld [vmem:[#allocation8 + $0x1c8] sm:$0xff] }
 0x188   :  { %1537 = vst.msk [vmem:[#allocation2 + $0x1a8] sm:$0xff] %vm636_vm4, %v1441_v38  ;;  %v522_v50 = vpop.f32.mrb[58].mxu0  ;;  %v16268_v5 = vpop.f32.mrb[57].mxu1  ;;  %13233 = vmatmul.mubr.msk.f32.gmra.mrb[162].mxu1 %vm130_vm3, %v4125_v39  ;;  %v5773_v39 = vld [vmem:[#allocation8 + $0x1c0] sm:$0xff] }
 0x189   :  { %v524_v46 = vpop.f32.mrb[59].mxu0  ;;  %v787_v27 = vld [vmem:[#allocation2 + $0x1b8] sm:$0xff]  ;;  %13100 = vmatmul.mubr.msk.f32.gmra.mrb[164].mxu0 %vm130_vm3, %v15650_v54  ;;  %v1446_v1 = vadd.f32 %v16000_v28, %v522_v50  ;;  %4407 = vmatprep.mubr.f32.mxu1 %v19814_v0 }
 0x18a   :  { %695 = vst.msk [vmem:[#allocation2 + $0x1d8] sm:$0xff] %vm636_vm4, %v524_v46  ;;  %v1443_v43 = vadd.f32 %v15970_v24, %v787_v27  ;;  %2061 = vmatprep.mubr.f32.mxu0 %v19814_v0  ;;  %v5776_v54 = vld [vmem:[#allocation8 + $0x1d8] sm:$0xff]  ;;  %v4126_v24 = vld [vmem:[%s19783_s0 + $0x10] sm:$0xff] }
 0x18b   :  { %1542 = vst [vmem:[#allocation2 + $0x1d0] sm:$0xff] %v1446_v1  ;;  %v14005_v50 = vpack.c.bf16 %v5776_v54, %v5774_v40  ;;  %v5775_v46 = vld [vmem:[#allocation8 + $0x1d0] sm:$0xff]  ;;  %v16282_v1 = vpop.f32.mrb[58].mxu1 }
 0x18c   :  { %1539 = vst.msk [vmem:[#allocation2 + $0x1b8] sm:$0xff] %vm636_vm4, %v1443_v43  ;;  %v528_v49 = vpop.f32.mrb[60].mxu0  ;;  %v14007_v43 = vpack.c.bf16 %v5775_v46, %v5773_v39  ;;  %v16284_v36 = vpop.f32.mrb[59].mxu1  ;;  %13234 = vmatmul.mubr.msk.f32.gmra.mrb[164].mxu1 %vm130_vm3, %v4126_v24 }
 0x18d   :  { %v530_v28 = vpop.f32.mrb[61].mxu0  ;;  %v789_v41 = vld [vmem:[#allocation2 + $0x1c8] sm:$0xff]  ;;  %13101 = vmatmul.mubr.msk.f32.gmra.mrb[166].mxu0 %vm130_vm3, %v15665_v56  ;;  %v1448_v38 = vadd.f32 %v16016_v61, %v528_v49  ;;  %14006 = vmatprep.subr.bf16.mxu1 %v14005_v50 }
 0x18e   :  { %697 = vst.msk [vmem:[#allocation2 + $0x1e8] sm:$0xff] %vm636_vm4, %v530_v28  ;;  %v1445_v27 = vadd.f32 %v15986_v45, %v789_v41  ;;  %2067 = vmatprep.mubr.f32.mxu0 %v19814_v0  ;;  %14008 = vmatpush1.bf16.msra.mxu1 %v14007_v43  ;;  %v4127_v45 = vld [vmem:[%s19783_s0 + $0x18] sm:$0xff] }
 0x18f   :  { %1544 = vst [vmem:[#allocation2 + $0x1e0] sm:$0xff] %v1448_v38  ;;  %4413 = vmatprep.mubr.f32.mxu1 %v19814_v0  ;;  %v16298_v24 = vpop.f32.mrb[60].mxu1 }
 0x190   :  { %1541 = vst.msk [vmem:[#allocation2 + $0x1c8] sm:$0xff] %vm636_vm4, %v1445_v27  ;;  %v534_v56 = vpop.f32.mrb[62].mxu0  ;;  %v16300_v28 = vpop.f32.mrb[61].mxu1  ;;  %13235 = vmatmul.mubr.msk.f32.gmra.mrb[166].mxu1 %vm130_vm3, %v4127_v45 }
 0x191   :  { %v536_v61 = vpop.f32.mrb[63].mxu0  ;;  %v791_v49 = vld [vmem:[#allocation2 + $0x1d8] sm:$0xff]  ;;  %13102 = vmatmul.mubr.msk.f32.gmra.mrb[168].mxu0 %vm130_vm3, %v15681_v58  ;;  %v1450_v40 = vadd.f32 %v16033_v57, %v534_v56  ;;  %4419 = vmatprep.mubr.f32.mxu1 %v19814_v0  ;;  %v4128_v58 = vld [vmem:[%s19783_s0 + $0x20] sm:$0xff] }
 0x192   :  { %699 = vst.msk [vmem:[#allocation2 + $0x1f8] sm:$0xff] %vm636_vm4, %v536_v61  ;;  %v1447_v54 = vadd.f32 %v16002_v59, %v791_v49  ;;  %2073 = vmatprep.mubr.f32.mxu0 %v19814_v0 }
 0x193   :  { %1546 = vst [vmem:[#allocation2 + $0x1f0] sm:$0xff] %v1450_v40  ;;  %v16314_v39 = vpop.f32.mrb[62].mxu1 }
 0x194   :  { %1543 = vst.msk [vmem:[#allocation2 + $0x1d8] sm:$0xff] %vm636_vm4, %v1447_v54  ;;  %v540_v41 = vpop.f32.mrb[64].mxu0  ;;  %v16316_v46 = vpop.f32.mrb[63].mxu1  ;;  %13236 = vmatmul.mubr.msk.f32.gmra.mrb[168].mxu1 %vm130_vm3, %v4128_v58 }
 0x195   :  { %v542_v57 = vpop.f32.mrb[65].mxu0  ;;  %v793_v59 = vld [vmem:[#allocation2 + $0x1e8] sm:$0xff]  ;;  %13103 = vmatmul.mubr.msk.f32.gmra.mrb[170].mxu0 %vm130_vm3, %v15697_v60  ;;  %v1452_v38 = vadd.f32 %v16050_v42, %v540_v41  ;;  %4425 = vmatprep.mubr.f32.mxu1 %v19814_v0 }
 0x196   :  { %701 = vst.msk [vmem:[#allocation2 + $0x208] sm:$0xff] %vm636_vm4, %v542_v57  ;;  %v1449_v50 = vadd.f32 %v16018_v3, %v793_v59  ;;  %2079 = vmatprep.mubr.f32.mxu0 %v19814_v0  ;;  %v4129_v60 = vld [vmem:[%s19783_s0 + $0x28] sm:$0xff] }
 0x197   :  { %1548 = vst [vmem:[#allocation2 + $0x200] sm:$0xff] %v1452_v38  ;;  %v16330_v45 = vpop.f32.mrb[64].mxu1 }
 0x198   :  { %1545 = vst.msk [vmem:[#allocation2 + $0x1e8] sm:$0xff] %vm636_vm4, %v1449_v50  ;;  %v546_v27 = vpop.f32.mrb[66].mxu0  ;;  %v16332_v61 = vpop.f32.mrb[65].mxu1  ;;  %13237 = vmatmul.mubr.msk.f32.gmra.mrb[170].mxu1 %vm130_vm3, %v4129_v60 }
 0x199   :  { %v548_v42 = vpop.f32.mrb[67].mxu0  ;;  %v795_v3 = vld [vmem:[#allocation2 + $0x1f8] sm:$0xff]  ;;  %13104 = vmatmul.mubr.msk.f32.gmra.mrb[172].mxu0 %vm130_vm3, %v15713_v63  ;;  %v1454_v43 = vadd.f32 %v16068_v13, %v546_v27  ;;  %4431 = vmatprep.mubr.f32.mxu1 %v19814_v0  ;;  %v4130_v63 = vld [vmem:[%s19783_s0 + $0x30] sm:$0xff] }
 0x19a   :  { %703 = vst.msk [vmem:[#allocation2 + $0x218] sm:$0xff] %vm636_vm4, %v548_v42  ;;  %v1451_v56 = vadd.f32 %v16035_v51, %v795_v3  ;;  %2085 = vmatprep.mubr.f32.mxu0 %v19814_v0  ;;  %v16378_v3 = vld [vmem:[%s19783_s0 + $0x40] sm:$0xff] }
 0x19b   :  { %1550 = vst [vmem:[#allocation2 + $0x210] sm:$0xff] %v1454_v43  ;;  %v16346_v41 = vpop.f32.mrb[66].mxu1 }
 0x19c   :  { %1547 = vst.msk [vmem:[#allocation2 + $0x1f8] sm:$0xff] %vm636_vm4, %v1451_v56  ;;  %v552_v49 = vpop.f32.mrb[68].mxu0  ;;  %v16348_v58 = vpop.f32.mrb[67].mxu1  ;;  %13238 = vmatmul.mubr.msk.f32.gmra.mrb[172].mxu1 %vm130_vm3, %v4130_v63 }
 0x19d   :  { %v554_v13 = vpop.f32.mrb[69].mxu0  ;;  %v797_v51 = vld [vmem:[#allocation2 + $0x208] sm:$0xff]  ;;  %13105 = vmatmul.mubr.msk.f32.gmra.mrb[174].mxu0 %vm130_vm3, %v15730_v4  ;;  %v1456_v40 = vadd.f32 %v16087_v19, %v552_v49  ;;  %4437 = vmatprep.mubr.f32.mxu1 %v19814_v0  ;;  %v4131_v4 = vld [vmem:[%s19783_s0 + $0x38] sm:$0xff] }
 0x19e   :  { %705 = vst.msk [vmem:[#allocation2 + $0x228] sm:$0xff] %vm636_vm4, %v554_v13  ;;  %v1453_v54 = vadd.f32 %v16052_v6, %v797_v51  ;;  %2091 = vmatprep.mubr.f32.mxu0 %v19814_v0  ;;  %v16397_v13 = vld [vmem:[%s19783_s0 + $0x48] sm:$0xff] }
 0x19f   :  { %1552 = vst [vmem:[#allocation2 + $0x220] sm:$0xff] %v1456_v40  ;;  %v16362_v50 = vpop.f32.mrb[68].mxu1 }
 0x1a0   :  { %1549 = vst.msk [vmem:[#allocation2 + $0x208] sm:$0xff] %vm636_vm4, %v1453_v54  ;;  %v558_v57 = vpop.f32.mrb[70].mxu0  ;;  %v16364_v27 = vpop.f32.mrb[69].mxu1  ;;  %13239 = vmatmul.mubr.msk.f32.gmra.mrb[174].mxu1 %vm130_vm3, %v4131_v4  ;;  %v16416_v4 = vld [vmem:[%s19783_s0 + $0x50] sm:$0xff] }
 0x1a1   :  { %v560_v19 = vpop.f32.mrb[71].mxu0  ;;  %v799_v6 = vld [vmem:[#allocation2 + $0x218] sm:$0xff]  ;;  %13106 = vmatmul.mubr.msk.f32.gmra.mrb[176].mxu0 %vm130_vm3, %v15751_v11  ;;  %v1458_v59 = vadd.f32 %v16106_v25, %v558_v57  ;;  %4443 = vmatprep.mubr.f32.mxu1 %v19814_v0 }
 0x1a2   :  { %707 = vst.msk [vmem:[#allocation2 + $0x238] sm:$0xff] %vm636_vm4, %v560_v19  ;;  %v1455_v38 = vadd.f32 %v16070_v48, %v799_v6  ;;  %2097 = vmatprep.mubr.f32.mxu0 %v19814_v0 }
 0x1a3   :  { %1554 = vst [vmem:[#allocation2 + $0x230] sm:$0xff] %v1458_v59  ;;  %v16380_v43 = vpop.f32.mrb[70].mxu1 }
 0x1a4   :  { %1551 = vst.msk [vmem:[#allocation2 + $0x218] sm:$0xff] %vm636_vm4, %v1455_v38  ;;  %v564_v60 = vpop.f32.mrb[72].mxu0  ;;  %v16382_v56 = vpop.f32.mrb[71].mxu1  ;;  %13240 = vmatmul.mubr.msk.f32.gmra.mrb[176].mxu1 %vm130_vm3, %v16378_v3 }
 0x1a5   :  { %v566_v11 = vpop.f32.mrb[73].mxu0  ;;  %v801_v25 = vld [vmem:[#allocation2 + $0x228] sm:$0xff]  ;;  %13107 = vmatmul.mubr.msk.f32.gmra.mrb[178].mxu0 %vm130_vm3, %v15772_v17  ;;  %v1460_v48 = vadd.f32 %v16125_v31, %v564_v60  ;;  %4449 = vmatprep.mubr.f32.mxu1 %v19814_v0  ;;  %v16435_v60 = vld [vmem:[%s19783_s0 + $0x58] sm:$0xff] }
 0x1a6   :  { %709 = vst.msk [vmem:[#allocation2 + $0x248] sm:$0xff] %vm636_vm4, %v566_v11  ;;  %v1457_v42 = vadd.f32 %v16089_v53, %v801_v25  ;;  %2103 = vmatprep.mubr.f32.mxu0 %v19814_v0 }
 0x1a7   :  { %1556 = vst [vmem:[#allocation2 + $0x240] sm:$0xff] %v1460_v48  ;;  %v16399_v51 = vpop.f32.mrb[72].mxu1  ;;  %v19835_v48 = vld [vmem:[#allocation16_spill] sm:$0xff] }
 0x1a8   :  { %1553 = vst.msk [vmem:[#allocation2 + $0x228] sm:$0xff] %vm636_vm4, %v1457_v42  ;;  %v570_v17 = vpop.f32.mrb[74].mxu0  ;;  %v16401_v40 = vpop.f32.mrb[73].mxu1  ;;  %13241 = vmatmul.mubr.msk.f32.gmra.mrb[178].mxu1 %vm130_vm3, %v16397_v13 }
 0x1a9   :  { %v572_v53 = vpop.f32.mrb[75].mxu0  ;;  %v803_v31 = vld [vmem:[#allocation2 + $0x238] sm:$0xff]  ;;  %13108 = vmatmul.mubr.msk.f32.gmra.mrb[180].mxu0 %vm130_vm3, %v15793_v23  ;;  %v1462_v49 = vadd.f32 %v16144_v44, %v570_v17  ;;  %4455 = vmatprep.mubr.f32.mxu1 %v19814_v0 }
 0x1aa   :  { %711 = vst.msk [vmem:[#allocation2 + $0x258] sm:$0xff] %vm636_vm4, %v572_v53  ;;  %v1459_v63 = vadd.f32 %v16108_v2, %v803_v31  ;;  %2109 = vmatprep.mubr.f32.mxu0 %v19814_v0  ;;  %v16454_v53 = vld [vmem:[%s19783_s0 + $0x60] sm:$0xff] }
 0x1ab   :  { %1558 = vst [vmem:[#allocation2 + $0x250] sm:$0xff] %v1462_v49  ;;  %v16418_v19 = vpop.f32.mrb[74].mxu1 }
 0x1ac   :  { %1555 = vst.msk [vmem:[#allocation2 + $0x238] sm:$0xff] %vm636_vm4, %v1459_v63  ;;  %v576_v23 = vpop.f32.mrb[76].mxu0  ;;  %v16420_v6 = vpop.f32.mrb[75].mxu1  ;;  %13242 = vmatmul.mubr.msk.f32.gmra.mrb[180].mxu1 %vm130_vm3, %v16416_v4 }
 0x1ad   :  { %v578_v2 = vpop.f32.mrb[77].mxu0  ;;  %v805_v44 = vld [vmem:[#allocation2 + $0x248] sm:$0xff]  ;;  %13109 = vmatmul.mubr.msk.f32.gmra.mrb[182].mxu0 %vm130_vm3, %v15814_v29  ;;  %v1464_v54 = vadd.f32 %v16163_v55, %v576_v23  ;;  %4461 = vmatprep.mubr.f32.mxu1 %v19814_v0  ;;  %v19836_v23 = vld [vmem:[#allocation17_spill] sm:$0xff] }
 0x1ae   :  { %713 = vst.msk [vmem:[#allocation2 + $0x268] sm:$0xff] %vm636_vm4, %v578_v2  ;;  %v1461_v57 = vadd.f32 %v16127_v52, %v805_v44  ;;  %2115 = vmatprep.mubr.f32.mxu0 %v19814_v0 }
 0x1af   :  { %1560 = vst [vmem:[#allocation2 + $0x260] sm:$0xff] %v1464_v54  ;;  %v16437_v11 = vpop.f32.mrb[76].mxu1  ;;  %v16473_v54 = vld [vmem:[%s19783_s0 + $0x68] sm:$0xff] }
 0x1b0   :  { %1557 = vst.msk [vmem:[#allocation2 + $0x248] sm:$0xff] %vm636_vm4, %v1461_v57  ;;  %v582_v29 = vpop.f32.mrb[78].mxu0  ;;  %v16439_v25 = vpop.f32.mrb[77].mxu1  ;;  %13243 = vmatmul.mubr.msk.f32.gmra.mrb[182].mxu1 %vm130_vm3, %v16435_v60 }
 0x1b1   :  { %v584_v52 = vpop.f32.mrb[79].mxu0  ;;  %v807_v55 = vld [vmem:[#allocation2 + $0x258] sm:$0xff]  ;;  %13110 = vmatmul.mubr.msk.f32.gmra.mrb[184].mxu0 %vm130_vm3, %v15835_v34  ;;  %v1466_v59 = vadd.f32 %v16182_v12, %v582_v29  ;;  %4467 = vmatprep.mubr.f32.mxu1 %v19814_v0 }
 0x1b2   :  { %715 = vst.msk [vmem:[#allocation2 + $0x278] sm:$0xff] %vm636_vm4, %v584_v52  ;;  %v1463_v38 = vadd.f32 %v16146_v7, %v807_v55  ;;  %2121 = vmatprep.mubr.f32.mxu0 %v19814_v0  ;;  %v19837_v55 = vld [vmem:[#allocation18_spill] sm:$0xff] }
 0x1b3   :  { %1562 = vst [vmem:[#allocation2 + $0x270] sm:$0xff] %v1466_v59  ;;  %v16456_v31 = vpop.f32.mrb[78].mxu1 }
 0x1b4   :  { %1559 = vst.msk [vmem:[#allocation2 + $0x258] sm:$0xff] %vm636_vm4, %v1463_v38  ;;  %v588_v34 = vpop.f32.mrb[80].mxu0  ;;  %v16458_v49 = vpop.f32.mrb[79].mxu1  ;;  %13244 = vmatmul.mubr.msk.f32.gmra.mrb[184].mxu1 %vm130_vm3, %v16454_v53 }
 0x1b5   :  { %v590_v7 = vpop.f32.mrb[81].mxu0  ;;  %v809_v12 = vld [vmem:[#allocation2 + $0x268] sm:$0xff]  ;;  %13111 = vmatmul.mubr.msk.f32.gmra.mrb[186].mxu0 %vm130_vm3, %v19835_v48  ;;  %v1468_v42 = vadd.f32 %v16201_v30, %v588_v34  ;;  %4473 = vmatprep.mubr.f32.mxu1 %v19814_v0  ;;  %v16492_v34 = vld [vmem:[%s19783_s0 + $0x70] sm:$0xff] }
 0x1b6   :  { %717 = vst.msk [vmem:[#allocation2 + $0x288] sm:$0xff] %vm636_vm4, %v590_v7  ;;  %v1465_v17 = vadd.f32 %v16165_v14, %v809_v12  ;;  %2127 = vmatprep.mubr.f32.mxu0 %v19814_v0 }
 0x1b7   :  { %1564 = vst [vmem:[#allocation2 + $0x280] sm:$0xff] %v1468_v42  ;;  %v16475_v57 = vpop.f32.mrb[80].mxu1  ;;  %v19839_v42 = vld [vmem:[#allocation19_spill] sm:$0xff] }
 0x1b8   :  { %1561 = vst.msk [vmem:[#allocation2 + $0x268] sm:$0xff] %vm636_vm4, %v1465_v17  ;;  %v594_v30 = vpop.f32.mrb[82].mxu0  ;;  %v16477_v29 = vpop.f32.mrb[81].mxu1  ;;  %13245 = vmatmul.mubr.msk.f32.gmra.mrb[186].mxu1 %vm130_vm3, %v16473_v54 }
 0x1b9   :  { %v596_v14 = vpop.f32.mrb[83].mxu0  ;;  %v811_v63 = vld [vmem:[#allocation2 + $0x278] sm:$0xff]  ;;  %13112 = vmatmul.mubr.msk.f32.gmra.mrb[188].mxu0 %vm130_vm3, %v19836_v23  ;;  %v1470_v2 = vadd.f32 %v16218_v35, %v594_v30  ;;  %4479 = vmatprep.mubr.f32.mxu1 %v19814_v0 }
 0x1ba   :  { %719 = vst.msk [vmem:[#allocation2 + $0x298] sm:$0xff] %vm636_vm4, %v596_v14  ;;  %v1467_v44 = vadd.f32 %v16184_v8, %v811_v63  ;;  %2133 = vmatprep.mubr.f32.mxu0 %v19814_v0  ;;  %v16511_v14 = vld [vmem:[%s19783_s0 + $0x78] sm:$0xff] }
 0x1bb   :  { %1566 = vst [vmem:[#allocation2 + $0x290] sm:$0xff] %v1470_v2  ;;  %v16494_v7 = vpop.f32.mrb[82].mxu1 }
 0x1bc   :  { %1563 = vst.msk [vmem:[#allocation2 + $0x278] sm:$0xff] %vm636_vm4, %v1467_v44  ;;  %v600_v35 = vpop.f32.mrb[84].mxu0  ;;  %v16496_v12 = vpop.f32.mrb[83].mxu1  ;;  %13246 = vmatmul.mubr.msk.f32.gmra.mrb[188].mxu1 %vm130_vm3, %v16492_v34  ;;  %v19841_v44 = vld [vmem:[#allocation20_spill] sm:$0xff] }
 0x1bd   :  { %v602_v8 = vpop.f32.mrb[85].mxu0  ;;  %v813_v52 = vld [vmem:[#allocation2 + $0x288] sm:$0xff]  ;;  %13113 = vmatmul.mubr.msk.f32.gmra.mrb[190].mxu0 %vm130_vm3, %v19837_v55  ;;  %v1472_v59 = vadd.f32 %v16234_v18, %v600_v35  ;;  %19838 = vst [vmem:[#allocation16_spill] sm:$0xff] %v16496_v12  ;;  %4485 = vmatprep.mubr.f32.mxu1 %v19814_v0  ;;  %v4929_v12 = vld [vmem:[#allocation8 + $0x1a0] sm:$0xff] }
 0x1be   :  { %721 = vst.msk [vmem:[#allocation2 + $0x2a8] sm:$0xff] %vm636_vm4, %v602_v8  ;;  %v1469_v38 = vadd.f32 %v16203_v15, %v813_v52  ;;  %2139 = vmatprep.mubr.f32.mxu0 %v19814_v0  ;;  %v16530_v52 = vld [vmem:[%s19783_s0 + $0x80] sm:$0xff] }
 0x1bf   :  { %1568 = vst [vmem:[#allocation2 + $0x2a0] sm:$0xff] %v1472_v59  ;;  %v16513_v63 = vpop.f32.mrb[84].mxu1 }
 0x1c0   :  { %1565 = vst.msk [vmem:[#allocation2 + $0x288] sm:$0xff] %vm636_vm4, %v1469_v38  ;;  %v606_v18 = vpop.f32.mrb[86].mxu0  ;;  %v16515_v23 = vpop.f32.mrb[85].mxu1  ;;  %13247 = vmatmul.mubr.msk.f32.gmra.mrb[190].mxu1 %vm130_vm3, %v16511_v14 }
 0x1c1   :  { %v608_v15 = vpop.f32.mrb[87].mxu0  ;;  %v815_v48 = vld [vmem:[#allocation2 + $0x298] sm:$0xff]  ;;  %13114 = vmatmul.mubr.msk.f32.gmra.mrb[192].mxu0 %vm130_vm3, %v19839_v42  ;;  %v1474_v17 = vadd.f32 %v16250_v33, %v606_v18  ;;  %19840 = vst [vmem:[#allocation17_spill] sm:$0xff] %v16515_v23  ;;  %4491 = vmatprep.mubr.f32.mxu1 %v19814_v0  ;;  %v19844_v18 = vld [vmem:[#allocation21_spill] sm:$0xff]  ;;  %v16549_v42 = vld [vmem:[%s19783_s0 + $0x88] sm:$0xff] }
 0x1c2   :  { %723 = vst.msk [vmem:[#allocation2 + $0x2b8] sm:$0xff] %vm636_vm4, %v608_v15  ;;  %v1471_v30 = vadd.f32 %v16220_v21, %v815_v48  ;;  %2145 = vmatprep.mubr.f32.mxu0 %v19814_v0 }
 0x1c3   :  { %1570 = vst [vmem:[#allocation2 + $0x2b0] sm:$0xff] %v1474_v17  ;;  %v16532_v55 = vpop.f32.mrb[86].mxu1 }
 0x1c4   :  { %1567 = vst.msk [vmem:[#allocation2 + $0x298] sm:$0xff] %vm636_vm4, %v1471_v30  ;;  %v612_v33 = vpop.f32.mrb[88].mxu0  ;;  %19842 = vst [vmem:[#allocation18_spill] sm:$0xff] %v16532_v55  ;;  %v16534_v59 = vpop.f32.mrb[87].mxu1  ;;  %13248 = vmatmul.mubr.msk.f32.gmra.mrb[192].mxu1 %vm130_vm3, %v16530_v52  ;;  %v4931_v55 = vld [vmem:[#allocation8 + $0x1b0] sm:$0xf] }
 0x1c5   :  { %v614_v21 = vpop.f32.mrb[89].mxu0  ;;  %v817_v2 = vld [vmem:[#allocation2 + $0x2a8] sm:$0xff]  ;;  %13115 = vmatmul.mubr.msk.f32.gmra.mrb[194].mxu0 %vm130_vm3, %v19841_v44  ;;  %v1476_v35 = vadd.f32 %v16266_v22, %v612_v33  ;;  %19843 = vst [vmem:[#allocation19_spill] sm:$0xff] %v16534_v59  ;;  %4497 = vmatprep.mubr.f32.mxu1 %v19814_v0 }
 0x1c6   :  { %725 = vst.msk [vmem:[#allocation2 + $0x2c8] sm:$0xff] %vm636_vm4, %v614_v21  ;;  %v1473_v8 = vadd.f32 %v16236_v9, %v817_v2  ;;  %2151 = vmatprep.mubr.f32.mxu0 %v19814_v0  ;;  %v19847_v21 = vld [vmem:[#allocation22_spill] sm:$0xff] }
 0x1c7   :  { %1572 = vst [vmem:[#allocation2 + $0x2c0] sm:$0xff] %v1476_v35  ;;  %v16551_v17 = vpop.f32.mrb[88].mxu1  ;;  %v16568_v35 = vld [vmem:[%s19783_s0 + $0x90] sm:$0xff] }
 0x1c8   :  { %1569 = vst.msk [vmem:[#allocation2 + $0x2a8] sm:$0xff] %vm636_vm4, %v1473_v8  ;;  %v618_v22 = vpop.f32.mrb[90].mxu0  ;;  %19845 = vst [vmem:[#allocation20_spill] sm:$0xff] %v16551_v17  ;;  %v16553_v30 = vpop.f32.mrb[89].mxu1  ;;  %13249 = vmatmul.mubr.msk.f32.gmra.mrb[194].mxu1 %vm130_vm3, %v16549_v42 }
 0x1c9   :  { %v620_v9 = vpop.f32.mrb[91].mxu0  ;;  %v819_v38 = vld [vmem:[#allocation2 + $0x2b8] sm:$0xff]  ;;  %13116 = vmatmul.mubr.msk.f32.gmra.mrb[196].mxu0 %vm130_vm3, %v19844_v18  ;;  %v1478_v15 = vadd.f32 %v16282_v1, %v618_v22  ;;  %19846 = vst [vmem:[#allocation21_spill] sm:$0xff] %v16553_v30  ;;  %4503 = vmatprep.mubr.f32.mxu1 %v19814_v0 }
 0x1ca   :  { %727 = vst.msk [vmem:[#allocation2 + $0x2d8] sm:$0xff] %vm636_vm4, %v620_v9  ;;  %v1475_v48 = vadd.f32 %v16252_v37, %v819_v38  ;;  %2157 = vmatprep.mubr.f32.mxu0 %v19814_v0  ;;  %v19850_v38 = vld [vmem:[#allocation23_spill] sm:$0xff]  ;;  %v5780_v30 = vld [vmem:[#allocation8 + $0x1f8] sm:$0xf] }
 0x1cb   :  { %1574 = vst [vmem:[#allocation2 + $0x2d0] sm:$0xff] %v1478_v15  ;;  %v16570_v8 = vpop.f32.mrb[90].mxu1 }
 0x1cc   :  { %1571 = vst.msk [vmem:[#allocation2 + $0x2b8] sm:$0xff] %vm636_vm4, %v1475_v48  ;;  %v624_v1 = vpop.f32.mrb[92].mxu0  ;;  %19848 = vst [vmem:[#allocation22_spill] sm:$0xff] %v16570_v8  ;;  %v16572_v22 = vpop.f32.mrb[91].mxu1  ;;  %13250 = vmatmul.mubr.msk.f32.gmra.mrb[196].mxu1 %vm130_vm3, %v16568_v35  ;;  %v16587_v48 = vld [vmem:[%s19783_s0 + $0x98] sm:$0xff] }
 0x1cd   :  { %v626_v37 = vpop.f32.mrb[93].mxu0  ;;  %v821_v33 = vld [vmem:[#allocation2 + $0x2c8] sm:$0xff]  ;;  %13117 = vmatmul.mubr.msk.f32.gmra.mrb[198].mxu0 %vm130_vm3, %v19847_v21  ;;  %v1480_v2 = vadd.f32 %v16298_v24, %v624_v1  ;;  %19849 = vst [vmem:[#allocation28_spill] sm:$0xff] %v16572_v22  ;;  %4509 = vmatprep.mubr.f32.mxu1 %v19814_v0  ;;  %v5779_v8 = vld [vmem:[#allocation8 + $0x1f0] sm:$0xf] }
 0x1ce   :  { %729 = vst.msk [vmem:[#allocation2 + $0x2e8] sm:$0xff] %vm636_vm4, %v626_v37  ;;  %v1477_v44 = vadd.f32 %v16268_v5, %v821_v33  ;;  %2163 = vmatprep.mubr.f32.mxu0 %v19814_v0 }
 0x1cf   :  { %1576 = vst [vmem:[#allocation2 + $0x2e0] sm:$0xff] %v1480_v2  ;;  %v16589_v1 = vpop.f32.mrb[92].mxu1  ;;  %v19853_v2 = vld [vmem:[#allocation24_spill] sm:$0xff] }
 0x1d0   :  { %1573 = vst.msk [vmem:[#allocation2 + $0x2c8] sm:$0xff] %vm636_vm4, %v1477_v44  ;;  %v630_v24 = vpop.f32.mrb[94].mxu0  ;;  %19851 = vst [vmem:[#allocation23_spill] sm:$0xff] %v16589_v1  ;;  %v16591_v37 = vpop.f32.mrb[93].mxu1  ;;  %13251 = vmatmul.mubr.msk.f32.gmra.mrb[198].mxu1 %vm130_vm3, %v16587_v48 }
 0x1d1   :  { %v632_v5 = vpop.f32.mrb[95].mxu0  ;;  %v823_v9 = vld [vmem:[#allocation2 + $0x2d8] sm:$0xff]  ;;  %13118 = vmatmul.mubr.msk.f32.gmra.mrb[200].mxu0 %vm130_vm3, %v19850_v38  ;;  %v1482_v18 = vadd.f32 %v16314_v39, %v630_v24  ;;  %19852 = vst [vmem:[#allocation29_spill] sm:$0xff] %v16591_v37  ;;  %4515 = vmatprep.mubr.f32.mxu1 %v19814_v0 }
 0x1d2   :  { %731 = vst.msk [vmem:[#allocation2 + $0x2f8] sm:$0xff] %vm636_vm4, %v632_v5  ;;  %v1479_v15 = vadd.f32 %v16284_v36, %v823_v9  ;;  %2169 = vmatprep.mubr.f32.mxu0 %v19814_v0  ;;  %v733_v36 = vld [vmem:[#allocation2 + $0x8] sm:$0xff]  ;;  %v16606_v5 = vld [vmem:[%s19783_s0 + $0xa0] sm:$0xff] }
 0x1d3   :  { %1578 = vst [vmem:[#allocation2 + $0x2f0] sm:$0xff] %v1482_v18  ;;  %v16608_v9 = vpop.f32.mrb[94].mxu1 }
 0x1d4   :  { %1575 = vst.msk [vmem:[#allocation2 + $0x2d8] sm:$0xff] %vm636_vm4, %v1479_v15  ;;  %v16596_v39 = vpop.f32.mrb[96].mxu0  ;;  %19854 = vst [vmem:[#allocation24_spill] sm:$0xff] %v16608_v9  ;;  %v16610_v38 = vpop.f32.mrb[95].mxu1  ;;  %13252 = vmatmul.mubr.msk.f32.gmra.mrb[200].mxu1 %vm130_vm3, %v16606_v5 }
 0x1d5   :  { %v1103_v33 = vpop.f32.mrb[97].mxu0  ;;  %v825_v21 = vld [vmem:[#allocation2 + $0x2e8] sm:$0xff]  ;;  %13119 = vmatmul.mubr.msk.f32.gmra.mrb[202].mxu0 %vm130_vm3, %v19853_v2  ;;  %19855 = vst [vmem:[#allocation30_spill] sm:$0xff] %v16610_v38  ;;  %4521 = vmatprep.mubr.f32.mxu1 %v19814_v0 }
 0x1d6   :  { %v1389_v44 = vadd.f32 %v1103_v33, %v733_v36  ;;  %v1481_v24 = vadd.f32 %v16300_v28, %v825_v21  ;;  %2175 = vmatprep.mubr.f32.mxu0 %v19814_v0  ;;  %v735_v28 = vld [vmem:[#allocation2 + $0x18] sm:$0xff]  ;;  %v19856_v33 = vld [vmem:[#allocation25_spill] sm:$0xff] }
 0x1d8   :  { %1485 = vst.msk [vmem:[#allocation2 + $0x8] sm:$0xff] %vm636_vm4, %v1389_v44  ;;  %1577 = vst.msk [vmem:[#allocation2 + $0x2e8] sm:$0xff] %vm636_vm4, %v1481_v24  ;;  %v16616_v18 = vpop.f32.mrb[98].mxu0  ;;  %v16626_v44 = vld [vmem:[%s19783_s0 + $0xa8] sm:$0xff]  ;;  %v16628_v24 = vpop.f32.mrb[96].mxu1 }
 0x1d9   :  { %v1109_v15 = vpop.f32.mrb[99].mxu0  ;;  %v827_v36 = vld [vmem:[#allocation2 + $0x2f8] sm:$0xff]  ;;  %13120 = vmatmul.mubr.msk.f32.gmra.mrb[204].mxu0 %vm130_vm3, %v19856_v33  ;;  %19857 = vst [vmem:[#allocation25_spill] sm:$0xff] %v16628_v24  ;;  %v16630_v38 = vpop.f32.mrb[97].mxu1  ;;  %13253 = vmatmul.mubr.msk.f32.gmra.mrb[202].mxu1 %vm130_vm3, %v16626_v44 }
 0x1da   :  { %v1391_v21 = vadd.f32 %v1109_v15, %v735_v28  ;;  %v1483_v2 = vadd.f32 %v16316_v46, %v827_v36  ;;  %2181 = vmatprep.mubr.f32.mxu0 %v19814_v0  ;;  %19858 = vst [vmem:[#allocation31_spill] sm:$0xff] %v16630_v38  ;;  %4527 = vmatprep.mubr.f32.mxu1 %v19814_v0  ;;  %v737_v46 = vld [vmem:[#allocation2 + $0x28] sm:$0xff]  ;;  %v19859_v36 = vld [vmem:[#allocation26_spill] sm:$0xff]  ;;  %v16645_v38 = vld [vmem:[%s19783_s0 + $0xb0] sm:$0xff] }
 0x1dc   :  { %1487 = vst.msk [vmem:[#allocation2 + $0x18] sm:$0xff] %vm636_vm4, %v1391_v21  ;;  %1579 = vst.msk [vmem:[#allocation2 + $0x2f8] sm:$0xff] %vm636_vm4, %v1483_v2  ;;  %v16636_v28 = vpop.f32.mrb[100].mxu0  ;;  %v16647_v21 = vpop.f32.mrb[98].mxu1 }
 0x1dd   :  { %v1115_v15 = vpop.f32.mrb[101].mxu0  ;;  %13121 = vmatmul.mubr.msk.f32.gmra.mrb[206].mxu0 %vm130_vm3, %v19859_v36  ;;  %19860 = vst [vmem:[#allocation26_spill] sm:$0xff] %v16647_v21  ;;  %v16649_v2 = vpop.f32.mrb[99].mxu1  ;;  %13254 = vmatmul.mubr.msk.f32.gmra.mrb[204].mxu1 %vm130_vm3, %v16645_v38 }
 0x1de   :  { %v1393_v33 = vadd.f32 %v1115_v15, %v737_v46  ;;  %2187 = vmatprep.mubr.f32.mxu0 %v19814_v0  ;;  %19861 = vst [vmem:[#allocation32_spill] sm:$0xff] %v16649_v2  ;;  %4533 = vmatprep.mubr.f32.mxu1 %v19814_v0  ;;  %v739_v46 = vld [vmem:[#allocation2 + $0x38] sm:$0xff] }
 0x1df   :  { %v16663_v2 = vld [vmem:[%s19783_s0 + $0xb8] sm:$0xff]  ;;  %v16665_v21 = vpop.f32.mrb[100].mxu1 }
 0x1e0   :  { %1489 = vst.msk [vmem:[#allocation2 + $0x28] sm:$0xff] %vm636_vm4, %v1393_v33  ;;  %v16654_v37 = vpop.f32.mrb[102].mxu0  ;;  %19862 = vst [vmem:[#allocation33_spill] sm:$0xff] %v16665_v21  ;;  %v16667_v33 = vpop.f32.mrb[101].mxu1 }
 0x1e1   :  { %v1121_v15 = vpop.f32.mrb[103].mxu0  ;;  %13122 = vmatmul.mubr.msk.f32.gmra.mrb[208].mxu0 %vm130_vm3, %v16059_v10  ;;  %19863 = vst [vmem:[#allocation34_spill] sm:$0xff] %v16667_v33  ;;  %13255 = vmatmul.mubr.msk.f32.gmra.mrb[206].mxu1 %vm130_vm3, %v16663_v2  ;;  %v741_v10 = vld [vmem:[#allocation2 + $0x48] sm:$0xff]  ;;  %v16681_v33 = vld [vmem:[%s19783_s0 + $0xc0] sm:$0xff] }
 0x1e2   :  { %v1395_v36 = vadd.f32 %v1121_v15, %v739_v46  ;;  %2193 = vmatprep.mubr.f32.mxu0 %v19814_v0  ;;  %4539 = vmatprep.mubr.f32.mxu1 %v19814_v0  ;;  %19864 = vst [vmem:[#allocation35_spill] sm:$0xff] %v16681_v33 }
 0x1e3   :  { %v16683_v21 = vpop.f32.mrb[102].mxu1 }
 0x1e4   :  { %1491 = vst.msk [vmem:[#allocation2 + $0x38] sm:$0xff] %vm636_vm4, %v1395_v36  ;;  %v16672_v24 = vpop.f32.mrb[104].mxu0  ;;  %19865 = vst [vmem:[#allocation36_spill] sm:$0xff] %v16683_v21  ;;  %v16685_v36 = vpop.f32.mrb[103].mxu1 }
 0x1e5   :  { %v1127_v46 = vpop.f32.mrb[105].mxu0  ;;  %13123 = vmatmul.mubr.msk.f32.gmra.mrb[210].mxu0 %vm130_vm3, %v16078_v20  ;;  %19866 = vst [vmem:[#allocation37_spill] sm:$0xff] %v16685_v36  ;;  %13256 = vmatmul.mubr.msk.f32.gmra.mrb[208].mxu1 %vm130_vm3, %v16681_v33  ;;  %v743_v20 = vld [vmem:[#allocation2 + $0x58] sm:$0xff]  ;;  %v16699_v36 = vld [vmem:[%s19783_s0 + $0xc8] sm:$0xff] }
 0x1e6   :  { %v1397_v15 = vadd.f32 %v1127_v46, %v741_v10  ;;  %2199 = vmatprep.mubr.f32.mxu0 %v19814_v0  ;;  %4545 = vmatprep.mubr.f32.mxu1 %v19814_v0  ;;  %19867 = vst [vmem:[#allocation38_spill] sm:$0xff] %v16699_v36 }
 0x1e7   :  { %v16701_v21 = vpop.f32.mrb[104].mxu1 }
 0x1e8   :  { %1493 = vst.msk [vmem:[#allocation2 + $0x48] sm:$0xff] %vm636_vm4, %v1397_v15  ;;  %v16690_v22 = vpop.f32.mrb[106].mxu0  ;;  %19868 = vst [vmem:[#allocation39_spill] sm:$0xff] %v16701_v21  ;;  %v16703_v15 = vpop.f32.mrb[105].mxu1  ;;  %v5778_v21 = vld [vmem:[#allocation8 + $0x1e8] sm:$0xff] }
 0x1e9   :  { %v1133_v10 = vpop.f32.mrb[107].mxu0  ;;  %13124 = vmatmul.mubr.msk.f32.gmra.mrb[212].mxu0 %vm130_vm3, %v16097_v26  ;;  %19869 = vst [vmem:[#allocation40_spill] sm:$0xff] %v16703_v15  ;;  %13257 = vmatmul.mubr.msk.f32.gmra.mrb[210].mxu1 %vm130_vm3, %v16699_v36  ;;  %v745_v26 = vld [vmem:[#allocation2 + $0x68] sm:$0xff]  ;;  %v14009_v59 = vpack.c.bf16 %v5780_v30, %v5778_v21  ;;  %v16737_v21 = vld [vmem:[%s19783_s0 + $0xd8] sm:$0xff] }
 0x1ea   :  { %v1399_v46 = vadd.f32 %v1133_v10, %v743_v20  ;;  %2205 = vmatprep.mubr.f32.mxu0 %v19814_v0  ;;  %4551 = vmatprep.mubr.f32.mxu1 %v19814_v0  ;;  %v16716_v10 = vld [vmem:[%s19783_s0 + $0xd0] sm:$0xff]  ;;  %19874 = vst [vmem:[#allocation44_spill] sm:$0xff] %v16737_v21 }
 0x1eb   :  { %19870 = vst [vmem:[#allocation41_spill] sm:$0xff] %v16716_v10  ;;  %v16719_v1 = vpop.f32.mrb[106].mxu1  ;;  %14011 = vmatprep.subr.msk.bf16.mxu1 %vm15086_vm2, %v14009_v59  ;;  %v749_v59 = vld [vmem:[#allocation2 + $0x88] sm:$0xff] }
 0x1ec   :  { %1495 = vst.msk [vmem:[#allocation2 + $0x58] sm:$0xff] %vm636_vm4, %v1399_v46  ;;  %v16708_v9 = vpop.f32.mrb[108].mxu0  ;;  %v5777_v46 = vld [vmem:[#allocation8 + $0x1e0] sm:$0xff]  ;;  %19871 = vst [vmem:[#allocation42_spill] sm:$0xff] %v16719_v1  ;;  %v16721_v23 = vpop.f32.mrb[107].mxu1 }
 0x1ed   :  { %v1139_v20 = vpop.f32.mrb[109].mxu0  ;;  %13125 = vmatmul.mubr.msk.f32.gmra.mrb[214].mxu0 %vm130_vm3, %v16116_v32  ;;  %19872 = vst [vmem:[#allocation43_spill] sm:$0xff] %v16721_v23  ;;  %13258 = vmatmul.mubr.msk.f32.gmra.mrb[212].mxu1 %vm130_vm3, %v16716_v10  ;;  %v14012_v17 = vpack.c.bf16 %v5779_v8, %v5777_v46  ;;  %v19883_v10 = vld [vmem:[#allocation27_spill] sm:$0xff] }
 0x1ee   :  { %v1401_v15 = vadd.f32 %v1139_v20, %v745_v26  ;;  %2211 = vmatprep.mubr.f32.mxu0 %v19814_v0  ;;  %4557 = vmatprep.mubr.f32.mxu1 %v19814_v0  ;;  %v747_v26 = vld [vmem:[#allocation2 + $0x78] sm:$0xff] }
 0x1ef   :  { %14014 = vmatpush1.bf16.msk.msra.mxu1 %vm15086_vm2, %v14012_v17  ;;  %v16741_v8 = vpop.f32.mrb[108].mxu1  ;;  %v16757_v17 = vld [vmem:[%s19783_s0 + $0xe0] sm:$0xff] }
 0x1f0   :  { %1497 = vst.msk [vmem:[#allocation2 + $0x68] sm:$0xff] %vm636_vm4, %v1401_v15  ;;  %v16726_v32 = vpop.f32.mrb[110].mxu0  ;;  %19875 = vst [vmem:[#allocation45_spill] sm:$0xff] %v16741_v8  ;;  %v16743_v15 = vpop.f32.mrb[109].mxu1 }
 0x1f1   :  { %v1145_v20 = vpop.f32.mrb[111].mxu0  ;;  %13126 = vmatmul.mubr.msk.f32.gmra.mrb[216].mxu0 %vm130_vm3, %v16135_v47  ;;  %19876 = vst [vmem:[#allocation46_spill] sm:$0xff] %v16743_v15  ;;  %13259 = vmatmul.mubr.msk.f32.gmra.mrb[214].mxu1 %vm130_vm3, %v16737_v21  ;;  %19877 = vst [vmem:[#allocation47_spill] sm:$0xff] %v16757_v17 }
 0x1f2   :  { %v1403_v30 = vadd.f32 %v1145_v20, %v747_v26  ;;  %2217 = vmatprep.mubr.f32.mxu0 %v19814_v0  ;;  %4563 = vmatprep.mubr.f32.mxu1 %v19814_v0 }
 0x1f3   :  { %v16759_v20 = vpop.f32.mrb[110].mxu1 }
 0x1f4   :  { %1499 = vst.msk [vmem:[#allocation2 + $0x78] sm:$0xff] %vm636_vm4, %v1403_v30  ;;  %v16748_v47 = vpop.f32.mrb[112].mxu0  ;;  %19878 = vst [vmem:[#allocation48_spill] sm:$0xff] %v16759_v20  ;;  %v16761_v30 = vpop.f32.mrb[111].mxu1  ;;  %v4927_v20 = vld [vmem:[#allocation8 + $0x190] sm:$0xff] }
 0x1f5   :  { %v1151_v46 = vpop.f32.mrb[113].mxu0  ;;  %13127 = vmatmul.mubr.msk.f32.gmra.mrb[218].mxu0 %vm130_vm3, %v16154_v62  ;;  %19879 = vst [vmem:[#allocation49_spill] sm:$0xff] %v16761_v30  ;;  %13260 = vmatmul.mubr.msk.f32.gmra.mrb[216].mxu1 %vm130_vm3, %v16757_v17  ;;  %v751_v62 = vld [vmem:[#allocation2 + $0x98] sm:$0xff]  ;;  %v16775_v30 = vld [vmem:[%s19783_s0 + $0xe8] sm:$0xff] }
 0x1f6   :  { %v1405_v26 = vadd.f32 %v1151_v46, %v749_v59  ;;  %2223 = vmatprep.mubr.f32.mxu0 %v19814_v0  ;;  %4569 = vmatprep.mubr.f32.mxu1 %v19814_v0  ;;  %19880 = vst [vmem:[#allocation50_spill] sm:$0xff] %v16775_v30  ;;  %v753_v17 = vld [vmem:[#allocation2 + $0xa8] sm:$0xff] }
 0x1f7   :  { %v16777_v23 = vpop.f32.mrb[112].mxu1 }
 0x1f8   :  { %1501 = vst.msk [vmem:[#allocation2 + $0x88] sm:$0xff] %vm636_vm4, %v1405_v26  ;;  %v16766_v15 = vpop.f32.mrb[114].mxu0  ;;  %19881 = vst [vmem:[#allocation51_spill] sm:$0xff] %v16777_v23  ;;  %v4925_v26 = vld [vmem:[#allocation8 + $0x180] sm:$0xff]  ;;  %v16779_v8 = vpop.f32.mrb[113].mxu1 }
 0x1f9   :  { %v1157_v59 = vpop.f32.mrb[115].mxu0  ;;  %13128 = vmatmul.mubr.msk.f32.gmra.mrb[220].mxu0 %vm130_vm3, %v16173_v16  ;;  %19882 = vst [vmem:[#allocation52_spill] sm:$0xff] %v16779_v8  ;;  %13261 = vmatmul.mubr.msk.f32.gmra.mrb[218].mxu1 %vm130_vm3, %v16775_v30  ;;  %v13997_v8 = vpack.c.bf16 %v4927_v20, %v4925_v26  ;;  %v16793_v30 = vld [vmem:[%s19783_s0 + $0xf0] sm:$0xff]  ;;  %v16811_v26 = vld [vmem:[%s19783_s0 + $0xf8] sm:$0xff] }
 0x1fa   :  { %v1407_v46 = vadd.f32 %v1157_v59, %v751_v62  ;;  %2229 = vmatprep.mubr.f32.mxu0 %v19814_v0  ;;  %v4930_v62 = vld [vmem:[#allocation8 + $0x1a8] sm:$0xff]  ;;  %v4932_v59 = vld [vmem:[#allocation8 + $0x1b8] sm:$0xf]  ;;  %4575 = vmatprep.mubr.f32.mxu1 %v19814_v0 }
 0x1fb   :  { %v13999_v36 = vpack.c.bf16 %v4932_v59, %v4930_v62  ;;  %v14002_v62 = vpack.c.bf16 %v4931_v55, %v4929_v12  ;;  %v16831_v55 = vld [vmem:[%s19783_s0 + $0x100] sm:$0xff] }
 0x1fc   :  { %1503 = vst.msk [vmem:[#allocation2 + $0x98] sm:$0xff] %vm636_vm4, %v1407_v46  ;;  %v16784_v16 = vpop.f32.mrb[116].mxu0  ;;  %v16795_v46 = vpop.f32.mrb[114].mxu1 }
 0x1fd   :  { %v1163_v21 = vpop.f32.mrb[117].mxu0  ;;  %13129 = vmatmul.mubr.msk.f32.gmra.mrb[222].mxu0 %vm130_vm3, %v19883_v10  ;;  %19884 = vst [vmem:[#allocation27_spill] sm:$0xff] %v16795_v46  ;;  %v16797_v33 = vpop.f32.mrb[115].mxu1  ;;  %13262 = vmatmul.mubr.msk.f32.gmra.mrb[220].mxu1 %vm130_vm3, %v16793_v30  ;;  %v734_v46 = vld [vmem:[#allocation2 + $0x10] sm:$0xff] }
 0x1fe   :  { %v1409_v23 = vadd.f32 %v1163_v21, %v753_v17  ;;  %3643 = vmatprep.mubr.f32.mxu0 %v19814_v0  ;;  %19885 = vst [vmem:[#allocation53_spill] sm:$0xff] %v16797_v33  ;;  %4581 = vmatprep.mubr.f32.mxu1 %v19814_v0  ;;  %v755_v21 = vld [vmem:[#allocation2 + $0xb8] sm:$0xff] }
 0x200   :  { %1505 = vst.msk [vmem:[#allocation2 + $0xa8] sm:$0xff] %vm636_vm4, %v1409_v23  ;;  %v16802_v10 = vpop.f32.mrb[118].mxu0  ;;  %v16813_v23 = vpop.f32.mrb[116].mxu1 }
 0x201   :  { %v1169_v17 = vpop.f32.mrb[119].mxu0  ;;  %13182 = vmatmul.mubr.msk.f32.vlgmr.msra.gmra.mrb[224].mxu0 %vm130_vm3, %v16378_v3  ;;  %19886 = vst [vmem:[#allocation54_spill] sm:$0xff] %v16813_v23  ;;  %v16817_v59 = vpop.f32.mrb[117].mxu1  ;;  %13263 = vmatmul.mubr.msk.f32.gmra.mrb[222].mxu1 %vm130_vm3, %v16811_v26 }
 0x202   :  { %v1411_v20 = vadd.f32 %v1169_v17, %v755_v21  ;;  %13998 = vmatpush1.bf16.msra.mxu0 %v13997_v8  ;;  %3649 = vmatprep.mubr.f32.mxu0 %v19814_v0  ;;  %19887 = vst [vmem:[#allocation55_spill] sm:$0xff] %v16817_v59  ;;  %v757_v8 = vld [vmem:[#allocation2 + $0xc8] sm:$0xff] }
 0x203   :  { %14001 = vmatprep.subr.msk.bf16.mxu0 %vm15086_vm2, %v13999_v36  ;;  %4587 = vmatprep.mubr.f32.mxu1 %v19814_v0  ;;  %v16835_v36 = vpop.f32.mrb[118].mxu1 }
 0x204   :  { %1507 = vst.msk [vmem:[#allocation2 + $0xb8] sm:$0xff] %vm636_vm4, %v1411_v20  ;;  %v16822_v3 = vpop.f32.mrb[120].mxu0  ;;  %19888 = vst [vmem:[#allocation56_spill] sm:$0xff] %v16835_v36  ;;  %v16837_v17 = vpop.f32.mrb[119].mxu1  ;;  %v759_v20 = vld [vmem:[#allocation2 + $0xd8] sm:$0xff] }
 0x205   :  { %v1175_v21 = vpop.f32.mrb[121].mxu0  ;;  %13183 = vmatmul.mubr.msk.f32.gmra.mrb[226].mxu0 %vm130_vm3, %v16397_v13  ;;  %19889 = vst [vmem:[#allocation57_spill] sm:$0xff] %v16837_v17  ;;  %13264 = vmatmul.mubr.msk.f32.gmra.mrb[224].mxu1 %vm130_vm3, %v16831_v55 }
 0x206   :  { %v1413_v12 = vadd.f32 %v1175_v21, %v757_v8  ;;  %3655 = vmatprep.mubr.f32.mxu0 %v19814_v0  ;;  %14004 = vmatpush1.bf16.msk.msra.mxu0 %vm15086_vm2, %v14002_v62  ;;  %v16851_v62 = vld [vmem:[%s19783_s0 + $0x108] sm:$0xff] }
 0x207   :  { %4593 = vmatprep.mubr.f32.mxu1 %v19814_v0  ;;  %v16853_v1 = vpop.f32.mrb[120].mxu1 }
 0x208   :  { %1509 = vst.msk [vmem:[#allocation2 + $0xc8] sm:$0xff] %vm636_vm4, %v1413_v12  ;;  %v16842_v13 = vpop.f32.mrb[122].mxu0  ;;  %19890 = vst [vmem:[#allocation58_spill] sm:$0xff] %v16853_v1  ;;  %v16855_v12 = vpop.f32.mrb[121].mxu1 }
 0x209   :  { %v1181_v8 = vpop.f32.mrb[123].mxu0  ;;  %13184 = vmatmul.mubr.msk.f32.gmra.mrb[228].mxu0 %vm130_vm3, %v16416_v4  ;;  %19891 = vst [vmem:[#allocation59_spill] sm:$0xff] %v16855_v12  ;;  %13265 = vmatmul.mubr.msk.f32.gmra.mrb[226].mxu1 %vm130_vm3, %v16851_v62  ;;  %v761_v4 = vld [vmem:[#allocation2 + $0xe8] sm:$0xff]  ;;  %v16869_v12 = vld [vmem:[%s19783_s0 + $0x110] sm:$0xff] }
 0x20a   :  { %v1415_v21 = vadd.f32 %v1181_v8, %v759_v20  ;;  %3661 = vmatprep.mubr.f32.mxu0 %v19814_v0  ;;  %4599 = vmatprep.mubr.f32.mxu1 %v19814_v0 }
 0x20b   :  { %v16871_v59 = vpop.f32.mrb[122].mxu1 }
 0x20c   :  { %1511 = vst.msk [vmem:[#allocation2 + $0xd8] sm:$0xff] %vm636_vm4, %v1415_v21  ;;  %v16860_v17 = vpop.f32.mrb[124].mxu0  ;;  %19892 = vst [vmem:[#allocation60_spill] sm:$0xff] %v16871_v59  ;;  %v16873_v21 = vpop.f32.mrb[123].mxu1 }
 0x20d   :  { %v1187_v20 = vpop.f32.mrb[125].mxu0  ;;  %13185 = vmatmul.mubr.msk.f32.gmra.mrb[230].mxu0 %vm130_vm3, %v16435_v60  ;;  %19893 = vst [vmem:[#allocation61_spill] sm:$0xff] %v16873_v21  ;;  %13266 = vmatmul.mubr.msk.f32.gmra.mrb[228].mxu1 %vm130_vm3, %v16869_v12  ;;  %v763_v60 = vld [vmem:[#allocation2 + $0xf8] sm:$0xff] }
 0x20e   :  { %v1417_v8 = vadd.f32 %v1187_v20, %v761_v4  ;;  %3667 = vmatprep.mubr.f32.mxu0 %v19814_v0  ;;  %4605 = vmatprep.mubr.f32.mxu1 %v19814_v0  ;;  %v732_v20 = vld [vmem:[#allocation2] sm:$0xff]  ;;  %v16887_v21 = vld [vmem:[%s19783_s0 + $0x118] sm:$0xff] }
 0x20f   :  { %v16889_v59 = vpop.f32.mrb[124].mxu1 }
 0x210   :  { %1513 = vst.msk [vmem:[#allocation2 + $0xe8] sm:$0xff] %vm636_vm4, %v1417_v8  ;;  %v16878_v1 = vpop.f32.mrb[126].mxu0  ;;  %19894 = vst [vmem:[#allocation62_spill] sm:$0xff] %v16889_v59  ;;  %v1388_v8 = vadd.f32 %v16596_v39, %v732_v20  ;;  %v16892_v36 = vpop.f32.mrb[125].mxu1  ;;  %v16904_v39 = vld [vmem:[%s19783_s0 + $0x120] sm:$0xff] }
 0x211   :  { %v1193_v4 = vpop.f32.mrb[127].mxu0  ;;  %13186 = vmatmul.mubr.msk.f32.gmra.mrb[232].mxu0 %vm130_vm3, %v16454_v53  ;;  %19895 = vst [vmem:[#allocation63_spill] sm:$0xff] %v16892_v36  ;;  %13267 = vmatmul.mubr.msk.f32.gmra.mrb[230].mxu1 %vm130_vm3, %v16887_v21 }
 0x212   :  { %v1419_v33 = vadd.f32 %v1193_v4, %v763_v60  ;;  %3673 = vmatprep.mubr.f32.mxu0 %v19814_v0  ;;  %4611 = vmatprep.mubr.f32.mxu1 %v19814_v0  ;;  %v1581_v4 = vld [vmem:[#allocation2 + $0x8] sm:$0xff] }
 0x213   :  { %v16906_v20 = vpop.f32.mrb[126].mxu1 }
 0x214   :  { %1515 = vst.msk [vmem:[#allocation2 + $0xf8] sm:$0xff] %vm636_vm4, %v1419_v33  ;;  %v1949_v53 = vpop.f32.mrb[128].mxu0  ;;  %v1390_v33 = vadd.f32 %v16616_v18, %v734_v46  ;;  %v736_v18 = vld [vmem:[#allocation2 + $0x20] sm:$0xff] }
 0x215   :  { %v2236_v60 = vadd.f32 %v1949_v53, %v1388_v8  ;;  %v1951_v23 = vpop.f32.mrb[129].mxu0  ;;  %13187 = vmatmul.mubr.msk.f32.gmra.mrb[234].mxu0 %vm130_vm3, %v16473_v54  ;;  %v16910_v53 = vpop.f32.mrb[127].mxu1  ;;  %13268 = vmatmul.mubr.msk.f32.gmra.mrb[232].mxu1 %vm130_vm3, %v16904_v39 }
 0x216   :  { %v2237_v59 = vadd.f32 %v1951_v23, %v1581_v4  ;;  %3679 = vmatprep.mubr.f32.mxu0 %v19814_v0  ;;  %19896 = vst [vmem:[#allocation64_spill] sm:$0xff] %v16910_v53  ;;  %4617 = vmatprep.mubr.f32.mxu1 %v19814_v0  ;;  %v1583_v4 = vld [vmem:[#allocation2 + $0x18] sm:$0xff] }
 0x217   :  { %v3084_v8 = vadd.f32 %v16330_v45, %v2236_v60  ;;  %v16922_v45 = vld [vmem:[%s19783_s0 + $0x128] sm:$0xff]  ;;  %v1392_v60 = vadd.f32 %v16636_v28, %v736_v18  ;;  %v738_v28 = vld [vmem:[#allocation2 + $0x30] sm:$0xff] }
 0x218   :  { %2333 = vst.msk [vmem:[#allocation2 + $0x8] sm:$0xff] %vm636_vm4, %v2237_v59  ;;  %v1955_v54 = vpop.f32.mrb[130].mxu0  ;;  %v16924_v59 = vpop.f32.mrb[128].mxu1 }
 0x219   :  { %v2238_v23 = vadd.f32 %v1955_v54, %v1390_v33  ;;  %v1957_v36 = vpop.f32.mrb[131].mxu0  ;;  %13188 = vmatmul.mubr.msk.f32.gmra.mrb[236].mxu0 %vm130_vm3, %v16492_v34  ;;  %3180 = vst [vmem:[#allocation2] sm:$0xff] %v3084_v8  ;;  %v16928_v54 = vpop.f32.mrb[129].mxu1  ;;  %13269 = vmatmul.mubr.msk.f32.gmra.mrb[234].mxu1 %vm130_vm3, %v16922_v45  ;;  %v1585_v8 = vld [vmem:[#allocation2 + $0x28] sm:$0xff] }
 0x21a   :  { %v2239_v46 = vadd.f32 %v1957_v36, %v1583_v4  ;;  %3685 = vmatprep.mubr.f32.mxu0 %v19814_v0  ;;  %19897 = vst [vmem:[#allocation65_spill] sm:$0xff] %v16928_v54  ;;  %4623 = vmatprep.mubr.f32.mxu1 %v19814_v0 }
 0x21b   :  { %v3086_v33 = vadd.f32 %v16346_v41, %v2238_v23  ;;  %v16940_v41 = vld [vmem:[%s19783_s0 + $0x130] sm:$0xff]  ;;  %v16942_v23 = vpop.f32.mrb[130].mxu1 }
 0x21c   :  { %2335 = vst.msk [vmem:[#allocation2 + $0x18] sm:$0xff] %vm636_vm4, %v2239_v46  ;;  %v1961_v34 = vpop.f32.mrb[132].mxu0  ;;  %v1394_v46 = vadd.f32 %v16654_v37, %v738_v28  ;;  %v16946_v54 = vpop.f32.mrb[131].mxu1 }
 0x21d   :  { %v2240_v36 = vadd.f32 %v1961_v34, %v1392_v60  ;;  %v1963_v4 = vpop.f32.mrb[133].mxu0  ;;  %13189 = vmatmul.mubr.msk.f32.gmra.mrb[238].mxu0 %vm130_vm3, %v16511_v14  ;;  %3182 = vst [vmem:[#allocation2 + $0x10] sm:$0xff] %v3086_v33  ;;  %13270 = vmatmul.mubr.msk.f32.gmra.mrb[236].mxu1 %vm130_vm3, %v16940_v41 }
 0x21e   :  { %v2241_v18 = vadd.f32 %v1963_v4, %v1585_v8  ;;  %3691 = vmatprep.mubr.f32.mxu0 %v19814_v0  ;;  %4629 = vmatprep.mubr.f32.mxu1 %v19814_v0  ;;  %v1587_v4 = vld [vmem:[#allocation2 + $0x38] sm:$0xff] }
 0x21f   :  { %v2429_v60 = vld [vmem:[#allocation2 + $0x8] sm:$0xff]  ;;  %v3088_v34 = vadd.f32 %v16362_v50, %v2240_v36  ;;  %v740_v50 = vld [vmem:[#allocation2 + $0x40] sm:$0xff]  ;;  %v16962_v36 = vpop.f32.mrb[132].mxu1 }
 0x220   :  { %2337 = vst.msk [vmem:[#allocation2 + $0x28] sm:$0xff] %vm636_vm4, %v2241_v18  ;;  %v3085_v14 = vadd.f32 %v16332_v61, %v2429_v60  ;;  %v1967_v33 = vpop.f32.mrb[134].mxu0  ;;  %v16960_v61 = vld [vmem:[%s19783_s0 + $0x138] sm:$0xff]  ;;  %v1396_v28 = vadd.f32 %v16672_v24, %v740_v50 }
 0x221   :  { %v2242_v8 = vadd.f32 %v1967_v33, %v1394_v46  ;;  %v1969_v53 = vpop.f32.mrb[135].mxu0  ;;  %13190 = vmatmul.mubr.msk.f32.gmra.mrb[240].mxu0 %vm130_vm3, %v16530_v52  ;;  %3184 = vst [vmem:[#allocation2 + $0x20] sm:$0xff] %v3088_v34  ;;  %v16966_v52 = vpop.f32.mrb[133].mxu1  ;;  %13271 = vmatmul.mubr.msk.f32.gmra.mrb[238].mxu1 %vm130_vm3, %v16960_v61 }
 0x222   :  { %3181 = vst.msk [vmem:[#allocation2 + $0x8] sm:$0xff] %vm636_vm4, %v3085_v14  ;;  %v2243_v37 = vadd.f32 %v1969_v53, %v1587_v4  ;;  %3697 = vmatprep.mubr.f32.mxu0 %v19814_v0  ;;  %4635 = vmatprep.mubr.f32.mxu1 %v19814_v0  ;;  %v1589_v14 = vld [vmem:[#allocation2 + $0x48] sm:$0xff] }
 0x223   :  { %v2431_v18 = vld [vmem:[#allocation2 + $0x18] sm:$0xff]  ;;  %v3090_v46 = vadd.f32 %v16380_v43, %v2242_v8  ;;  %v742_v43 = vld [vmem:[#allocation2 + $0x50] sm:$0xff]  ;;  %v16982_v8 = vpop.f32.mrb[134].mxu1 }
 0x224   :  { %2339 = vst.msk [vmem:[#allocation2 + $0x38] sm:$0xff] %vm636_vm4, %v2243_v37  ;;  %v3087_v53 = vadd.f32 %v16348_v58, %v2431_v18  ;;  %v1973_v60 = vpop.f32.mrb[136].mxu0  ;;  %v16980_v58 = vld [vmem:[%s19783_s0 + $0x140] sm:$0xff]  ;;  %v1398_v4 = vadd.f32 %v16690_v22, %v742_v43 }
 0x225   :  { %v2244_v34 = vadd.f32 %v1973_v60, %v1396_v28  ;;  %v1975_v33 = vpop.f32.mrb[137].mxu0  ;;  %13191 = vmatmul.mubr.msk.f32.gmra.mrb[242].mxu0 %vm130_vm3, %v16549_v42  ;;  %3186 = vst [vmem:[#allocation2 + $0x30] sm:$0xff] %v3090_v46  ;;  %v16986_v42 = vpop.f32.mrb[135].mxu1  ;;  %13272 = vmatmul.mubr.msk.f32.gmra.mrb[240].mxu1 %vm130_vm3, %v16980_v58 }
 0x226   :  { %3183 = vst.msk [vmem:[#allocation2 + $0x18] sm:$0xff] %vm636_vm4, %v3087_v53  ;;  %v2245_v24 = vadd.f32 %v1975_v33, %v1589_v14  ;;  %3703 = vmatprep.mubr.f32.mxu0 %v19814_v0  ;;  %4641 = vmatprep.mubr.f32.mxu1 %v19814_v0  ;;  %v1591_v53 = vld [vmem:[#allocation2 + $0x58] sm:$0xff] }
 0x227   :  { %v2433_v50 = vld [vmem:[#allocation2 + $0x28] sm:$0xff]  ;;  %v3092_v37 = vadd.f32 %v16399_v51, %v2244_v34  ;;  %v744_v51 = vld [vmem:[#allocation2 + $0x60] sm:$0xff]  ;;  %v17002_v34 = vpop.f32.mrb[136].mxu1 }
 0x228   :  { %2341 = vst.msk [vmem:[#allocation2 + $0x48] sm:$0xff] %vm636_vm4, %v2245_v24  ;;  %v3089_v28 = vadd.f32 %v16364_v27, %v2433_v50  ;;  %v1979_v18 = vpop.f32.mrb[138].mxu0  ;;  %v17000_v27 = vld [vmem:[%s19783_s0 + $0x148] sm:$0xff]  ;;  %v1400_v14 = vadd.f32 %v16708_v9, %v744_v51 }
 0x229   :  { %v2246_v46 = vadd.f32 %v1979_v18, %v1398_v4  ;;  %v1981_v60 = vpop.f32.mrb[139].mxu0  ;;  %13192 = vmatmul.mubr.msk.f32.gmra.mrb[244].mxu0 %vm130_vm3, %v16568_v35  ;;  %3188 = vst [vmem:[#allocation2 + $0x40] sm:$0xff] %v3092_v37  ;;  %v17006_v35 = vpop.f32.mrb[137].mxu1  ;;  %13273 = vmatmul.mubr.msk.f32.gmra.mrb[242].mxu1 %vm130_vm3, %v17000_v27  ;;  %v1593_v37 = vld [vmem:[#allocation2 + $0x68] sm:$0xff] }
 0x22a   :  { %3185 = vst.msk [vmem:[#allocation2 + $0x28] sm:$0xff] %vm636_vm4, %v3089_v28  ;;  %v2247_v22 = vadd.f32 %v1981_v60, %v1591_v53  ;;  %3709 = vmatprep.mubr.f32.mxu0 %v19814_v0  ;;  %4647 = vmatprep.mubr.f32.mxu1 %v19814_v0 }
 0x22b   :  { %v2435_v33 = vld [vmem:[#allocation2 + $0x38] sm:$0xff]  ;;  %v3094_v43 = vadd.f32 %v16418_v19, %v2246_v46  ;;  %v746_v19 = vld [vmem:[#allocation2 + $0x70] sm:$0xff]  ;;  %v17022_v18 = vpop.f32.mrb[138].mxu1 }
 0x22c   :  { %2343 = vst.msk [vmem:[#allocation2 + $0x58] sm:$0xff] %vm636_vm4, %v2247_v22  ;;  %v3091_v24 = vadd.f32 %v16382_v56, %v2435_v33  ;;  %v1985_v4 = vpop.f32.mrb[140].mxu0  ;;  %v17020_v56 = vld [vmem:[%s19783_s0 + $0x150] sm:$0xff]  ;;  %v1402_v46 = vadd.f32 %v16726_v32, %v746_v19  ;;  %v1595_v33 = vld [vmem:[#allocation2 + $0x78] sm:$0xff] }
 0x22d   :  { %v2248_v50 = vadd.f32 %v1985_v4, %v1400_v14  ;;  %v1987_v28 = vpop.f32.mrb[141].mxu0  ;;  %13193 = vmatmul.mubr.msk.f32.gmra.mrb[246].mxu0 %vm130_vm3, %v16587_v48  ;;  %3190 = vst [vmem:[#allocation2 + $0x50] sm:$0xff] %v3094_v43  ;;  %v17026_v48 = vpop.f32.mrb[139].mxu1  ;;  %13274 = vmatmul.mubr.msk.f32.gmra.mrb[244].mxu1 %vm130_vm3, %v17020_v56 }
 0x22e   :  { %3187 = vst.msk [vmem:[#allocation2 + $0x38] sm:$0xff] %vm636_vm4, %v3091_v24  ;;  %v2249_v9 = vadd.f32 %v1987_v28, %v1593_v37  ;;  %3715 = vmatprep.mubr.f32.mxu0 %v19814_v0  ;;  %4653 = vmatprep.mubr.f32.mxu1 %v19814_v0 }
 0x22f   :  { %v2437_v53 = vld [vmem:[#allocation2 + $0x48] sm:$0xff]  ;;  %v3096_v60 = vadd.f32 %v16437_v11, %v2248_v50  ;;  %v748_v11 = vld [vmem:[#allocation2 + $0x80] sm:$0xff]  ;;  %v17042_v24 = vpop.f32.mrb[140].mxu1 }
 0x230   :  { %2345 = vst.msk [vmem:[#allocation2 + $0x68] sm:$0xff] %vm636_vm4, %v2249_v9  ;;  %v3093_v51 = vadd.f32 %v16401_v40, %v2437_v53  ;;  %v1991_v22 = vpop.f32.mrb[142].mxu0  ;;  %v17040_v40 = vld [vmem:[%s19783_s0 + $0x158] sm:$0xff]  ;;  %v1404_v4 = vadd.f32 %v16748_v47, %v748_v11 }
 0x231   :  { %v2250_v14 = vadd.f32 %v1991_v22, %v1402_v46  ;;  %v1993_v43 = vpop.f32.mrb[143].mxu0  ;;  %13194 = vmatmul.mubr.msk.f32.gmra.mrb[248].mxu0 %vm130_vm3, %v16606_v5  ;;  %3192 = vst [vmem:[#allocation2 + $0x60] sm:$0xff] %v3096_v60  ;;  %v17046_v5 = vpop.f32.mrb[141].mxu1  ;;  %13275 = vmatmul.mubr.msk.f32.gmra.mrb[246].mxu1 %vm130_vm3, %v17040_v40  ;;  %v1597_v46 = vld [vmem:[#allocation2 + $0x88] sm:$0xff] }
 0x232   :  { %3189 = vst.msk [vmem:[#allocation2 + $0x48] sm:$0xff] %vm636_vm4, %v3093_v51  ;;  %v2251_v32 = vadd.f32 %v1993_v43, %v1595_v33  ;;  %3721 = vmatprep.mubr.f32.mxu0 %v19814_v0  ;;  %4659 = vmatprep.mubr.f32.mxu1 %v19814_v0 }
 0x233   :  { %v2439_v50 = vld [vmem:[#allocation2 + $0x58] sm:$0xff]  ;;  %v3098_v37 = vadd.f32 %v16456_v31, %v2250_v14  ;;  %v750_v31 = vld [vmem:[#allocation2 + $0x90] sm:$0xff]  ;;  %v17062_v60 = vpop.f32.mrb[142].mxu1 }
 0x234   :  { %2347 = vst.msk [vmem:[#allocation2 + $0x78] sm:$0xff] %vm636_vm4, %v2251_v32  ;;  %v3095_v28 = vadd.f32 %v16420_v6, %v2439_v50  ;;  %v1997_v19 = vpop.f32.mrb[144].mxu0  ;;  %v17060_v6 = vld [vmem:[%s19783_s0 + $0x160] sm:$0xff]  ;;  %v1406_v51 = vadd.f32 %v16766_v15, %v750_v31  ;;  %v1599_v32 = vld [vmem:[#allocation2 + $0x98] sm:$0xff]  ;;  %v1601_v31 = vld [vmem:[#allocation2 + $0xa8] sm:$0xff] }
 0x235   :  { %v2252_v9 = vadd.f32 %v1997_v19, %v1404_v4  ;;  %v1999_v53 = vpop.f32.mrb[145].mxu0  ;;  %13195 = vmatmul.mubr.msk.f32.gmra.mrb[250].mxu0 %vm130_vm3, %v16626_v44  ;;  %3194 = vst [vmem:[#allocation2 + $0x70] sm:$0xff] %v3098_v37  ;;  %v17066_v44 = vpop.f32.mrb[143].mxu1  ;;  %13276 = vmatmul.mubr.msk.f32.gmra.mrb[248].mxu1 %vm130_vm3, %v17060_v6 }
 0x236   :  { %3191 = vst.msk [vmem:[#allocation2 + $0x58] sm:$0xff] %vm636_vm4, %v3095_v28  ;;  %v2253_v47 = vadd.f32 %v1999_v53, %v1597_v46  ;;  %3727 = vmatprep.mubr.f32.mxu0 %v19814_v0  ;;  %4665 = vmatprep.mubr.f32.mxu1 %v19814_v0 }
 0x237   :  { %v2441_v22 = vld [vmem:[#allocation2 + $0x68] sm:$0xff]  ;;  %v3100_v14 = vadd.f32 %v16475_v57, %v2252_v9  ;;  %v752_v57 = vld [vmem:[#allocation2 + $0xa0] sm:$0xff]  ;;  %v17082_v50 = vpop.f32.mrb[144].mxu1 }
 0x238   :  { %2349 = vst.msk [vmem:[#allocation2 + $0x88] sm:$0xff] %vm636_vm4, %v2253_v47  ;;  %v3097_v33 = vadd.f32 %v16439_v25, %v2441_v22  ;;  %v2003_v43 = vpop.f32.mrb[146].mxu0  ;;  %v17080_v25 = vld [vmem:[%s19783_s0 + $0x168] sm:$0xff]  ;;  %v1408_v37 = vadd.f32 %v16784_v16, %v752_v57 }
 0x239   :  { %v2254_v11 = vadd.f32 %v2003_v43, %v1406_v51  ;;  %v2005_v4 = vpop.f32.mrb[147].mxu0  ;;  %13196 = vmatmul.mubr.msk.f32.gmra.mrb[252].mxu0 %vm130_vm3, %v16645_v38  ;;  %3196 = vst [vmem:[#allocation2 + $0x80] sm:$0xff] %v3100_v14  ;;  %v17086_v38 = vpop.f32.mrb[145].mxu1  ;;  %13277 = vmatmul.mubr.msk.f32.gmra.mrb[250].mxu1 %vm130_vm3, %v17080_v25 }
 0x23a   :  { %3193 = vst.msk [vmem:[#allocation2 + $0x68] sm:$0xff] %vm636_vm4, %v3097_v33  ;;  %v2255_v15 = vadd.f32 %v2005_v4, %v1599_v32  ;;  %3733 = vmatprep.mubr.f32.mxu0 %v19814_v0  ;;  %4671 = vmatprep.mubr.f32.mxu1 %v19814_v0  ;;  %v1603_v4 = vld [vmem:[#allocation2 + $0xb8] sm:$0xff] }
 0x23b   :  { %v2443_v28 = vld [vmem:[#allocation2 + $0x78] sm:$0xff]  ;;  %v3102_v19 = vadd.f32 %v16494_v7, %v2254_v11  ;;  %v754_v7 = vld [vmem:[#allocation2 + $0xb0] sm:$0xff]  ;;  %v17102_v51 = vpop.f32.mrb[146].mxu1 }
 0x23c   :  { %2351 = vst.msk [vmem:[#allocation2 + $0x98] sm:$0xff] %vm636_vm4, %v2255_v15  ;;  %v3099_v9 = vadd.f32 %v16458_v49, %v2443_v28  ;;  %v2009_v46 = vpop.f32.mrb[148].mxu0  ;;  %v17100_v49 = vld [vmem:[%s19783_s0 + $0x170] sm:$0xff]  ;;  %v1410_v22 = vadd.f32 %v16802_v10, %v754_v7  ;;  %v19898_v15 = vld [vmem:[#allocation35_spill] sm:$0xff] }
 0x23d   :  { %v2256_v53 = vadd.f32 %v2009_v46, %v1408_v37  ;;  %v2011_v47 = vpop.f32.mrb[149].mxu0  ;;  %13197 = vmatmul.mubr.msk.f32.gmra.mrb[254].mxu0 %vm130_vm3, %v16663_v2  ;;  %3198 = vst [vmem:[#allocation2 + $0x90] sm:$0xff] %v3102_v19  ;;  %v17106_v2 = vpop.f32.mrb[147].mxu1  ;;  %13278 = vmatmul.mubr.msk.f32.gmra.mrb[252].mxu1 %vm130_vm3, %v17100_v49 }
 0x23e   :  { %3195 = vst.msk [vmem:[#allocation2 + $0x78] sm:$0xff] %vm636_vm4, %v3099_v9  ;;  %v2257_v16 = vadd.f32 %v2011_v47, %v1601_v31  ;;  %3739 = vmatprep.mubr.f32.mxu0 %v19814_v0  ;;  %4677 = vmatprep.mubr.f32.mxu1 %v19814_v0  ;;  %v19899_v9 = vld [vmem:[#allocation18_spill] sm:$0xff]  ;;  %v19900_v31 = vld [vmem:[#allocation16_spill] sm:$0xff] }
 0x23f   :  { %v2445_v14 = vld [vmem:[#allocation2 + $0x88] sm:$0xff]  ;;  %v3104_v33 = vadd.f32 %v16513_v63, %v2256_v53  ;;  %v756_v63 = vld [vmem:[#allocation2 + $0xc0] sm:$0xff]  ;;  %v17122_v37 = vpop.f32.mrb[148].mxu1 }
 0x240   :  { %2353 = vst.msk [vmem:[#allocation2 + $0xa8] sm:$0xff] %vm636_vm4, %v2257_v16  ;;  %v3101_v43 = vadd.f32 %v16477_v29, %v2445_v14  ;;  %v2015_v11 = vpop.f32.mrb[150].mxu0  ;;  %v17120_v29 = vld [vmem:[%s19783_s0 + $0x178] sm:$0xff]  ;;  %v1412_v28 = vadd.f32 %v16822_v3, %v756_v63  ;;  %v17126_v53 = vpop.f32.mrb[149].mxu1  ;;  %v6622_v16 = vld [vmem:[#allocation8 + $0x208] sm:$0xff]  ;;  %v4878_v14 = vld [vmem:[%s19783_s0 + $0x20] sm:$0xff] }
 0x241   :  { %v2258_v32 = vadd.f32 %v2015_v11, %v1410_v22  ;;  %v2017_v57 = vpop.f32.mrb[151].mxu0  ;;  %13198 = vmatmul.mubr.msk.f32.gmra.mrb[0].mxu0 %vm130_vm3, %v19898_v15  ;;  %3200 = vst [vmem:[#allocation2 + $0xa0] sm:$0xff] %v3104_v33  ;;  %13279 = vmatmul.mubr.msk.f32.gmra.mrb[254].mxu1 %vm130_vm3, %v17120_v29  ;;  %v6624_v22 = vld [vmem:[#allocation8 + $0x218] sm:$0xff]  ;;  %v1605_v33 = vld [vmem:[#allocation2 + $0xc8] sm:$0xff] }
 0x242   :  { %3197 = vst.msk [vmem:[#allocation2 + $0x88] sm:$0xff] %vm636_vm4, %v3101_v43  ;;  %v2259_v10 = vadd.f32 %v2017_v57, %v1603_v4  ;;  %3745 = vmatprep.mubr.f32.mxu0 %v19814_v0  ;;  %5995 = vmatprep.mubr.f32.mxu1 %v19814_v0  ;;  %v19901_v11 = vld [vmem:[#allocation38_spill] sm:$0xff]  ;;  %v758_v4 = vld [vmem:[#allocation2 + $0xd0] sm:$0xff] }
 0x243   :  { %v2447_v19 = vld [vmem:[#allocation2 + $0x98] sm:$0xff]  ;;  %v3106_v46 = vadd.f32 %v19899_v9, %v2258_v32  ;;  %v14015_v32 = vpack.c.bf16 %v6624_v22, %v6622_v16  ;;  %v17140_v15 = vpop.f32.mrb[150].mxu1  ;;  %v1414_v63 = vadd.f32 %v16842_v13, %v758_v4 }
 0x244   :  { %2355 = vst.msk [vmem:[#allocation2 + $0xb8] sm:$0xff] %vm636_vm4, %v2259_v10  ;;  %v3103_v47 = vadd.f32 %v19900_v31, %v2447_v19  ;;  %v2021_v7 = vpop.f32.mrb[152].mxu0  ;;  %v19902_v19 = vld [vmem:[#allocation20_spill] sm:$0xff]  ;;  %v17144_v9 = vpop.f32.mrb[151].mxu1  ;;  %v1607_v16 = vld [vmem:[#allocation2 + $0xd8] sm:$0xff] }
 0x245   :  { %v2260_v3 = vadd.f32 %v2021_v7, %v1412_v28  ;;  %v2023_v43 = vpop.f32.mrb[153].mxu0  ;;  %13199 = vmatmul.mubr.msk.f32.gmra.mrb[2].mxu0 %vm130_vm3, %v19901_v11  ;;  %3202 = vst [vmem:[#allocation2 + $0xb0] sm:$0xff] %v3106_v46  ;;  %14016 = vmatprep.subr.bf16.mxu0 %v14015_v32  ;;  %19903 = vst [vmem:[#allocation35_spill] sm:$0xff] %v17144_v9  ;;  %v19904_v46 = vld [vmem:[#allocation17_spill] sm:$0xff]  ;;  %v4879_v7 = vld [vmem:[%s19783_s0 + $0x28] sm:$0xff] }
 0x246   :  { %3199 = vst.msk [vmem:[#allocation2 + $0x98] sm:$0xff] %vm636_vm4, %v3103_v47  ;;  %v2261_v57 = vadd.f32 %v2023_v43, %v1605_v33  ;;  %3751 = vmatprep.mubr.f32.mxu0 %v19814_v0  ;;  %13332 = vmatmul.mubr.msk.f32.vlgmr.msra.gmra.mrb[0].mxu1 %vm130_vm3, %v4878_v14  ;;  %v760_v33 = vld [vmem:[#allocation2 + $0xe0] sm:$0xff]  ;;  %v19906_v4 = vld [vmem:[#allocation22_spill] sm:$0xff] }
 0x247   :  { %v2449_v10 = vld [vmem:[#allocation2 + $0xa8] sm:$0xff]  ;;  %v3108_v28 = vadd.f32 %v19902_v19, %v2260_v3  ;;  %6001 = vmatprep.mubr.f32.mxu1 %v19814_v0  ;;  %v19905_v3 = vld [vmem:[#allocation41_spill] sm:$0xff]  ;;  %v17157_v43 = vpop.f32.mrb[152].mxu1  ;;  %v1416_v11 = vadd.f32 %v16860_v17, %v760_v33  ;;  %v7469_v33 = vld [vmem:[#allocation8 + $0x240] sm:$0xff] }
 0x248   :  { %2357 = vst.msk [vmem:[#allocation2 + $0xc8] sm:$0xff] %vm636_vm4, %v2261_v57  ;;  %v3105_v31 = vadd.f32 %v19904_v46, %v2449_v10  ;;  %v2027_v47 = vpop.f32.mrb[154].mxu0  ;;  %v19908_v10 = vld [vmem:[#allocation19_spill] sm:$0xff]  ;;  %v4880_v46 = vld [vmem:[%s19783_s0 + $0x30] sm:$0xff] }
 0x249   :  { %v2262_v13 = vadd.f32 %v2027_v47, %v1414_v63  ;;  %v2029_v22 = vpop.f32.mrb[155].mxu0  ;;  %13200 = vmatmul.mubr.msk.f32.gmra.mrb[4].mxu0 %vm130_vm3, %v19905_v3  ;;  %3204 = vst [vmem:[#allocation2 + $0xc0] sm:$0xff] %v3108_v28  ;;  %v17161_v63 = vpop.f32.mrb[153].mxu1  ;;  %v1609_v47 = vld [vmem:[#allocation2 + $0xe8] sm:$0xff]  ;;  %v7472_v3 = vld [vmem:[#allocation8 + $0x258] sm:$0xff] }
 0x24a   :  { %3201 = vst.msk [vmem:[#allocation2 + $0xa8] sm:$0xff] %vm636_vm4, %v3105_v31  ;;  %v2263_v14 = vadd.f32 %v2029_v22, %v1607_v16  ;;  %3757 = vmatprep.mubr.f32.mxu0 %v19814_v0  ;;  %19907 = vst [vmem:[#allocation18_spill] sm:$0xff] %v17161_v63  ;;  %13333 = vmatmul.mubr.msk.f32.gmra.mrb[2].mxu1 %vm130_vm3, %v4879_v7  ;;  %v762_v31 = vld [vmem:[#allocation2 + $0xf0] sm:$0xff]  ;;  %v7470_v22 = vld [vmem:[#allocation8 + $0x248] sm:$0xff] }
 0x24b   :  { %v2451_v32 = vld [vmem:[#allocation2 + $0xb8] sm:$0xff]  ;;  %v3110_v57 = vadd.f32 %v19906_v4, %v2262_v13  ;;  %6007 = vmatprep.mubr.f32.mxu1 %v19814_v0  ;;  %v19909_v13 = vld [vmem:[#allocation44_spill] sm:$0xff]  ;;  %v7471_v63 = vld [vmem:[#allocation8 + $0x250] sm:$0xff] }
 0x24c   :  { %2359 = vst.msk [vmem:[#allocation2 + $0xd8] sm:$0xff] %vm636_vm4, %v2263_v14  ;;  %v3107_v19 = vadd.f32 %v19908_v10, %v2451_v32  ;;  %v2033_v28 = vpop.f32.mrb[156].mxu0  ;;  %v17174_v14 = vpop.f32.mrb[154].mxu1  ;;  %v1418_v32 = vadd.f32 %v16878_v1, %v762_v31  ;;  %v1611_v31 = vld [vmem:[#allocation2 + $0xf8] sm:$0xff] }
 0x24d   :  { %v2264_v17 = vadd.f32 %v2033_v28, %v1416_v11  ;;  %v2035_v16 = vpop.f32.mrb[157].mxu0  ;;  %13201 = vmatmul.mubr.msk.f32.gmra.mrb[6].mxu0 %vm130_vm3, %v19909_v13  ;;  %3206 = vst [vmem:[#allocation2 + $0xd0] sm:$0xff] %v3110_v57  ;;  %v19910_v11 = vld [vmem:[#allocation23_spill] sm:$0xff]  ;;  %v14025_v28 = vpack.c.bf16 %v7472_v3, %v7470_v22  ;;  %v17178_v9 = vpop.f32.mrb[155].mxu1  ;;  %v19911_v57 = vld [vmem:[#allocation21_spill] sm:$0xff]  ;;  %v4881_v13 = vld [vmem:[%s19783_s0 + $0x38] sm:$0xff] }
 0x24e   :  { %3203 = vst.msk [vmem:[#allocation2 + $0xb8] sm:$0xff] %vm636_vm4, %v3107_v19  ;;  %v2265_v7 = vadd.f32 %v2035_v16, %v1609_v47  ;;  %3763 = vmatprep.mubr.f32.mxu0 %v19814_v0  ;;  %13334 = vmatmul.mubr.msk.f32.gmra.mrb[4].mxu1 %vm130_vm3, %v4880_v46  ;;  %v14027_v16 = vpack.c.bf16 %v7471_v63, %v7469_v33  ;;  %v19912_v22 = vld [vmem:[#allocation47_spill] sm:$0xff]  ;;  %v19913_v3 = vld [vmem:[#allocation24_spill] sm:$0xff] }
 0x24f   :  { %v2453_v4 = vld [vmem:[#allocation2 + $0xc8] sm:$0xff]  ;;  %v3112_v10 = vadd.f32 %v19910_v11, %v2264_v17  ;;  %6013 = vmatprep.mubr.f32.mxu1 %v19814_v0  ;;  %14026 = vmatprep.subr.bf16.mxu1 %v14025_v28  ;;  %v17191_v63 = vpop.f32.mrb[156].mxu1 }
 0x250   :  { %2361 = vst.msk [vmem:[#allocation2 + $0xe8] sm:$0xff] %vm636_vm4, %v2265_v7  ;;  %v3109_v19 = vadd.f32 %v19911_v57, %v2453_v4  ;;  %v2039_v47 = vpop.f32.mrb[158].mxu0  ;;  %14028 = vmatpush1.bf16.msra.mxu1 %v14027_v16  ;;  %v17194_v4 = vpop.f32.mrb[157].mxu1  ;;  %v4882_v57 = vld [vmem:[%s19783_s0 + $0x40] sm:$0xff] }
 0x251   :  { %v2266_v1 = vadd.f32 %v2039_v47, %v1418_v32  ;;  %v2041_v17 = vpop.f32.mrb[159].mxu0  ;;  %13202 = vmatmul.mubr.msk.f32.gmra.mrb[8].mxu0 %vm130_vm3, %v19912_v22  ;;  %3208 = vst [vmem:[#allocation2 + $0xe0] sm:$0xff] %v3112_v10  ;;  %v19914_v32 = vld [vmem:[#allocation28_spill] sm:$0xff]  ;;  %v1612_v10 = vld [vmem:[#allocation2 + $0x100] sm:$0xff]  ;;  %v19916_v22 = vld [vmem:[#allocation25_spill] sm:$0xff] }
 0x252   :  { %3205 = vst.msk [vmem:[#allocation2 + $0xc8] sm:$0xff] %vm636_vm4, %v3109_v19  ;;  %v2267_v46 = vadd.f32 %v2041_v17, %v1611_v31  ;;  %3769 = vmatprep.mubr.f32.mxu0 %v19814_v0  ;;  %13335 = vmatmul.mubr.msk.f32.gmra.mrb[6].mxu1 %vm130_vm3, %v4881_v13  ;;  %v1613_v47 = vld [vmem:[#allocation2 + $0x108] sm:$0xff] }
 0x253   :  { %v2455_v7 = vld [vmem:[#allocation2 + $0xd8] sm:$0xff]  ;;  %v3114_v33 = vadd.f32 %v19913_v3, %v2266_v1  ;;  %6019 = vmatprep.mubr.f32.mxu1 %v19814_v0  ;;  %v17207_v31 = vpop.f32.mrb[158].mxu1 }
 0x254   :  { %2363 = vst.msk [vmem:[#allocation2 + $0xf8] sm:$0xff] %vm636_vm4, %v2267_v46  ;;  %v3111_v11 = vadd.f32 %v19914_v32, %v2455_v7  ;;  %v2045_v28 = vpop.f32.mrb[160].mxu0  ;;  %v19915_v1 = vld [vmem:[#allocation50_spill] sm:$0xff]  ;;  %v19917_v7 = vld [vmem:[#allocation29_spill] sm:$0xff] }
 0x255   :  { %v2268_v19 = vadd.f32 %v2045_v28, %v1612_v10  ;;  %v2047_v16 = vpop.f32.mrb[161].mxu0  ;;  %13203 = vmatmul.mubr.msk.f32.gmra.mrb[10].mxu0 %vm130_vm3, %v19915_v1  ;;  %3210 = vst [vmem:[#allocation2 + $0xf0] sm:$0xff] %v3114_v33  ;;  %v1614_v32 = vld [vmem:[#allocation2 + $0x110] sm:$0xff]  ;;  %v4883_v33 = vld [vmem:[%s19783_s0 + $0x48] sm:$0xff]  ;;  %v1615_v28 = vld [vmem:[#allocation2 + $0x118] sm:$0xff] }
 0x256   :  { %3207 = vst.msk [vmem:[#allocation2 + $0xd8] sm:$0xff] %vm636_vm4, %v3111_v11  ;;  %v2269_v13 = vadd.f32 %v2047_v16, %v1613_v47  ;;  %3775 = vmatprep.mubr.f32.mxu0 %v19814_v0  ;;  %13336 = vmatmul.mubr.msk.f32.gmra.mrb[8].mxu1 %vm130_vm3, %v4882_v57  ;;  %v19918_v16 = vld [vmem:[#allocation26_spill] sm:$0xff] }
 0x257   :  { %v2457_v17 = vld [vmem:[#allocation2 + $0xe8] sm:$0xff]  ;;  %v3116_v46 = vadd.f32 %v19916_v22, %v2268_v19  ;;  %6025 = vmatprep.mubr.f32.mxu1 %v19814_v0 }
 0x258   :  { %2365 = vst.msk [vmem:[#allocation2 + $0x108] sm:$0xff] %vm636_vm4, %v2269_v13  ;;  %v3113_v3 = vadd.f32 %v19917_v7, %v2457_v17  ;;  %v2051_v10 = vpop.f32.mrb[162].mxu0  ;;  %v17222_v13 = vpop.f32.mrb[159].mxu1  ;;  %v19919_v17 = vld [vmem:[#allocation30_spill] sm:$0xff]  ;;  %v1616_v7 = vld [vmem:[#allocation2 + $0x120] sm:$0xff] }
 0x259   :  { %v2270_v11 = vadd.f32 %v2051_v10, %v1614_v32  ;;  %v2053_v47 = vpop.f32.mrb[163].mxu0  ;;  %13204 = vmatmul.mubr.msk.f32.gmra.mrb[12].mxu0 %vm130_vm3, %v16793_v30  ;;  %3212 = vst [vmem:[#allocation2 + $0x100] sm:$0xff] %v3116_v46  ;;  %v4884_v30 = vld [vmem:[%s19783_s0 + $0x50] sm:$0xff] }
 0x25a   :  { %3209 = vst.msk [vmem:[#allocation2 + $0xe8] sm:$0xff] %vm636_vm4, %v3113_v3  ;;  %v2271_v57 = vadd.f32 %v2053_v47, %v1615_v28  ;;  %3781 = vmatprep.mubr.f32.mxu0 %v19814_v0  ;;  %13337 = vmatmul.mubr.msk.f32.gmra.mrb[10].mxu1 %vm130_vm3, %v4883_v33  ;;  %v1617_v3 = vld [vmem:[#allocation2 + $0x128] sm:$0xff]  ;;  %v19920_v47 = vld [vmem:[#allocation33_spill] sm:$0xff] }
 0x25b   :  { %v2459_v19 = vld [vmem:[#allocation2 + $0xf8] sm:$0xff]  ;;  %v3118_v1 = vadd.f32 %v19918_v16, %v2270_v11  ;;  %6031 = vmatprep.mubr.f32.mxu1 %v19814_v0  ;;  %v4397_v11 = vpop.f32.mrb[160].mxu1  ;;  %v19921_v16 = vld [vmem:[#allocation31_spill] sm:$0xff] }
 0x25c   :  { %2367 = vst.msk [vmem:[#allocation2 + $0x118] sm:$0xff] %vm636_vm4, %v2271_v57  ;;  %v3115_v22 = vadd.f32 %v19919_v17, %v2459_v19  ;;  %v2057_v32 = vpop.f32.mrb[164].mxu0  ;;  %4684 = vst [vmem:[#allocation3] sm:$0xff] %v4397_v11  ;;  %v4399_v19 = vpop.f32.mrb[161].mxu1 }
 0x25d   :  { %v2272_v46 = vadd.f32 %v2057_v32, %v1616_v7  ;;  %v2059_v10 = vpop.f32.mrb[165].mxu0  ;;  %13205 = vmatmul.mubr.msk.f32.gmra.mrb[14].mxu0 %vm130_vm3, %v16811_v26  ;;  %3214 = vst [vmem:[#allocation2 + $0x110] sm:$0xff] %v3118_v1  ;;  %v1618_v7 = vld [vmem:[#allocation2 + $0x130] sm:$0xff]  ;;  %4685 = vst.msk [vmem:[#allocation3 + $0x8] sm:$0xff] %vm636_vm4, %v4399_v19  ;;  %v4885_v1 = vld [vmem:[%s19783_s0 + $0x58] sm:$0xff] }
 0x25e   :  { %3211 = vst.msk [vmem:[#allocation2 + $0xf8] sm:$0xff] %vm636_vm4, %v3115_v22  ;;  %v2273_v33 = vadd.f32 %v2059_v10, %v1617_v3  ;;  %3787 = vmatprep.mubr.f32.mxu0 %v19814_v0  ;;  %13338 = vmatmul.mubr.msk.f32.gmra.mrb[12].mxu1 %vm130_vm3, %v4884_v30  ;;  %v1619_v32 = vld [vmem:[#allocation2 + $0x138] sm:$0xff]  ;;  %v4403_v3 = vpop.f32.mrb[162].mxu1 }
 0x25f   :  { %v2461_v28 = vld [vmem:[#allocation2 + $0x108] sm:$0xff]  ;;  %v3120_v57 = vadd.f32 %v19920_v47, %v2272_v46  ;;  %6037 = vmatprep.mubr.f32.mxu1 %v19814_v0  ;;  %4686 = vst [vmem:[#allocation3 + $0x10] sm:$0xff] %v4403_v3 }
 0x260   :  { %2369 = vst.msk [vmem:[#allocation2 + $0x128] sm:$0xff] %vm636_vm4, %v2273_v33  ;;  %v3117_v17 = vadd.f32 %v19921_v16, %v2461_v28  ;;  %v2063_v26 = vpop.f32.mrb[166].mxu0  ;;  %v19922_v33 = vld [vmem:[#allocation36_spill] sm:$0xff]  ;;  %v4405_v28 = vpop.f32.mrb[163].mxu1  ;;  %v1620_v16 = vld [vmem:[#allocation2 + $0x140] sm:$0xff] }
 0x261   :  { %v2274_v22 = vadd.f32 %v2063_v26, %v1618_v7  ;;  %v2065_v46 = vpop.f32.mrb[167].mxu0  ;;  %13206 = vmatmul.mubr.msk.f32.gmra.mrb[16].mxu0 %vm130_vm3, %v16831_v55  ;;  %3216 = vst [vmem:[#allocation2 + $0x120] sm:$0xff] %v3120_v57  ;;  %v19923_v47 = vld [vmem:[#allocation32_spill] sm:$0xff]  ;;  %4687 = vst.msk [vmem:[#allocation3 + $0x18] sm:$0xff] %vm636_vm4, %v4405_v28  ;;  %v4886_v57 = vld [vmem:[%s19783_s0 + $0x60] sm:$0xff] }
 0x262   :  { %3213 = vst.msk [vmem:[#allocation2 + $0x108] sm:$0xff] %vm636_vm4, %v3117_v17  ;;  %v2275_v30 = vadd.f32 %v2065_v46, %v1619_v32  ;;  %3793 = vmatprep.mubr.f32.mxu0 %v19814_v0  ;;  %13339 = vmatmul.mubr.msk.f32.gmra.mrb[14].mxu1 %vm130_vm3, %v4885_v1  ;;  %v1621_v7 = vld [vmem:[#allocation2 + $0x148] sm:$0xff]  ;;  %v19924_v46 = vld [vmem:[#allocation39_spill] sm:$0xff]  ;;  %v1622_v28 = vld [vmem:[#allocation2 + $0x150] sm:$0xff] }
 0x263   :  { %v2463_v10 = vld [vmem:[#allocation2 + $0x118] sm:$0xff]  ;;  %v3122_v11 = vadd.f32 %v19922_v33, %v2274_v22  ;;  %6043 = vmatprep.mubr.f32.mxu1 %v19814_v0  ;;  %v4409_v22 = vpop.f32.mrb[164].mxu1 }
 0x264   :  { %2371 = vst.msk [vmem:[#allocation2 + $0x138] sm:$0xff] %vm636_vm4, %v2275_v30  ;;  %v3119_v19 = vadd.f32 %v19923_v47, %v2463_v10  ;;  %v2069_v55 = vpop.f32.mrb[168].mxu0  ;;  %4688 = vst [vmem:[#allocation3 + $0x20] sm:$0xff] %v4409_v22  ;;  %v4411_v3 = vpop.f32.mrb[165].mxu1  ;;  %v19925_v10 = vld [vmem:[#allocation34_spill] sm:$0xff]  ;;  %v19927_v22 = vld [vmem:[#allocation37_spill] sm:$0xff] }
 0x265   :  { %v2276_v17 = vadd.f32 %v2069_v55, %v1620_v16  ;;  %v2071_v26 = vpop.f32.mrb[169].mxu0  ;;  %13207 = vmatmul.mubr.msk.f32.gmra.mrb[18].mxu0 %vm130_vm3, %v16851_v62  ;;  %3218 = vst [vmem:[#allocation2 + $0x130] sm:$0xff] %v3122_v11  ;;  %4689 = vst.msk [vmem:[#allocation3 + $0x28] sm:$0xff] %vm636_vm4, %v4411_v3  ;;  %v4887_v11 = vld [vmem:[%s19783_s0 + $0x68] sm:$0xff] }
 0x266   :  { %3215 = vst.msk [vmem:[#allocation2 + $0x118] sm:$0xff] %vm636_vm4, %v3119_v19  ;;  %v2277_v1 = vadd.f32 %v2071_v26, %v1621_v7  ;;  %3799 = vmatprep.mubr.f32.mxu0 %v19814_v0  ;;  %13340 = vmatmul.mubr.msk.f32.gmra.mrb[16].mxu1 %vm130_vm3, %v4886_v57  ;;  %v1623_v19 = vld [vmem:[#allocation2 + $0x158] sm:$0xff]  ;;  %v4415_v57 = vpop.f32.mrb[166].mxu1 }
 0x267   :  { %v2465_v32 = vld [vmem:[#allocation2 + $0x128] sm:$0xff]  ;;  %v3124_v30 = vadd.f32 %v19924_v46, %v2276_v17  ;;  %6049 = vmatprep.mubr.f32.mxu1 %v19814_v0  ;;  %v19926_v7 = vld [vmem:[#allocation42_spill] sm:$0xff]  ;;  %4690 = vst [vmem:[#allocation3 + $0x30] sm:$0xff] %v4415_v57  ;;  %v1624_v46 = vld [vmem:[#allocation2 + $0x160] sm:$0xff] }
 0x268   :  { %2373 = vst.msk [vmem:[#allocation2 + $0x148] sm:$0xff] %vm636_vm4, %v2277_v1  ;;  %v3121_v33 = vadd.f32 %v19925_v10, %v2465_v32  ;;  %v2075_v62 = vpop.f32.mrb[170].mxu0  ;;  %v4417_v1 = vpop.f32.mrb[167].mxu1  ;;  %v1625_v10 = vld [vmem:[#allocation2 + $0x168] sm:$0xff] }
 0x269   :  { %v2278_v47 = vadd.f32 %v2075_v62, %v1622_v28  ;;  %v2077_v16 = vpop.f32.mrb[171].mxu0  ;;  %13208 = vmatmul.mubr.msk.f32.gmra.mrb[20].mxu0 %vm130_vm3, %v16869_v12  ;;  %3220 = vst [vmem:[#allocation2 + $0x140] sm:$0xff] %v3124_v30  ;;  %4691 = vst.msk [vmem:[#allocation3 + $0x38] sm:$0xff] %vm636_vm4, %v4417_v1  ;;  %v4888_v30 = vld [vmem:[%s19783_s0 + $0x70] sm:$0xff]  ;;  %v4421_v62 = vpop.f32.mrb[168].mxu1  ;;  %v1627_v1 = vld [vmem:[#allocation2 + $0x178] sm:$0xff] }
 0x26a   :  { %3217 = vst.msk [vmem:[#allocation2 + $0x128] sm:$0xff] %vm636_vm4, %v3121_v33  ;;  %v2279_v55 = vadd.f32 %v2077_v16, %v1623_v19  ;;  %3805 = vmatprep.mubr.f32.mxu0 %v19814_v0  ;;  %13341 = vmatmul.mubr.msk.f32.gmra.mrb[18].mxu1 %vm130_vm3, %v4887_v11  ;;  %4692 = vst [vmem:[#allocation3 + $0x40] sm:$0xff] %v4421_v62  ;;  %v4423_v16 = vpop.f32.mrb[169].mxu1  ;;  %v1628_v62 = vld [vmem:[#allocation2 + $0x180] sm:$0xff] }
 0x26b   :  { %v2467_v17 = vld [vmem:[#allocation2 + $0x138] sm:$0xff]  ;;  %v3126_v26 = vadd.f32 %v19926_v7, %v2278_v47  ;;  %6055 = vmatprep.mubr.f32.mxu1 %v19814_v0  ;;  %v19928_v47 = vld [vmem:[#allocation45_spill] sm:$0xff]  ;;  %4693 = vst.msk [vmem:[#allocation3 + $0x48] sm:$0xff] %vm636_vm4, %v4423_v16 }
 0x26c   :  { %2375 = vst.msk [vmem:[#allocation2 + $0x158] sm:$0xff] %vm636_vm4, %v2279_v55  ;;  %v3123_v32 = vadd.f32 %v19927_v22, %v2467_v17  ;;  %v2081_v12 = vpop.f32.mrb[172].mxu0  ;;  %v19929_v55 = vld [vmem:[#allocation40_spill] sm:$0xff]  ;;  %v1626_v17 = vld [vmem:[#allocation2 + $0x170] sm:$0xff]  ;;  %v4889_v7 = vld [vmem:[%s19783_s0 + $0x78] sm:$0xff] }
 0x26d   :  { %v2280_v3 = vadd.f32 %v2081_v12, %v1624_v46  ;;  %v2083_v33 = vpop.f32.mrb[173].mxu0  ;;  %13209 = vmatmul.mubr.msk.f32.gmra.mrb[22].mxu0 %vm130_vm3, %v16887_v21  ;;  %3222 = vst [vmem:[#allocation2 + $0x150] sm:$0xff] %v3126_v26  ;;  %v4427_v46 = vpop.f32.mrb[170].mxu1 }
 0x26e   :  { %3219 = vst.msk [vmem:[#allocation2 + $0x138] sm:$0xff] %vm636_vm4, %v3123_v32  ;;  %v2281_v28 = vadd.f32 %v2083_v33, %v1625_v10  ;;  %3811 = vmatprep.mubr.f32.mxu0 %v19814_v0  ;;  %13342 = vmatmul.mubr.msk.f32.gmra.mrb[20].mxu1 %vm130_vm3, %v4888_v30  ;;  %v19930_v30 = vld [vmem:[#allocation48_spill] sm:$0xff]  ;;  %4694 = vst [vmem:[#allocation3 + $0x50] sm:$0xff] %v4427_v46  ;;  %v4429_v10 = vpop.f32.mrb[171].mxu1  ;;  %v19931_v33 = vld [vmem:[#allocation43_spill] sm:$0xff] }
 0x26f   :  { %v2469_v11 = vld [vmem:[#allocation2 + $0x148] sm:$0xff]  ;;  %v3128_v19 = vadd.f32 %v19928_v47, %v2280_v3  ;;  %6061 = vmatprep.mubr.f32.mxu1 %v19814_v0  ;;  %4695 = vst.msk [vmem:[#allocation3 + $0x58] sm:$0xff] %vm636_vm4, %v4429_v10 }
 0x270   :  { %2377 = vst.msk [vmem:[#allocation2 + $0x168] sm:$0xff] %vm636_vm4, %v2281_v28  ;;  %v3125_v57 = vadd.f32 %v19929_v55, %v2469_v11  ;;  %v2087_v21 = vpop.f32.mrb[174].mxu0  ;;  %v4890_v11 = vld [vmem:[%s19783_s0 + $0x80] sm:$0xff]  ;;  %v4891_v46 = vld [vmem:[%s19783_s0 + $0x88] sm:$0xff] }
 0x271   :  { %v2282_v26 = vadd.f32 %v2087_v21, %v1626_v17  ;;  %v2089_v22 = vpop.f32.mrb[175].mxu0  ;;  %13210 = vmatmul.mubr.msk.f32.gmra.mrb[24].mxu0 %vm130_vm3, %v16904_v39  ;;  %3224 = vst [vmem:[#allocation2 + $0x160] sm:$0xff] %v3128_v19  ;;  %v1629_v19 = vld [vmem:[#allocation2 + $0x188] sm:$0xff]  ;;  %v19932_v21 = vld [vmem:[#allocation51_spill] sm:$0xff] }
 0x272   :  { %3221 = vst.msk [vmem:[#allocation2 + $0x148] sm:$0xff] %vm636_vm4, %v3125_v57  ;;  %v2283_v32 = vadd.f32 %v2089_v22, %v1627_v1  ;;  %3817 = vmatprep.mubr.f32.mxu0 %v19814_v0  ;;  %13343 = vmatmul.mubr.msk.f32.gmra.mrb[22].mxu1 %vm130_vm3, %v4889_v7  ;;  %v4433_v57 = vpop.f32.mrb[172].mxu1  ;;  %v19933_v1 = vld [vmem:[#allocation46_spill] sm:$0xff] }
 0x273   :  { %v2471_v12 = vld [vmem:[#allocation2 + $0x158] sm:$0xff]  ;;  %v3130_v3 = vadd.f32 %v19930_v30, %v2282_v26  ;;  %6067 = vmatprep.mubr.f32.mxu1 %v19814_v0  ;;  %4696 = vst [vmem:[#allocation3 + $0x60] sm:$0xff] %v4433_v57  ;;  %v4435_v26 = vpop.f32.mrb[173].mxu1 }
 0x274   :  { %2379 = vst.msk [vmem:[#allocation2 + $0x178] sm:$0xff] %vm636_vm4, %v2283_v32  ;;  %v3127_v28 = vadd.f32 %v19931_v33, %v2471_v12  ;;  %v2093_v39 = vpop.f32.mrb[176].mxu0  ;;  %v1630_v32 = vld [vmem:[#allocation2 + $0x190] sm:$0xff]  ;;  %4697 = vst.msk [vmem:[#allocation3 + $0x68] sm:$0xff] %vm636_vm4, %v4435_v26  ;;  %v1631_v30 = vld [vmem:[#allocation2 + $0x198] sm:$0xff] }
 0x275   :  { %v2284_v47 = vadd.f32 %v2093_v39, %v1628_v62  ;;  %v2095_v16 = vpop.f32.mrb[177].mxu0  ;;  %13211 = vmatmul.mubr.msk.f32.gmra.mrb[26].mxu0 %vm130_vm3, %v16922_v45  ;;  %3226 = vst [vmem:[#allocation2 + $0x170] sm:$0xff] %v3130_v3  ;;  %v4439_v39 = vpop.f32.mrb[174].mxu1 }
 0x276   :  { %3223 = vst.msk [vmem:[#allocation2 + $0x158] sm:$0xff] %vm636_vm4, %v3127_v28  ;;  %v2285_v55 = vadd.f32 %v2095_v16, %v1629_v19  ;;  %3823 = vmatprep.mubr.f32.mxu0 %v19814_v0  ;;  %13344 = vmatmul.mubr.msk.f32.gmra.mrb[24].mxu1 %vm130_vm3, %v4890_v11  ;;  %v19934_v28 = vld [vmem:[#allocation27_spill] sm:$0xff]  ;;  %v19935_v11 = vld [vmem:[#allocation49_spill] sm:$0xff]  ;;  %4698 = vst [vmem:[#allocation3 + $0x70] sm:$0xff] %v4439_v39 }
 0x277   :  { %v2473_v17 = vld [vmem:[#allocation2 + $0x168] sm:$0xff]  ;;  %v3132_v7 = vadd.f32 %v19932_v21, %v2284_v47  ;;  %6073 = vmatprep.mubr.f32.mxu1 %v19814_v0  ;;  %v1632_v19 = vld [vmem:[#allocation2 + $0x1a0] sm:$0xff] }
 0x278   :  { %2381 = vst.msk [vmem:[#allocation2 + $0x188] sm:$0xff] %vm636_vm4, %v2285_v55  ;;  %v3129_v22 = vadd.f32 %v19933_v1, %v2473_v17  ;;  %v2099_v45 = vpop.f32.mrb[178].mxu0  ;;  %v4892_v55 = vld [vmem:[%s19783_s0 + $0x90] sm:$0xff]  ;;  %v1633_v17 = vld [vmem:[#allocation2 + $0x1a8] sm:$0xff]  ;;  %v19936_v1 = vld [vmem:[#allocation54_spill] sm:$0xff] }
 0x279   :  { %v2286_v12 = vadd.f32 %v2099_v45, %v1630_v32  ;;  %v2101_v3 = vpop.f32.mrb[179].mxu0  ;;  %13212 = vmatmul.mubr.msk.f32.gmra.mrb[28].mxu0 %vm130_vm3, %v16940_v41  ;;  %3228 = vst [vmem:[#allocation2 + $0x180] sm:$0xff] %v3132_v7  ;;  %v4441_v41 = vpop.f32.mrb[175].mxu1  ;;  %v19937_v45 = vld [vmem:[#allocation52_spill] sm:$0xff] }
 0x27a   :  { %3225 = vst.msk [vmem:[#allocation2 + $0x168] sm:$0xff] %vm636_vm4, %v3129_v22  ;;  %v2287_v10 = vadd.f32 %v2101_v3, %v1631_v30  ;;  %3829 = vmatprep.mubr.f32.mxu0 %v19814_v0  ;;  %13345 = vmatmul.mubr.msk.f32.gmra.mrb[26].mxu1 %vm130_vm3, %v4891_v46  ;;  %4699 = vst.msk [vmem:[#allocation3 + $0x78] sm:$0xff] %vm636_vm4, %v4441_v41  ;;  %v4445_v32 = vpop.f32.mrb[176].mxu1  ;;  %v4893_v3 = vld [vmem:[%s19783_s0 + $0x98] sm:$0xff] }
 0x27b   :  { %v2475_v33 = vld [vmem:[#allocation2 + $0x178] sm:$0xff]  ;;  %v3134_v62 = vadd.f32 %v19934_v28, %v2286_v12  ;;  %6079 = vmatprep.mubr.f32.mxu1 %v19814_v0  ;;  %v1634_v12 = vld [vmem:[#allocation2 + $0x1b0] sm:$0xff]  ;;  %4700 = vst [vmem:[#allocation3 + $0x80] sm:$0xff] %v4445_v32  ;;  %v4447_v30 = vpop.f32.mrb[177].mxu1 }
 0x27c   :  { %2383 = vst.msk [vmem:[#allocation2 + $0x198] sm:$0xff] %vm636_vm4, %v2287_v10  ;;  %v3131_v47 = vadd.f32 %v19935_v11, %v2475_v33  ;;  %v2105_v16 = vpop.f32.mrb[180].mxu0  ;;  %v1635_v33 = vld [vmem:[#allocation2 + $0x1b8] sm:$0xff]  ;;  %4701 = vst.msk [vmem:[#allocation3 + $0x88] sm:$0xff] %vm636_vm4, %v4447_v30  ;;  %v19938_v11 = vld [vmem:[#allocation56_spill] sm:$0xff] }
 0x27d   :  { %v2288_v57 = vadd.f32 %v2105_v16, %v1632_v19  ;;  %v2107_v21 = vpop.f32.mrb[181].mxu0  ;;  %13213 = vmatmul.mubr.msk.f32.gmra.mrb[30].mxu0 %vm130_vm3, %v16960_v61  ;;  %3230 = vst [vmem:[#allocation2 + $0x190] sm:$0xff] %v3134_v62  ;;  %v4451_v19 = vpop.f32.mrb[178].mxu1  ;;  %v19939_v16 = vld [vmem:[#allocation53_spill] sm:$0xff]  ;;  %v19940_v32 = vld [vmem:[#allocation58_spill] sm:$0xff] }
 0x27e   :  { %3227 = vst.msk [vmem:[#allocation2 + $0x178] sm:$0xff] %vm636_vm4, %v3131_v47  ;;  %v2289_v7 = vadd.f32 %v2107_v21, %v1633_v17  ;;  %3835 = vmatprep.mubr.f32.mxu0 %v19814_v0  ;;  %13346 = vmatmul.mubr.msk.f32.gmra.mrb[28].mxu1 %vm130_vm3, %v4892_v55  ;;  %v1636_v55 = vld [vmem:[#allocation2 + $0x1c0] sm:$0xff]  ;;  %4702 = vst [vmem:[#allocation3 + $0x90] sm:$0xff] %v4451_v19  ;;  %v1638_v30 = vld [vmem:[#allocation2 + $0x1d0] sm:$0xff] }
 0x27f   :  { %v2477_v26 = vld [vmem:[#allocation2 + $0x188] sm:$0xff]  ;;  %v3136_v22 = vadd.f32 %v19936_v1, %v2288_v57  ;;  %6085 = vmatprep.mubr.f32.mxu1 %v19814_v0  ;;  %v4453_v57 = vpop.f32.mrb[179].mxu1  ;;  %v4894_v17 = vld [vmem:[%s19783_s0 + $0xa0] sm:$0xff] }
 0x280   :  { %2385 = vst.msk [vmem:[#allocation2 + $0x1a8] sm:$0xff] %vm636_vm4, %v2289_v7  ;;  %v3133_v46 = vadd.f32 %v19937_v45, %v2477_v26  ;;  %v2111_v61 = vpop.f32.mrb[182].mxu0  ;;  %v1637_v7 = vld [vmem:[#allocation2 + $0x1c8] sm:$0xff]  ;;  %4703 = vst.msk [vmem:[#allocation3 + $0x98] sm:$0xff] %vm636_vm4, %v4453_v57 }
 0x281   :  { %v2290_v10 = vadd.f32 %v2111_v61, %v1634_v12  ;;  %v2113_v28 = vpop.f32.mrb[183].mxu0  ;;  %13214 = vmatmul.mubr.msk.f32.gmra.mrb[32].mxu0 %vm130_vm3, %v16980_v58  ;;  %3232 = vst [vmem:[#allocation2 + $0x1a0] sm:$0xff] %v3136_v22  ;;  %v19941_v12 = vld [vmem:[#allocation55_spill] sm:$0xff] }
 0x282   :  { %3229 = vst.msk [vmem:[#allocation2 + $0x188] sm:$0xff] %vm636_vm4, %v3133_v46  ;;  %v2291_v62 = vadd.f32 %v2113_v28, %v1635_v33  ;;  %3841 = vmatprep.mubr.f32.mxu0 %v19814_v0  ;;  %13347 = vmatmul.mubr.msk.f32.gmra.mrb[30].mxu1 %vm130_vm3, %v4893_v3  ;;  %v4457_v46 = vpop.f32.mrb[180].mxu1  ;;  %v1639_v28 = vld [vmem:[#allocation2 + $0x1d8] sm:$0xff] }
 0x283   :  { %v2479_v39 = vld [vmem:[#allocation2 + $0x198] sm:$0xff]  ;;  %v3138_v47 = vadd.f32 %v19938_v11, %v2290_v10  ;;  %6091 = vmatprep.mubr.f32.mxu1 %v19814_v0  ;;  %4704 = vst [vmem:[#allocation3 + $0xa0] sm:$0xff] %v4457_v46  ;;  %v4459_v3 = vpop.f32.mrb[181].mxu1  ;;  %v4895_v10 = vld [vmem:[%s19783_s0 + $0xa8] sm:$0xff] }
 0x284   :  { %2387 = vst.msk [vmem:[#allocation2 + $0x1b8] sm:$0xff] %vm636_vm4, %v2291_v62  ;;  %v3135_v41 = vadd.f32 %v19939_v16, %v2479_v39  ;;  %v2117_v58 = vpop.f32.mrb[184].mxu0  ;;  %4705 = vst.msk [vmem:[#allocation3 + $0xa8] sm:$0xff] %vm636_vm4, %v4459_v3  ;;  %v4463_v16 = vpop.f32.mrb[182].mxu1  ;;  %v4897_v3 = vld [vmem:[%s19783_s0 + $0xb8] sm:$0xff] }
 0x285   :  { %v2292_v21 = vadd.f32 %v2117_v58, %v1636_v55  ;;  %v2119_v26 = vpop.f32.mrb[185].mxu0  ;;  %13215 = vmatmul.mubr.msk.f32.gmra.mrb[34].mxu0 %vm130_vm3, %v17000_v27  ;;  %3234 = vst [vmem:[#allocation2 + $0x1b0] sm:$0xff] %v3138_v47  ;;  %v19942_v47 = vld [vmem:[#allocation60_spill] sm:$0xff]  ;;  %v1640_v58 = vld [vmem:[#allocation2 + $0x1e0] sm:$0xff]  ;;  %4706 = vst [vmem:[#allocation3 + $0xb0] sm:$0xff] %v4463_v16  ;;  %v4465_v57 = vpop.f32.mrb[183].mxu1 }
 0x286   :  { %3231 = vst.msk [vmem:[#allocation2 + $0x198] sm:$0xff] %vm636_vm4, %v3135_v41  ;;  %v2293_v1 = vadd.f32 %v2119_v26, %v1637_v7  ;;  %3847 = vmatprep.mubr.f32.mxu0 %v19814_v0  ;;  %13348 = vmatmul.mubr.msk.f32.gmra.mrb[32].mxu1 %vm130_vm3, %v4894_v17  ;;  %v19943_v41 = vld [vmem:[#allocation57_spill] sm:$0xff]  ;;  %v1641_v7 = vld [vmem:[#allocation2 + $0x1e8] sm:$0xff]  ;;  %4707 = vst.msk [vmem:[#allocation3 + $0xb8] sm:$0xff] %vm636_vm4, %v4465_v57 }
 0x287   :  { %v2481_v22 = vld [vmem:[#allocation2 + $0x1a8] sm:$0xff]  ;;  %v3140_v45 = vadd.f32 %v19940_v32, %v2292_v21  ;;  %6097 = vmatprep.mubr.f32.mxu1 %v19814_v0  ;;  %v4896_v17 = vld [vmem:[%s19783_s0 + $0xb0] sm:$0xff]  ;;  %v19944_v32 = vld [vmem:[#allocation62_spill] sm:$0xff]  ;;  %v4469_v46 = vpop.f32.mrb[184].mxu1 }
 0x288   :  { %2389 = vst.msk [vmem:[#allocation2 + $0x1c8] sm:$0xff] %vm636_vm4, %v2293_v1  ;;  %v3137_v61 = vadd.f32 %v19941_v12, %v2481_v22  ;;  %v2123_v27 = vpop.f32.mrb[186].mxu0  ;;  %v19945_v12 = vld [vmem:[#allocation59_spill] sm:$0xff]  ;;  %4708 = vst [vmem:[#allocation3 + $0xc0] sm:$0xff] %v4469_v46  ;;  %v1645_v57 = vld [vmem:[#allocation2 + $0x208] sm:$0xff] }
 0x289   :  { %v2294_v33 = vadd.f32 %v2123_v27, %v1638_v30  ;;  %v2125_v62 = vpop.f32.mrb[187].mxu0  ;;  %13216 = vmatmul.mubr.msk.f32.gmra.mrb[36].mxu0 %vm130_vm3, %v17020_v56  ;;  %3236 = vst [vmem:[#allocation2 + $0x1c0] sm:$0xff] %v3140_v45  ;;  %v1642_v30 = vld [vmem:[#allocation2 + $0x1f0] sm:$0xff]  ;;  %v4471_v27 = vpop.f32.mrb[185].mxu1  ;;  %v4899_v46 = vld [vmem:[%s19783_s0 + $0xc8] sm:$0xff] }
 0x28a   :  { %3233 = vst.msk [vmem:[#allocation2 + $0x1a8] sm:$0xff] %vm636_vm4, %v3137_v61  ;;  %v2295_v39 = vadd.f32 %v2125_v62, %v1639_v28  ;;  %3853 = vmatprep.mubr.f32.mxu0 %v19814_v0  ;;  %13349 = vmatmul.mubr.msk.f32.gmra.mrb[34].mxu1 %vm130_vm3, %v4895_v10  ;;  %4709 = vst.msk [vmem:[#allocation3 + $0xc8] sm:$0xff] %vm636_vm4, %v4471_v27 }
 0x28b   :  { %v2483_v11 = vld [vmem:[#allocation2 + $0x1b8] sm:$0xff]  ;;  %v3142_v19 = vadd.f32 %v19942_v47, %v2294_v33  ;;  %6103 = vmatprep.mubr.f32.mxu1 %v19814_v0  ;;  %v4475_v47 = vpop.f32.mrb[186].mxu1 }
 0x28c   :  { %2391 = vst.msk [vmem:[#allocation2 + $0x1d8] sm:$0xff] %vm636_vm4, %v2295_v39  ;;  %v3139_v55 = vadd.f32 %v19943_v41, %v2483_v11  ;;  %v2129_v56 = vpop.f32.mrb[188].mxu0  ;;  %v1643_v33 = vld [vmem:[#allocation2 + $0x1f8] sm:$0xff]  ;;  %v1644_v41 = vld [vmem:[#allocation2 + $0x200] sm:$0xff]  ;;  %4710 = vst [vmem:[#allocation3 + $0xd0] sm:$0xff] %v4475_v47 }
 0x28d   :  { %v2296_v21 = vadd.f32 %v2129_v56, %v1640_v58  ;;  %v2131_v26 = vpop.f32.mrb[189].mxu0  ;;  %13217 = vmatmul.mubr.msk.f32.gmra.mrb[38].mxu0 %vm130_vm3, %v17040_v40  ;;  %3238 = vst [vmem:[#allocation2 + $0x1d0] sm:$0xff] %v3142_v19  ;;  %v19946_v19 = vld [vmem:[#allocation61_spill] sm:$0xff]  ;;  %v4898_v58 = vld [vmem:[%s19783_s0 + $0xc0] sm:$0xff]  ;;  %v1649_v47 = vld [vmem:[#allocation2 + $0x228] sm:$0xff] }
 0x28e   :  { %3235 = vst.msk [vmem:[#allocation2 + $0x1b8] sm:$0xff] %vm636_vm4, %v3139_v55  ;;  %v2297_v1 = vadd.f32 %v2131_v26, %v1641_v7  ;;  %3859 = vmatprep.mubr.f32.mxu0 %v19814_v0  ;;  %13350 = vmatmul.mubr.msk.f32.gmra.mrb[36].mxu1 %vm130_vm3, %v4896_v17  ;;  %v4477_v55 = vpop.f32.mrb[187].mxu1 }
 0x28f   :  { %v2485_v22 = vld [vmem:[#allocation2 + $0x1c8] sm:$0xff]  ;;  %v3144_v45 = vadd.f32 %v19944_v32, %v2296_v21  ;;  %6109 = vmatprep.mubr.f32.mxu1 %v19814_v0  ;;  %4711 = vst.msk [vmem:[#allocation3 + $0xd8] sm:$0xff] %vm636_vm4, %v4477_v55  ;;  %v4481_v26 = vpop.f32.mrb[188].mxu1  ;;  %v1646_v32 = vld [vmem:[#allocation2 + $0x210] sm:$0xff] }
 0x290   :  { %2393 = vst.msk [vmem:[#allocation2 + $0x1e8] sm:$0xff] %vm636_vm4, %v2297_v1  ;;  %v3141_v61 = vadd.f32 %v19945_v12, %v2485_v22  ;;  %v2135_v40 = vpop.f32.mrb[190].mxu0  ;;  %v19947_v1 = vld [vmem:[#allocation63_spill] sm:$0xff]  ;;  %4712 = vst [vmem:[#allocation3 + $0xe0] sm:$0xff] %v4481_v26 }
 0x291   :  { %v2298_v10 = vadd.f32 %v2135_v40, %v1642_v30  ;;  %v2137_v28 = vpop.f32.mrb[191].mxu0  ;;  %13218 = vmatmul.mubr.msk.f32.gmra.mrb[40].mxu0 %vm130_vm3, %v17060_v6  ;;  %3240 = vst [vmem:[#allocation2 + $0x1e0] sm:$0xff] %v3144_v45  ;;  %v4483_v45 = vpop.f32.mrb[189].mxu1 }
 0x292   :  { %3237 = vst.msk [vmem:[#allocation2 + $0x1c8] sm:$0xff] %vm636_vm4, %v3141_v61  ;;  %v2299_v62 = vadd.f32 %v2137_v28, %v1643_v33  ;;  %3865 = vmatprep.mubr.f32.mxu0 %v19814_v0  ;;  %13351 = vmatmul.mubr.msk.f32.gmra.mrb[38].mxu1 %vm130_vm3, %v4897_v3  ;;  %v1647_v61 = vld [vmem:[#allocation2 + $0x218] sm:$0xff]  ;;  %4713 = vst.msk [vmem:[#allocation3 + $0xe8] sm:$0xff] %vm636_vm4, %v4483_v45  ;;  %v1648_v28 = vld [vmem:[#allocation2 + $0x220] sm:$0xff] }
 0x293   :  { %v2487_v39 = vld [vmem:[#allocation2 + $0x1d8] sm:$0xff]  ;;  %v3146_v11 = vadd.f32 %v16906_v20, %v2298_v10  ;;  %6115 = vmatprep.mubr.f32.mxu1 %v19814_v0  ;;  %v4487_v3 = vpop.f32.mrb[190].mxu1  ;;  %v19948_v10 = vld [vmem:[#allocation64_spill] sm:$0xff] }
 0x294   :  { %2395 = vst.msk [vmem:[#allocation2 + $0x1f8] sm:$0xff] %vm636_vm4, %v2299_v62  ;;  %v3143_v16 = vadd.f32 %v19946_v19, %v2487_v39  ;;  %v2141_v6 = vpop.f32.mrb[192].mxu0  ;;  %4714 = vst [vmem:[#allocation3 + $0xf0] sm:$0xff] %v4487_v3  ;;  %v4489_v62 = vpop.f32.mrb[191].mxu1  ;;  %v4900_v39 = vld [vmem:[%s19783_s0 + $0xd0] sm:$0xff] }
 0x295   :  { %v2300_v56 = vadd.f32 %v2141_v6, %v1644_v41  ;;  %v2143_v20 = vpop.f32.mrb[193].mxu0  ;;  %13219 = vmatmul.mubr.msk.f32.gmra.mrb[42].mxu0 %vm130_vm3, %v17080_v25  ;;  %3242 = vst [vmem:[#allocation2 + $0x1f0] sm:$0xff] %v3146_v11  ;;  %4715 = vst.msk [vmem:[#allocation3 + $0xf8] sm:$0xff] %vm636_vm4, %v4489_v62 }
 0x296   :  { %3239 = vst.msk [vmem:[#allocation2 + $0x1d8] sm:$0xff] %vm636_vm4, %v3143_v16  ;;  %v2301_v17 = vadd.f32 %v2143_v20, %v1645_v57  ;;  %3871 = vmatprep.mubr.f32.mxu0 %v19814_v0  ;;  %13352 = vmatmul.mubr.msk.f32.gmra.mrb[40].mxu1 %vm130_vm3, %v4898_v58  ;;  %v3412_v16 = vld [vmem:[%s19783_s0 + $0x180] sm:$0xff] }
 0x297   :  { %v2489_v21 = vld [vmem:[#allocation2 + $0x1e8] sm:$0xff]  ;;  %v3148_v7 = vadd.f32 %v16924_v59, %v2300_v56  ;;  %6121 = vmatprep.mubr.f32.mxu1 %v19814_v0  ;;  %v4493_v55 = vpop.f32.mrb[192].mxu1  ;;  %v1650_v56 = vld [vmem:[#allocation2 + $0x230] sm:$0xff] }
 0x298   :  { %2397 = vst.msk [vmem:[#allocation2 + $0x208] sm:$0xff] %vm636_vm4, %v2301_v17  ;;  %v3145_v22 = vadd.f32 %v19947_v1, %v2489_v21  ;;  %v2147_v25 = vpop.f32.mrb[194].mxu0  ;;  %4716 = vst [vmem:[#allocation3 + $0x100] sm:$0xff] %v4493_v55  ;;  %v4495_v20 = vpop.f32.mrb[193].mxu1  ;;  %v4901_v17 = vld [vmem:[%s19783_s0 + $0xd8] sm:$0xff]  ;;  %v3413_v1 = vld [vmem:[%s19783_s0 + $0x188] sm:$0xff] }
 0x299   :  { %v2302_v12 = vadd.f32 %v2147_v25, %v1646_v32  ;;  %v2149_v59 = vpop.f32.mrb[195].mxu0  ;;  %13220 = vmatmul.mubr.msk.f32.gmra.mrb[44].mxu0 %vm130_vm3, %v17100_v49  ;;  %3244 = vst [vmem:[#allocation2 + $0x200] sm:$0xff] %v3148_v7  ;;  %v1651_v7 = vld [vmem:[#allocation2 + $0x238] sm:$0xff]  ;;  %4717 = vst.msk [vmem:[#allocation3 + $0x108] sm:$0xff] %vm636_vm4, %v4495_v20 }
 0x29a   :  { %3241 = vst.msk [vmem:[#allocation2 + $0x1e8] sm:$0xff] %vm636_vm4, %v3145_v22  ;;  %v2303_v30 = vadd.f32 %v2149_v59, %v1647_v61  ;;  %3877 = vmatprep.mubr.f32.mxu0 %v19814_v0  ;;  %13353 = vmatmul.mubr.msk.f32.gmra.mrb[42].mxu1 %vm130_vm3, %v4899_v46  ;;  %v1652_v46 = vld [vmem:[#allocation2 + $0x240] sm:$0xff]  ;;  %v7476_v20 = vld [vmem:[#allocation8 + $0x278] sm:$0xf] }
 0x29b   :  { %v2491_v40 = vld [vmem:[#allocation2 + $0x1f8] sm:$0xff]  ;;  %v3150_v27 = vadd.f32 %v16942_v23, %v2302_v12  ;;  %6127 = vmatprep.mubr.f32.mxu1 %v19814_v0  ;;  %v4499_v25 = vpop.f32.mrb[194].mxu1 }
 0x29c   :  { %2399 = vst.msk [vmem:[#allocation2 + $0x218] sm:$0xff] %vm636_vm4, %v2303_v30  ;;  %v3147_v33 = vadd.f32 %v19948_v10, %v2491_v40  ;;  %v2153_v49 = vpop.f32.mrb[196].mxu0  ;;  %4718 = vst [vmem:[#allocation3 + $0x110] sm:$0xff] %v4499_v25  ;;  %v4501_v61 = vpop.f32.mrb[195].mxu1  ;;  %v1653_v30 = vld [vmem:[#allocation2 + $0x248] sm:$0xff]  ;;  %v7473_v25 = vld [vmem:[#allocation8 + $0x260] sm:$0xff] }
 0x29d   :  { %v2304_v11 = vadd.f32 %v2153_v49, %v1648_v28  ;;  %v2155_v23 = vpop.f32.mrb[197].mxu0  ;;  %13221 = vmatmul.mubr.msk.f32.gmra.mrb[46].mxu0 %vm130_vm3, %v17120_v29  ;;  %3246 = vst [vmem:[#allocation2 + $0x210] sm:$0xff] %v3150_v27  ;;  %v19949_v29 = vld [vmem:[#allocation65_spill] sm:$0xff]  ;;  %4719 = vst.msk [vmem:[#allocation3 + $0x118] sm:$0xff] %vm636_vm4, %v4501_v61 }
 0x29e   :  { %3243 = vst.msk [vmem:[#allocation2 + $0x1f8] sm:$0xff] %vm636_vm4, %v3147_v33  ;;  %v2305_v19 = vadd.f32 %v2155_v23, %v1649_v47  ;;  %3883 = vmatprep.mubr.f32.mxu0 %v19814_v0  ;;  %13354 = vmatmul.mubr.msk.f32.gmra.mrb[44].mxu1 %vm130_vm3, %v4900_v39  ;;  %v3414_v27 = vld [vmem:[%s19783_s0 + $0x190] sm:$0xff]  ;;  %v1655_v23 = vld [vmem:[#allocation2 + $0x258] sm:$0xff] }
 0x29f   :  { %v2493_v41 = vld [vmem:[#allocation2 + $0x208] sm:$0xff]  ;;  %v3152_v6 = vadd.f32 %v16962_v36, %v2304_v11  ;;  %6133 = vmatprep.mubr.f32.mxu1 %v19814_v0  ;;  %v4505_v33 = vpop.f32.mrb[196].mxu1  ;;  %v1654_v49 = vld [vmem:[#allocation2 + $0x250] sm:$0xff] }
 0x2a0   :  { %2401 = vst.msk [vmem:[#allocation2 + $0x228] sm:$0xff] %vm636_vm4, %v2305_v19  ;;  %v3149_v58 = vadd.f32 %v19949_v29, %v2493_v41  ;;  %v2159_v57 = vpop.f32.mrb[198].mxu0  ;;  %4720 = vst [vmem:[#allocation3 + $0x120] sm:$0xff] %v4505_v33  ;;  %v4507_v39 = vpop.f32.mrb[197].mxu1  ;;  %v4903_v11 = vld [vmem:[%s19783_s0 + $0xe8] sm:$0xff]  ;;  %v3415_v19 = vld [vmem:[%s19783_s0 + $0x198] sm:$0xff] }
 0x2a1   :  { %v2306_v21 = vadd.f32 %v2159_v57, %v1650_v56  ;;  %v2161_v36 = vpop.f32.mrb[199].mxu0  ;;  %13222 = vmatmul.mubr.msk.f32.gmra.mrb[48].mxu0 %vm130_vm3, %v3412_v16  ;;  %3248 = vst [vmem:[#allocation2 + $0x220] sm:$0xff] %v3152_v6  ;;  %4721 = vst.msk [vmem:[#allocation3 + $0x128] sm:$0xff] %vm636_vm4, %v4507_v39  ;;  %v1656_v41 = vld [vmem:[#allocation2 + $0x260] sm:$0xff]  ;;  %v7474_v57 = vld [vmem:[#allocation8 + $0x268] sm:$0xff] }
 0x2a2   :  { %3245 = vst.msk [vmem:[#allocation2 + $0x208] sm:$0xff] %vm636_vm4, %v3149_v58  ;;  %v2307_v26 = vadd.f32 %v2161_v36, %v1651_v7  ;;  %3889 = vmatprep.mubr.f32.mxu0 %v19814_v0  ;;  %13355 = vmatmul.mubr.msk.f32.gmra.mrb[46].mxu1 %vm130_vm3, %v4901_v17  ;;  %v4904_v17 = vld [vmem:[%s19783_s0 + $0xf0] sm:$0xff] }
 0x2a3   :  { %v2495_v22 = vld [vmem:[#allocation2 + $0x218] sm:$0xff]  ;;  %v3154_v32 = vadd.f32 %v16982_v8, %v2306_v21  ;;  %6139 = vmatprep.mubr.f32.mxu1 %v19814_v0  ;;  %v4902_v8 = vld [vmem:[%s19783_s0 + $0xe0] sm:$0xff]  ;;  %v4511_v55 = vpop.f32.mrb[198].mxu1  ;;  %v1658_v61 = vld [vmem:[#allocation2 + $0x270] sm:$0xff] }
 0x2a4   :  { %2403 = vst.msk [vmem:[#allocation2 + $0x238] sm:$0xff] %vm636_vm4, %v2307_v26  ;;  %v3151_v45 = vadd.f32 %v16946_v54, %v2495_v22  ;;  %v2165_v12 = vpop.f32.mrb[200].mxu0  ;;  %4722 = vst [vmem:[#allocation3 + $0x130] sm:$0xff] %v4511_v55  ;;  %v4513_v56 = vpop.f32.mrb[199].mxu1  ;;  %v3416_v26 = vld [vmem:[%s19783_s0 + $0x1a0] sm:$0xff]  ;;  %v1662_v55 = vld [vmem:[#allocation2 + $0x290] sm:$0xff] }
 0x2a5   :  { %v2308_v59 = vadd.f32 %v2165_v12, %v1652_v46  ;;  %v2167_v40 = vpop.f32.mrb[201].mxu0  ;;  %13223 = vmatmul.mubr.msk.f32.gmra.mrb[50].mxu0 %vm130_vm3, %v3413_v1  ;;  %3250 = vst [vmem:[#allocation2 + $0x230] sm:$0xff] %v3154_v32  ;;  %4723 = vst.msk [vmem:[#allocation3 + $0x138] sm:$0xff] %vm636_vm4, %v4513_v56  ;;  %v4907_v56 = vld [vmem:[%s19783_s0 + $0x108] sm:$0xff] }
 0x2a6   :  { %3247 = vst.msk [vmem:[#allocation2 + $0x218] sm:$0xff] %vm636_vm4, %v3151_v45  ;;  %v2309_v54 = vadd.f32 %v2167_v40, %v1653_v30  ;;  %3895 = vmatprep.mubr.f32.mxu0 %v19814_v0  ;;  %13356 = vmatmul.mubr.msk.f32.gmra.mrb[48].mxu1 %vm130_vm3, %v4902_v8  ;;  %v7475_v45 = vld [vmem:[#allocation8 + $0x270] sm:$0xf] }
 0x2a7   :  { %v2497_v3 = vld [vmem:[#allocation2 + $0x228] sm:$0xff]  ;;  %v3156_v10 = vadd.f32 %v17002_v34, %v2308_v59  ;;  %6145 = vmatprep.mubr.f32.mxu1 %v19814_v0  ;;  %v4517_v46 = vpop.f32.mrb[200].mxu1  ;;  %v14032_v30 = vpack.c.bf16 %v7475_v45, %v7473_v25  ;;  %v6628_v45 = vld [vmem:[#allocation8 + $0x238] sm:$0xf] }
 0x2a8   :  { %2405 = vst.msk [vmem:[#allocation2 + $0x248] sm:$0xff] %vm636_vm4, %v2309_v54  ;;  %v3153_v28 = vadd.f32 %v16966_v52, %v2497_v3  ;;  %v2171_v62 = vpop.f32.mrb[202].mxu0  ;;  %4724 = vst [vmem:[#allocation3 + $0x140] sm:$0xff] %v4517_v46  ;;  %v4519_v40 = vpop.f32.mrb[201].mxu1  ;;  %v1659_v54 = vld [vmem:[#allocation2 + $0x278] sm:$0xff]  ;;  %v3417_v3 = vld [vmem:[%s19783_s0 + $0x1a8] sm:$0xff] }
 0x2a9   :  { %v2310_v47 = vadd.f32 %v2171_v62, %v1654_v49  ;;  %v2173_v34 = vpop.f32.mrb[203].mxu0  ;;  %13224 = vmatmul.mubr.msk.f32.gmra.mrb[52].mxu0 %vm130_vm3, %v3414_v27  ;;  %3252 = vst [vmem:[#allocation2 + $0x240] sm:$0xff] %v3156_v10  ;;  %4725 = vst.msk [vmem:[#allocation3 + $0x148] sm:$0xff] %vm636_vm4, %v4519_v40  ;;  %v1660_v62 = vld [vmem:[#allocation2 + $0x280] sm:$0xff]  ;;  %v6626_v25 = vld [vmem:[#allocation8 + $0x228] sm:$0xff] }
 0x2aa   :  { %3249 = vst.msk [vmem:[#allocation2 + $0x228] sm:$0xff] %vm636_vm4, %v3153_v28  ;;  %v2311_v52 = vadd.f32 %v2173_v34, %v1655_v23  ;;  %3901 = vmatprep.mubr.f32.mxu0 %v19814_v0  ;;  %13357 = vmatmul.mubr.msk.f32.gmra.mrb[50].mxu1 %vm130_vm3, %v4903_v11  ;;  %v1661_v34 = vld [vmem:[#allocation2 + $0x288] sm:$0xff] }
 0x2ab   :  { %v2499_v16 = vld [vmem:[#allocation2 + $0x238] sm:$0xff]  ;;  %v3158_v6 = vadd.f32 %v17022_v18, %v2310_v47  ;;  %6151 = vmatprep.mubr.f32.mxu1 %v19814_v0  ;;  %v1657_v18 = vld [vmem:[#allocation2 + $0x268] sm:$0xff]  ;;  %v4906_v47 = vld [vmem:[%s19783_s0 + $0x100] sm:$0xff] }
 0x2ac   :  { %2407 = vst.msk [vmem:[#allocation2 + $0x258] sm:$0xff] %vm636_vm4, %v2311_v52  ;;  %v3155_v29 = vadd.f32 %v16986_v42, %v2499_v16  ;;  %v2177_v58 = vpop.f32.mrb[204].mxu0  ;;  %v14029_v42 = vpack.c.bf16 %v7476_v20, %v7474_v57  ;;  %v4523_v28 = vpop.f32.mrb[202].mxu1  ;;  %v3418_v52 = vld [vmem:[%s19783_s0 + $0x1b0] sm:$0xff]  ;;  %v1663_v20 = vld [vmem:[#allocation2 + $0x298] sm:$0xff] }
 0x2ad   :  { %v2312_v21 = vadd.f32 %v2177_v58, %v1656_v41  ;;  %v2179_v7 = vpop.f32.mrb[205].mxu0  ;;  %13225 = vmatmul.mubr.msk.f32.gmra.mrb[54].mxu0 %vm130_vm3, %v3415_v19  ;;  %3254 = vst [vmem:[#allocation2 + $0x250] sm:$0xff] %v3158_v6  ;;  %4726 = vst [vmem:[#allocation3 + $0x150] sm:$0xff] %v4523_v28  ;;  %v4525_v11 = vpop.f32.mrb[203].mxu1 }
 0x2ae   :  { %3251 = vst.msk [vmem:[#allocation2 + $0x238] sm:$0xff] %vm636_vm4, %v3155_v29  ;;  %v2313_v36 = vadd.f32 %v2179_v7, %v1657_v18  ;;  %3907 = vmatprep.mubr.f32.mxu0 %v19814_v0  ;;  %14031 = vmatprep.subr.msk.bf16.mxu1 %vm15086_vm2, %v14029_v42  ;;  %4727 = vst.msk [vmem:[#allocation3 + $0x158] sm:$0xff] %vm636_vm4, %v4525_v11  ;;  %v6621_v42 = vld [vmem:[#allocation8 + $0x200] sm:$0xff] }
 0x2af   :  { %v2501_v1 = vld [vmem:[#allocation2 + $0x248] sm:$0xff]  ;;  %v3160_v22 = vadd.f32 %v17042_v24, %v2312_v21  ;;  %13358 = vmatmul.mubr.msk.f32.gmra.mrb[52].mxu1 %vm130_vm3, %v4904_v17  ;;  %v4905_v24 = vld [vmem:[%s19783_s0 + $0xf8] sm:$0xff]  ;;  %v1664_v17 = vld [vmem:[#allocation2 + $0x2a0] sm:$0xff] }
 0x2b0   :  { %2409 = vst.msk [vmem:[#allocation2 + $0x268] sm:$0xff] %vm636_vm4, %v2313_v36  ;;  %v3157_v12 = vadd.f32 %v17006_v35, %v2501_v1  ;;  %v2183_v59 = vpop.f32.mrb[206].mxu0  ;;  %6157 = vmatprep.mubr.f32.mxu1 %v19814_v0  ;;  %14034 = vmatpush1.bf16.msk.msra.mxu1 %vm15086_vm2, %v14032_v30  ;;  %v4529_v41 = vpop.f32.mrb[204].mxu1  ;;  %v3419_v21 = vld [vmem:[%s19783_s0 + $0x1b8] sm:$0xff]  ;;  %v6623_v36 = vld [vmem:[#allocation8 + $0x210] sm:$0xff] }
 0x2b1   :  { %v2314_v8 = vadd.f32 %v2183_v59, %v1658_v61  ;;  %v2185_v27 = vpop.f32.mrb[207].mxu0  ;;  %13226 = vmatmul.mubr.msk.f32.gmra.mrb[56].mxu0 %vm130_vm3, %v3416_v26  ;;  %3256 = vst [vmem:[#allocation2 + $0x260] sm:$0xff] %v3160_v22  ;;  %4728 = vst [vmem:[#allocation3 + $0x160] sm:$0xff] %v4529_v41  ;;  %v4531_v58 = vpop.f32.mrb[205].mxu1  ;;  %v1665_v61 = vld [vmem:[#allocation2 + $0x2a8] sm:$0xff]  ;;  %v4876_v30 = vld [vmem:[%s19783_s0 + $0x10] sm:$0xff]  ;;  %v14017_v40 = vpack.c.bf16 %v6623_v36, %v6621_v42 }
 0x2b2   :  { %3253 = vst.msk [vmem:[#allocation2 + $0x248] sm:$0xff] %vm636_vm4, %v3157_v12  ;;  %v2315_v35 = vadd.f32 %v2185_v27, %v1659_v54  ;;  %3913 = vmatprep.mubr.f32.mxu0 %v19814_v0  ;;  %4729 = vst.msk [vmem:[#allocation3 + $0x168] sm:$0xff] %vm636_vm4, %v4531_v58  ;;  %v4908_v12 = vld [vmem:[%s19783_s0 + $0x110] sm:$0xff]  ;;  %v14019_v54 = vpack.c.bf16 %v6628_v45, %v6626_v25  ;;  %v6625_v27 = vld [vmem:[#allocation8 + $0x220] sm:$0xff] }
 0x2b3   :  { %v2503_v10 = vld [vmem:[#allocation2 + $0x258] sm:$0xff]  ;;  %v3162_v33 = vadd.f32 %v17062_v60, %v2314_v8  ;;  %13359 = vmatmul.mubr.msk.f32.gmra.mrb[54].mxu1 %vm130_vm3, %v4905_v24  ;;  %v1672_v25 = vld [vmem:[#allocation2 + $0x2e0] sm:$0xff] }
 0x2b4   :  { %2411 = vst.msk [vmem:[#allocation2 + $0x278] sm:$0xff] %vm636_vm4, %v2315_v35  ;;  %v3159_v49 = vadd.f32 %v17026_v48, %v2503_v10  ;;  %v2189_v39 = vpop.f32.mrb[208].mxu0  ;;  %6163 = vmatprep.mubr.f32.mxu1 %v19814_v0  ;;  %v4535_v26 = vpop.f32.mrb[206].mxu1  ;;  %v6627_v35 = vld [vmem:[#allocation8 + $0x230] sm:$0xf] }
 0x2b5   :  { %v2316_v23 = vadd.f32 %v2189_v39, %v1660_v62  ;;  %v2191_v60 = vpop.f32.mrb[209].mxu0  ;;  %13227 = vmatmul.mubr.msk.f32.gmra.mrb[58].mxu0 %vm130_vm3, %v3417_v3  ;;  %3258 = vst [vmem:[#allocation2 + $0x270] sm:$0xff] %v3162_v33  ;;  %4730 = vst [vmem:[#allocation3 + $0x170] sm:$0xff] %v4535_v26  ;;  %v4537_v46 = vpop.f32.mrb[207].mxu1  ;;  %v1666_v33 = vld [vmem:[#allocation2 + $0x2b0] sm:$0xff]  ;;  %v4909_v62 = vld [vmem:[%s19783_s0 + $0x118] sm:$0xff] }
 0x2b6   :  { %3255 = vst.msk [vmem:[#allocation2 + $0x258] sm:$0xff] %vm636_vm4, %v3159_v49  ;;  %v2317_v48 = vadd.f32 %v2191_v60, %v1661_v34  ;;  %3919 = vmatprep.mubr.f32.mxu0 %v19814_v0  ;;  %4731 = vst.msk [vmem:[#allocation3 + $0x178] sm:$0xff] %vm636_vm4, %v4537_v46  ;;  %v1667_v39 = vld [vmem:[#allocation2 + $0x2b8] sm:$0xff] }
 0x2b7   :  { %v2505_v19 = vld [vmem:[#allocation2 + $0x268] sm:$0xff]  ;;  %v3164_v16 = vadd.f32 %v17082_v50, %v2316_v23  ;;  %13360 = vmatmul.mubr.msk.f32.gmra.mrb[56].mxu1 %vm130_vm3, %v4906_v47  ;;  %v4877_v47 = vld [vmem:[%s19783_s0 + $0x18] sm:$0xff]  ;;  %v14022_v23 = vpack.c.bf16 %v6627_v35, %v6625_v27  ;;  %v1674_v27 = vld [vmem:[#allocation2 + $0x2f0] sm:$0xff] }
 0x2b8   :  { %2413 = vst.msk [vmem:[#allocation2 + $0x288] sm:$0xff] %vm636_vm4, %v2317_v48  ;;  %v3161_v6 = vadd.f32 %v17046_v5, %v2505_v19  ;;  %v2195_v29 = vpop.f32.mrb[210].mxu0  ;;  %6169 = vmatprep.mubr.f32.mxu1 %v19814_v0  ;;  %v4541_v3 = vpop.f32.mrb[208].mxu1  ;;  %v1668_v19 = vld [vmem:[#allocation2 + $0x2c0] sm:$0xff] }
 0x2b9   :  { %v2318_v57 = vadd.f32 %v2195_v29, %v1662_v55  ;;  %v2197_v50 = vpop.f32.mrb[211].mxu0  ;;  %13228 = vmatmul.mubr.msk.f32.gmra.mrb[60].mxu0 %vm130_vm3, %v3418_v52  ;;  %3260 = vst [vmem:[#allocation2 + $0x280] sm:$0xff] %v3164_v16  ;;  %4732 = vst [vmem:[#allocation3 + $0x180] sm:$0xff] %v4541_v3  ;;  %v4543_v49 = vpop.f32.mrb[209].mxu1  ;;  %v1669_v55 = vld [vmem:[#allocation2 + $0x2c8] sm:$0xff] }
 0x2ba   :  { %3257 = vst.msk [vmem:[#allocation2 + $0x268] sm:$0xff] %vm636_vm4, %v3161_v6  ;;  %v2319_v5 = vadd.f32 %v2197_v50, %v1663_v20  ;;  %3925 = vmatprep.mubr.f32.mxu0 %v19814_v0  ;;  %4733 = vst.msk [vmem:[#allocation3 + $0x188] sm:$0xff] %vm636_vm4, %v4543_v49  ;;  %v4910_v6 = vld [vmem:[%s19783_s0 + $0x120] sm:$0xff]  ;;  %v1670_v50 = vld [vmem:[#allocation2 + $0x2d0] sm:$0xff] }
 0x2bb   :  { %v2507_v18 = vld [vmem:[#allocation2 + $0x278] sm:$0xff]  ;;  %v3166_v7 = vadd.f32 %v17102_v51, %v2318_v57  ;;  %13361 = vmatmul.mubr.msk.f32.gmra.mrb[58].mxu1 %vm130_vm3, %v4907_v56  ;;  %v14810_v49 = vld [vmem:[%s19783_s0 + $0x30] sm:$0xff] }
 0x2bc   :  { %2415 = vst.msk [vmem:[#allocation2 + $0x298] sm:$0xff] %vm636_vm4, %v2319_v5  ;;  %v3163_v1 = vadd.f32 %v17066_v44, %v2507_v18  ;;  %v2201_v22 = vpop.f32.mrb[212].mxu0  ;;  %6175 = vmatprep.mubr.f32.mxu1 %v19814_v0  ;;  %v4547_v48 = vpop.f32.mrb[210].mxu1  ;;  %v1671_v18 = vld [vmem:[#allocation2 + $0x2d8] sm:$0xff] }
 0x2bd   :  { %v2320_v51 = vadd.f32 %v2201_v22, %v1664_v17  ;;  %v2203_v59 = vpop.f32.mrb[213].mxu0  ;;  %13229 = vmatmul.mubr.msk.f32.gmra.mrb[62].mxu0 %vm130_vm3, %v3419_v21  ;;  %3262 = vst [vmem:[#allocation2 + $0x290] sm:$0xff] %v3166_v7  ;;  %4734 = vst [vmem:[#allocation3 + $0x190] sm:$0xff] %v4547_v48  ;;  %v4549_v41 = vpop.f32.mrb[211].mxu1  ;;  %v4911_v21 = vld [vmem:[%s19783_s0 + $0x128] sm:$0xff]  ;;  %v14808_v7 = vld [vmem:[%s19783_s0 + $0x20] sm:$0xff] }
 0x2be   :  { %3259 = vst.msk [vmem:[#allocation2 + $0x278] sm:$0xff] %vm636_vm4, %v3163_v1  ;;  %v2321_v44 = vadd.f32 %v2203_v59, %v1665_v61  ;;  %5147 = vmatprep.mubr.f32.mxu0 %v19814_v0  ;;  %4735 = vst.msk [vmem:[#allocation3 + $0x198] sm:$0xff] %vm636_vm4, %v4549_v41  ;;  %v19951_v1 = vld [vmem:[#allocation35_spill] sm:$0xff]  ;;  %v1673_v61 = vld [vmem:[#allocation2 + $0x2e8] sm:$0xff] }
 0x2bf   :  { %v2509_v24 = vld [vmem:[#allocation2 + $0x288] sm:$0xff]  ;;  %v3168_v8 = vadd.f32 %v17122_v37, %v2320_v51  ;;  %13362 = vmatmul.mubr.msk.f32.gmra.mrb[60].mxu1 %vm130_vm3, %v4908_v12  ;;  %v4912_v12 = vld [vmem:[%s19783_s0 + $0x130] sm:$0xff] }
 0x2c0   :  { %2417 = vst.msk [vmem:[#allocation2 + $0x2a8] sm:$0xff] %vm636_vm4, %v2321_v44  ;;  %v3165_v10 = vadd.f32 %v17086_v38, %v2509_v24  ;;  %v2207_v28 = vpop.f32.mrb[214].mxu0  ;;  %6181 = vmatprep.mubr.f32.mxu1 %v19814_v0  ;;  %v4553_v57 = vpop.f32.mrb[212].mxu1  ;;  %v14809_v59 = vld [vmem:[%s19783_s0 + $0x28] sm:$0xff] }
 0x2c1   :  { %v2322_v37 = vadd.f32 %v2207_v28, %v1666_v33  ;;  %v2209_v11 = vpop.f32.mrb[215].mxu0  ;;  %13282 = vmatmul.mubr.msk.f32.vlgmr.msra.gmra.mrb[64].mxu0 %vm130_vm3, %v4876_v30  ;;  %3264 = vst [vmem:[#allocation2 + $0x2a0] sm:$0xff] %v3168_v8  ;;  %4736 = vst [vmem:[#allocation3 + $0x1a0] sm:$0xff] %v4553_v57  ;;  %v4555_v17 = vpop.f32.mrb[213].mxu1  ;;  %v19952_v8 = vld [vmem:[#allocation18_spill] sm:$0xff] }
 0x2c2   :  { %3261 = vst.msk [vmem:[#allocation2 + $0x288] sm:$0xff] %vm636_vm4, %v3165_v10  ;;  %v2323_v38 = vadd.f32 %v2209_v11, %v1667_v39  ;;  %14018 = vmatpush1.bf16.msra.mxu0 %v14017_v40  ;;  %5153 = vmatprep.mubr.f32.mxu0 %v19814_v0  ;;  %4737 = vst.msk [vmem:[#allocation3 + $0x1a8] sm:$0xff] %vm636_vm4, %v4555_v17  ;;  %v4913_v10 = vld [vmem:[%s19783_s0 + $0x138] sm:$0xff] }
 0x2c3   :  { %v2511_v34 = vld [vmem:[#allocation2 + $0x298] sm:$0xff]  ;;  %v3170_v60 = vadd.f32 %v17140_v15, %v2322_v37  ;;  %14021 = vmatprep.subr.msk.bf16.mxu0 %vm15086_vm2, %v14019_v54  ;;  %13363 = vmatmul.mubr.msk.f32.gmra.mrb[62].mxu1 %vm130_vm3, %v4909_v62 }
 0x2c4   :  { %2419 = vst.msk [vmem:[#allocation2 + $0x2b8] sm:$0xff] %vm636_vm4, %v2323_v38  ;;  %v3167_v52 = vadd.f32 %v17106_v2, %v2511_v34  ;;  %v2213_v16 = vpop.f32.mrb[216].mxu0  ;;  %6187 = vmatprep.mubr.f32.mxu1 %v19814_v0  ;;  %v4559_v26 = vpop.f32.mrb[214].mxu1  ;;  %v1675_v28 = vld [vmem:[#allocation2 + $0x2f8] sm:$0xff] }
 0x2c5   :  { %v2324_v15 = vadd.f32 %v2213_v16, %v1668_v19  ;;  %v2215_v29 = vpop.f32.mrb[217].mxu0  ;;  %13283 = vmatmul.mubr.msk.f32.gmra.mrb[66].mxu0 %vm130_vm3, %v4877_v47  ;;  %3266 = vst [vmem:[#allocation2 + $0x2b0] sm:$0xff] %v3170_v60  ;;  %4738 = vst [vmem:[#allocation3 + $0x1b0] sm:$0xff] %v4559_v26  ;;  %v4561_v46 = vpop.f32.mrb[215].mxu1  ;;  %v3276_v47 = vld [vmem:[#allocation2] sm:$0xff]  ;;  %v14811_v19 = vld [vmem:[%s19783_s0 + $0x38] sm:$0xff] }
 0x2c6   :  { %3263 = vst.msk [vmem:[#allocation2 + $0x298] sm:$0xff] %vm636_vm4, %v3167_v52  ;;  %v2325_v2 = vadd.f32 %v2215_v29, %v1669_v55  ;;  %5159 = vmatprep.mubr.f32.mxu0 %v19814_v0  ;;  %14024 = vmatpush1.bf16.msk.msra.mxu0 %vm15086_vm2, %v14022_v23  ;;  %4739 = vst.msk [vmem:[#allocation3 + $0x1b8] sm:$0xff] %vm636_vm4, %v4561_v46  ;;  %v4914_v60 = vld [vmem:[%s19783_s0 + $0x140] sm:$0xff]  ;;  %v3277_v52 = vld [vmem:[#allocation2 + $0x8] sm:$0xff] }
 0x2c7   :  { %v2513_v58 = vld [vmem:[#allocation2 + $0x2a8] sm:$0xff]  ;;  %v3172_v56 = vadd.f32 %v17157_v43, %v2324_v15  ;;  %13364 = vmatmul.mubr.msk.f32.gmra.mrb[64].mxu1 %vm130_vm3, %v4910_v6  ;;  %v3278_v15 = vld [vmem:[#allocation2 + $0x10] sm:$0xff] }
 0x2c8   :  { %2421 = vst.msk [vmem:[#allocation2 + $0x2c8] sm:$0xff] %vm636_vm4, %v2325_v2  ;;  %v3169_v20 = vadd.f32 %v17126_v53, %v2513_v58  ;;  %v2219_v5 = vpop.f32.mrb[218].mxu0  ;;  %6193 = vmatprep.mubr.f32.mxu1 %v19814_v0  ;;  %v4565_v24 = vpop.f32.mrb[216].mxu1  ;;  %v4915_v2 = vld [vmem:[%s19783_s0 + $0x148] sm:$0xff] }
 0x2c9   :  { %v2326_v32 = vadd.f32 %v2219_v5, %v1670_v50  ;;  %v2221_v43 = vpop.f32.mrb[219].mxu0  ;;  %13284 = vmatmul.mubr.msk.f32.gmra.mrb[68].mxu0 %vm130_vm3, %v14808_v7  ;;  %3268 = vst [vmem:[#allocation2 + $0x2c0] sm:$0xff] %v3172_v56  ;;  %4740 = vst [vmem:[#allocation3 + $0x1c0] sm:$0xff] %v4565_v24  ;;  %v4567_v3 = vpop.f32.mrb[217].mxu1  ;;  %v3279_v56 = vld [vmem:[#allocation2 + $0x18] sm:$0xff]  ;;  %v4918_v24 = vld [vmem:[%s19783_s0 + $0x160] sm:$0xff] }
 0x2ca   :  { %3265 = vst.msk [vmem:[#allocation2 + $0x2a8] sm:$0xff] %vm636_vm4, %v3169_v20  ;;  %v2327_v53 = vadd.f32 %v2221_v43, %v1671_v18  ;;  %5165 = vmatprep.mubr.f32.mxu0 %v19814_v0  ;;  %4741 = vst.msk [vmem:[#allocation3 + $0x1c8] sm:$0xff] %vm636_vm4, %v4567_v3  ;;  %v14812_v20 = vld [vmem:[%s19783_s0 + $0x40] sm:$0xff]  ;;  %v4916_v43 = vld [vmem:[%s19783_s0 + $0x150] sm:$0xff] }
 0x2cb   :  { %v2515_v42 = vld [vmem:[#allocation2 + $0x2b8] sm:$0xff]  ;;  %v3174_v36 = vadd.f32 %v17174_v14, %v2326_v32  ;;  %13365 = vmatmul.mubr.msk.f32.gmra.mrb[66].mxu1 %vm130_vm3, %v4911_v21  ;;  %v3280_v21 = vld [vmem:[#allocation2 + $0x20] sm:$0xff] }
 0x2cc   :  { %2423 = vst.msk [vmem:[#allocation2 + $0x2d8] sm:$0xff] %vm636_vm4, %v2327_v53  ;;  %v3171_v22 = vadd.f32 %v19951_v1, %v2515_v42  ;;  %v2225_v45 = vpop.f32.mrb[220].mxu0  ;;  %6199 = vmatprep.mubr.f32.mxu1 %v19814_v0  ;;  %v4571_v11 = vpop.f32.mrb[218].mxu1  ;;  %v3281_v53 = vld [vmem:[#allocation2 + $0x28] sm:$0xff]  ;;  %v3282_v1 = vld [vmem:[#allocation2 + $0x30] sm:$0xff] }
 0x2cd   :  { %v2328_v51 = vadd.f32 %v2225_v45, %v1672_v25  ;;  %v2227_v14 = vpop.f32.mrb[221].mxu0  ;;  %13285 = vmatmul.mubr.msk.f32.gmra.mrb[70].mxu0 %vm130_vm3, %v14809_v59  ;;  %3270 = vst [vmem:[#allocation2 + $0x2d0] sm:$0xff] %v3174_v36  ;;  %4742 = vst [vmem:[#allocation3 + $0x1d0] sm:$0xff] %v4571_v11  ;;  %v4573_v34 = vpop.f32.mrb[219].mxu1  ;;  %v14813_v36 = vld [vmem:[%s19783_s0 + $0x48] sm:$0xff]  ;;  %v4917_v45 = vld [vmem:[%s19783_s0 + $0x158] sm:$0xff] }
 0x2ce   :  { %3267 = vst.msk [vmem:[#allocation2 + $0x2b8] sm:$0xff] %vm636_vm4, %v3171_v22  ;;  %v2329_v44 = vadd.f32 %v2227_v14, %v1673_v61  ;;  %5171 = vmatprep.mubr.f32.mxu0 %v19814_v0  ;;  %4743 = vst.msk [vmem:[#allocation3 + $0x1d8] sm:$0xff] %vm636_vm4, %v4573_v34  ;;  %v14814_v61 = vld [vmem:[%s19783_s0 + $0x50] sm:$0xff]  ;;  %v14816_v11 = vld [vmem:[%s19783_s0 + $0x60] sm:$0xff] }
 0x2cf   :  { %v2517_v30 = vld [vmem:[#allocation2 + $0x2c8] sm:$0xff]  ;;  %v3176_v40 = vadd.f32 %v17191_v63, %v2328_v51  ;;  %13366 = vmatmul.mubr.msk.f32.gmra.mrb[68].mxu1 %vm130_vm3, %v4912_v12  ;;  %v3283_v12 = vld [vmem:[#allocation2 + $0x38] sm:$0xff] }
 0x2d0   :  { %2425 = vst.msk [vmem:[#allocation2 + $0x2e8] sm:$0xff] %vm636_vm4, %v2329_v44  ;;  %v3173_v54 = vadd.f32 %v19952_v8, %v2517_v30  ;;  %v2231_v35 = vpop.f32.mrb[222].mxu0  ;;  %6205 = vmatprep.mubr.f32.mxu1 %v19814_v0  ;;  %v4577_v41 = vpop.f32.mrb[220].mxu1  ;;  %v3284_v44 = vld [vmem:[#allocation2 + $0x40] sm:$0xff] }
 0x2d1   :  { %v2330_v33 = vadd.f32 %v2231_v35, %v1674_v27  ;;  %v2233_v63 = vpop.f32.mrb[223].mxu0  ;;  %13286 = vmatmul.mubr.msk.f32.gmra.mrb[72].mxu0 %vm130_vm3, %v14810_v49  ;;  %3272 = vst [vmem:[#allocation2 + $0x2e0] sm:$0xff] %v3176_v40  ;;  %4744 = vst [vmem:[#allocation3 + $0x1e0] sm:$0xff] %v4577_v41  ;;  %v4579_v29 = vpop.f32.mrb[221].mxu1  ;;  %v14815_v35 = vld [vmem:[%s19783_s0 + $0x58] sm:$0xff]  ;;  %v4919_v49 = vld [vmem:[%s19783_s0 + $0x168] sm:$0xff] }
 0x2d2   :  { %3269 = vst.msk [vmem:[#allocation2 + $0x2c8] sm:$0xff] %vm636_vm4, %v3173_v54  ;;  %v2331_v62 = vadd.f32 %v2233_v63, %v1675_v28  ;;  %5177 = vmatprep.mubr.f32.mxu0 %v19814_v0  ;;  %4745 = vst.msk [vmem:[#allocation3 + $0x1e8] sm:$0xff] %vm636_vm4, %v4579_v29  ;;  %v3285_v54 = vld [vmem:[#allocation2 + $0x48] sm:$0xff]  ;;  %v4921_v29 = vld [vmem:[%s19783_s0 + $0x178] sm:$0xff] }
 0x2d3   :  { %v2519_v37 = vld [vmem:[#allocation2 + $0x2d8] sm:$0xff]  ;;  %v3178_v39 = vadd.f32 %v17207_v31, %v2330_v33  ;;  %13367 = vmatmul.mubr.msk.f32.gmra.mrb[70].mxu1 %vm130_vm3, %v4913_v10  ;;  %v3286_v33 = vld [vmem:[#allocation2 + $0x50] sm:$0xff] }
 0x2d4   :  { %2427 = vst.msk [vmem:[#allocation2 + $0x2f8] sm:$0xff] %vm636_vm4, %v2331_v62  ;;  %v3175_v38 = vadd.f32 %v17178_v9, %v2519_v37  ;;  %v3645_v23 = vpop.f32.mrb[224].mxu0  ;;  %6211 = vmatprep.mubr.f32.mxu1 %v19814_v0  ;;  %v4583_v5 = vpop.f32.mrb[222].mxu1  ;;  %v3287_v37 = vld [vmem:[#allocation2 + $0x58] sm:$0xff] }
 0x2d5   :  { %v3932_v48 = vadd.f32 %v3645_v23, %v3276_v47  ;;  %v3647_v31 = vpop.f32.mrb[225].mxu0  ;;  %13287 = vmatmul.mubr.msk.f32.gmra.mrb[74].mxu0 %vm130_vm3, %v14811_v19  ;;  %3274 = vst [vmem:[#allocation2 + $0x2f0] sm:$0xff] %v3178_v39  ;;  %4746 = vst [vmem:[#allocation3 + $0x1f0] sm:$0xff] %v4583_v5  ;;  %v4585_v18 = vpop.f32.mrb[223].mxu1  ;;  %v3288_v23 = vld [vmem:[#allocation2 + $0x60] sm:$0xff] }
 0x2d6   :  { %3271 = vst.msk [vmem:[#allocation2 + $0x2d8] sm:$0xff] %vm636_vm4, %v3175_v38  ;;  %v3933_v9 = vadd.f32 %v3647_v31, %v3277_v52  ;;  %5183 = vmatprep.mubr.f32.mxu0 %v19814_v0  ;;  %4747 = vst.msk [vmem:[#allocation3 + $0x1f8] sm:$0xff] %vm636_vm4, %v4585_v18  ;;  %v3289_v31 = vld [vmem:[#allocation2 + $0x68] sm:$0xff] }
 0x2d7   :  { %4028 = vst [vmem:[#allocation2] sm:$0xff] %v3932_v48  ;;  %v2521_v16 = vld [vmem:[#allocation2 + $0x2e8] sm:$0xff]  ;;  %13368 = vmatmul.mubr.msk.f32.gmra.mrb[72].mxu1 %vm130_vm3, %v4914_v60  ;;  %v4920_v48 = vld [vmem:[%s19783_s0 + $0x170] sm:$0xff] }
 0x2d8   :  { %4029 = vst.msk [vmem:[#allocation2 + $0x8] sm:$0xff] %vm636_vm4, %v3933_v9  ;;  %v3177_v6 = vadd.f32 %v17194_v4, %v2521_v16  ;;  %v3651_v55 = vpop.f32.mrb[226].mxu0  ;;  %6217 = vmatprep.mubr.f32.mxu1 %v19814_v0  ;;  %v4589_v26 = vpop.f32.mrb[224].mxu1  ;;  %v14817_v9 = vld [vmem:[%s19783_s0 + $0x68] sm:$0xff] }
 0x2d9   :  { %v3934_v58 = vadd.f32 %v3651_v55, %v3278_v15  ;;  %v3653_v57 = vpop.f32.mrb[227].mxu0  ;;  %13288 = vmatmul.mubr.msk.f32.gmra.mrb[76].mxu0 %vm130_vm3, %v14812_v20  ;;  %4748 = vst [vmem:[#allocation3 + $0x200] sm:$0xff] %v4589_v26  ;;  %v4591_v25 = vpop.f32.mrb[225].mxu1  ;;  %v3293_v18 = vld [vmem:[#allocation2 + $0x88] sm:$0xff] }
 0x2da   :  { %3273 = vst.msk [vmem:[#allocation2 + $0x2e8] sm:$0xff] %vm636_vm4, %v3177_v6  ;;  %v3935_v4 = vadd.f32 %v3653_v57, %v3279_v56  ;;  %5189 = vmatprep.mubr.f32.mxu0 %v19814_v0  ;;  %4749 = vst.msk [vmem:[#allocation3 + $0x208] sm:$0xff] %vm636_vm4, %v4591_v25  ;;  %v3290_v6 = vld [vmem:[#allocation2 + $0x70] sm:$0xff]  ;;  %v3295_v25 = vld [vmem:[#allocation2 + $0x98] sm:$0xff] }
 0x2db   :  { %4030 = vst [vmem:[#allocation2 + $0x10] sm:$0xff] %v3934_v58  ;;  %v2523_v50 = vld [vmem:[#allocation2 + $0x2f8] sm:$0xff]  ;;  %13369 = vmatmul.mubr.msk.f32.gmra.mrb[74].mxu1 %vm130_vm3, %v4915_v2  ;;  %v14818_v57 = vld [vmem:[%s19783_s0 + $0x70] sm:$0xff] }
 0x2dc   :  { %4031 = vst.msk [vmem:[#allocation2 + $0x18] sm:$0xff] %vm636_vm4, %v3935_v4  ;;  %v3179_v17 = vadd.f32 %v17222_v13, %v2523_v50  ;;  %v3657_v32 = vpop.f32.mrb[228].mxu0  ;;  %6223 = vmatprep.mubr.f32.mxu1 %v19814_v0  ;;  %v4595_v59 = vpop.f32.mrb[226].mxu1  ;;  %v3291_v58 = vld [vmem:[#allocation2 + $0x78] sm:$0xff]  ;;  %v3292_v50 = vld [vmem:[#allocation2 + $0x80] sm:$0xff] }
 0x2dd   :  { %v3936_v7 = vadd.f32 %v3657_v32, %v3280_v21  ;;  %v3659_v42 = vpop.f32.mrb[229].mxu0  ;;  %13289 = vmatmul.mubr.msk.f32.gmra.mrb[78].mxu0 %vm130_vm3, %v14813_v36  ;;  %4750 = vst [vmem:[#allocation3 + $0x210] sm:$0xff] %v4595_v59  ;;  %v4597_v40 = vpop.f32.mrb[227].mxu1  ;;  %v4922_v21 = vld [vmem:[%s19783_s0 + $0x180] sm:$0xff]  ;;  %v3294_v36 = vld [vmem:[#allocation2 + $0x90] sm:$0xff] }
 0x2de   :  { %3275 = vst.msk [vmem:[#allocation2 + $0x2f8] sm:$0xff] %vm636_vm4, %v3179_v17  ;;  %v3937_v13 = vadd.f32 %v3659_v42, %v3281_v53  ;;  %5195 = vmatprep.mubr.f32.mxu0 %v19814_v0  ;;  %4751 = vst.msk [vmem:[#allocation3 + $0x218] sm:$0xff] %vm636_vm4, %v4597_v40  ;;  %v3297_v40 = vld [vmem:[#allocation2 + $0xa8] sm:$0xff] }
 0x2df   :  { %4032 = vst [vmem:[#allocation2 + $0x20] sm:$0xff] %v3936_v7  ;;  %13370 = vmatmul.mubr.msk.f32.gmra.mrb[76].mxu1 %vm130_vm3, %v4916_v43  ;;  %v14819_v7 = vld [vmem:[%s19783_s0 + $0x78] sm:$0xff] }
 0x2e0   :  { %4033 = vst.msk [vmem:[#allocation2 + $0x28] sm:$0xff] %vm636_vm4, %v3937_v13  ;;  %v3663_v22 = vpop.f32.mrb[230].mxu0  ;;  %6229 = vmatprep.mubr.f32.mxu1 %v19814_v0  ;;  %v4601_v10 = vpop.f32.mrb[228].mxu1 }
 0x2e1   :  { %v3938_v46 = vadd.f32 %v3663_v22, %v3282_v1  ;;  %v3665_v51 = vpop.f32.mrb[231].mxu0  ;;  %13290 = vmatmul.mubr.msk.f32.gmra.mrb[80].mxu0 %vm130_vm3, %v14814_v61  ;;  %4752 = vst [vmem:[#allocation3 + $0x220] sm:$0xff] %v4601_v10  ;;  %v4603_v63 = vpop.f32.mrb[229].mxu1  ;;  %v4923_v1 = vld [vmem:[%s19783_s0 + $0x188] sm:$0xff]  ;;  %v3296_v61 = vld [vmem:[#allocation2 + $0xa0] sm:$0xff] }
 0x2e2   :  { %v3939_v14 = vadd.f32 %v3665_v51, %v3283_v12  ;;  %5201 = vmatprep.mubr.f32.mxu0 %v19814_v0  ;;  %4753 = vst.msk [vmem:[#allocation3 + $0x228] sm:$0xff] %vm636_vm4, %v4603_v63  ;;  %v3299_v63 = vld [vmem:[#allocation2 + $0xb8] sm:$0xff] }
 0x2e3   :  { %4034 = vst [vmem:[#allocation2 + $0x30] sm:$0xff] %v3938_v46  ;;  %13371 = vmatmul.mubr.msk.f32.gmra.mrb[78].mxu1 %vm130_vm3, %v4917_v45  ;;  %v14820_v46 = vld [vmem:[%s19783_s0 + $0x80] sm:$0xff] }
 0x2e4   :  { %4035 = vst.msk [vmem:[#allocation2 + $0x38] sm:$0xff] %vm636_vm4, %v3939_v14  ;;  %v3669_v30 = vpop.f32.mrb[232].mxu0  ;;  %6235 = vmatprep.mubr.f32.mxu1 %v19814_v0  ;;  %v4607_v47 = vpop.f32.mrb[230].mxu1 }
 0x2e5   :  { %v3940_v8 = vadd.f32 %v3669_v30, %v3284_v44  ;;  %v3671_v27 = vpop.f32.mrb[233].mxu0  ;;  %13291 = vmatmul.mubr.msk.f32.gmra.mrb[82].mxu0 %vm130_vm3, %v14815_v35  ;;  %4754 = vst [vmem:[#allocation3 + $0x230] sm:$0xff] %v4607_v47  ;;  %v4609_v60 = vpop.f32.mrb[231].mxu1  ;;  %v5770_v44 = vld [vmem:[%s19783_s0 + $0x190] sm:$0xff] }
 0x2e6   :  { %v3941_v3 = vadd.f32 %v3671_v27, %v3285_v54  ;;  %5207 = vmatprep.mubr.f32.mxu0 %v19814_v0  ;;  %4755 = vst.msk [vmem:[#allocation3 + $0x238] sm:$0xff] %vm636_vm4, %v4609_v60  ;;  %v3298_v35 = vld [vmem:[#allocation2 + $0xb0] sm:$0xff]  ;;  %v3301_v60 = vld [vmem:[#allocation2 + $0xc8] sm:$0xff] }
 0x2e7   :  { %4036 = vst [vmem:[#allocation2 + $0x40] sm:$0xff] %v3940_v8  ;;  %13372 = vmatmul.mubr.msk.f32.gmra.mrb[80].mxu1 %vm130_vm3, %v4918_v24  ;;  %v14821_v8 = vld [vmem:[%s19783_s0 + $0x88] sm:$0xff] }
 0x2e8   :  { %4037 = vst.msk [vmem:[#allocation2 + $0x48] sm:$0xff] %vm636_vm4, %v3941_v3  ;;  %v3675_v28 = vpop.f32.mrb[234].mxu0  ;;  %6241 = vmatprep.mubr.f32.mxu1 %v19814_v0  ;;  %v4613_v41 = vpop.f32.mrb[232].mxu1 }
 0x2e9   :  { %v3942_v62 = vadd.f32 %v3675_v28, %v3286_v33  ;;  %v3677_v39 = vpop.f32.mrb[235].mxu0  ;;  %13292 = vmatmul.mubr.msk.f32.gmra.mrb[84].mxu0 %vm130_vm3, %v14816_v11  ;;  %4756 = vst [vmem:[#allocation3 + $0x240] sm:$0xff] %v4613_v41  ;;  %v4615_v55 = vpop.f32.mrb[233].mxu1  ;;  %v5771_v33 = vld [vmem:[%s19783_s0 + $0x198] sm:$0xff]  ;;  %v3300_v11 = vld [vmem:[#allocation2 + $0xc0] sm:$0xff] }
 0x2ea   :  { %v3943_v38 = vadd.f32 %v3677_v39, %v3287_v37  ;;  %5213 = vmatprep.mubr.f32.mxu0 %v19814_v0  ;;  %4757 = vst.msk [vmem:[#allocation3 + $0x248] sm:$0xff] %vm636_vm4, %v4615_v55  ;;  %v3303_v55 = vld [vmem:[#allocation2 + $0xd8] sm:$0xff] }
 0x2eb   :  { %4038 = vst [vmem:[#allocation2 + $0x50] sm:$0xff] %v3942_v62  ;;  %13373 = vmatmul.mubr.msk.f32.gmra.mrb[82].mxu1 %vm130_vm3, %v4919_v49  ;;  %v14822_v62 = vld [vmem:[%s19783_s0 + $0x90] sm:$0xff] }
 0x2ec   :  { %4039 = vst.msk [vmem:[#allocation2 + $0x58] sm:$0xff] %vm636_vm4, %v3943_v38  ;;  %v3681_v34 = vpop.f32.mrb[236].mxu0  ;;  %6247 = vmatprep.mubr.f32.mxu1 %v19814_v0  ;;  %v4619_v4 = vpop.f32.mrb[234].mxu1 }
 0x2ed   :  { %v3944_v52 = vadd.f32 %v3681_v34, %v3288_v23  ;;  %v3683_v19 = vpop.f32.mrb[237].mxu0  ;;  %13293 = vmatmul.mubr.msk.f32.gmra.mrb[86].mxu0 %vm130_vm3, %v14817_v9  ;;  %4758 = vst [vmem:[#allocation3 + $0x250] sm:$0xff] %v4619_v4  ;;  %v4621_v17 = vpop.f32.mrb[235].mxu1  ;;  %v6574_v23 = vld [vmem:[%s19783_s0 + $0x40] sm:$0xff]  ;;  %v3302_v9 = vld [vmem:[#allocation2 + $0xd0] sm:$0xff] }
 0x2ee   :  { %v3945_v16 = vadd.f32 %v3683_v19, %v3289_v31  ;;  %5219 = vmatprep.mubr.f32.mxu0 %v19814_v0  ;;  %4759 = vst.msk [vmem:[#allocation3 + $0x258] sm:$0xff] %vm636_vm4, %v4621_v17  ;;  %v3305_v17 = vld [vmem:[#allocation2 + $0xe8] sm:$0xff] }
 0x2ef   :  { %4040 = vst [vmem:[#allocation2 + $0x60] sm:$0xff] %v3944_v52  ;;  %13374 = vmatmul.mubr.msk.f32.gmra.mrb[84].mxu1 %vm130_vm3, %v4920_v48  ;;  %v14823_v52 = vld [vmem:[%s19783_s0 + $0x98] sm:$0xff] }
 0x2f0   :  { %4041 = vst.msk [vmem:[#allocation2 + $0x68] sm:$0xff] %vm636_vm4, %v3945_v16  ;;  %v3687_v15 = vpop.f32.mrb[238].mxu0  ;;  %6253 = vmatprep.mubr.f32.mxu1 %v19814_v0  ;;  %v4625_v42 = vpop.f32.mrb[236].mxu1 }
 0x2f1   :  { %v3946_v2 = vadd.f32 %v3687_v15, %v3290_v6  ;;  %v3689_v56 = vpop.f32.mrb[239].mxu0  ;;  %13294 = vmatmul.mubr.msk.f32.gmra.mrb[88].mxu0 %vm130_vm3, %v14818_v57  ;;  %4760 = vst [vmem:[#allocation3 + $0x260] sm:$0xff] %v4625_v42  ;;  %v4627_v26 = vpop.f32.mrb[237].mxu1  ;;  %v6575_v6 = vld [vmem:[%s19783_s0 + $0x48] sm:$0xff]  ;;  %v3304_v57 = vld [vmem:[#allocation2 + $0xe0] sm:$0xff] }
 0x2f2   :  { %v3947_v20 = vadd.f32 %v3689_v56, %v3291_v58  ;;  %5225 = vmatprep.mubr.f32.mxu0 %v19814_v0  ;;  %4761 = vst.msk [vmem:[#allocation3 + $0x268] sm:$0xff] %vm636_vm4, %v4627_v26  ;;  %v3307_v26 = vld [vmem:[#allocation2 + $0xf8] sm:$0xff] }
 0x2f3   :  { %4042 = vst [vmem:[#allocation2 + $0x70] sm:$0xff] %v3946_v2  ;;  %13375 = vmatmul.mubr.msk.f32.gmra.mrb[86].mxu1 %vm130_vm3, %v4921_v29  ;;  %v14824_v2 = vld [vmem:[%s19783_s0 + $0xa0] sm:$0xff] }
 0x2f4   :  { %4043 = vst.msk [vmem:[#allocation2 + $0x78] sm:$0xff] %vm636_vm4, %v3947_v20  ;;  %v3693_v5 = vpop.f32.mrb[240].mxu0  ;;  %6259 = vmatprep.mubr.f32.mxu1 %v19814_v0  ;;  %v4631_v51 = vpop.f32.mrb[238].mxu1 }
 0x2f5   :  { %v3948_v32 = vadd.f32 %v3693_v5, %v3292_v50  ;;  %v3695_v43 = vpop.f32.mrb[241].mxu0  ;;  %13295 = vmatmul.mubr.msk.f32.gmra.mrb[90].mxu0 %vm130_vm3, %v14819_v7  ;;  %4762 = vst [vmem:[#allocation3 + $0x270] sm:$0xff] %v4631_v51  ;;  %v4633_v59 = vpop.f32.mrb[239].mxu1  ;;  %v6576_v50 = vld [vmem:[%s19783_s0 + $0x50] sm:$0xff] }
 0x2f6   :  { %v3949_v53 = vadd.f32 %v3695_v43, %v3293_v18  ;;  %5231 = vmatprep.mubr.f32.mxu0 %v19814_v0  ;;  %4763 = vst.msk [vmem:[#allocation3 + $0x278] sm:$0xff] %vm636_vm4, %v4633_v59  ;;  %v3306_v7 = vld [vmem:[#allocation2 + $0xf0] sm:$0xff] }
 0x2f7   :  { %4044 = vst [vmem:[#allocation2 + $0x80] sm:$0xff] %v3948_v32  ;;  %13376 = vmatmul.mubr.msk.f32.gmra.mrb[88].mxu1 %vm130_vm3, %v4922_v21  ;;  %v14825_v32 = vld [vmem:[%s19783_s0 + $0xa8] sm:$0xff] }
 0x2f8   :  { %4045 = vst.msk [vmem:[#allocation2 + $0x88] sm:$0xff] %vm636_vm4, %v3949_v53  ;;  %v3699_v13 = vpop.f32.mrb[242].mxu0  ;;  %6265 = vmatprep.mubr.f32.mxu1 %v19814_v0  ;;  %v4637_v27 = vpop.f32.mrb[240].mxu1 }
 0x2f9   :  { %v3950_v22 = vadd.f32 %v3699_v13, %v3294_v36  ;;  %v3701_v45 = vpop.f32.mrb[243].mxu0  ;;  %13296 = vmatmul.mubr.msk.f32.gmra.mrb[92].mxu0 %vm130_vm3, %v14820_v46  ;;  %4764 = vst [vmem:[#allocation3 + $0x280] sm:$0xff] %v4637_v27  ;;  %v4639_v10 = vpop.f32.mrb[241].mxu1  ;;  %v6577_v36 = vld [vmem:[%s19783_s0 + $0x58] sm:$0xff] }
 0x2fa   :  { %v3951_v12 = vadd.f32 %v3701_v45, %v3295_v25  ;;  %5237 = vmatprep.mubr.f32.mxu0 %v19814_v0  ;;  %4765 = vst.msk [vmem:[#allocation3 + $0x288] sm:$0xff] %vm636_vm4, %v4639_v10  ;;  %v17864_v10 = vld [vmem:[%s19783_s0 + $0x68] sm:$0xff] }
 0x2fb   :  { %4046 = vst [vmem:[#allocation2 + $0x90] sm:$0xff] %v3950_v22  ;;  %13377 = vmatmul.mubr.msk.f32.gmra.mrb[90].mxu1 %vm130_vm3, %v4923_v1  ;;  %v14826_v22 = vld [vmem:[%s19783_s0 + $0xb0] sm:$0xff] }
 0x2fc   :  { %4047 = vst.msk [vmem:[#allocation2 + $0x98] sm:$0xff] %vm636_vm4, %v3951_v12  ;;  %v3705_v14 = vpop.f32.mrb[244].mxu0  ;;  %6271 = vmatprep.mubr.f32.mxu1 %v19814_v0  ;;  %v4643_v39 = vpop.f32.mrb[242].mxu1  ;;  %v3308_v12 = vld [vmem:[#allocation2 + $0x100] sm:$0xff] }
 0x2fd   :  { %v3952_v30 = vadd.f32 %v3705_v14, %v3296_v61  ;;  %v3707_v24 = vpop.f32.mrb[245].mxu0  ;;  %13297 = vmatmul.mubr.msk.f32.gmra.mrb[94].mxu0 %vm130_vm3, %v14821_v8  ;;  %4766 = vst [vmem:[#allocation3 + $0x290] sm:$0xff] %v4643_v39  ;;  %v4645_v47 = vpop.f32.mrb[243].mxu1  ;;  %v6578_v14 = vld [vmem:[%s19783_s0 + $0x60] sm:$0xff] }
 0x2fe   :  { %v3953_v54 = vadd.f32 %v3707_v24, %v3297_v40  ;;  %5243 = vmatprep.mubr.f32.mxu0 %v19814_v0  ;;  %4767 = vst.msk [vmem:[#allocation3 + $0x298] sm:$0xff] %vm636_vm4, %v4645_v47  ;;  %v14827_v40 = vld [vmem:[%s19783_s0 + $0xb8] sm:$0xff]  ;;  %v6580_v47 = vld [vmem:[%s19783_s0 + $0x70] sm:$0xff] }
 0x2ff   :  { %4048 = vst [vmem:[#allocation2 + $0xa0] sm:$0xff] %v3952_v30  ;;  %13378 = vmatmul.mubr.msk.f32.gmra.mrb[92].mxu1 %vm130_vm3, %v5770_v44  ;;  %v3309_v44 = vld [vmem:[#allocation2 + $0x108] sm:$0xff] }
 0x300   :  { %4049 = vst.msk [vmem:[#allocation2 + $0xa8] sm:$0xff] %vm636_vm4, %v3953_v54  ;;  %v3711_v3 = vpop.f32.mrb[246].mxu0  ;;  %6277 = vmatprep.mubr.f32.mxu1 %v19814_v0  ;;  %v4649_v19 = vpop.f32.mrb[244].mxu1 }
 0x301   :  { %v3954_v28 = vadd.f32 %v3711_v3, %v3298_v35  ;;  %v3713_v49 = vpop.f32.mrb[247].mxu0  ;;  %13298 = vmatmul.mubr.msk.f32.gmra.mrb[96].mxu0 %vm130_vm3, %v14822_v62  ;;  %4768 = vst [vmem:[#allocation3 + $0x2a0] sm:$0xff] %v4649_v19  ;;  %v4651_v41 = vpop.f32.mrb[245].mxu1  ;;  %v3310_v35 = vld [vmem:[#allocation2 + $0x110] sm:$0xff] }
 0x302   :  { %v3955_v37 = vadd.f32 %v3713_v49, %v3299_v63  ;;  %5249 = vmatprep.mubr.f32.mxu0 %v19814_v0  ;;  %4769 = vst.msk [vmem:[#allocation3 + $0x2a8] sm:$0xff] %vm636_vm4, %v4651_v41  ;;  %v14828_v49 = vld [vmem:[%s19783_s0 + $0xc0] sm:$0xff]  ;;  %v6581_v41 = vld [vmem:[%s19783_s0 + $0x78] sm:$0xff] }
 0x303   :  { %4050 = vst [vmem:[#allocation2 + $0xb0] sm:$0xff] %v3954_v28  ;;  %13379 = vmatmul.mubr.msk.f32.gmra.mrb[94].mxu1 %vm130_vm3, %v5771_v33  ;;  %v3311_v28 = vld [vmem:[#allocation2 + $0x118] sm:$0xff] }
 0x304   :  { %4051 = vst.msk [vmem:[#allocation2 + $0xb8] sm:$0xff] %vm636_vm4, %v3955_v37  ;;  %v3717_v38 = vpop.f32.mrb[248].mxu0  ;;  %7691 = vmatprep.mubr.f32.mxu1 %v19814_v0  ;;  %v4655_v56 = vpop.f32.mrb[246].mxu1 }
 0x305   :  { %v3956_v34 = vadd.f32 %v3717_v38, %v3300_v11  ;;  %v3719_v48 = vpop.f32.mrb[249].mxu0  ;;  %13299 = vmatmul.mubr.msk.f32.gmra.mrb[98].mxu0 %vm130_vm3, %v14823_v52  ;;  %4770 = vst [vmem:[#allocation3 + $0x2b0] sm:$0xff] %v4655_v56  ;;  %v4657_v4 = vpop.f32.mrb[247].mxu1  ;;  %v3312_v11 = vld [vmem:[#allocation2 + $0x120] sm:$0xff] }
 0x306   :  { %v3957_v31 = vadd.f32 %v3719_v48, %v3301_v60  ;;  %5255 = vmatprep.mubr.f32.mxu0 %v19814_v0  ;;  %4771 = vst.msk [vmem:[#allocation3 + $0x2b8] sm:$0xff] %vm636_vm4, %v4657_v4  ;;  %v14829_v48 = vld [vmem:[%s19783_s0 + $0xc8] sm:$0xff]  ;;  %v6582_v4 = vld [vmem:[%s19783_s0 + $0x80] sm:$0xff] }
 0x307   :  { %4052 = vst [vmem:[#allocation2 + $0xc0] sm:$0xff] %v3956_v34  ;;  %13432 = vmatmul.mubr.msk.f32.vlgmr.msra.gmra.mrb[96].mxu1 %vm130_vm3, %v6574_v23  ;;  %v3313_v34 = vld [vmem:[#allocation2 + $0x128] sm:$0xff] }
 0x308   :  { %4053 = vst.msk [vmem:[#allocation2 + $0xc8] sm:$0xff] %vm636_vm4, %v3957_v31  ;;  %v3723_v16 = vpop.f32.mrb[250].mxu0  ;;  %7697 = vmatprep.mubr.f32.mxu1 %v19814_v0  ;;  %v4661_v43 = vpop.f32.mrb[248].mxu1 }
 0x309   :  { %v3958_v15 = vadd.f32 %v3723_v16, %v3302_v9  ;;  %v3725_v29 = vpop.f32.mrb[251].mxu0  ;;  %13300 = vmatmul.mubr.msk.f32.gmra.mrb[100].mxu0 %vm130_vm3, %v14824_v2  ;;  %4772 = vst [vmem:[#allocation3 + $0x2c0] sm:$0xff] %v4661_v43  ;;  %v4663_v42 = vpop.f32.mrb[249].mxu1  ;;  %v3314_v9 = vld [vmem:[#allocation2 + $0x130] sm:$0xff] }
 0x30a   :  { %v3959_v58 = vadd.f32 %v3725_v29, %v3303_v55  ;;  %5261 = vmatprep.mubr.f32.mxu0 %v19814_v0  ;;  %4773 = vst.msk [vmem:[#allocation3 + $0x2c8] sm:$0xff] %vm636_vm4, %v4663_v42  ;;  %v14830_v29 = vld [vmem:[%s19783_s0 + $0xd0] sm:$0xff]  ;;  %v6583_v42 = vld [vmem:[%s19783_s0 + $0x88] sm:$0xff] }
 0x30b   :  { %4054 = vst [vmem:[#allocation2 + $0xd0] sm:$0xff] %v3958_v15  ;;  %13433 = vmatmul.mubr.msk.f32.gmra.mrb[98].mxu1 %vm130_vm3, %v6575_v6  ;;  %v3315_v15 = vld [vmem:[#allocation2 + $0x138] sm:$0xff] }
 0x30c   :  { %4055 = vst.msk [vmem:[#allocation2 + $0xd8] sm:$0xff] %vm636_vm4, %v3959_v58  ;;  %v3729_v20 = vpop.f32.mrb[252].mxu0  ;;  %7703 = vmatprep.mubr.f32.mxu1 %v19814_v0  ;;  %v4667_v45 = vpop.f32.mrb[250].mxu1 }
 0x30d   :  { %v3960_v5 = vadd.f32 %v3729_v20, %v3304_v57  ;;  %v3731_v21 = vpop.f32.mrb[253].mxu0  ;;  %13301 = vmatmul.mubr.msk.f32.gmra.mrb[102].mxu0 %vm130_vm3, %v14825_v32  ;;  %4774 = vst [vmem:[#allocation3 + $0x2d0] sm:$0xff] %v4667_v45  ;;  %v4669_v46 = vpop.f32.mrb[251].mxu1  ;;  %v3316_v57 = vld [vmem:[#allocation2 + $0x140] sm:$0xff] }
 0x30e   :  { %v3961_v18 = vadd.f32 %v3731_v21, %v3305_v17  ;;  %5267 = vmatprep.mubr.f32.mxu0 %v19814_v0  ;;  %4775 = vst.msk [vmem:[#allocation3 + $0x2d8] sm:$0xff] %vm636_vm4, %v4669_v46  ;;  %v14831_v21 = vld [vmem:[%s19783_s0 + $0xd8] sm:$0xff]  ;;  %v3320_v46 = vld [vmem:[#allocation2 + $0x160] sm:$0xff] }
 0x30f   :  { %4056 = vst [vmem:[#allocation2 + $0xe0] sm:$0xff] %v3960_v5  ;;  %13434 = vmatmul.mubr.msk.f32.gmra.mrb[100].mxu1 %vm130_vm3, %v6576_v50  ;;  %v3317_v5 = vld [vmem:[#allocation2 + $0x148] sm:$0xff] }
 0x310   :  { %4057 = vst.msk [vmem:[#allocation2 + $0xe8] sm:$0xff] %vm636_vm4, %v3961_v18  ;;  %v3735_v53 = vpop.f32.mrb[254].mxu0  ;;  %7709 = vmatprep.mubr.f32.mxu1 %v19814_v0  ;;  %v4673_v61 = vpop.f32.mrb[252].mxu1 }
 0x311   :  { %v3962_v13 = vadd.f32 %v3735_v53, %v3306_v7  ;;  %v3737_v1 = vpop.f32.mrb[255].mxu0  ;;  %13302 = vmatmul.mubr.msk.f32.gmra.mrb[104].mxu0 %vm130_vm3, %v14826_v22  ;;  %4776 = vst [vmem:[#allocation3 + $0x2e0] sm:$0xff] %v4673_v61  ;;  %v4675_v24 = vpop.f32.mrb[253].mxu1  ;;  %v3318_v7 = vld [vmem:[#allocation2 + $0x150] sm:$0xff] }
 0x312   :  { %v3963_v25 = vadd.f32 %v3737_v1, %v3307_v26  ;;  %5273 = vmatprep.mubr.f32.mxu0 %v19814_v0  ;;  %4777 = vst.msk [vmem:[#allocation3 + $0x2e8] sm:$0xff] %vm636_vm4, %v4675_v24  ;;  %v14832_v1 = vld [vmem:[%s19783_s0 + $0xe0] sm:$0xff] }
 0x313   :  { %4058 = vst [vmem:[#allocation2 + $0xf0] sm:$0xff] %v3962_v13  ;;  %13435 = vmatmul.mubr.msk.f32.gmra.mrb[102].mxu1 %vm130_vm3, %v6577_v36  ;;  %v3319_v13 = vld [vmem:[#allocation2 + $0x158] sm:$0xff] }
 0x314   :  { %4059 = vst.msk [vmem:[#allocation2 + $0xf8] sm:$0xff] %vm636_vm4, %v3963_v25  ;;  %v3741_v51 = vpop.f32.mrb[0].mxu0  ;;  %7715 = vmatprep.mubr.f32.mxu1 %v19814_v0  ;;  %v4679_v54 = vpop.f32.mrb[254].mxu1 }
 0x315   :  { %v3964_v59 = vadd.f32 %v3741_v51, %v3308_v12  ;;  %v3743_v30 = vpop.f32.mrb[1].mxu0  ;;  %13303 = vmatmul.mubr.msk.f32.gmra.mrb[106].mxu0 %vm130_vm3, %v14827_v40  ;;  %4778 = vst [vmem:[#allocation3 + $0x2f0] sm:$0xff] %v4679_v54  ;;  %v4681_v27 = vpop.f32.mrb[255].mxu1  ;;  %v6584_v51 = vld [vmem:[%s19783_s0 + $0x90] sm:$0xff] }
 0x316   :  { %v3965_v8 = vadd.f32 %v3743_v30, %v3309_v44  ;;  %5279 = vmatprep.mubr.f32.mxu0 %v19814_v0  ;;  %4779 = vst.msk [vmem:[#allocation3 + $0x2f8] sm:$0xff] %vm636_vm4, %v4681_v27  ;;  %v14833_v44 = vld [vmem:[%s19783_s0 + $0xe8] sm:$0xff]  ;;  %v6585_v27 = vld [vmem:[%s19783_s0 + $0x98] sm:$0xff] }
 0x317   :  { %4060 = vst [vmem:[#allocation2 + $0x100] sm:$0xff] %v3964_v59  ;;  %13436 = vmatmul.mubr.msk.f32.gmra.mrb[104].mxu1 %vm130_vm3, %v6578_v14  ;;  %v3321_v14 = vld [vmem:[#allocation2 + $0x168] sm:$0xff] }
 0x318   :  { %4061 = vst.msk [vmem:[#allocation2 + $0x108] sm:$0xff] %vm636_vm4, %v3965_v8  ;;  %v3747_v3 = vpop.f32.mrb[2].mxu0  ;;  %7721 = vmatprep.mubr.f32.mxu1 %v19814_v0  ;;  %v3322_v8 = vld [vmem:[#allocation2 + $0x170] sm:$0xff] }
 0x319   :  { %v3966_v33 = vadd.f32 %v3747_v3, %v3310_v35  ;;  %v3749_v63 = vpop.f32.mrb[3].mxu0  ;;  %13304 = vmatmul.mubr.msk.f32.gmra.mrb[108].mxu0 %vm130_vm3, %v14828_v49  ;;  %v17872_v37 = vpop.f32.mrb[0].mxu1  ;;  %v3323_v3 = vld [vmem:[#allocation2 + $0x178] sm:$0xff] }
 0x31a   :  { %v3967_v62 = vadd.f32 %v3749_v63, %v3311_v28  ;;  %5285 = vmatprep.mubr.f32.mxu0 %v19814_v0  ;;  %v17874_v39 = vpop.f32.mrb[1].mxu1  ;;  %v14834_v28 = vld [vmem:[%s19783_s0 + $0xf0] sm:$0xff] }
 0x31b   :  { %4062 = vst [vmem:[#allocation2 + $0x110] sm:$0xff] %v3966_v33  ;;  %13437 = vmatmul.mubr.msk.f32.gmra.mrb[106].mxu1 %vm130_vm3, %v17864_v10 }
 0x31c   :  { %4063 = vst.msk [vmem:[#allocation2 + $0x118] sm:$0xff] %vm636_vm4, %v3967_v62  ;;  %v3753_v38 = vpop.f32.mrb[4].mxu0  ;;  %7727 = vmatprep.mubr.f32.mxu1 %v19814_v0 }
 0x31d   :  { %v3968_v23 = vadd.f32 %v3753_v38, %v3312_v11  ;;  %v3755_v60 = vpop.f32.mrb[5].mxu0  ;;  %13305 = vmatmul.mubr.msk.f32.gmra.mrb[110].mxu0 %vm130_vm3, %v14829_v48  ;;  %v17888_v31 = vpop.f32.mrb[2].mxu1  ;;  %v3324_v11 = vld [vmem:[#allocation2 + $0x180] sm:$0xff]  ;;  %v14835_v48 = vld [vmem:[%s19783_s0 + $0xf8] sm:$0xff] }
 0x31e   :  { %v3969_v52 = vadd.f32 %v3755_v60, %v3313_v34  ;;  %5291 = vmatprep.mubr.f32.mxu0 %v19814_v0  ;;  %v17890_v19 = vpop.f32.mrb[3].mxu1  ;;  %v3325_v34 = vld [vmem:[#allocation2 + $0x188] sm:$0xff] }
 0x31f   :  { %4064 = vst [vmem:[#allocation2 + $0x120] sm:$0xff] %v3968_v23  ;;  %13438 = vmatmul.mubr.msk.f32.gmra.mrb[108].mxu1 %vm130_vm3, %v6580_v47  ;;  %v6586_v47 = vld [vmem:[%s19783_s0 + $0xa0] sm:$0xff] }
 0x320   :  { %4065 = vst.msk [vmem:[#allocation2 + $0x128] sm:$0xff] %vm636_vm4, %v3969_v52  ;;  %v3759_v16 = vpop.f32.mrb[6].mxu0  ;;  %7733 = vmatprep.mubr.f32.mxu1 %v19814_v0 }
 0x321   :  { %v3970_v6 = vadd.f32 %v3759_v16, %v3314_v9  ;;  %v3761_v55 = vpop.f32.mrb[7].mxu0  ;;  %13306 = vmatmul.mubr.msk.f32.gmra.mrb[112].mxu0 %vm130_vm3, %v14830_v29  ;;  %v17903_v58 = vpop.f32.mrb[4].mxu1  ;;  %v3327_v29 = vld [vmem:[#allocation2 + $0x198] sm:$0xff] }
 0x322   :  { %v3971_v2 = vadd.f32 %v3761_v55, %v3315_v15  ;;  %5297 = vmatprep.mubr.f32.mxu0 %v19814_v0  ;;  %v17905_v56 = vpop.f32.mrb[5].mxu1  ;;  %v6587_v15 = vld [vmem:[%s19783_s0 + $0xa8] sm:$0xff] }
 0x323   :  { %4066 = vst [vmem:[#allocation2 + $0x130] sm:$0xff] %v3970_v6  ;;  %13439 = vmatmul.mubr.msk.f32.gmra.mrb[110].mxu1 %vm130_vm3, %v6581_v41  ;;  %v3326_v41 = vld [vmem:[#allocation2 + $0x190] sm:$0xff] }
 0x324   :  { %4067 = vst.msk [vmem:[#allocation2 + $0x138] sm:$0xff] %vm636_vm4, %v3971_v2  ;;  %v3765_v20 = vpop.f32.mrb[8].mxu0  ;;  %7739 = vmatprep.mubr.f32.mxu1 %v19814_v0 }
 0x325   :  { %v3972_v50 = vadd.f32 %v3765_v20, %v3316_v57  ;;  %v3767_v17 = vpop.f32.mrb[9].mxu0  ;;  %13307 = vmatmul.mubr.msk.f32.gmra.mrb[114].mxu0 %vm130_vm3, %v14831_v21  ;;  %v17918_v18 = vpop.f32.mrb[6].mxu1  ;;  %v14836_v57 = vld [vmem:[%s19783_s0 + $0x100] sm:$0xff]  ;;  %v6588_v21 = vld [vmem:[%s19783_s0 + $0xb0] sm:$0xff] }
 0x326   :  { %v3973_v32 = vadd.f32 %v3767_v17, %v3317_v5  ;;  %5303 = vmatprep.mubr.f32.mxu0 %v19814_v0  ;;  %v17920_v43 = vpop.f32.mrb[7].mxu1  ;;  %v3328_v5 = vld [vmem:[#allocation2 + $0x1a0] sm:$0xff] }
 0x327   :  { %4068 = vst [vmem:[#allocation2 + $0x140] sm:$0xff] %v3972_v50  ;;  %13440 = vmatmul.mubr.msk.f32.gmra.mrb[112].mxu1 %vm130_vm3, %v6582_v4 }
 0x328   :  { %4069 = vst.msk [vmem:[#allocation2 + $0x148] sm:$0xff] %vm636_vm4, %v3973_v32  ;;  %v3771_v53 = vpop.f32.mrb[10].mxu0  ;;  %7745 = vmatprep.mubr.f32.mxu1 %v19814_v0 }
 0x329   :  { %v3974_v36 = vadd.f32 %v3771_v53, %v3318_v7  ;;  %v3773_v26 = vpop.f32.mrb[11].mxu0  ;;  %13308 = vmatmul.mubr.msk.f32.gmra.mrb[116].mxu0 %vm130_vm3, %v14832_v1  ;;  %v17933_v25 = vpop.f32.mrb[8].mxu1  ;;  %v3329_v7 = vld [vmem:[#allocation2 + $0x1a8] sm:$0xff]  ;;  %v3330_v1 = vld [vmem:[#allocation2 + $0x1b0] sm:$0xff] }
 0x32a   :  { %v3975_v22 = vadd.f32 %v3773_v26, %v3319_v13  ;;  %5309 = vmatprep.mubr.f32.mxu0 %v19814_v0  ;;  %v17935_v45 = vpop.f32.mrb[9].mxu1 }
 0x32b   :  { %4070 = vst [vmem:[#allocation2 + $0x150] sm:$0xff] %v3974_v36  ;;  %13441 = vmatmul.mubr.msk.f32.gmra.mrb[114].mxu1 %vm130_vm3, %v6583_v42  ;;  %v14837_v42 = vld [vmem:[%s19783_s0 + $0x108] sm:$0xff] }
 0x32c   :  { %4071 = vst.msk [vmem:[#allocation2 + $0x158] sm:$0xff] %vm636_vm4, %v3975_v22  ;;  %v3777_v12 = vpop.f32.mrb[12].mxu0  ;;  %7751 = vmatprep.mubr.f32.mxu1 %v19814_v0 }
 0x32d   :  { %v3976_v61 = vadd.f32 %v3777_v12, %v3320_v46  ;;  %v3779_v59 = vpop.f32.mrb[13].mxu0  ;;  %13309 = vmatmul.mubr.msk.f32.gmra.mrb[118].mxu0 %vm130_vm3, %v14833_v44  ;;  %v17948_v40 = vpop.f32.mrb[10].mxu1  ;;  %v6589_v46 = vld [vmem:[%s19783_s0 + $0xb8] sm:$0xff] }
 0x32e   :  { %v3977_v30 = vadd.f32 %v3779_v59, %v3321_v14  ;;  %5315 = vmatprep.mubr.f32.mxu0 %v19814_v0  ;;  %v17950_v24 = vpop.f32.mrb[11].mxu1  ;;  %v14838_v14 = vld [vmem:[%s19783_s0 + $0x110] sm:$0xff] }
 0x32f   :  { %4072 = vst [vmem:[#allocation2 + $0x160] sm:$0xff] %v3976_v61  ;;  %13442 = vmatmul.mubr.msk.f32.gmra.mrb[116].mxu1 %vm130_vm3, %v6584_v51  ;;  %v3331_v51 = vld [vmem:[#allocation2 + $0x1b8] sm:$0xff] }
 0x330   :  { %4073 = vst.msk [vmem:[#allocation2 + $0x168] sm:$0xff] %vm636_vm4, %v3977_v30  ;;  %v3783_v54 = vpop.f32.mrb[14].mxu0  ;;  %7757 = vmatprep.mubr.f32.mxu1 %v19814_v0 }
 0x331   :  { %v3978_v35 = vadd.f32 %v3783_v54, %v3322_v8  ;;  %v3785_v33 = vpop.f32.mrb[15].mxu0  ;;  %13310 = vmatmul.mubr.msk.f32.gmra.mrb[120].mxu0 %vm130_vm3, %v14834_v28  ;;  %v17963_v49 = vpop.f32.mrb[12].mxu1  ;;  %v3332_v8 = vld [vmem:[#allocation2 + $0x1c0] sm:$0xff]  ;;  %v14839_v28 = vld [vmem:[%s19783_s0 + $0x118] sm:$0xff] }
 0x332   :  { %v3979_v63 = vadd.f32 %v3785_v33, %v3323_v3  ;;  %5321 = vmatprep.mubr.f32.mxu0 %v19814_v0  ;;  %v17965_v62 = vpop.f32.mrb[13].mxu1  ;;  %v3333_v3 = vld [vmem:[#allocation2 + $0x1c8] sm:$0xff] }
 0x333   :  { %4074 = vst [vmem:[#allocation2 + $0x170] sm:$0xff] %v3978_v35  ;;  %13443 = vmatmul.mubr.msk.f32.gmra.mrb[118].mxu1 %vm130_vm3, %v6585_v27  ;;  %v6590_v27 = vld [vmem:[%s19783_s0 + $0xc0] sm:$0xff] }
 0x334   :  { %4075 = vst.msk [vmem:[#allocation2 + $0x178] sm:$0xff] %vm636_vm4, %v3979_v63  ;;  %v3789_v38 = vpop.f32.mrb[16].mxu0  ;;  %7763 = vmatprep.mubr.f32.mxu1 %v19814_v0 }
 0x335   :  { %v3980_v23 = vadd.f32 %v3789_v38, %v3324_v11  ;;  %v3791_v60 = vpop.f32.mrb[17].mxu0  ;;  %13311 = vmatmul.mubr.msk.f32.gmra.mrb[122].mxu0 %vm130_vm3, %v14835_v48  ;;  %v17978_v9 = vpop.f32.mrb[14].mxu1  ;;  %v3335_v48 = vld [vmem:[#allocation2 + $0x1d8] sm:$0xff] }
 0x336   :  { %v3981_v52 = vadd.f32 %v3791_v60, %v3325_v34  ;;  %5327 = vmatprep.mubr.f32.mxu0 %v19814_v0  ;;  %v17980_v16 = vpop.f32.mrb[15].mxu1  ;;  %v6591_v34 = vld [vmem:[%s19783_s0 + $0xc8] sm:$0xff] }
 0x337   :  { %4076 = vst [vmem:[#allocation2 + $0x180] sm:$0xff] %v3980_v23  ;;  %13444 = vmatmul.mubr.msk.f32.gmra.mrb[120].mxu1 %vm130_vm3, %v6586_v47  ;;  %v3334_v47 = vld [vmem:[#allocation2 + $0x1d0] sm:$0xff] }
 0x338   :  { %4077 = vst.msk [vmem:[#allocation2 + $0x188] sm:$0xff] %vm636_vm4, %v3981_v52  ;;  %v3795_v6 = vpop.f32.mrb[18].mxu0  ;;  %7769 = vmatprep.mubr.f32.mxu1 %v19814_v0 }
 0x339   :  { %v3982_v55 = vadd.f32 %v3795_v6, %v3326_v41  ;;  %v3797_v2 = vpop.f32.mrb[19].mxu0  ;;  %13312 = vmatmul.mubr.msk.f32.gmra.mrb[124].mxu0 %vm130_vm3, %v14836_v57  ;;  %v17993_v4 = vpop.f32.mrb[16].mxu1  ;;  %v14840_v41 = vld [vmem:[%s19783_s0 + $0x120] sm:$0xff]  ;;  %v6592_v57 = vld [vmem:[%s19783_s0 + $0xd0] sm:$0xff] }
 0x33a   :  { %v3983_v20 = vadd.f32 %v3797_v2, %v3327_v29  ;;  %5333 = vmatprep.mubr.f32.mxu0 %v19814_v0  ;;  %v17995_v50 = vpop.f32.mrb[17].mxu1  ;;  %v3336_v29 = vld [vmem:[#allocation2 + $0x1e0] sm:$0xff] }
 0x33b   :  { %4078 = vst [vmem:[#allocation2 + $0x190] sm:$0xff] %v3982_v55  ;;  %13445 = vmatmul.mubr.msk.f32.gmra.mrb[122].mxu1 %vm130_vm3, %v6587_v15 }
 0x33c   :  { %4079 = vst.msk [vmem:[#allocation2 + $0x198] sm:$0xff] %vm636_vm4, %v3983_v20  ;;  %v3801_v17 = vpop.f32.mrb[20].mxu0  ;;  %7775 = vmatprep.mubr.f32.mxu1 %v19814_v0 }
 0x33d   :  { %v3984_v32 = vadd.f32 %v3801_v17, %v3328_v5  ;;  %v3803_v53 = vpop.f32.mrb[21].mxu0  ;;  %13313 = vmatmul.mubr.msk.f32.gmra.mrb[126].mxu0 %vm130_vm3, %v14837_v42  ;;  %v18008_v13 = vpop.f32.mrb[18].mxu1  ;;  %v3337_v5 = vld [vmem:[#allocation2 + $0x1e8] sm:$0xff]  ;;  %v3338_v42 = vld [vmem:[#allocation2 + $0x1f0] sm:$0xff] }
 0x33e   :  { %v3985_v36 = vadd.f32 %v3803_v53, %v3329_v7  ;;  %5339 = vmatprep.mubr.f32.mxu0 %v19814_v0  ;;  %v18010_v26 = vpop.f32.mrb[19].mxu1 }
 0x33f   :  { %4080 = vst [vmem:[#allocation2 + $0x1a0] sm:$0xff] %v3984_v32  ;;  %13446 = vmatmul.mubr.msk.f32.gmra.mrb[124].mxu1 %vm130_vm3, %v6588_v21  ;;  %v14841_v21 = vld [vmem:[%s19783_s0 + $0x128] sm:$0xff] }
 0x340   :  { %4081 = vst.msk [vmem:[#allocation2 + $0x1a8] sm:$0xff] %vm636_vm4, %v3985_v36  ;;  %v3807_v22 = vpop.f32.mrb[22].mxu0  ;;  %7781 = vmatprep.mubr.f32.mxu1 %v19814_v0 }
 0x341   :  { %v3986_v12 = vadd.f32 %v3807_v22, %v3330_v1  ;;  %v3809_v61 = vpop.f32.mrb[23].mxu0  ;;  %13314 = vmatmul.mubr.msk.f32.gmra.mrb[128].mxu0 %vm130_vm3, %v14838_v14  ;;  %v18023_v44 = vpop.f32.mrb[20].mxu1  ;;  %v6593_v1 = vld [vmem:[%s19783_s0 + $0xd8] sm:$0xff] }
 0x342   :  { %v3987_v59 = vadd.f32 %v3809_v61, %v3331_v51  ;;  %5345 = vmatprep.mubr.f32.mxu0 %v19814_v0  ;;  %v18025_v30 = vpop.f32.mrb[21].mxu1  ;;  %v14842_v51 = vld [vmem:[%s19783_s0 + $0x130] sm:$0xff] }
 0x343   :  { %4082 = vst [vmem:[#allocation2 + $0x1b0] sm:$0xff] %v3986_v12  ;;  %13447 = vmatmul.mubr.msk.f32.gmra.mrb[126].mxu1 %vm130_vm3, %v6589_v46  ;;  %v3339_v46 = vld [vmem:[#allocation2 + $0x1f8] sm:$0xff] }
 0x344   :  { %4083 = vst.msk [vmem:[#allocation2 + $0x1b8] sm:$0xff] %vm636_vm4, %v3987_v59  ;;  %v3813_v54 = vpop.f32.mrb[24].mxu0  ;;  %7787 = vmatprep.mubr.f32.mxu1 %v19814_v0 }
 0x345   :  { %v3988_v35 = vadd.f32 %v3813_v54, %v3332_v8  ;;  %v3815_v33 = vpop.f32.mrb[25].mxu0  ;;  %13315 = vmatmul.mubr.msk.f32.gmra.mrb[130].mxu0 %vm130_vm3, %v14839_v28  ;;  %v18038_v11 = vpop.f32.mrb[22].mxu1  ;;  %v3340_v8 = vld [vmem:[#allocation2 + $0x200] sm:$0xff]  ;;  %v14843_v28 = vld [vmem:[%s19783_s0 + $0x138] sm:$0xff] }
 0x346   :  { %v3989_v63 = vadd.f32 %v3815_v33, %v3333_v3  ;;  %5351 = vmatprep.mubr.f32.mxu0 %v19814_v0  ;;  %v18040_v38 = vpop.f32.mrb[23].mxu1  ;;  %v3341_v3 = vld [vmem:[#allocation2 + $0x208] sm:$0xff] }
 0x347   :  { %4084 = vst [vmem:[#allocation2 + $0x1c0] sm:$0xff] %v3988_v35  ;;  %13448 = vmatmul.mubr.msk.f32.gmra.mrb[128].mxu1 %vm130_vm3, %v6590_v27  ;;  %v6594_v27 = vld [vmem:[%s19783_s0 + $0xe0] sm:$0xff] }
 0x348   :  { %4085 = vst.msk [vmem:[#allocation2 + $0x1c8] sm:$0xff] %vm636_vm4, %v3989_v63  ;;  %v3819_v23 = vpop.f32.mrb[26].mxu0  ;;  %7793 = vmatprep.mubr.f32.mxu1 %v19814_v0 }
 0x349   :  { %v3990_v60 = vadd.f32 %v3819_v23, %v3334_v47  ;;  %v3821_v52 = vpop.f32.mrb[27].mxu0  ;;  %13316 = vmatmul.mubr.msk.f32.gmra.mrb[132].mxu0 %vm130_vm3, %v14840_v41  ;;  %v18053_v15 = vpop.f32.mrb[24].mxu1  ;;  %v3343_v41 = vld [vmem:[#allocation2 + $0x218] sm:$0xff] }
 0x34a   :  { %v3991_v6 = vadd.f32 %v3821_v52, %v3335_v48  ;;  %5357 = vmatprep.mubr.f32.mxu0 %v19814_v0  ;;  %v18055_v55 = vpop.f32.mrb[25].mxu1  ;;  %v6595_v48 = vld [vmem:[%s19783_s0 + $0xe8] sm:$0xff] }
 0x34b   :  { %4086 = vst [vmem:[#allocation2 + $0x1d0] sm:$0xff] %v3990_v60  ;;  %13449 = vmatmul.mubr.msk.f32.gmra.mrb[130].mxu1 %vm130_vm3, %v6591_v34  ;;  %v3342_v34 = vld [vmem:[#allocation2 + $0x210] sm:$0xff] }
 0x34c   :  { %4087 = vst.msk [vmem:[#allocation2 + $0x1d8] sm:$0xff] %vm636_vm4, %v3991_v6  ;;  %v3825_v2 = vpop.f32.mrb[28].mxu0  ;;  %7799 = vmatprep.mubr.f32.mxu1 %v19814_v0 }
 0x34d   :  { %v3992_v20 = vadd.f32 %v3825_v2, %v3336_v29  ;;  %v3827_v17 = vpop.f32.mrb[29].mxu0  ;;  %13317 = vmatmul.mubr.msk.f32.gmra.mrb[134].mxu0 %vm130_vm3, %v14841_v21  ;;  %v18068_v7 = vpop.f32.mrb[26].mxu1  ;;  %v14844_v29 = vld [vmem:[%s19783_s0 + $0x140] sm:$0xff]  ;;  %v6596_v21 = vld [vmem:[%s19783_s0 + $0xf0] sm:$0xff] }
 0x34e   :  { %v3993_v32 = vadd.f32 %v3827_v17, %v3337_v5  ;;  %5363 = vmatprep.mubr.f32.mxu0 %v19814_v0  ;;  %v18070_v53 = vpop.f32.mrb[27].mxu1  ;;  %v3344_v5 = vld [vmem:[#allocation2 + $0x220] sm:$0xff] }
 0x34f   :  { %4088 = vst [vmem:[#allocation2 + $0x1e0] sm:$0xff] %v3992_v20  ;;  %13450 = vmatmul.mubr.msk.f32.gmra.mrb[132].mxu1 %vm130_vm3, %v6592_v57 }
 0x350   :  { %4089 = vst.msk [vmem:[#allocation2 + $0x1e8] sm:$0xff] %vm636_vm4, %v3993_v32  ;;  %v3831_v36 = vpop.f32.mrb[30].mxu0  ;;  %7805 = vmatprep.mubr.f32.mxu1 %v19814_v0 }
 0x351   :  { %v3994_v22 = vadd.f32 %v3831_v36, %v3338_v42  ;;  %v3833_v12 = vpop.f32.mrb[31].mxu0  ;;  %13318 = vmatmul.mubr.msk.f32.gmra.mrb[136].mxu0 %vm130_vm3, %v14842_v51  ;;  %v18083_v14 = vpop.f32.mrb[28].mxu1  ;;  %v3345_v42 = vld [vmem:[#allocation2 + $0x228] sm:$0xff]  ;;  %v3346_v51 = vld [vmem:[#allocation2 + $0x230] sm:$0xff] }
 0x352   :  { %v3995_v61 = vadd.f32 %v3833_v12, %v3339_v46  ;;  %5369 = vmatprep.mubr.f32.mxu0 %v19814_v0  ;;  %v18085_v59 = vpop.f32.mrb[29].mxu1 }
 0x353   :  { %4090 = vst [vmem:[#allocation2 + $0x1f0] sm:$0xff] %v3994_v22  ;;  %13451 = vmatmul.mubr.msk.f32.gmra.mrb[134].mxu1 %vm130_vm3, %v6593_v1  ;;  %v14845_v1 = vld [vmem:[%s19783_s0 + $0x148] sm:$0xff] }
 0x354   :  { %4091 = vst.msk [vmem:[#allocation2 + $0x1f8] sm:$0xff] %vm636_vm4, %v3995_v61  ;;  %v3837_v54 = vpop.f32.mrb[32].mxu0  ;;  %7811 = vmatprep.mubr.f32.mxu1 %v19814_v0 }
 0x355   :  { %v3996_v35 = vadd.f32 %v3837_v54, %v3340_v8  ;;  %v3839_v33 = vpop.f32.mrb[33].mxu0  ;;  %13319 = vmatmul.mubr.msk.f32.gmra.mrb[138].mxu0 %vm130_vm3, %v14843_v28  ;;  %v18098_v47 = vpop.f32.mrb[30].mxu1  ;;  %v6597_v8 = vld [vmem:[%s19783_s0 + $0xf8] sm:$0xff] }
 0x356   :  { %v3997_v63 = vadd.f32 %v3839_v33, %v3341_v3  ;;  %5375 = vmatprep.mubr.f32.mxu0 %v19814_v0  ;;  %v18100_v23 = vpop.f32.mrb[31].mxu1  ;;  %v14846_v3 = vld [vmem:[%s19783_s0 + $0x150] sm:$0xff] }
 0x357   :  { %4092 = vst [vmem:[#allocation2 + $0x200] sm:$0xff] %v3996_v35  ;;  %13452 = vmatmul.mubr.msk.f32.gmra.mrb[136].mxu1 %vm130_vm3, %v6594_v27  ;;  %v3347_v27 = vld [vmem:[#allocation2 + $0x238] sm:$0xff] }
 0x358   :  { %4093 = vst.msk [vmem:[#allocation2 + $0x208] sm:$0xff] %vm636_vm4, %v3997_v63  ;;  %v3843_v60 = vpop.f32.mrb[34].mxu0  ;;  %7817 = vmatprep.mubr.f32.mxu1 %v19814_v0 }
 0x359   :  { %v3998_v52 = vadd.f32 %v3843_v60, %v3342_v34  ;;  %v3845_v6 = vpop.f32.mrb[35].mxu0  ;;  %13320 = vmatmul.mubr.msk.f32.gmra.mrb[140].mxu0 %vm130_vm3, %v14844_v29  ;;  %v18113_v57 = vpop.f32.mrb[32].mxu1  ;;  %v3348_v34 = vld [vmem:[#allocation2 + $0x240] sm:$0xff]  ;;  %v14847_v29 = vld [vmem:[%s19783_s0 + $0x158] sm:$0xff] }
 0x35a   :  { %v3999_v2 = vadd.f32 %v3845_v6, %v3343_v41  ;;  %5381 = vmatprep.mubr.f32.mxu0 %v19814_v0  ;;  %v18115_v20 = vpop.f32.mrb[33].mxu1  ;;  %v3349_v41 = vld [vmem:[#allocation2 + $0x248] sm:$0xff] }
 0x35b   :  { %4094 = vst [vmem:[#allocation2 + $0x210] sm:$0xff] %v3998_v52  ;;  %13453 = vmatmul.mubr.msk.f32.gmra.mrb[138].mxu1 %vm130_vm3, %v6595_v48  ;;  %v6598_v48 = vld [vmem:[%s19783_s0 + $0x100] sm:$0xff] }
 0x35c   :  { %4095 = vst.msk [vmem:[#allocation2 + $0x218] sm:$0xff] %vm636_vm4, %v3999_v2  ;;  %v3849_v17 = vpop.f32.mrb[36].mxu0  ;;  %7823 = vmatprep.mubr.f32.mxu1 %v19814_v0 }
 0x35d   :  { %v4000_v32 = vadd.f32 %v3849_v17, %v3344_v5  ;;  %v3851_v36 = vpop.f32.mrb[37].mxu0  ;;  %13321 = vmatmul.mubr.msk.f32.gmra.mrb[142].mxu0 %vm130_vm3, %v14845_v1  ;;  %v18128_v46 = vpop.f32.mrb[34].mxu1  ;;  %v3351_v1 = vld [vmem:[#allocation2 + $0x258] sm:$0xff] }
 0x35e   :  { %v4001_v22 = vadd.f32 %v3851_v36, %v3345_v42  ;;  %5387 = vmatprep.mubr.f32.mxu0 %v19814_v0  ;;  %v18130_v12 = vpop.f32.mrb[35].mxu1  ;;  %v6599_v42 = vld [vmem:[%s19783_s0 + $0x108] sm:$0xff] }
 0x35f   :  { %4096 = vst [vmem:[#allocation2 + $0x220] sm:$0xff] %v4000_v32  ;;  %13454 = vmatmul.mubr.msk.f32.gmra.mrb[140].mxu1 %vm130_vm3, %v6596_v21  ;;  %v3350_v21 = vld [vmem:[#allocation2 + $0x250] sm:$0xff] }
 0x360   :  { %4097 = vst.msk [vmem:[#allocation2 + $0x228] sm:$0xff] %vm636_vm4, %v4001_v22  ;;  %v3855_v61 = vpop.f32.mrb[38].mxu0  ;;  %7829 = vmatprep.mubr.f32.mxu1 %v19814_v0 }
 0x361   :  { %v4002_v54 = vadd.f32 %v3855_v61, %v3346_v51  ;;  %v3857_v35 = vpop.f32.mrb[39].mxu0  ;;  %13322 = vmatmul.mubr.msk.f32.gmra.mrb[144].mxu0 %vm130_vm3, %v14846_v3  ;;  %v18143_v28 = vpop.f32.mrb[36].mxu1  ;;  %v14848_v51 = vld [vmem:[%s19783_s0 + $0x160] sm:$0xff]  ;;  %v6600_v3 = vld [vmem:[%s19783_s0 + $0x110] sm:$0xff] }
 0x362   :  { %v4003_v33 = vadd.f32 %v3857_v35, %v3347_v27  ;;  %5393 = vmatprep.mubr.f32.mxu0 %v19814_v0  ;;  %v18145_v63 = vpop.f32.mrb[37].mxu1  ;;  %v3352_v27 = vld [vmem:[#allocation2 + $0x260] sm:$0xff] }
 0x363   :  { %4098 = vst [vmem:[#allocation2 + $0x230] sm:$0xff] %v4002_v54  ;;  %13455 = vmatmul.mubr.msk.f32.gmra.mrb[142].mxu1 %vm130_vm3, %v6597_v8 }
 0x364   :  { %4099 = vst.msk [vmem:[#allocation2 + $0x238] sm:$0xff] %vm636_vm4, %v4003_v33  ;;  %v3861_v60 = vpop.f32.mrb[40].mxu0  ;;  %7835 = vmatprep.mubr.f32.mxu1 %v19814_v0 }
 0x365   :  { %v4004_v52 = vadd.f32 %v3861_v60, %v3348_v34  ;;  %v3863_v6 = vpop.f32.mrb[41].mxu0  ;;  %13323 = vmatmul.mubr.msk.f32.gmra.mrb[146].mxu0 %vm130_vm3, %v14847_v29  ;;  %v18158_v5 = vpop.f32.mrb[38].mxu1  ;;  %v3353_v34 = vld [vmem:[#allocation2 + $0x268] sm:$0xff]  ;;  %v3354_v29 = vld [vmem:[#allocation2 + $0x270] sm:$0xff] }
 0x366   :  { %v4005_v2 = vadd.f32 %v3863_v6, %v3349_v41  ;;  %5399 = vmatprep.mubr.f32.mxu0 %v19814_v0  ;;  %v18160_v17 = vpop.f32.mrb[39].mxu1 }
 0x367   :  { %4100 = vst [vmem:[#allocation2 + $0x240] sm:$0xff] %v4004_v52  ;;  %13456 = vmatmul.mubr.msk.f32.gmra.mrb[144].mxu1 %vm130_vm3, %v6598_v48  ;;  %v14849_v48 = vld [vmem:[%s19783_s0 + $0x168] sm:$0xff] }
 0x368   :  { %4101 = vst.msk [vmem:[#allocation2 + $0x248] sm:$0xff] %vm636_vm4, %v4005_v2  ;;  %v3867_v32 = vpop.f32.mrb[42].mxu0  ;;  %7841 = vmatprep.mubr.f32.mxu1 %v19814_v0 }
 0x369   :  { %v4006_v36 = vadd.f32 %v3867_v32, %v3350_v21  ;;  %v3869_v22 = vpop.f32.mrb[43].mxu0  ;;  %13324 = vmatmul.mubr.msk.f32.gmra.mrb[148].mxu0 %vm130_vm3, %v14848_v51  ;;  %v18173_v8 = vpop.f32.mrb[40].mxu1  ;;  %v6601_v21 = vld [vmem:[%s19783_s0 + $0x118] sm:$0xff] }
 0x36a   :  { %v4007_v61 = vadd.f32 %v3869_v22, %v3351_v1  ;;  %5405 = vmatprep.mubr.f32.mxu0 %v19814_v0  ;;  %v18175_v54 = vpop.f32.mrb[41].mxu1  ;;  %v14850_v1 = vld [vmem:[%s19783_s0 + $0x170] sm:$0xff] }
 0x36b   :  { %4102 = vst [vmem:[#allocation2 + $0x250] sm:$0xff] %v4006_v36  ;;  %13457 = vmatmul.mubr.msk.f32.gmra.mrb[146].mxu1 %vm130_vm3, %v6599_v42  ;;  %v3355_v42 = vld [vmem:[#allocation2 + $0x278] sm:$0xff] }
 0x36c   :  { %4103 = vst.msk [vmem:[#allocation2 + $0x258] sm:$0xff] %vm636_vm4, %v4007_v61  ;;  %v3873_v35 = vpop.f32.mrb[44].mxu0  ;;  %7847 = vmatprep.mubr.f32.mxu1 %v19814_v0 }
 0x36d   :  { %v4008_v33 = vadd.f32 %v3873_v35, %v3352_v27  ;;  %v3875_v60 = vpop.f32.mrb[45].mxu0  ;;  %13325 = vmatmul.mubr.msk.f32.gmra.mrb[150].mxu0 %vm130_vm3, %v14849_v48  ;;  %v18188_v41 = vpop.f32.mrb[42].mxu1  ;;  %v3356_v27 = vld [vmem:[#allocation2 + $0x280] sm:$0xff]  ;;  %v14851_v48 = vld [vmem:[%s19783_s0 + $0x178] sm:$0xff] }
 0x36e   :  { %v4009_v52 = vadd.f32 %v3875_v60, %v3353_v34  ;;  %5411 = vmatprep.mubr.f32.mxu0 %v19814_v0  ;;  %v18190_v6 = vpop.f32.mrb[43].mxu1  ;;  %v3357_v34 = vld [vmem:[#allocation2 + $0x288] sm:$0xff] }
 0x36f   :  { %4104 = vst [vmem:[#allocation2 + $0x260] sm:$0xff] %v4008_v33  ;;  %13458 = vmatmul.mubr.msk.f32.gmra.mrb[148].mxu1 %vm130_vm3, %v6600_v3  ;;  %v6602_v3 = vld [vmem:[%s19783_s0 + $0x120] sm:$0xff] }
 0x370   :  { %4105 = vst.msk [vmem:[#allocation2 + $0x268] sm:$0xff] %vm636_vm4, %v4009_v52  ;;  %v3879_v2 = vpop.f32.mrb[46].mxu0  ;;  %7853 = vmatprep.mubr.f32.mxu1 %v19814_v0 }
 0x371   :  { %v4010_v32 = vadd.f32 %v3879_v2, %v3354_v29  ;;  %v3881_v36 = vpop.f32.mrb[47].mxu0  ;;  %13326 = vmatmul.mubr.msk.f32.gmra.mrb[152].mxu0 %vm130_vm3, %v14850_v1  ;;  %v18203_v51 = vpop.f32.mrb[44].mxu1  ;;  %v3359_v1 = vld [vmem:[#allocation2 + $0x298] sm:$0xff] }
 0x372   :  { %v4011_v22 = vadd.f32 %v3881_v36, %v3355_v42  ;;  %5417 = vmatprep.mubr.f32.mxu0 %v19814_v0  ;;  %v18205_v61 = vpop.f32.mrb[45].mxu1  ;;  %v6603_v42 = vld [vmem:[%s19783_s0 + $0x128] sm:$0xff] }
 0x373   :  { %4106 = vst [vmem:[#allocation2 + $0x270] sm:$0xff] %v4010_v32  ;;  %13459 = vmatmul.mubr.msk.f32.gmra.mrb[150].mxu1 %vm130_vm3, %v6601_v21  ;;  %v3358_v21 = vld [vmem:[#allocation2 + $0x290] sm:$0xff] }
 0x374   :  { %4107 = vst.msk [vmem:[#allocation2 + $0x278] sm:$0xff] %vm636_vm4, %v4011_v22  ;;  %v3885_v35 = vpop.f32.mrb[48].mxu0  ;;  %7859 = vmatprep.mubr.f32.mxu1 %v19814_v0 }
 0x375   :  { %v4012_v33 = vadd.f32 %v3885_v35, %v3356_v27  ;;  %v3887_v60 = vpop.f32.mrb[49].mxu0  ;;  %13327 = vmatmul.mubr.msk.f32.gmra.mrb[154].mxu0 %vm130_vm3, %v14851_v48  ;;  %v18218_v29 = vpop.f32.mrb[46].mxu1  ;;  %v14852_v27 = vld [vmem:[%s19783_s0 + $0x180] sm:$0xff]  ;;  %v6604_v48 = vld [vmem:[%s19783_s0 + $0x130] sm:$0xff] }
 0x376   :  { %v4013_v52 = vadd.f32 %v3887_v60, %v3357_v34  ;;  %5423 = vmatprep.mubr.f32.mxu0 %v19814_v0  ;;  %v18220_v2 = vpop.f32.mrb[47].mxu1  ;;  %v3360_v34 = vld [vmem:[#allocation2 + $0x2a0] sm:$0xff] }
 0x377   :  { %4108 = vst [vmem:[#allocation2 + $0x280] sm:$0xff] %v4012_v33  ;;  %19953 = vst [vmem:[#allocation16_spill] sm:$0xff] %v18220_v2  ;;  %13460 = vmatmul.mubr.msk.f32.gmra.mrb[152].mxu1 %vm130_vm3, %v6602_v3  ;;  %v3365_v2 = vld [vmem:[#allocation2 + $0x2c8] sm:$0xff] }
 0x378   :  { %4109 = vst.msk [vmem:[#allocation2 + $0x288] sm:$0xff] %vm636_vm4, %v4013_v52  ;;  %v3891_v32 = vpop.f32.mrb[50].mxu0  ;;  %7865 = vmatprep.mubr.f32.mxu1 %v19814_v0 }
 0x379   :  { %v4014_v36 = vadd.f32 %v3891_v32, %v3358_v21  ;;  %v3893_v22 = vpop.f32.mrb[51].mxu0  ;;  %13328 = vmatmul.mubr.msk.f32.gmra.mrb[156].mxu0 %vm130_vm3, %v14852_v27  ;;  %v18233_v3 = vpop.f32.mrb[48].mxu1  ;;  %v3361_v21 = vld [vmem:[#allocation2 + $0x2a8] sm:$0xff] }
 0x37a   :  { %v4015_v35 = vadd.f32 %v3893_v22, %v3359_v1  ;;  %5429 = vmatprep.mubr.f32.mxu0 %v19814_v0  ;;  %v18235_v33 = vpop.f32.mrb[49].mxu1  ;;  %v6572_v1 = vld [vmem:[%s19783_s0 + $0x30] sm:$0xff] }
 0x37b   :  { %4110 = vst [vmem:[#allocation2 + $0x290] sm:$0xff] %v4014_v36  ;;  %19954 = vst [vmem:[#allocation38_spill] sm:$0xff] %v18235_v33  ;;  %13461 = vmatmul.mubr.msk.f32.gmra.mrb[154].mxu1 %vm130_vm3, %v6603_v42  ;;  %v14853_v36 = vld [vmem:[%s19783_s0 + $0x188] sm:$0xff] }
 0x37c   :  { %4111 = vst.msk [vmem:[#allocation2 + $0x298] sm:$0xff] %vm636_vm4, %v4015_v35  ;;  %v3897_v60 = vpop.f32.mrb[52].mxu0  ;;  %7871 = vmatprep.mubr.f32.mxu1 %v19814_v0  ;;  %v3362_v35 = vld [vmem:[#allocation2 + $0x2b0] sm:$0xff] }
 0x37d   :  { %v4016_v52 = vadd.f32 %v3897_v60, %v3360_v34  ;;  %v3899_v32 = vpop.f32.mrb[53].mxu0  ;;  %13329 = vmatmul.mubr.msk.f32.gmra.mrb[158].mxu0 %vm130_vm3, %v14853_v36  ;;  %v18251_v22 = vpop.f32.mrb[50].mxu1  ;;  %v6605_v60 = vld [vmem:[%s19783_s0 + $0x138] sm:$0xff] }
 0x37e   :  { %v4017_v42 = vadd.f32 %v3899_v32, %v3361_v21  ;;  %6843 = vmatprep.mubr.f32.mxu0 %v19814_v0  ;;  %v18253_v27 = vpop.f32.mrb[51].mxu1  ;;  %v3363_v32 = vld [vmem:[#allocation2 + $0x2b8] sm:$0xff] }
 0x37f   :  { %4112 = vst [vmem:[#allocation2 + $0x2a0] sm:$0xff] %v4016_v52  ;;  %19955 = vst [vmem:[#allocation20_spill] sm:$0xff] %v18253_v27  ;;  %13462 = vmatmul.mubr.msk.f32.gmra.mrb[156].mxu1 %vm130_vm3, %v6604_v48  ;;  %v6573_v48 = vld [vmem:[%s19783_s0 + $0x38] sm:$0xff]  ;;  %v3364_v27 = vld [vmem:[#allocation2 + $0x2c0] sm:$0xff] }
 0x380   :  { %4113 = vst.msk [vmem:[#allocation2 + $0x2a8] sm:$0xff] %vm636_vm4, %v4017_v42  ;;  %v3903_v34 = vpop.f32.mrb[54].mxu0  ;;  %7877 = vmatprep.mubr.f32.mxu1 %v19814_v0 }
 0x381   :  { %v4018_v21 = vadd.f32 %v3903_v34, %v3362_v35  ;;  %v3905_v36 = vpop.f32.mrb[55].mxu0  ;;  %13382 = vmatmul.mubr.msk.f32.vlgmr.msra.gmra.mrb[160].mxu0 %vm130_vm3, %v6572_v1  ;;  %v14204_v34 = vld [vmem:[#allocation10] ss:$8 sps:$4 sm:$0xff]   ;;  %v14206_v1 = vld [vmem:[#allocation10 + $0x4] ss:$8 sps:$4 sm:$0xff]  }
 0x382   :  { %v4019_v52 = vadd.f32 %v3905_v36, %v3363_v32  ;;  %6849 = vmatprep.mubr.f32.mxu0 %v19814_v0  ;;  %v18266_v42 = vpop.f32.mrb[52].mxu1  ;;  %v6606_v32 = vld [vmem:[%s19783_s0 + $0x140] sm:$0xff]  ;;  %8896 = vmatprep.subr.bf16.mxu0 %v14206_v1 }
 0x383   :  { %19956 = vst [vmem:[#allocation17_spill] sm:$0xff] %v18266_v42  ;;  %4114 = vst [vmem:[#allocation2 + $0x2b0] sm:$0xff] %v4018_v21  ;;  %v18268_v33 = vpop.f32.mrb[53].mxu1  ;;  %13463 = vmatmul.mubr.msk.f32.gmra.mrb[158].mxu1 %vm130_vm3, %v6605_v60  ;;  %8897 = vmatpush1.bf16.msra.mxu0 %v14204_v34  ;;  %v14854_v34 = vld [vmem:[%s19783_s0 + $0x40] sm:$0xff] }
 0x384   :  { %19957 = vst [vmem:[#allocation41_spill] sm:$0xff] %v18268_v33  ;;  %4115 = vst.msk [vmem:[#allocation2 + $0x2b8] sm:$0xff] %vm636_vm4, %v4019_v52  ;;  %v3909_v35 = vpop.f32.mrb[56].mxu0  ;;  %7883 = vmatprep.mubr.f32.mxu1 %v19814_v0  ;;  %v3366_v33 = vld [vmem:[#allocation2 + $0x2d0] sm:$0xff] }
 0x385   :  { %v4020_v36 = vadd.f32 %v3909_v35, %v3364_v27  ;;  %v3911_v42 = vpop.f32.mrb[57].mxu0  ;;  %13383 = vmatmul.mubr.msk.f32.gmra.mrb[162].mxu0 %vm130_vm3, %v6573_v48  ;;  %v6607_v48 = vld [vmem:[%s19783_s0 + $0x148] sm:$0xff] }
 0x386   :  { %v4021_v21 = vadd.f32 %v3911_v42, %v3365_v2  ;;  %6855 = vmatprep.mubr.f32.mxu0 %v19814_v0  ;;  %v18278_v60 = vpop.f32.mrb[54].mxu1  ;;  %v3367_v42 = vld [vmem:[#allocation2 + $0x2d8] sm:$0xff] }
 0x387   :  { %19958 = vst [vmem:[#allocation22_spill] sm:$0xff] %v18278_v60  ;;  %4116 = vst [vmem:[#allocation2 + $0x2c0] sm:$0xff] %v4020_v36  ;;  %v18280_v52 = vpop.f32.mrb[55].mxu1  ;;  %13464 = vmatmul.mubr.msk.f32.gmra.mrb[160].mxu1 %vm130_vm3, %v6606_v32 }
 0x388   :  { %19959 = vst [vmem:[#allocation19_spill] sm:$0xff] %v18280_v52  ;;  %4117 = vst.msk [vmem:[#allocation2 + $0x2c8] sm:$0xff] %vm636_vm4, %v4021_v21  ;;  %v3915_v27 = vpop.f32.mrb[58].mxu0  ;;  %7889 = vmatprep.mubr.f32.mxu1 %v19814_v0  ;;  %v6609_v52 = vld [vmem:[%s19783_s0 + $0x158] sm:$0xff] }
 0x389   :  { %v4022_v2 = vadd.f32 %v3915_v27, %v3366_v33  ;;  %v3917_v35 = vpop.f32.mrb[59].mxu0  ;;  %13384 = vmatmul.mubr.msk.f32.gmra.mrb[164].mxu0 %vm130_vm3, %v14854_v34  ;;  %v3368_v33 = vld [vmem:[#allocation2 + $0x2e0] sm:$0xff]  ;;  %v6608_v27 = vld [vmem:[%s19783_s0 + $0x150] sm:$0xff] }
 0x38a   :  { %v4023_v1 = vadd.f32 %v3917_v35, %v3367_v42  ;;  %6861 = vmatprep.mubr.f32.mxu0 %v19814_v0  ;;  %v18293_v32 = vpop.f32.mrb[56].mxu1  ;;  %v3369_v35 = vld [vmem:[#allocation2 + $0x2e8] sm:$0xff] }
 0x38b   :  { %19960 = vst [vmem:[#allocation44_spill] sm:$0xff] %v18293_v32  ;;  %4118 = vst [vmem:[#allocation2 + $0x2d0] sm:$0xff] %v4022_v2  ;;  %v18295_v36 = vpop.f32.mrb[57].mxu1  ;;  %13465 = vmatmul.mubr.msk.f32.gmra.mrb[162].mxu1 %vm130_vm3, %v6607_v48  ;;  %v14855_v2 = vld [vmem:[%s19783_s0 + $0x48] sm:$0xff]  ;;  %v14209_v32 = vld [vmem:[#allocation10 + $0x14] ss:$8 sps:$4 sm:$0xff]  }
 0x38c   :  { %19961 = vst [vmem:[#allocation23_spill] sm:$0xff] %v18295_v36  ;;  %4119 = vst.msk [vmem:[#allocation2 + $0x2d8] sm:$0xff] %vm636_vm4, %v4023_v1  ;;  %v3921_v21 = vpop.f32.mrb[60].mxu0  ;;  %7895 = vmatprep.mubr.f32.mxu1 %v19814_v0  ;;  %8898 = vmatprep.subr.bf16.mxu0 %v14209_v32 }
 0x38d   :  { %v4024_v42 = vadd.f32 %v3921_v21, %v3368_v33  ;;  %v3923_v34 = vpop.f32.mrb[61].mxu0  ;;  %13385 = vmatmul.mubr.msk.f32.gmra.mrb[166].mxu0 %vm130_vm3, %v14855_v2  ;;  %v3370_v33 = vld [vmem:[#allocation2 + $0x2f0] sm:$0xff] }
 0x38e   :  { %v4025_v48 = vadd.f32 %v3923_v34, %v3369_v35  ;;  %6867 = vmatprep.mubr.f32.mxu0 %v19814_v0  ;;  %v18308_v1 = vpop.f32.mrb[58].mxu1  ;;  %v3371_v34 = vld [vmem:[#allocation2 + $0x2f8] sm:$0xff] }
 0x38f   :  { %19962 = vst [vmem:[#allocation21_spill] sm:$0xff] %v18308_v1  ;;  %4120 = vst [vmem:[#allocation2 + $0x2e0] sm:$0xff] %v4024_v42  ;;  %v18310_v36 = vpop.f32.mrb[59].mxu1  ;;  %13466 = vmatmul.mubr.msk.f32.gmra.mrb[164].mxu1 %vm130_vm3, %v6608_v27  ;;  %v14856_v42 = vld [vmem:[%s19783_s0 + $0x50] sm:$0xff] }
 0x390   :  { %19963 = vst [vmem:[#allocation47_spill] sm:$0xff] %v18310_v36  ;;  %4121 = vst.msk [vmem:[#allocation2 + $0x2e8] sm:$0xff] %vm636_vm4, %v4025_v48  ;;  %v3927_v21 = vpop.f32.mrb[62].mxu0  ;;  %7901 = vmatprep.mubr.f32.mxu1 %v19814_v0  ;;  %v4780_v36 = vld [vmem:[#allocation3] sm:$0xff] }
 0x391   :  { %v4026_v35 = vadd.f32 %v3927_v21, %v3370_v33  ;;  %v3929_v2 = vpop.f32.mrb[63].mxu0  ;;  %13386 = vmatmul.mubr.msk.f32.gmra.mrb[168].mxu0 %vm130_vm3, %v14856_v42  ;;  %v14207_v21 = vld [vmem:[#allocation10 + $0x10] ss:$8 sps:$4 sm:$0xff]   ;;  %v6610_v42 = vld [vmem:[%s19783_s0 + $0x160] sm:$0xff] }
 0x392   :  { %v4027_v27 = vadd.f32 %v3929_v2, %v3371_v34  ;;  %6873 = vmatprep.mubr.f32.mxu0 %v19814_v0  ;;  %v18323_v48 = vpop.f32.mrb[60].mxu1  ;;  %v4781_v2 = vld [vmem:[#allocation3 + $0x8] sm:$0xff]  ;;  %8899 = vmatpush1.bf16.msra.mxu0 %v14207_v21 }
 0x393   :  { %19964 = vst [vmem:[#allocation24_spill] sm:$0xff] %v18323_v48  ;;  %4122 = vst [vmem:[#allocation2 + $0x2f0] sm:$0xff] %v4026_v35  ;;  %v18325_v1 = vpop.f32.mrb[61].mxu1  ;;  %13467 = vmatmul.mubr.msk.f32.gmra.mrb[166].mxu1 %vm130_vm3, %v6609_v52  ;;  %v14857_v35 = vld [vmem:[%s19783_s0 + $0x58] sm:$0xff] }
 0x394   :  { %19965 = vst [vmem:[#allocation28_spill] sm:$0xff] %v18325_v1  ;;  %4123 = vst.msk [vmem:[#allocation2 + $0x2f8] sm:$0xff] %vm636_vm4, %v4027_v27  ;;  %v5149_v33 = vpop.f32.mrb[64].mxu0  ;;  %7907 = vmatprep.mubr.f32.mxu1 %v19814_v0 }
 0x395   :  { %v5436_v34 = vadd.f32 %v5149_v33, %v4780_v36  ;;  %v5151_v48 = vpop.f32.mrb[65].mxu0  ;;  %13387 = vmatmul.mubr.msk.f32.gmra.mrb[170].mxu0 %vm130_vm3, %v14857_v35  ;;  %v4782_v36 = vld [vmem:[#allocation3 + $0x10] sm:$0xff] }
 0x396   :  { %v5437_v52 = vadd.f32 %v5151_v48, %v4781_v2  ;;  %6879 = vmatprep.mubr.f32.mxu0 %v19814_v0  ;;  %v18338_v27 = vpop.f32.mrb[62].mxu1  ;;  %v6611_v48 = vld [vmem:[%s19783_s0 + $0x168] sm:$0xff]  ;;  %v4783_v2 = vld [vmem:[#allocation3 + $0x18] sm:$0xff] }
 0x397   :  { %v6284_v1 = vadd.f32 %v17872_v37, %v5436_v34  ;;  %v18341_v60 = vpop.f32.mrb[63].mxu1  ;;  %13468 = vmatmul.mubr.msk.f32.gmra.mrb[168].mxu1 %vm130_vm3, %v6610_v42  ;;  %v14858_v37 = vld [vmem:[%s19783_s0 + $0x60] sm:$0xff] }
 0x398   :  { %19966 = vst [vmem:[#allocation50_spill] sm:$0xff] %v18341_v60  ;;  %5533 = vst.msk [vmem:[#allocation3 + $0x8] sm:$0xff] %vm636_vm4, %v5437_v52  ;;  %v5155_v33 = vpop.f32.mrb[66].mxu0  ;;  %7913 = vmatprep.mubr.f32.mxu1 %v19814_v0 }
 0x399   :  { %v5438_v32 = vadd.f32 %v5155_v33, %v4782_v36  ;;  %v5157_v35 = vpop.f32.mrb[67].mxu0  ;;  %13388 = vmatmul.mubr.msk.f32.gmra.mrb[172].mxu0 %vm130_vm3, %v14858_v37  ;;  %6380 = vst [vmem:[#allocation3] sm:$0xff] %v6284_v1  ;;  %v4784_v36 = vld [vmem:[#allocation3 + $0x20] sm:$0xff]  ;;  %v6612_v37 = vld [vmem:[%s19783_s0 + $0x170] sm:$0xff] }
 0x39a   :  { %v5439_v21 = vadd.f32 %v5157_v35, %v4783_v2  ;;  %6885 = vmatprep.mubr.f32.mxu0 %v19814_v0  ;;  %v18354_v42 = vpop.f32.mrb[64].mxu1  ;;  %v4785_v2 = vld [vmem:[#allocation3 + $0x28] sm:$0xff] }
 0x39b   :  { %v6286_v34 = vadd.f32 %v17888_v31, %v5438_v32  ;;  %v18357_v52 = vpop.f32.mrb[65].mxu1  ;;  %13469 = vmatmul.mubr.msk.f32.gmra.mrb[170].mxu1 %vm130_vm3, %v6611_v48 }
 0x39c   :  { %19967 = vst [vmem:[#allocation25_spill] sm:$0xff] %v18357_v52  ;;  %5535 = vst.msk [vmem:[#allocation3 + $0x18] sm:$0xff] %vm636_vm4, %v5439_v21  ;;  %v5161_v33 = vpop.f32.mrb[68].mxu0  ;;  %7919 = vmatprep.mubr.f32.mxu1 %v19814_v0 }
 0x39d   :  { %v5440_v1 = vadd.f32 %v5161_v33, %v4784_v36  ;;  %v5163_v35 = vpop.f32.mrb[69].mxu0  ;;  %13389 = vmatmul.mubr.msk.f32.gmra.mrb[174].mxu0 %vm130_vm3, %v17864_v10  ;;  %6382 = vst [vmem:[#allocation3 + $0x10] sm:$0xff] %v6286_v34  ;;  %v4786_v33 = vld [vmem:[#allocation3 + $0x30] sm:$0xff]  ;;  %v6613_v10 = vld [vmem:[%s19783_s0 + $0x178] sm:$0xff] }
 0x39e   :  { %v5441_v31 = vadd.f32 %v5163_v35, %v4785_v2  ;;  %6891 = vmatprep.mubr.f32.mxu0 %v19814_v0  ;;  %v18368_v48 = vpop.f32.mrb[66].mxu1  ;;  %v4787_v2 = vld [vmem:[#allocation3 + $0x38] sm:$0xff] }
 0x39f   :  { %v5629_v32 = vld [vmem:[#allocation3 + $0x8] sm:$0xff]  ;;  %v6288_v21 = vadd.f32 %v17903_v58, %v5440_v1  ;;  %v18371_v52 = vpop.f32.mrb[67].mxu1  ;;  %13470 = vmatmul.mubr.msk.f32.gmra.mrb[172].mxu1 %vm130_vm3, %v6612_v37  ;;  %v14859_v58 = vld [vmem:[%s19783_s0 + $0x70] sm:$0xff] }
 0x3a0   :  { %19968 = vst [vmem:[#allocation29_spill] sm:$0xff] %v18371_v52  ;;  %5537 = vst.msk [vmem:[#allocation3 + $0x28] sm:$0xff] %vm636_vm4, %v5441_v31  ;;  %v6285_v36 = vadd.f32 %v17874_v39, %v5629_v32  ;;  %v5167_v60 = vpop.f32.mrb[70].mxu0  ;;  %7925 = vmatprep.mubr.f32.mxu1 %v19814_v0  ;;  %v4788_v31 = vld [vmem:[#allocation3 + $0x40] sm:$0xff]  ;;  %v4789_v52 = vld [vmem:[#allocation3 + $0x48] sm:$0xff] }
 0x3a1   :  { %v5442_v34 = vadd.f32 %v5167_v60, %v4786_v33  ;;  %v5169_v35 = vpop.f32.mrb[71].mxu0  ;;  %13390 = vmatmul.mubr.msk.f32.gmra.mrb[176].mxu0 %vm130_vm3, %v14859_v58  ;;  %6384 = vst [vmem:[#allocation3 + $0x20] sm:$0xff] %v6288_v21  ;;  %v14210_v58 = vld [vmem:[#allocation10 + $0x20] ss:$8 sps:$4 sm:$0xff]  }
 0x3a2   :  { %6381 = vst.msk [vmem:[#allocation3 + $0x8] sm:$0xff] %vm636_vm4, %v6285_v36  ;;  %v5443_v39 = vadd.f32 %v5169_v35, %v4787_v2  ;;  %6897 = vmatprep.mubr.f32.mxu0 %v19814_v0  ;;  %v18386_v37 = vpop.f32.mrb[68].mxu1  ;;  %v14212_v36 = vld [vmem:[#allocation10 + $0x24] ss:$8 sps:$4 sm:$0xff]  }
 0x3a3   :  { %v5631_v1 = vld [vmem:[#allocation3 + $0x18] sm:$0xff]  ;;  %v6290_v60 = vadd.f32 %v17918_v18, %v5442_v34  ;;  %v18389_v32 = vpop.f32.mrb[69].mxu1  ;;  %13471 = vmatmul.mubr.msk.f32.gmra.mrb[174].mxu1 %vm130_vm3, %v6613_v10  ;;  %v6614_v2 = vld [vmem:[%s19783_s0 + $0x180] sm:$0xff]  ;;  %8900 = vmatprep.subr.bf16.mxu0 %v14212_v36 }
 0x3a4   :  { %5539 = vst.msk [vmem:[#allocation3 + $0x38] sm:$0xff] %vm636_vm4, %v5443_v39  ;;  %v6287_v33 = vadd.f32 %v17890_v19, %v5631_v1  ;;  %v5173_v21 = vpop.f32.mrb[72].mxu0  ;;  %7931 = vmatprep.mubr.f32.mxu1 %v19814_v0  ;;  %v14860_v10 = vld [vmem:[%s19783_s0 + $0x78] sm:$0xff]  ;;  %8901 = vmatpush1.bf16.msra.mxu0 %v14210_v58  ;;  %v14861_v58 = vld [vmem:[%s19783_s0 + $0x80] sm:$0xff] }
 0x3a5   :  { %v5444_v35 = vadd.f32 %v5173_v21, %v4788_v31  ;;  %v5175_v18 = vpop.f32.mrb[73].mxu0  ;;  %13391 = vmatmul.mubr.msk.f32.gmra.mrb[178].mxu0 %vm130_vm3, %v14860_v10  ;;  %6386 = vst [vmem:[#allocation3 + $0x30] sm:$0xff] %v6290_v60  ;;  %v4790_v21 = vld [vmem:[#allocation3 + $0x50] sm:$0xff] }
 0x3a6   :  { %6383 = vst.msk [vmem:[#allocation3 + $0x18] sm:$0xff] %vm636_vm4, %v6287_v33  ;;  %v5445_v19 = vadd.f32 %v5175_v18, %v4789_v52  ;;  %6903 = vmatprep.mubr.f32.mxu0 %v19814_v0  ;;  %v18404_v34 = vpop.f32.mrb[70].mxu1  ;;  %v6615_v52 = vld [vmem:[%s19783_s0 + $0x188] sm:$0xff]  ;;  %v4791_v18 = vld [vmem:[#allocation3 + $0x58] sm:$0xff] }
 0x3a7   :  { %v5633_v39 = vld [vmem:[#allocation3 + $0x28] sm:$0xff]  ;;  %v6292_v1 = vadd.f32 %v17933_v25, %v5444_v35  ;;  %v18407_v31 = vpop.f32.mrb[71].mxu1  ;;  %13472 = vmatmul.mubr.msk.f32.gmra.mrb[176].mxu1 %vm130_vm3, %v6614_v2 }
 0x3a8   :  { %5541 = vst.msk [vmem:[#allocation3 + $0x48] sm:$0xff] %vm636_vm4, %v5445_v19  ;;  %v6289_v60 = vadd.f32 %v17905_v56, %v5633_v39  ;;  %v5179_v33 = vpop.f32.mrb[74].mxu0  ;;  %7937 = vmatprep.mubr.f32.mxu1 %v19814_v0 }
 0x3a9   :  { %v5446_v36 = vadd.f32 %v5179_v33, %v4790_v21  ;;  %v5181_v25 = vpop.f32.mrb[75].mxu0  ;;  %13392 = vmatmul.mubr.msk.f32.gmra.mrb[180].mxu0 %vm130_vm3, %v14861_v58  ;;  %6388 = vst [vmem:[#allocation3 + $0x40] sm:$0xff] %v6292_v1  ;;  %v4792_v21 = vld [vmem:[#allocation3 + $0x60] sm:$0xff] }
 0x3aa   :  { %6385 = vst.msk [vmem:[#allocation3 + $0x28] sm:$0xff] %vm636_vm4, %v6289_v60  ;;  %v5447_v56 = vadd.f32 %v5181_v25, %v4791_v18  ;;  %6909 = vmatprep.mubr.f32.mxu0 %v19814_v0  ;;  %v18422_v2 = vpop.f32.mrb[72].mxu1  ;;  %v6616_v60 = vld [vmem:[%s19783_s0 + $0x190] sm:$0xff]  ;;  %v4793_v18 = vld [vmem:[#allocation3 + $0x68] sm:$0xff] }
 0x3ab   :  { %v5635_v35 = vld [vmem:[#allocation3 + $0x38] sm:$0xff]  ;;  %v6294_v10 = vadd.f32 %v17948_v40, %v5446_v36  ;;  %v18425_v19 = vpop.f32.mrb[73].mxu1  ;;  %13473 = vmatmul.mubr.msk.f32.gmra.mrb[178].mxu1 %vm130_vm3, %v6615_v52  ;;  %v14862_v40 = vld [vmem:[%s19783_s0 + $0x88] sm:$0xff] }
 0x3ac   :  { %5543 = vst.msk [vmem:[#allocation3 + $0x58] sm:$0xff] %vm636_vm4, %v5447_v56  ;;  %v6291_v39 = vadd.f32 %v17920_v43, %v5635_v35  ;;  %v5185_v1 = vpop.f32.mrb[76].mxu0  ;;  %7943 = vmatprep.mubr.f32.mxu1 %v19814_v0 }
 0x3ad   :  { %v5448_v33 = vadd.f32 %v5185_v1, %v4792_v21  ;;  %v5187_v25 = vpop.f32.mrb[77].mxu0  ;;  %13393 = vmatmul.mubr.msk.f32.gmra.mrb[182].mxu0 %vm130_vm3, %v14862_v40  ;;  %6390 = vst [vmem:[#allocation3 + $0x50] sm:$0xff] %v6294_v10  ;;  %v4794_v21 = vld [vmem:[#allocation3 + $0x70] sm:$0xff]  ;;  %v4796_v40 = vld [vmem:[#allocation3 + $0x80] sm:$0xff] }
 0x3ae   :  { %6387 = vst.msk [vmem:[#allocation3 + $0x38] sm:$0xff] %vm636_vm4, %v6291_v39  ;;  %v5449_v43 = vadd.f32 %v5187_v25, %v4793_v18  ;;  %6915 = vmatprep.mubr.f32.mxu0 %v19814_v0  ;;  %v18440_v52 = vpop.f32.mrb[74].mxu1  ;;  %v6617_v39 = vld [vmem:[%s19783_s0 + $0x198] sm:$0xff] }
 0x3af   :  { %v5637_v36 = vld [vmem:[#allocation3 + $0x48] sm:$0xff]  ;;  %v6296_v58 = vadd.f32 %v17963_v49, %v5448_v33  ;;  %v18443_v56 = vpop.f32.mrb[75].mxu1  ;;  %13474 = vmatmul.mubr.msk.f32.gmra.mrb[180].mxu1 %vm130_vm3, %v6616_v60  ;;  %v4795_v18 = vld [vmem:[#allocation3 + $0x78] sm:$0xff]  ;;  %v14863_v49 = vld [vmem:[%s19783_s0 + $0x90] sm:$0xff] }
 0x3b0   :  { %5545 = vst.msk [vmem:[#allocation3 + $0x68] sm:$0xff] %vm636_vm4, %v5449_v43  ;;  %v6293_v35 = vadd.f32 %v17935_v45, %v5637_v36  ;;  %v5191_v10 = vpop.f32.mrb[78].mxu0  ;;  %7949 = vmatprep.mubr.f32.mxu1 %v19814_v0 }
 0x3b1   :  { %v5450_v1 = vadd.f32 %v5191_v10, %v4794_v21  ;;  %v5193_v25 = vpop.f32.mrb[79].mxu0  ;;  %13394 = vmatmul.mubr.msk.f32.gmra.mrb[184].mxu0 %vm130_vm3, %v14863_v49  ;;  %6392 = vst [vmem:[#allocation3 + $0x60] sm:$0xff] %v6296_v58  ;;  %v14213_v10 = vld [vmem:[#allocation10 + $0x30] ss:$8 sps:$4 sm:$0xff]   ;;  %v4797_v49 = vld [vmem:[#allocation3 + $0x88] sm:$0xff] }
 0x3b2   :  { %6389 = vst.msk [vmem:[#allocation3 + $0x48] sm:$0xff] %vm636_vm4, %v6293_v35  ;;  %v5451_v45 = vadd.f32 %v5193_v25, %v4795_v18  ;;  %6921 = vmatprep.mubr.f32.mxu0 %v19814_v0  ;;  %v18458_v60 = vpop.f32.mrb[76].mxu1  ;;  %v14215_v35 = vld [vmem:[#allocation10 + $0x34] ss:$8 sps:$4 sm:$0xff]   ;;  %v6618_v18 = vld [vmem:[%s19783_s0 + $0x1a0] sm:$0xff] }
 0x3b3   :  { %v5639_v33 = vld [vmem:[#allocation3 + $0x58] sm:$0xff]  ;;  %v6298_v43 = vadd.f32 %v17978_v9, %v5450_v1  ;;  %v18461_v36 = vpop.f32.mrb[77].mxu1  ;;  %13475 = vmatmul.mubr.msk.f32.gmra.mrb[182].mxu1 %vm130_vm3, %v6617_v39  ;;  %8902 = vmatprep.subr.bf16.mxu0 %v14215_v35  ;;  %v6619_v35 = vld [vmem:[%s19783_s0 + $0x1a8] sm:$0xff] }
 0x3b4   :  { %5547 = vst.msk [vmem:[#allocation3 + $0x78] sm:$0xff] %vm636_vm4, %v5451_v45  ;;  %v6295_v21 = vadd.f32 %v17950_v24, %v5639_v33  ;;  %v5197_v58 = vpop.f32.mrb[80].mxu0  ;;  %7955 = vmatprep.mubr.f32.mxu1 %v19814_v0  ;;  %v14864_v39 = vld [vmem:[%s19783_s0 + $0x98] sm:$0xff]  ;;  %8903 = vmatpush1.bf16.msra.mxu0 %v14213_v10  ;;  %v14865_v10 = vld [vmem:[%s19783_s0 + $0xa0] sm:$0xff] }
 0x3b5   :  { %v5452_v25 = vadd.f32 %v5197_v58, %v4796_v40  ;;  %v5199_v9 = vpop.f32.mrb[81].mxu0  ;;  %13395 = vmatmul.mubr.msk.f32.gmra.mrb[186].mxu0 %vm130_vm3, %v14864_v39  ;;  %6394 = vst [vmem:[#allocation3 + $0x70] sm:$0xff] %v6298_v43  ;;  %v4798_v58 = vld [vmem:[#allocation3 + $0x90] sm:$0xff] }
 0x3b6   :  { %6391 = vst.msk [vmem:[#allocation3 + $0x58] sm:$0xff] %vm636_vm4, %v6295_v21  ;;  %v5453_v24 = vadd.f32 %v5199_v9, %v4797_v49  ;;  %6927 = vmatprep.mubr.f32.mxu0 %v19814_v0  ;;  %v18476_v1 = vpop.f32.mrb[78].mxu1  ;;  %v4799_v9 = vld [vmem:[#allocation3 + $0x98] sm:$0xff] }
 0x3b7   :  { %v5641_v45 = vld [vmem:[#allocation3 + $0x68] sm:$0xff]  ;;  %v6300_v33 = vadd.f32 %v17993_v4, %v5452_v25  ;;  %v18479_v40 = vpop.f32.mrb[79].mxu1  ;;  %13476 = vmatmul.mubr.msk.f32.gmra.mrb[184].mxu1 %vm130_vm3, %v6618_v18 }
 0x3b8   :  { %5549 = vst.msk [vmem:[#allocation3 + $0x88] sm:$0xff] %vm636_vm4, %v5453_v24  ;;  %v6297_v43 = vadd.f32 %v17965_v62, %v5641_v45  ;;  %v5203_v21 = vpop.f32.mrb[82].mxu0  ;;  %7961 = vmatprep.mubr.f32.mxu1 %v19814_v0 }
 0x3b9   :  { %v5454_v49 = vadd.f32 %v5203_v21, %v4798_v58  ;;  %v5205_v4 = vpop.f32.mrb[83].mxu0  ;;  %13396 = vmatmul.mubr.msk.f32.gmra.mrb[188].mxu0 %vm130_vm3, %v14865_v10  ;;  %6396 = vst [vmem:[#allocation3 + $0x80] sm:$0xff] %v6300_v33  ;;  %v4800_v58 = vld [vmem:[#allocation3 + $0xa0] sm:$0xff] }
 0x3ba   :  { %6393 = vst.msk [vmem:[#allocation3 + $0x68] sm:$0xff] %vm636_vm4, %v6297_v43  ;;  %v5455_v62 = vadd.f32 %v5205_v4, %v4799_v9  ;;  %6933 = vmatprep.mubr.f32.mxu0 %v19814_v0  ;;  %v18494_v18 = vpop.f32.mrb[80].mxu1  ;;  %v7466_v43 = vld [vmem:[%s19783_s0 + $0x1b0] sm:$0xff]  ;;  %v4801_v9 = vld [vmem:[#allocation3 + $0xa8] sm:$0xff] }
 0x3bb   :  { %v5643_v25 = vld [vmem:[#allocation3 + $0x78] sm:$0xff]  ;;  %v6302_v39 = vadd.f32 %v18008_v13, %v5454_v49  ;;  %v18497_v24 = vpop.f32.mrb[81].mxu1  ;;  %13477 = vmatmul.mubr.msk.f32.gmra.mrb[186].mxu1 %vm130_vm3, %v6619_v35  ;;  %v14866_v13 = vld [vmem:[%s19783_s0 + $0xa8] sm:$0xff] }
 0x3bc   :  { %5551 = vst.msk [vmem:[#allocation3 + $0x98] sm:$0xff] %vm636_vm4, %v5455_v62  ;;  %v6299_v45 = vadd.f32 %v17980_v16, %v5643_v25  ;;  %v5209_v33 = vpop.f32.mrb[84].mxu0  ;;  %7967 = vmatprep.mubr.f32.mxu1 %v19814_v0 }
 0x3bd   :  { %v5456_v21 = vadd.f32 %v5209_v33, %v4800_v58  ;;  %v5211_v4 = vpop.f32.mrb[85].mxu0  ;;  %13397 = vmatmul.mubr.msk.f32.gmra.mrb[190].mxu0 %vm130_vm3, %v14866_v13  ;;  %6398 = vst [vmem:[#allocation3 + $0x90] sm:$0xff] %v6302_v39  ;;  %v4802_v58 = vld [vmem:[#allocation3 + $0xb0] sm:$0xff] }
 0x3be   :  { %6395 = vst.msk [vmem:[#allocation3 + $0x78] sm:$0xff] %vm636_vm4, %v6299_v45  ;;  %v5457_v16 = vadd.f32 %v5211_v4, %v4801_v9  ;;  %6939 = vmatprep.mubr.f32.mxu0 %v19814_v0  ;;  %v18512_v35 = vpop.f32.mrb[82].mxu1  ;;  %v7467_v45 = vld [vmem:[%s19783_s0 + $0x1b8] sm:$0xff] }
 0x3bf   :  { %v5645_v49 = vld [vmem:[#allocation3 + $0x88] sm:$0xff]  ;;  %v6304_v10 = vadd.f32 %v18023_v44, %v5456_v21  ;;  %v18515_v62 = vpop.f32.mrb[83].mxu1  ;;  %13478 = vmatmul.mubr.msk.f32.gmra.mrb[188].mxu1 %vm130_vm3, %v7466_v43  ;;  %v4803_v9 = vld [vmem:[#allocation3 + $0xb8] sm:$0xff]  ;;  %v14867_v44 = vld [vmem:[%s19783_s0 + $0xb0] sm:$0xff] }
 0x3c0   :  { %5553 = vst.msk [vmem:[#allocation3 + $0xa8] sm:$0xff] %vm636_vm4, %v5457_v16  ;;  %v6301_v25 = vadd.f32 %v17995_v50, %v5645_v49  ;;  %v5215_v39 = vpop.f32.mrb[86].mxu0  ;;  %7973 = vmatprep.mubr.f32.mxu1 %v19814_v0 }
 0x3c1   :  { %v5458_v33 = vadd.f32 %v5215_v39, %v4802_v58  ;;  %v5217_v4 = vpop.f32.mrb[87].mxu0  ;;  %13398 = vmatmul.mubr.msk.f32.gmra.mrb[192].mxu0 %vm130_vm3, %v14867_v44  ;;  %6400 = vst [vmem:[#allocation3 + $0xa0] sm:$0xff] %v6304_v10  ;;  %v4804_v58 = vld [vmem:[#allocation3 + $0xc0] sm:$0xff] }
 0x3c2   :  { %6397 = vst.msk [vmem:[#allocation3 + $0x88] sm:$0xff] %vm636_vm4, %v6301_v25  ;;  %v5459_v50 = vadd.f32 %v5217_v4, %v4803_v9  ;;  %6945 = vmatprep.mubr.f32.mxu0 %v19814_v0  ;;  %v18530_v43 = vpop.f32.mrb[84].mxu1  ;;  %v14216_v39 = vld [vmem:[#allocation10 + $0x40] ss:$8 sps:$4 sm:$0xff]   ;;  %v14218_v25 = vld [vmem:[#allocation10 + $0x44] ss:$8 sps:$4 sm:$0xff]  }
 0x3c3   :  { %v5647_v21 = vld [vmem:[#allocation3 + $0x98] sm:$0xff]  ;;  %v6306_v13 = vadd.f32 %v18038_v11, %v5458_v33  ;;  %v18533_v16 = vpop.f32.mrb[85].mxu1  ;;  %13479 = vmatmul.mubr.msk.f32.gmra.mrb[190].mxu1 %vm130_vm3, %v7467_v45  ;;  %v4805_v4 = vld [vmem:[#allocation3 + $0xc8] sm:$0xff]  ;;  %v19969_v45 = vmov 0.0   ;;  %8904 = vmatprep.subr.bf16.mxu0 %v14218_v25  ;;  %v14869_v25 = vld [vmem:[%s19783_s0 + $0xc0] sm:$0xff] }
 0x3c4   :  { %5555 = vst.msk [vmem:[#allocation3 + $0xb8] sm:$0xff] %vm636_vm4, %v5459_v50  ;;  %v6303_v49 = vadd.f32 %v18010_v26, %v5647_v21  ;;  %v5221_v10 = vpop.f32.mrb[88].mxu0  ;;  %v14868_v0 = vld [vmem:[%s19783_s0 + $0xb8] sm:$0xff]  ;;  %8905 = vmatpush1.bf16.msra.mxu0 %v14216_v39 }
 0x3c5   :  { %v5460_v9 = vadd.f32 %v5221_v10, %v4804_v58  ;;  %v5223_v44 = vpop.f32.mrb[89].mxu0  ;;  %13399 = vmatmul.mubr.msk.f32.gmra.mrb[194].mxu0 %vm130_vm3, %v14868_v0  ;;  %6402 = vst [vmem:[#allocation3 + $0xb0] sm:$0xff] %v6306_v13  ;;  %v4806_v0 = vld [vmem:[#allocation3 + $0xd0] sm:$0xff] }
 0x3c6   :  { %6399 = vst.msk [vmem:[#allocation3 + $0x98] sm:$0xff] %vm636_vm4, %v6303_v49  ;;  %v5461_v11 = vadd.f32 %v5223_v44, %v4805_v4  ;;  %6951 = vmatprep.mubr.f32.mxu0 %v19969_v45  ;;  %v18544_v26 = vpop.f32.mrb[86].mxu1  ;;  %v4807_v49 = vld [vmem:[#allocation3 + $0xd8] sm:$0xff] }
 0x3c7   :  { %v5649_v33 = vld [vmem:[#allocation3 + $0xa8] sm:$0xff]  ;;  %v6308_v50 = vadd.f32 %v18053_v15, %v5460_v9  ;;  %v18547_v21 = vpop.f32.mrb[87].mxu1 }
 0x3c8   :  { %5557 = vst.msk [vmem:[#allocation3 + $0xc8] sm:$0xff] %vm636_vm4, %v5461_v11  ;;  %v6305_v58 = vadd.f32 %v18025_v30, %v5649_v33  ;;  %v5227_v13 = vpop.f32.mrb[90].mxu0  ;;  %v4808_v33 = vld [vmem:[#allocation3 + $0xe0] sm:$0xff] }
 0x3c9   :  { %v5462_v10 = vadd.f32 %v5227_v13, %v4806_v0  ;;  %v5229_v4 = vpop.f32.mrb[91].mxu0  ;;  %13400 = vmatmul.mubr.msk.f32.gmra.mrb[196].mxu0 %vm130_vm3, %v14869_v25  ;;  %6404 = vst [vmem:[#allocation3 + $0xc0] sm:$0xff] %v6308_v50  ;;  %v4809_v50 = vld [vmem:[#allocation3 + $0xe8] sm:$0xff] }
 0x3ca   :  { %6401 = vst.msk [vmem:[#allocation3 + $0xa8] sm:$0xff] %vm636_vm4, %v6305_v58  ;;  %v5463_v15 = vadd.f32 %v5229_v4, %v4807_v49  ;;  %6957 = vmatprep.mubr.f32.mxu0 %v19969_v45  ;;  %v18557_v39 = vpop.f32.mrb[88].mxu1  ;;  %v14870_v58 = vld [vmem:[%s19783_s0 + $0xc8] sm:$0xff] }
 0x3cb   :  { %v5651_v30 = vld [vmem:[#allocation3 + $0xb8] sm:$0xff]  ;;  %v6310_v9 = vadd.f32 %v18068_v7, %v5462_v10  ;;  %v18560_v44 = vpop.f32.mrb[89].mxu1 }
 0x3cc   :  { %5559 = vst.msk [vmem:[#allocation3 + $0xd8] sm:$0xff] %vm636_vm4, %v5463_v15  ;;  %v6307_v11 = vadd.f32 %v18040_v38, %v5651_v30  ;;  %v5233_v0 = vpop.f32.mrb[92].mxu0  ;;  %v4810_v30 = vld [vmem:[#allocation3 + $0xf0] sm:$0xff] }
 0x3cd   :  { %v5464_v13 = vadd.f32 %v5233_v0, %v4808_v33  ;;  %v5235_v25 = vpop.f32.mrb[93].mxu0  ;;  %13401 = vmatmul.mubr.msk.f32.gmra.mrb[198].mxu0 %vm130_vm3, %v14870_v58  ;;  %6406 = vst [vmem:[#allocation3 + $0xd0] sm:$0xff] %v6310_v9  ;;  %v4811_v9 = vld [vmem:[#allocation3 + $0xf8] sm:$0xff] }
 0x3ce   :  { %6403 = vst.msk [vmem:[#allocation3 + $0xb8] sm:$0xff] %vm636_vm4, %v6307_v11  ;;  %v5465_v7 = vadd.f32 %v5235_v25, %v4809_v50  ;;  %6963 = vmatprep.mubr.f32.mxu0 %v19969_v45  ;;  %v18570_v10 = vpop.f32.mrb[90].mxu1  ;;  %v14871_v11 = vld [vmem:[%s19783_s0 + $0xd0] sm:$0xff] }
 0x3cf   :  { %v5653_v38 = vld [vmem:[#allocation3 + $0xc8] sm:$0xff]  ;;  %v6312_v49 = vadd.f32 %v18083_v14, %v5464_v13  ;;  %v18573_v4 = vpop.f32.mrb[91].mxu1 }
 0x3d0   :  { %5561 = vst.msk [vmem:[#allocation3 + $0xe8] sm:$0xff] %vm636_vm4, %v5465_v7  ;;  %v6309_v15 = vadd.f32 %v18055_v55, %v5653_v38  ;;  %v5239_v33 = vpop.f32.mrb[94].mxu0  ;;  %v4812_v38 = vld [vmem:[#allocation3 + $0x100] sm:$0xff] }
 0x3d1   :  { %v5466_v0 = vadd.f32 %v5239_v33, %v4810_v30  ;;  %v5241_v58 = vpop.f32.mrb[95].mxu0  ;;  %13402 = vmatmul.mubr.msk.f32.gmra.mrb[200].mxu0 %vm130_vm3, %v14871_v11  ;;  %6408 = vst [vmem:[#allocation3 + $0xe0] sm:$0xff] %v6312_v49  ;;  %v14219_v33 = vld [vmem:[#allocation10 + $0x50] ss:$8 sps:$4 sm:$0xff]   ;;  %v14221_v49 = vld [vmem:[#allocation10 + $0x54] ss:$8 sps:$4 sm:$0xff]  }
 0x3d2   :  { %6405 = vst.msk [vmem:[#allocation3 + $0xc8] sm:$0xff] %vm636_vm4, %v6309_v15  ;;  %v5467_v14 = vadd.f32 %v5241_v58, %v4811_v9  ;;  %6969 = vmatprep.mubr.f32.mxu0 %v19969_v45  ;;  %v18583_v13 = vpop.f32.mrb[92].mxu1  ;;  %v4813_v15 = vld [vmem:[#allocation3 + $0x108] sm:$0xff]  ;;  %v14872_v58 = vld [vmem:[%s19783_s0 + $0xd8] sm:$0xff]  ;;  %8906 = vmatprep.subr.bf16.mxu0 %v14221_v49  ;;  %v14873_v49 = vld [vmem:[%s19783_s0 + $0xe0] sm:$0xff] }
 0x3d3   :  { %v5655_v55 = vld [vmem:[#allocation3 + $0xd8] sm:$0xff]  ;;  %v6314_v50 = vadd.f32 %v18098_v47, %v5466_v0  ;;  %v18586_v25 = vpop.f32.mrb[93].mxu1  ;;  %8907 = vmatpush1.bf16.msra.mxu0 %v14219_v33 }
 0x3d4   :  { %5563 = vst.msk [vmem:[#allocation3 + $0xf8] sm:$0xff] %vm636_vm4, %v5467_v14  ;;  %v6311_v7 = vadd.f32 %v18070_v53, %v5655_v55  ;;  %v5245_v30 = vpop.f32.mrb[96].mxu0 }
 0x3d5   :  { %v5468_v11 = vadd.f32 %v5245_v30, %v4812_v38  ;;  %v5247_v9 = vpop.f32.mrb[97].mxu0  ;;  %13403 = vmatmul.mubr.msk.f32.gmra.mrb[202].mxu0 %vm130_vm3, %v14872_v58  ;;  %6410 = vst [vmem:[#allocation3 + $0xf0] sm:$0xff] %v6314_v50  ;;  %v4814_v30 = vld [vmem:[#allocation3 + $0x110] sm:$0xff] }
 0x3d6   :  { %6407 = vst.msk [vmem:[#allocation3 + $0xd8] sm:$0xff] %vm636_vm4, %v6311_v7  ;;  %v5469_v47 = vadd.f32 %v5247_v9, %v4813_v15  ;;  %6975 = vmatprep.mubr.f32.mxu0 %v19969_v45  ;;  %v18596_v53 = vpop.f32.mrb[94].mxu1  ;;  %v4815_v7 = vld [vmem:[#allocation3 + $0x118] sm:$0xff] }
 0x3d7   :  { %v5657_v0 = vld [vmem:[#allocation3 + $0xe8] sm:$0xff]  ;;  %v6316_v14 = vadd.f32 %v18113_v57, %v5468_v11  ;;  %v18599_v55 = vpop.f32.mrb[95].mxu1 }
 0x3d8   :  { %5565 = vst.msk [vmem:[#allocation3 + $0x108] sm:$0xff] %vm636_vm4, %v5469_v47  ;;  %v6313_v38 = vadd.f32 %v18085_v59, %v5657_v0  ;;  %v5251_v50 = vpop.f32.mrb[98].mxu0  ;;  %v4816_v0 = vld [vmem:[#allocation3 + $0x120] sm:$0xff] }
 0x3d9   :  { %v5470_v58 = vadd.f32 %v5251_v50, %v4814_v30  ;;  %v5253_v15 = vpop.f32.mrb[99].mxu0  ;;  %13404 = vmatmul.mubr.msk.f32.gmra.mrb[204].mxu0 %vm130_vm3, %v14873_v49  ;;  %6412 = vst [vmem:[#allocation3 + $0x100] sm:$0xff] %v6316_v14  ;;  %v4817_v14 = vld [vmem:[#allocation3 + $0x128] sm:$0xff] }
 0x3da   :  { %6409 = vst.msk [vmem:[#allocation3 + $0xe8] sm:$0xff] %vm636_vm4, %v6313_v38  ;;  %v5471_v57 = vadd.f32 %v5253_v15, %v4815_v7  ;;  %6981 = vmatprep.mubr.f32.mxu0 %v19969_v45  ;;  %v18609_v33 = vpop.f32.mrb[96].mxu1  ;;  %v14874_v38 = vld [vmem:[%s19783_s0 + $0xe8] sm:$0xff] }
 0x3db   :  { %v5659_v59 = vld [vmem:[#allocation3 + $0xf8] sm:$0xff]  ;;  %v6318_v11 = vadd.f32 %v18128_v46, %v5470_v58  ;;  %v18612_v9 = vpop.f32.mrb[97].mxu1 }
 0x3dc   :  { %5567 = vst.msk [vmem:[#allocation3 + $0x118] sm:$0xff] %vm636_vm4, %v5471_v57  ;;  %v6315_v47 = vadd.f32 %v18100_v23, %v5659_v59  ;;  %v5257_v30 = vpop.f32.mrb[100].mxu0  ;;  %v4818_v59 = vld [vmem:[#allocation3 + $0x130] sm:$0xff] }
 0x3dd   :  { %v5472_v50 = vadd.f32 %v5257_v30, %v4816_v0  ;;  %v5259_v49 = vpop.f32.mrb[101].mxu0  ;;  %13405 = vmatmul.mubr.msk.f32.gmra.mrb[206].mxu0 %vm130_vm3, %v14874_v38  ;;  %6414 = vst [vmem:[#allocation3 + $0x110] sm:$0xff] %v6318_v11  ;;  %v4819_v11 = vld [vmem:[#allocation3 + $0x138] sm:$0xff] }
 0x3de   :  { %6411 = vst.msk [vmem:[#allocation3 + $0xf8] sm:$0xff] %vm636_vm4, %v6315_v47  ;;  %v5473_v46 = vadd.f32 %v5259_v49, %v4817_v14  ;;  %6987 = vmatprep.mubr.f32.mxu0 %v19969_v45  ;;  %v18622_v58 = vpop.f32.mrb[98].mxu1  ;;  %v14875_v47 = vld [vmem:[%s19783_s0 + $0xf0] sm:$0xff] }
 0x3df   :  { %v5661_v23 = vld [vmem:[#allocation3 + $0x108] sm:$0xff]  ;;  %v6320_v7 = vadd.f32 %v18143_v28, %v5472_v50  ;;  %v18625_v15 = vpop.f32.mrb[99].mxu1 }
 0x3e0   :  { %5569 = vst.msk [vmem:[#allocation3 + $0x128] sm:$0xff] %vm636_vm4, %v5473_v46  ;;  %v6317_v57 = vadd.f32 %v18115_v20, %v5661_v23  ;;  %v5263_v0 = vpop.f32.mrb[102].mxu0  ;;  %v4820_v23 = vld [vmem:[#allocation3 + $0x140] sm:$0xff] }
 0x3e1   :  { %v5474_v30 = vadd.f32 %v5263_v0, %v4818_v59  ;;  %v5265_v38 = vpop.f32.mrb[103].mxu0  ;;  %13406 = vmatmul.mubr.msk.f32.gmra.mrb[208].mxu0 %vm130_vm3, %v14875_v47  ;;  %6416 = vst [vmem:[#allocation3 + $0x120] sm:$0xff] %v6320_v7  ;;  %v4821_v7 = vld [vmem:[#allocation3 + $0x148] sm:$0xff] }
 0x3e2   :  { %6413 = vst.msk [vmem:[#allocation3 + $0x108] sm:$0xff] %vm636_vm4, %v6317_v57  ;;  %v5475_v28 = vadd.f32 %v5265_v38, %v4819_v11  ;;  %6993 = vmatprep.mubr.f32.mxu0 %v19969_v45  ;;  %v18635_v50 = vpop.f32.mrb[100].mxu1  ;;  %v14876_v57 = vld [vmem:[%s19783_s0 + $0xf8] sm:$0xff] }
 0x3e3   :  { %v5663_v20 = vld [vmem:[#allocation3 + $0x118] sm:$0xff]  ;;  %v6322_v14 = vadd.f32 %v18158_v5, %v5474_v30  ;;  %v18638_v49 = vpop.f32.mrb[101].mxu1 }
 0x3e4   :  { %5571 = vst.msk [vmem:[#allocation3 + $0x138] sm:$0xff] %vm636_vm4, %v5475_v28  ;;  %v6319_v46 = vadd.f32 %v18130_v12, %v5663_v20  ;;  %v5269_v59 = vpop.f32.mrb[104].mxu0  ;;  %v4822_v20 = vld [vmem:[#allocation3 + $0x150] sm:$0xff] }
 0x3e5   :  { %v5476_v0 = vadd.f32 %v5269_v59, %v4820_v23  ;;  %v5271_v47 = vpop.f32.mrb[105].mxu0  ;;  %13407 = vmatmul.mubr.msk.f32.gmra.mrb[210].mxu0 %vm130_vm3, %v14876_v57  ;;  %6418 = vst [vmem:[#allocation3 + $0x130] sm:$0xff] %v6322_v14  ;;  %v4823_v14 = vld [vmem:[#allocation3 + $0x158] sm:$0xff] }
 0x3e6   :  { %6415 = vst.msk [vmem:[#allocation3 + $0x118] sm:$0xff] %vm636_vm4, %v6319_v46  ;;  %v5477_v5 = vadd.f32 %v5271_v47, %v4821_v7  ;;  %6999 = vmatprep.mubr.f32.mxu0 %v19969_v45  ;;  %v18648_v30 = vpop.f32.mrb[102].mxu1  ;;  %v14877_v46 = vld [vmem:[%s19783_s0 + $0x100] sm:$0xff] }
 0x3e7   :  { %v5665_v12 = vld [vmem:[#allocation3 + $0x128] sm:$0xff]  ;;  %v6324_v11 = vadd.f32 %v18173_v8, %v5476_v0  ;;  %v18651_v38 = vpop.f32.mrb[103].mxu1 }
 0x3e8   :  { %5573 = vst.msk [vmem:[#allocation3 + $0x148] sm:$0xff] %vm636_vm4, %v5477_v5  ;;  %v6321_v28 = vadd.f32 %v18145_v63, %v5665_v12  ;;  %v5275_v23 = vpop.f32.mrb[106].mxu0  ;;  %v4824_v12 = vld [vmem:[#allocation3 + $0x160] sm:$0xff] }
 0x3e9   :  { %v5478_v59 = vadd.f32 %v5275_v23, %v4822_v20  ;;  %v5277_v57 = vpop.f32.mrb[107].mxu0  ;;  %13408 = vmatmul.mubr.msk.f32.gmra.mrb[212].mxu0 %vm130_vm3, %v14877_v46  ;;  %6420 = vst [vmem:[#allocation3 + $0x140] sm:$0xff] %v6324_v11  ;;  %v14222_v23 = vld [vmem:[#allocation10 + $0x60] ss:$8 sps:$4 sm:$0xff]   ;;  %v14224_v11 = vld [vmem:[#allocation10 + $0x64] ss:$8 sps:$4 sm:$0xff]  }
 0x3ea   :  { %6417 = vst.msk [vmem:[#allocation3 + $0x128] sm:$0xff] %vm636_vm4, %v6321_v28  ;;  %v5479_v8 = vadd.f32 %v5277_v57, %v4823_v14  ;;  %7005 = vmatprep.mubr.f32.mxu0 %v19969_v45  ;;  %v18661_v0 = vpop.f32.mrb[104].mxu1  ;;  %v4825_v28 = vld [vmem:[#allocation3 + $0x168] sm:$0xff]  ;;  %8908 = vmatprep.subr.bf16.mxu0 %v14224_v11  ;;  %v14879_v11 = vld [vmem:[%s19783_s0 + $0x110] sm:$0xff] }
 0x3eb   :  { %v5667_v63 = vld [vmem:[#allocation3 + $0x138] sm:$0xff]  ;;  %v6326_v7 = vadd.f32 %v18188_v41, %v5478_v59  ;;  %v18664_v47 = vpop.f32.mrb[105].mxu1  ;;  %v14878_v57 = vld [vmem:[%s19783_s0 + $0x108] sm:$0xff]  ;;  %8909 = vmatpush1.bf16.msra.mxu0 %v14222_v23 }
 0x3ec   :  { %5575 = vst.msk [vmem:[#allocation3 + $0x158] sm:$0xff] %vm636_vm4, %v5479_v8  ;;  %v6323_v5 = vadd.f32 %v18160_v17, %v5667_v63  ;;  %v5281_v20 = vpop.f32.mrb[108].mxu0 }
 0x3ed   :  { %v5480_v46 = vadd.f32 %v5281_v20, %v4824_v12  ;;  %v5283_v14 = vpop.f32.mrb[109].mxu0  ;;  %13409 = vmatmul.mubr.msk.f32.gmra.mrb[214].mxu0 %vm130_vm3, %v14878_v57  ;;  %6422 = vst [vmem:[#allocation3 + $0x150] sm:$0xff] %v6326_v7  ;;  %v4826_v20 = vld [vmem:[#allocation3 + $0x170] sm:$0xff] }
 0x3ee   :  { %6419 = vst.msk [vmem:[#allocation3 + $0x138] sm:$0xff] %vm636_vm4, %v6323_v5  ;;  %v5481_v41 = vadd.f32 %v5283_v14, %v4825_v28  ;;  %7011 = vmatprep.mubr.f32.mxu0 %v19969_v45  ;;  %v18674_v17 = vpop.f32.mrb[106].mxu1  ;;  %v4827_v5 = vld [vmem:[#allocation3 + $0x178] sm:$0xff] }
 0x3ef   :  { %v5669_v59 = vld [vmem:[#allocation3 + $0x148] sm:$0xff]  ;;  %v6328_v8 = vadd.f32 %v18203_v51, %v5480_v46  ;;  %v18677_v63 = vpop.f32.mrb[107].mxu1 }
 0x3f0   :  { %5577 = vst.msk [vmem:[#allocation3 + $0x168] sm:$0xff] %vm636_vm4, %v5481_v41  ;;  %v6325_v12 = vadd.f32 %v18175_v54, %v5669_v59  ;;  %v5287_v7 = vpop.f32.mrb[110].mxu0  ;;  %v4828_v59 = vld [vmem:[#allocation3 + $0x180] sm:$0xff] }
 0x3f1   :  { %v5482_v57 = vadd.f32 %v5287_v7, %v4826_v20  ;;  %v5289_v28 = vpop.f32.mrb[111].mxu0  ;;  %13410 = vmatmul.mubr.msk.f32.gmra.mrb[216].mxu0 %vm130_vm3, %v14879_v11  ;;  %6424 = vst [vmem:[#allocation3 + $0x160] sm:$0xff] %v6328_v8  ;;  %v4829_v8 = vld [vmem:[#allocation3 + $0x188] sm:$0xff] }
 0x3f2   :  { %6421 = vst.msk [vmem:[#allocation3 + $0x148] sm:$0xff] %vm636_vm4, %v6325_v12  ;;  %v5483_v51 = vadd.f32 %v5289_v28, %v4827_v5  ;;  %7017 = vmatprep.mubr.f32.mxu0 %v19969_v45  ;;  %v18687_v23 = vpop.f32.mrb[108].mxu1  ;;  %v14880_v12 = vld [vmem:[%s19783_s0 + $0x118] sm:$0xff] }
 0x3f3   :  { %v5671_v54 = vld [vmem:[#allocation3 + $0x158] sm:$0xff]  ;;  %v6330_v46 = vadd.f32 %v18218_v29, %v5482_v57  ;;  %v18690_v14 = vpop.f32.mrb[109].mxu1 }
 0x3f4   :  { %19970 = vst [vmem:[#allocation26_spill] sm:$0xff] %v18690_v14  ;;  %5579 = vst.msk [vmem:[#allocation3 + $0x178] sm:$0xff] %vm636_vm4, %v5483_v51  ;;  %v6327_v41 = vadd.f32 %v18190_v6, %v5671_v54  ;;  %v5293_v20 = vpop.f32.mrb[112].mxu0  ;;  %v14227_v5 = vld [vmem:[#allocation10 + $0x74] ss:$8 sps:$4 sm:$0xff]  }
 0x3f5   :  { %v5484_v7 = vadd.f32 %v5293_v20, %v4828_v59  ;;  %v5295_v11 = vpop.f32.mrb[113].mxu0  ;;  %13411 = vmatmul.mubr.msk.f32.gmra.mrb[218].mxu0 %vm130_vm3, %v14880_v12  ;;  %6426 = vst [vmem:[#allocation3 + $0x170] sm:$0xff] %v6330_v46  ;;  %v14225_v57 = vld [vmem:[#allocation10 + $0x70] ss:$8 sps:$4 sm:$0xff]   ;;  %8910 = vmatprep.subr.bf16.mxu0 %v14227_v5  ;;  %v14881_v12 = vld [vmem:[%s19783_s0 + $0x120] sm:$0xff] }
 0x3f6   :  { %6423 = vst.msk [vmem:[#allocation3 + $0x158] sm:$0xff] %vm636_vm4, %v6327_v41  ;;  %v5485_v29 = vadd.f32 %v5295_v11, %v4829_v8  ;;  %7023 = vmatprep.mubr.f32.mxu0 %v19969_v45  ;;  %v18700_v6 = vpop.f32.mrb[110].mxu1  ;;  %v4830_v46 = vld [vmem:[#allocation3 + $0x190] sm:$0xff]  ;;  %8911 = vmatpush1.bf16.msra.mxu0 %v14225_v57  ;;  %v4831_v8 = vld [vmem:[#allocation3 + $0x198] sm:$0xff] }
 0x3f7   :  { %v5673_v28 = vld [vmem:[#allocation3 + $0x168] sm:$0xff]  ;;  %v6332_v51 = vadd.f32 %v18233_v3, %v5484_v7  ;;  %v18703_v54 = vpop.f32.mrb[111].mxu1 }
 0x3f8   :  { %19971 = vst [vmem:[#allocation30_spill] sm:$0xff] %v18703_v54  ;;  %5581 = vst.msk [vmem:[#allocation3 + $0x188] sm:$0xff] %vm636_vm4, %v5485_v29  ;;  %v6329_v59 = vadd.f32 %v18205_v61, %v5673_v28  ;;  %v5299_v20 = vpop.f32.mrb[114].mxu0  ;;  %v14230_v3 = vld [vmem:[#allocation10 + $0x84] ss:$8 sps:$4 sm:$0xff]  }
 0x3f9   :  { %v5486_v41 = vadd.f32 %v5299_v20, %v4830_v46  ;;  %v5301_v11 = vpop.f32.mrb[115].mxu0  ;;  %13412 = vmatmul.mubr.msk.f32.gmra.mrb[220].mxu0 %vm130_vm3, %v14881_v12  ;;  %6428 = vst [vmem:[#allocation3 + $0x180] sm:$0xff] %v6332_v51  ;;  %v14228_v61 = vld [vmem:[#allocation10 + $0x80] ss:$8 sps:$4 sm:$0xff]   ;;  %8912 = vmatprep.subr.bf16.mxu0 %v14230_v3  ;;  %v14231_v3 = vld [vmem:[#allocation10 + $0x90] ss:$8 sps:$4 sm:$0xff]  }
 0x3fa   :  { %6425 = vst.msk [vmem:[#allocation3 + $0x168] sm:$0xff] %vm636_vm4, %v6329_v59  ;;  %v5487_v7 = vadd.f32 %v5301_v11, %v4831_v8  ;;  %7029 = vmatprep.mubr.f32.mxu0 %v19969_v45  ;;  %v18713_v5 = vpop.f32.mrb[112].mxu1  ;;  %v19973_v46 = vld [vmem:[#allocation16_spill] sm:$0xff]  ;;  %v4832_v51 = vld [vmem:[#allocation3 + $0x1a0] sm:$0xff]  ;;  %8913 = vmatpush1.bf16.msra.mxu0 %v14228_v61 }
 0x3fb   :  { %v5675_v29 = vld [vmem:[#allocation3 + $0x178] sm:$0xff]  ;;  %v6334_v57 = vadd.f32 %v18251_v22, %v5486_v41  ;;  %v18716_v28 = vpop.f32.mrb[113].mxu1  ;;  %v4833_v8 = vld [vmem:[#allocation3 + $0x1a8] sm:$0xff] }
 0x3fc   :  { %19972 = vst [vmem:[#allocation33_spill] sm:$0xff] %v18716_v28  ;;  %5583 = vst.msk [vmem:[#allocation3 + $0x198] sm:$0xff] %vm636_vm4, %v5487_v7  ;;  %v6331_v20 = vadd.f32 %v19973_v46, %v5675_v29  ;;  %v5305_v12 = vpop.f32.mrb[116].mxu0  ;;  %v14882_v54 = vld [vmem:[%s19783_s0 + $0x128] sm:$0xff]  ;;  %v14233_v22 = vld [vmem:[#allocation10 + $0x94] ss:$8 sps:$4 sm:$0xff]  }
 0x3fd   :  { %v5488_v59 = vadd.f32 %v5305_v12, %v4832_v51  ;;  %v5307_v11 = vpop.f32.mrb[117].mxu0  ;;  %13413 = vmatmul.mubr.msk.f32.gmra.mrb[222].mxu0 %vm130_vm3, %v14882_v54  ;;  %6430 = vst [vmem:[#allocation3 + $0x190] sm:$0xff] %v6334_v57  ;;  %v19975_v29 = vld [vmem:[#allocation17_spill] sm:$0xff]  ;;  %8914 = vmatprep.subr.bf16.mxu0 %v14233_v22  ;;  %v19977_v12 = vld [vmem:[#allocation38_spill] sm:$0xff] }
 0x3fe   :  { %6427 = vst.msk [vmem:[#allocation3 + $0x178] sm:$0xff] %vm636_vm4, %v6331_v20  ;;  %v5489_v41 = vadd.f32 %v5307_v11, %v4833_v8  ;;  %7035 = vmatprep.mubr.f32.mxu0 %v19969_v45  ;;  %v18726_v7 = vpop.f32.mrb[114].mxu1  ;;  %v4834_v57 = vld [vmem:[#allocation3 + $0x1b0] sm:$0xff]  ;;  %8915 = vmatpush1.bf16.msra.mxu0 %v14231_v3  ;;  %v4835_v8 = vld [vmem:[#allocation3 + $0x1b8] sm:$0xff] }
 0x3ff   :  { %19974 = vst [vmem:[#allocation31_spill] sm:$0xff] %v18726_v7  ;;  %v5677_v61 = vld [vmem:[#allocation3 + $0x188] sm:$0xff]  ;;  %v6336_v46 = vadd.f32 %v19975_v29, %v5488_v59  ;;  %v18729_v51 = vpop.f32.mrb[115].mxu1  ;;  %v14883_v7 = vld [vmem:[%s19783_s0 + $0x130] sm:$0xff] }
 0x400   :  { %19976 = vst [vmem:[#allocation36_spill] sm:$0xff] %v18729_v51  ;;  %5585 = vst.msk [vmem:[#allocation3 + $0x1a8] sm:$0xff] %vm636_vm4, %v5489_v41  ;;  %v6333_v54 = vadd.f32 %v19977_v12, %v5677_v61  ;;  %v5311_v28 = vpop.f32.mrb[118].mxu0  ;;  %v14236_v59 = vld [vmem:[#allocation10 + $0xa4] ss:$8 sps:$4 sm:$0xff]  }
 0x401   :  { %v5490_v20 = vadd.f32 %v5311_v28, %v4834_v57  ;;  %v5313_v11 = vpop.f32.mrb[119].mxu0  ;;  %13414 = vmatmul.mubr.msk.f32.gmra.mrb[224].mxu0 %vm130_vm3, %v14883_v7  ;;  %6432 = vst [vmem:[#allocation3 + $0x1a0] sm:$0xff] %v6336_v46  ;;  %v14234_v41 = vld [vmem:[#allocation10 + $0xa0] ss:$8 sps:$4 sm:$0xff]   ;;  %v19979_v28 = vld [vmem:[#allocation22_spill] sm:$0xff]  ;;  %8916 = vmatprep.subr.bf16.mxu0 %v14236_v59 }
 0x402   :  { %6429 = vst.msk [vmem:[#allocation3 + $0x188] sm:$0xff] %vm636_vm4, %v6333_v54  ;;  %v5491_v22 = vadd.f32 %v5313_v11, %v4835_v8  ;;  %7041 = vmatprep.mubr.f32.mxu0 %v19969_v45  ;;  %v18739_v61 = vpop.f32.mrb[116].mxu1  ;;  %v19981_v57 = vld [vmem:[#allocation20_spill] sm:$0xff]  ;;  %v4836_v46 = vld [vmem:[#allocation3 + $0x1c0] sm:$0xff]  ;;  %8917 = vmatpush1.bf16.msra.mxu0 %v14234_v41 }
 0x403   :  { %19978 = vst [vmem:[#allocation32_spill] sm:$0xff] %v18739_v61  ;;  %v5679_v3 = vld [vmem:[#allocation3 + $0x198] sm:$0xff]  ;;  %v6338_v29 = vadd.f32 %v19979_v28, %v5490_v20  ;;  %v18742_v12 = vpop.f32.mrb[117].mxu1  ;;  %v4837_v8 = vld [vmem:[#allocation3 + $0x1c8] sm:$0xff] }
 0x404   :  { %19980 = vst [vmem:[#allocation39_spill] sm:$0xff] %v18742_v12  ;;  %5587 = vst.msk [vmem:[#allocation3 + $0x1b8] sm:$0xff] %vm636_vm4, %v5491_v22  ;;  %v6335_v7 = vadd.f32 %v19981_v57, %v5679_v3  ;;  %v5317_v51 = vpop.f32.mrb[120].mxu0  ;;  %v14884_v61 = vld [vmem:[%s19783_s0 + $0x138] sm:$0xff] }
 0x405   :  { %v5492_v54 = vadd.f32 %v5317_v51, %v4836_v46  ;;  %v5319_v11 = vpop.f32.mrb[121].mxu0  ;;  %13415 = vmatmul.mubr.msk.f32.gmra.mrb[226].mxu0 %vm130_vm3, %v14884_v61  ;;  %6434 = vst [vmem:[#allocation3 + $0x1b0] sm:$0xff] %v6338_v29  ;;  %v14239_v20 = vld [vmem:[#allocation10 + $0xb4] ss:$8 sps:$4 sm:$0xff]   ;;  %v14237_v22 = vld [vmem:[#allocation10 + $0xb0] ss:$8 sps:$4 sm:$0xff]  }
 0x406   :  { %6431 = vst.msk [vmem:[#allocation3 + $0x198] sm:$0xff] %vm636_vm4, %v6335_v7  ;;  %v5493_v59 = vadd.f32 %v5319_v11, %v4837_v8  ;;  %7047 = vmatprep.mubr.f32.mxu0 %v19969_v45  ;;  %v18752_v3 = vpop.f32.mrb[118].mxu1  ;;  %v19983_v51 = vld [vmem:[#allocation44_spill] sm:$0xff]  ;;  %8918 = vmatprep.subr.bf16.mxu0 %v14239_v20  ;;  %v19985_v46 = vld [vmem:[#allocation41_spill] sm:$0xff]  ;;  %v4839_v8 = vld [vmem:[#allocation3 + $0x1d8] sm:$0xff] }
 0x407   :  { %19982 = vst [vmem:[#allocation34_spill] sm:$0xff] %v18752_v3  ;;  %v5681_v41 = vld [vmem:[#allocation3 + $0x1a8] sm:$0xff]  ;;  %v6340_v28 = vadd.f32 %v19983_v51, %v5492_v54  ;;  %v18755_v57 = vpop.f32.mrb[119].mxu1  ;;  %v4838_v29 = vld [vmem:[#allocation3 + $0x1d0] sm:$0xff]  ;;  %8919 = vmatpush1.bf16.msra.mxu0 %v14237_v22  ;;  %v14885_v3 = vld [vmem:[%s19783_s0 + $0x140] sm:$0xff] }
 0x408   :  { %19984 = vst [vmem:[#allocation42_spill] sm:$0xff] %v18755_v57  ;;  %5589 = vst.msk [vmem:[#allocation3 + $0x1c8] sm:$0xff] %vm636_vm4, %v5493_v59  ;;  %v6337_v61 = vadd.f32 %v19985_v46, %v5681_v41  ;;  %v5323_v12 = vpop.f32.mrb[122].mxu0  ;;  %v19987_v41 = vld [vmem:[#allocation21_spill] sm:$0xff]  ;;  %v19989_v51 = vld [vmem:[#allocation19_spill] sm:$0xff] }
 0x409   :  { %v5494_v7 = vadd.f32 %v5323_v12, %v4838_v29  ;;  %v5325_v11 = vpop.f32.mrb[123].mxu0  ;;  %13416 = vmatmul.mubr.msk.f32.gmra.mrb[228].mxu0 %vm130_vm3, %v14885_v3  ;;  %6436 = vst [vmem:[#allocation3 + $0x1c0] sm:$0xff] %v6340_v28  ;;  %v4840_v29 = vld [vmem:[#allocation3 + $0x1e0] sm:$0xff]  ;;  %v4841_v28 = vld [vmem:[#allocation3 + $0x1e8] sm:$0xff] }
 0x40a   :  { %6433 = vst.msk [vmem:[#allocation3 + $0x1a8] sm:$0xff] %vm636_vm4, %v6337_v61  ;;  %v5495_v54 = vadd.f32 %v5325_v11, %v4839_v8  ;;  %7053 = vmatprep.mubr.f32.mxu0 %v19969_v45  ;;  %v18765_v20 = vpop.f32.mrb[120].mxu1  ;;  %v14886_v61 = vld [vmem:[%s19783_s0 + $0x148] sm:$0xff] }
 0x40b   :  { %19986 = vst [vmem:[#allocation37_spill] sm:$0xff] %v18765_v20  ;;  %v5683_v59 = vld [vmem:[#allocation3 + $0x1b8] sm:$0xff]  ;;  %v6342_v22 = vadd.f32 %v19987_v41, %v5494_v7  ;;  %v18768_v12 = vpop.f32.mrb[121].mxu1  ;;  %v19992_v41 = vld [vmem:[#allocation23_spill] sm:$0xff] }
 0x40c   :  { %19988 = vst [vmem:[#allocation45_spill] sm:$0xff] %v18768_v12  ;;  %5591 = vst.msk [vmem:[#allocation3 + $0x1d8] sm:$0xff] %vm636_vm4, %v5495_v54  ;;  %v6339_v46 = vadd.f32 %v19989_v51, %v5683_v59  ;;  %v5329_v57 = vpop.f32.mrb[124].mxu0  ;;  %v19990_v54 = vld [vmem:[#allocation24_spill] sm:$0xff] }
 0x40d   :  { %v5496_v3 = vadd.f32 %v5329_v57, %v4840_v29  ;;  %v5331_v14 = vpop.f32.mrb[125].mxu0  ;;  %13417 = vmatmul.mubr.msk.f32.gmra.mrb[230].mxu0 %vm130_vm3, %v14886_v61  ;;  %6438 = vst [vmem:[#allocation3 + $0x1d0] sm:$0xff] %v6342_v22  ;;  %v4842_v29 = vld [vmem:[#allocation3 + $0x1f0] sm:$0xff]  ;;  %v4843_v22 = vld [vmem:[#allocation3 + $0x1f8] sm:$0xff] }
 0x40e   :  { %6435 = vst.msk [vmem:[#allocation3 + $0x1b8] sm:$0xff] %vm636_vm4, %v6339_v46  ;;  %v5497_v7 = vadd.f32 %v5331_v14, %v4841_v28  ;;  %7059 = vmatprep.mubr.f32.mxu0 %v19969_v45  ;;  %v18778_v8 = vpop.f32.mrb[122].mxu1  ;;  %v14887_v14 = vld [vmem:[%s19783_s0 + $0x150] sm:$0xff] }
 0x40f   :  { %v5685_v11 = vld [vmem:[#allocation3 + $0x1c8] sm:$0xff]  ;;  %v6344_v59 = vadd.f32 %v19990_v54, %v5496_v3  ;;  %v18781_v57 = vpop.f32.mrb[123].mxu1 }
 0x410   :  { %19991 = vst [vmem:[#allocation40_spill] sm:$0xff] %v18781_v57  ;;  %5593 = vst.msk [vmem:[#allocation3 + $0x1e8] sm:$0xff] %vm636_vm4, %v5497_v7  ;;  %v6341_v51 = vadd.f32 %v19992_v41, %v5685_v11  ;;  %v5335_v12 = vpop.f32.mrb[126].mxu0  ;;  %v19994_v11 = vld [vmem:[#allocation47_spill] sm:$0xff] }
 0x411   :  { %v5498_v61 = vadd.f32 %v5335_v12, %v4842_v29  ;;  %v5337_v20 = vpop.f32.mrb[127].mxu0  ;;  %13418 = vmatmul.mubr.msk.f32.gmra.mrb[232].mxu0 %vm130_vm3, %v14887_v14  ;;  %6440 = vst [vmem:[#allocation3 + $0x1e0] sm:$0xff] %v6344_v59  ;;  %v4844_v41 = vld [vmem:[#allocation3 + $0x200] sm:$0xff]  ;;  %v4845_v59 = vld [vmem:[#allocation3 + $0x208] sm:$0xff] }
 0x412   :  { %6437 = vst.msk [vmem:[#allocation3 + $0x1c8] sm:$0xff] %vm636_vm4, %v6341_v51  ;;  %v5499_v46 = vadd.f32 %v5337_v20, %v4843_v22  ;;  %7065 = vmatprep.mubr.f32.mxu0 %v19969_v45  ;;  %v18791_v3 = vpop.f32.mrb[124].mxu1  ;;  %v14888_v20 = vld [vmem:[%s19783_s0 + $0x158] sm:$0xff] }
 0x413   :  { %v5687_v28 = vld [vmem:[#allocation3 + $0x1d8] sm:$0xff]  ;;  %v6346_v7 = vadd.f32 %v18338_v27, %v5498_v61  ;;  %v18794_v12 = vpop.f32.mrb[125].mxu1 }
 0x414   :  { %19993 = vst [vmem:[#allocation48_spill] sm:$0xff] %v18794_v12  ;;  %5595 = vst.msk [vmem:[#allocation3 + $0x1f8] sm:$0xff] %vm636_vm4, %v5499_v46  ;;  %v6343_v54 = vadd.f32 %v19994_v11, %v5687_v28  ;;  %v5341_v29 = vpop.f32.mrb[128].mxu0  ;;  %v19996_v28 = vld [vmem:[#allocation28_spill] sm:$0xff] }
 0x415   :  { %v5500_v14 = vadd.f32 %v5341_v29, %v4844_v41  ;;  %v5343_v57 = vpop.f32.mrb[129].mxu0  ;;  %13419 = vmatmul.mubr.msk.f32.gmra.mrb[234].mxu0 %vm130_vm3, %v14888_v20  ;;  %6442 = vst [vmem:[#allocation3 + $0x1f0] sm:$0xff] %v6346_v7  ;;  %v4846_v41 = vld [vmem:[#allocation3 + $0x210] sm:$0xff]  ;;  %v4847_v7 = vld [vmem:[#allocation3 + $0x218] sm:$0xff] }
 0x416   :  { %6439 = vst.msk [vmem:[#allocation3 + $0x1d8] sm:$0xff] %vm636_vm4, %v6343_v54  ;;  %v5501_v27 = vadd.f32 %v5343_v57, %v4845_v59  ;;  %7071 = vmatprep.mubr.f32.mxu0 %v19969_v45  ;;  %v18804_v51 = vpop.f32.mrb[126].mxu1  ;;  %v14889_v57 = vld [vmem:[%s19783_s0 + $0x160] sm:$0xff] }
 0x417   :  { %v5689_v61 = vld [vmem:[#allocation3 + $0x1e8] sm:$0xff]  ;;  %v6348_v22 = vadd.f32 %v18354_v42, %v5500_v14  ;;  %v18807_v46 = vpop.f32.mrb[127].mxu1 }
 0x418   :  { %19995 = vst [vmem:[#allocation43_spill] sm:$0xff] %v18807_v46  ;;  %5597 = vst.msk [vmem:[#allocation3 + $0x208] sm:$0xff] %vm636_vm4, %v5501_v27  ;;  %v6345_v11 = vadd.f32 %v19996_v28, %v5689_v61  ;;  %v5347_v29 = vpop.f32.mrb[130].mxu0  ;;  %v19998_v61 = vld [vmem:[#allocation50_spill] sm:$0xff] }
 0x419   :  { %v5502_v20 = vadd.f32 %v5347_v29, %v4846_v41  ;;  %v5349_v12 = vpop.f32.mrb[131].mxu0  ;;  %13420 = vmatmul.mubr.msk.f32.gmra.mrb[236].mxu0 %vm130_vm3, %v14889_v57  ;;  %6444 = vst [vmem:[#allocation3 + $0x200] sm:$0xff] %v6348_v22  ;;  %v4848_v41 = vld [vmem:[#allocation3 + $0x220] sm:$0xff]  ;;  %v4849_v22 = vld [vmem:[#allocation3 + $0x228] sm:$0xff] }
 0x41a   :  { %6441 = vst.msk [vmem:[#allocation3 + $0x1e8] sm:$0xff] %vm636_vm4, %v6345_v11  ;;  %v5503_v42 = vadd.f32 %v5349_v12, %v4847_v7  ;;  %7077 = vmatprep.mubr.f32.mxu0 %v19969_v45  ;;  %v18817_v54 = vpop.f32.mrb[128].mxu1  ;;  %v14890_v12 = vld [vmem:[%s19783_s0 + $0x168] sm:$0xff] }
 0x41b   :  { %v5691_v14 = vld [vmem:[#allocation3 + $0x1f8] sm:$0xff]  ;;  %v6350_v59 = vadd.f32 %v18368_v48, %v5502_v20  ;;  %v18820_v27 = vpop.f32.mrb[129].mxu1 }
 0x41c   :  { %19997 = vst [vmem:[#allocation51_spill] sm:$0xff] %v18820_v27  ;;  %5599 = vst.msk [vmem:[#allocation3 + $0x218] sm:$0xff] %vm636_vm4, %v5503_v42  ;;  %v6347_v28 = vadd.f32 %v19998_v61, %v5691_v14  ;;  %v5353_v29 = vpop.f32.mrb[132].mxu0  ;;  %v20000_v14 = vld [vmem:[#allocation25_spill] sm:$0xff] }
 0x41d   :  { %v5504_v57 = vadd.f32 %v5353_v29, %v4848_v41  ;;  %v5355_v46 = vpop.f32.mrb[133].mxu0  ;;  %13421 = vmatmul.mubr.msk.f32.gmra.mrb[238].mxu0 %vm130_vm3, %v14890_v12  ;;  %6446 = vst [vmem:[#allocation3 + $0x210] sm:$0xff] %v6350_v59  ;;  %v4850_v41 = vld [vmem:[#allocation3 + $0x230] sm:$0xff]  ;;  %v4851_v59 = vld [vmem:[#allocation3 + $0x238] sm:$0xff] }
 0x41e   :  { %6443 = vst.msk [vmem:[#allocation3 + $0x1f8] sm:$0xff] %vm636_vm4, %v6347_v28  ;;  %v5505_v48 = vadd.f32 %v5355_v46, %v4849_v22  ;;  %7083 = vmatprep.mubr.f32.mxu0 %v19969_v45  ;;  %v18830_v11 = vpop.f32.mrb[130].mxu1  ;;  %v14891_v46 = vld [vmem:[%s19783_s0 + $0x170] sm:$0xff] }
 0x41f   :  { %v5693_v20 = vld [vmem:[#allocation3 + $0x208] sm:$0xff]  ;;  %v6352_v7 = vadd.f32 %v18386_v37, %v5504_v57  ;;  %v18833_v42 = vpop.f32.mrb[131].mxu1 }
 0x420   :  { %19999 = vst [vmem:[#allocation46_spill] sm:$0xff] %v18833_v42  ;;  %5601 = vst.msk [vmem:[#allocation3 + $0x228] sm:$0xff] %vm636_vm4, %v5505_v48  ;;  %v6349_v61 = vadd.f32 %v20000_v14, %v5693_v20  ;;  %v5359_v29 = vpop.f32.mrb[134].mxu0  ;;  %v20001_v20 = vld [vmem:[#allocation29_spill] sm:$0xff] }
 0x421   :  { %v5506_v12 = vadd.f32 %v5359_v29, %v4850_v41  ;;  %v5361_v27 = vpop.f32.mrb[135].mxu0  ;;  %13422 = vmatmul.mubr.msk.f32.gmra.mrb[240].mxu0 %vm130_vm3, %v14891_v46  ;;  %6448 = vst [vmem:[#allocation3 + $0x220] sm:$0xff] %v6352_v7  ;;  %v4852_v41 = vld [vmem:[#allocation3 + $0x240] sm:$0xff]  ;;  %v4853_v7 = vld [vmem:[#allocation3 + $0x248] sm:$0xff] }
 0x422   :  { %6445 = vst.msk [vmem:[#allocation3 + $0x208] sm:$0xff] %vm636_vm4, %v6349_v61  ;;  %v5507_v37 = vadd.f32 %v5361_v27, %v4851_v59  ;;  %7089 = vmatprep.mubr.f32.mxu0 %v19969_v45  ;;  %v18843_v28 = vpop.f32.mrb[132].mxu1  ;;  %v14892_v27 = vld [vmem:[%s19783_s0 + $0x178] sm:$0xff] }
 0x423   :  { %v5695_v57 = vld [vmem:[#allocation3 + $0x218] sm:$0xff]  ;;  %v6354_v22 = vadd.f32 %v18404_v34, %v5506_v12  ;;  %v18846_v48 = vpop.f32.mrb[133].mxu1 }
 0x424   :  { %5603 = vst.msk [vmem:[#allocation3 + $0x238] sm:$0xff] %vm636_vm4, %v5507_v37  ;;  %v6351_v14 = vadd.f32 %v20001_v20, %v5695_v57  ;;  %v5365_v29 = vpop.f32.mrb[136].mxu0  ;;  %v4854_v20 = vld [vmem:[#allocation3 + $0x250] sm:$0xff] }
 0x425   :  { %v5508_v46 = vadd.f32 %v5365_v29, %v4852_v41  ;;  %v5367_v42 = vpop.f32.mrb[137].mxu0  ;;  %13423 = vmatmul.mubr.msk.f32.gmra.mrb[242].mxu0 %vm130_vm3, %v14892_v27  ;;  %6450 = vst [vmem:[#allocation3 + $0x230] sm:$0xff] %v6354_v22  ;;  %v4855_v22 = vld [vmem:[#allocation3 + $0x258] sm:$0xff] }
 0x426   :  { %6447 = vst.msk [vmem:[#allocation3 + $0x218] sm:$0xff] %vm636_vm4, %v6351_v14  ;;  %v5509_v34 = vadd.f32 %v5367_v42, %v4853_v7  ;;  %7095 = vmatprep.mubr.f32.mxu0 %v19969_v45  ;;  %v18856_v61 = vpop.f32.mrb[134].mxu1  ;;  %v14893_v42 = vld [vmem:[%s19783_s0 + $0x180] sm:$0xff] }
 0x427   :  { %v5697_v12 = vld [vmem:[#allocation3 + $0x228] sm:$0xff]  ;;  %v6356_v59 = vadd.f32 %v18422_v2, %v5508_v46  ;;  %v18859_v37 = vpop.f32.mrb[135].mxu1 }
 0x428   :  { %5605 = vst.msk [vmem:[#allocation3 + $0x248] sm:$0xff] %vm636_vm4, %v5509_v34  ;;  %v6353_v57 = vadd.f32 %v18389_v32, %v5697_v12  ;;  %v5371_v41 = vpop.f32.mrb[138].mxu0  ;;  %v4856_v12 = vld [vmem:[#allocation3 + $0x260] sm:$0xff] }
 0x429   :  { %v5510_v29 = vadd.f32 %v5371_v41, %v4854_v20  ;;  %v5373_v27 = vpop.f32.mrb[139].mxu0  ;;  %13424 = vmatmul.mubr.msk.f32.gmra.mrb[244].mxu0 %vm130_vm3, %v14893_v42  ;;  %6452 = vst [vmem:[#allocation3 + $0x240] sm:$0xff] %v6356_v59  ;;  %v4857_v59 = vld [vmem:[#allocation3 + $0x268] sm:$0xff] }
 0x42a   :  { %6449 = vst.msk [vmem:[#allocation3 + $0x228] sm:$0xff] %vm636_vm4, %v6353_v57  ;;  %v5511_v2 = vadd.f32 %v5373_v27, %v4855_v22  ;;  %7101 = vmatprep.mubr.f32.mxu0 %v19969_v45  ;;  %v18869_v14 = vpop.f32.mrb[136].mxu1  ;;  %v14894_v57 = vld [vmem:[%s19783_s0 + $0x188] sm:$0xff] }
 0x42b   :  { %v5699_v32 = vld [vmem:[#allocation3 + $0x238] sm:$0xff]  ;;  %v6358_v46 = vadd.f32 %v18440_v52, %v5510_v29  ;;  %v18872_v7 = vpop.f32.mrb[137].mxu1 }
 0x42c   :  { %5607 = vst.msk [vmem:[#allocation3 + $0x258] sm:$0xff] %vm636_vm4, %v5511_v2  ;;  %v6355_v34 = vadd.f32 %v18407_v31, %v5699_v32  ;;  %v5377_v20 = vpop.f32.mrb[140].mxu0  ;;  %v4858_v32 = vld [vmem:[#allocation3 + $0x270] sm:$0xff] }
 0x42d   :  { %v5512_v41 = vadd.f32 %v5377_v20, %v4856_v12  ;;  %v5379_v42 = vpop.f32.mrb[141].mxu0  ;;  %13425 = vmatmul.mubr.msk.f32.gmra.mrb[246].mxu0 %vm130_vm3, %v14894_v57  ;;  %6454 = vst [vmem:[#allocation3 + $0x250] sm:$0xff] %v6358_v46  ;;  %v4859_v46 = vld [vmem:[#allocation3 + $0x278] sm:$0xff] }
 0x42e   :  { %6451 = vst.msk [vmem:[#allocation3 + $0x238] sm:$0xff] %vm636_vm4, %v6355_v34  ;;  %v5513_v52 = vadd.f32 %v5379_v42, %v4857_v59  ;;  %7107 = vmatprep.mubr.f32.mxu0 %v19969_v45  ;;  %v18882_v29 = vpop.f32.mrb[138].mxu1  ;;  %v14895_v34 = vld [vmem:[%s19783_s0 + $0x190] sm:$0xff] }
 0x42f   :  { %v5701_v31 = vld [vmem:[#allocation3 + $0x248] sm:$0xff]  ;;  %v6360_v22 = vadd.f32 %v18458_v60, %v5512_v41  ;;  %v18885_v27 = vpop.f32.mrb[139].mxu1 }
 0x430   :  { %5609 = vst.msk [vmem:[#allocation3 + $0x268] sm:$0xff] %vm636_vm4, %v5513_v52  ;;  %v6357_v2 = vadd.f32 %v18425_v19, %v5701_v31  ;;  %v5383_v12 = vpop.f32.mrb[142].mxu0  ;;  %v4860_v31 = vld [vmem:[#allocation3 + $0x280] sm:$0xff] }
 0x431   :  { %v5514_v20 = vadd.f32 %v5383_v12, %v4858_v32  ;;  %v5385_v57 = vpop.f32.mrb[143].mxu0  ;;  %13426 = vmatmul.mubr.msk.f32.gmra.mrb[248].mxu0 %vm130_vm3, %v14895_v34  ;;  %6456 = vst [vmem:[#allocation3 + $0x260] sm:$0xff] %v6360_v22  ;;  %v4861_v22 = vld [vmem:[#allocation3 + $0x288] sm:$0xff] }
 0x432   :  { %6453 = vst.msk [vmem:[#allocation3 + $0x248] sm:$0xff] %vm636_vm4, %v6357_v2  ;;  %v5515_v60 = vadd.f32 %v5385_v57, %v4859_v46  ;;  %7113 = vmatprep.mubr.f32.mxu0 %v19969_v45  ;;  %v18895_v41 = vpop.f32.mrb[140].mxu1  ;;  %v14896_v2 = vld [vmem:[%s19783_s0 + $0x198] sm:$0xff] }
 0x433   :  { %v5703_v19 = vld [vmem:[#allocation3 + $0x258] sm:$0xff]  ;;  %v6362_v59 = vadd.f32 %v18476_v1, %v5514_v20  ;;  %v18898_v42 = vpop.f32.mrb[141].mxu1 }
 0x434   :  { %5611 = vst.msk [vmem:[#allocation3 + $0x278] sm:$0xff] %vm636_vm4, %v5515_v60  ;;  %v6359_v52 = vadd.f32 %v18443_v56, %v5703_v19  ;;  %v5389_v32 = vpop.f32.mrb[144].mxu0  ;;  %v4862_v19 = vld [vmem:[#allocation3 + $0x290] sm:$0xff] }
 0x435   :  { %v5516_v12 = vadd.f32 %v5389_v32, %v4860_v31  ;;  %v5391_v34 = vpop.f32.mrb[145].mxu0  ;;  %13427 = vmatmul.mubr.msk.f32.gmra.mrb[250].mxu0 %vm130_vm3, %v14896_v2  ;;  %6458 = vst [vmem:[#allocation3 + $0x270] sm:$0xff] %v6362_v59  ;;  %v4863_v59 = vld [vmem:[#allocation3 + $0x298] sm:$0xff] }
 0x436   :  { %6455 = vst.msk [vmem:[#allocation3 + $0x258] sm:$0xff] %vm636_vm4, %v6359_v52  ;;  %v5517_v1 = vadd.f32 %v5391_v34, %v4861_v22  ;;  %7119 = vmatprep.mubr.f32.mxu0 %v19969_v45  ;;  %v18908_v20 = vpop.f32.mrb[142].mxu1  ;;  %v14897_v52 = vld [vmem:[%s19783_s0 + $0x1a0] sm:$0xff] }
 0x437   :  { %v5705_v56 = vld [vmem:[#allocation3 + $0x268] sm:$0xff]  ;;  %v6364_v46 = vadd.f32 %v18494_v18, %v5516_v12  ;;  %v18911_v57 = vpop.f32.mrb[143].mxu1 }
 0x438   :  { %5613 = vst.msk [vmem:[#allocation3 + $0x288] sm:$0xff] %vm636_vm4, %v5517_v1  ;;  %v6361_v60 = vadd.f32 %v18461_v36, %v5705_v56  ;;  %v5395_v31 = vpop.f32.mrb[146].mxu0  ;;  %v4864_v56 = vld [vmem:[#allocation3 + $0x2a0] sm:$0xff] }
 0x439   :  { %v5518_v32 = vadd.f32 %v5395_v31, %v4862_v19  ;;  %v5397_v2 = vpop.f32.mrb[147].mxu0  ;;  %13428 = vmatmul.mubr.msk.f32.gmra.mrb[252].mxu0 %vm130_vm3, %v14897_v52  ;;  %6460 = vst [vmem:[#allocation3 + $0x280] sm:$0xff] %v6364_v46  ;;  %v4865_v46 = vld [vmem:[#allocation3 + $0x2a8] sm:$0xff] }
 0x43a   :  { %6457 = vst.msk [vmem:[#allocation3 + $0x268] sm:$0xff] %vm636_vm4, %v6361_v60  ;;  %v5519_v18 = vadd.f32 %v5397_v2, %v4863_v59  ;;  %7125 = vmatprep.mubr.f32.mxu0 %v19969_v45  ;;  %v18921_v12 = vpop.f32.mrb[144].mxu1  ;;  %v14898_v45 = vld [vmem:[%s19783_s0 + $0x1a8] sm:$0xff] }
 0x43b   :  { %v5707_v36 = vld [vmem:[#allocation3 + $0x278] sm:$0xff]  ;;  %v6366_v22 = vadd.f32 %v18512_v35, %v5518_v32  ;;  %v18924_v34 = vpop.f32.mrb[145].mxu1 }
 0x43c   :  { %5615 = vst.msk [vmem:[#allocation3 + $0x298] sm:$0xff] %vm636_vm4, %v5519_v18  ;;  %v6363_v1 = vadd.f32 %v18479_v40, %v5707_v36  ;;  %v5401_v19 = vpop.f32.mrb[148].mxu0  ;;  %v4866_v18 = vld [vmem:[#allocation3 + $0x2b0] sm:$0xff] }
 0x43d   :  { %v5520_v31 = vadd.f32 %v5401_v19, %v4864_v56  ;;  %v5403_v52 = vpop.f32.mrb[149].mxu0  ;;  %13429 = vmatmul.mubr.msk.f32.gmra.mrb[254].mxu0 %vm130_vm3, %v14898_v45  ;;  %6462 = vst [vmem:[#allocation3 + $0x290] sm:$0xff] %v6366_v22  ;;  %v4867_v19 = vld [vmem:[#allocation3 + $0x2b8] sm:$0xff] }
 0x43e   :  { %6459 = vst.msk [vmem:[#allocation3 + $0x278] sm:$0xff] %vm636_vm4, %v6363_v1  ;;  %v5521_v35 = vadd.f32 %v5403_v52, %v4865_v46  ;;  %v18933_v60 = vpop.f32.mrb[146].mxu1  ;;  %v4868_v52 = vld [vmem:[#allocation3 + $0x2c0] sm:$0xff] }
 0x43f   :  { %v5709_v32 = vld [vmem:[#allocation3 + $0x288] sm:$0xff]  ;;  %v6368_v40 = vadd.f32 %v18530_v43, %v5520_v31  ;;  %v18936_v59 = vpop.f32.mrb[147].mxu1 }
 0x440   :  { %5617 = vst.msk [vmem:[#allocation3 + $0x2a8] sm:$0xff] %vm636_vm4, %v5521_v35  ;;  %v6365_v2 = vadd.f32 %v18497_v24, %v5709_v32  ;;  %v5407_v36 = vpop.f32.mrb[150].mxu0 }
 0x441   :  { %v5522_v56 = vadd.f32 %v5407_v36, %v4866_v18  ;;  %v5409_v45 = vpop.f32.mrb[151].mxu0  ;;  %6464 = vst [vmem:[#allocation3 + $0x2a0] sm:$0xff] %v6368_v40  ;;  %v4869_v18 = vld [vmem:[#allocation3 + $0x2c8] sm:$0xff] }
 0x442   :  { %6461 = vst.msk [vmem:[#allocation3 + $0x288] sm:$0xff] %vm636_vm4, %v6365_v2  ;;  %v5523_v22 = vadd.f32 %v5409_v45, %v4867_v19  ;;  %v18941_v1 = vpop.f32.mrb[148].mxu1  ;;  %v4870_v45 = vld [vmem:[#allocation3 + $0x2d0] sm:$0xff] }
 0x443   :  { %v5711_v46 = vld [vmem:[#allocation3 + $0x298] sm:$0xff]  ;;  %v6370_v43 = vadd.f32 %v18544_v26, %v5522_v56  ;;  %v18944_v31 = vpop.f32.mrb[149].mxu1 }
 0x444   :  { %5619 = vst.msk [vmem:[#allocation3 + $0x2b8] sm:$0xff] %vm636_vm4, %v5523_v22  ;;  %v6367_v24 = vadd.f32 %v18515_v62, %v5711_v46  ;;  %v5413_v35 = vpop.f32.mrb[152].mxu0 }
 0x445   :  { %v5524_v32 = vadd.f32 %v5413_v35, %v4868_v52  ;;  %v5415_v36 = vpop.f32.mrb[153].mxu0  ;;  %6466 = vst [vmem:[#allocation3 + $0x2b0] sm:$0xff] %v6370_v43  ;;  %v4871_v52 = vld [vmem:[#allocation3 + $0x2d8] sm:$0xff] }
 0x446   :  { %6463 = vst.msk [vmem:[#allocation3 + $0x298] sm:$0xff] %vm636_vm4, %v6367_v24  ;;  %v5525_v40 = vadd.f32 %v5415_v36, %v4869_v18  ;;  %v18949_v2 = vpop.f32.mrb[150].mxu1  ;;  %v4872_v36 = vld [vmem:[#allocation3 + $0x2e0] sm:$0xff] }
 0x447   :  { %v5713_v19 = vld [vmem:[#allocation3 + $0x2a8] sm:$0xff]  ;;  %v6372_v26 = vadd.f32 %v18557_v39, %v5524_v32  ;;  %v18952_v56 = vpop.f32.mrb[151].mxu1 }
 0x448   :  { %5621 = vst.msk [vmem:[#allocation3 + $0x2c8] sm:$0xff] %vm636_vm4, %v5525_v40  ;;  %v6369_v62 = vadd.f32 %v18533_v16, %v5713_v19  ;;  %v5419_v22 = vpop.f32.mrb[154].mxu0  ;;  %v14242_v19 = vld [vmem:[#allocation10 + $0xc4] ss:$8 sps:$4 sm:$0xff]  }
 0x449   :  { %v5526_v46 = vadd.f32 %v5419_v22, %v4870_v45  ;;  %v5421_v35 = vpop.f32.mrb[155].mxu0  ;;  %6468 = vst [vmem:[#allocation3 + $0x2c0] sm:$0xff] %v6372_v26  ;;  %v4873_v22 = vld [vmem:[#allocation3 + $0x2e8] sm:$0xff]  ;;  %9258 = vmatprep.subr.bf16.mxu0 %v14242_v19 }
 0x44a   :  { %6465 = vst.msk [vmem:[#allocation3 + $0x2a8] sm:$0xff] %vm636_vm4, %v6369_v62  ;;  %v5527_v43 = vadd.f32 %v5421_v35, %v4871_v52  ;;  %v18957_v24 = vpop.f32.mrb[152].mxu1 }
 0x44b   :  { %v5715_v18 = vld [vmem:[#allocation3 + $0x2b8] sm:$0xff]  ;;  %v6374_v39 = vadd.f32 %v18570_v10, %v5526_v46  ;;  %v18960_v32 = vpop.f32.mrb[153].mxu1 }
 0x44c   :  { %5623 = vst.msk [vmem:[#allocation3 + $0x2d8] sm:$0xff] %vm636_vm4, %v5527_v43  ;;  %v6371_v16 = vadd.f32 %v18547_v21, %v5715_v18  ;;  %v5425_v40 = vpop.f32.mrb[156].mxu0  ;;  %v4874_v43 = vld [vmem:[#allocation3 + $0x2f0] sm:$0xff] }
 0x44d   :  { %v5528_v45 = vadd.f32 %v5425_v40, %v4872_v36  ;;  %v5427_v26 = vpop.f32.mrb[157].mxu0  ;;  %6470 = vst [vmem:[#allocation3 + $0x2d0] sm:$0xff] %v6374_v39  ;;  %v4875_v40 = vld [vmem:[#allocation3 + $0x2f8] sm:$0xff] }
 0x44e   :  { %6467 = vst.msk [vmem:[#allocation3 + $0x2b8] sm:$0xff] %vm636_vm4, %v6371_v16  ;;  %v5529_v62 = vadd.f32 %v5427_v26, %v4873_v22  ;;  %v18965_v52 = vpop.f32.mrb[154].mxu1 }
 0x44f   :  { %v5717_v10 = vld [vmem:[#allocation3 + $0x2c8] sm:$0xff]  ;;  %v6376_v46 = vadd.f32 %v18583_v13, %v5528_v45  ;;  %v18968_v35 = vpop.f32.mrb[155].mxu1  ;;  %v8462_v45 = vlaneseq }
 0x450   :  { %20002 = vst [vmem:[#allocation27_spill] sm:$0xff] %v18968_v35  ;;  %5625 = vst.msk [vmem:[#allocation3 + $0x2e8] sm:$0xff] %vm636_vm4, %v5529_v62  ;;  %v6373_v21 = vadd.f32 %v18560_v44, %v5717_v10  ;;  %v5431_v18 = vpop.f32.mrb[158].mxu0  ;;  %v6476_v62 = vld [vmem:[#allocation3] sm:$0xff] }
 0x451   :  { %v5530_v36 = vadd.f32 %v5431_v18, %v4874_v43  ;;  %v5433_v39 = vpop.f32.mrb[159].mxu0  ;;  %6472 = vst [vmem:[#allocation3 + $0x2e0] sm:$0xff] %v6376_v46  ;;  %v6477_v18 = vld [vmem:[#allocation3 + $0x8] sm:$0xff] }
 0x452   :  { %6469 = vst.msk [vmem:[#allocation3 + $0x2c8] sm:$0xff] %vm636_vm4, %v6373_v21  ;;  %v5531_v16 = vadd.f32 %v5433_v39, %v4875_v40  ;;  %v18973_v19 = vpop.f32.mrb[156].mxu1 }
 0x453   :  { %v5719_v22 = vld [vmem:[#allocation3 + $0x2d8] sm:$0xff]  ;;  %v6378_v13 = vadd.f32 %v18596_v53, %v5530_v36  ;;  %v18976_v26 = vpop.f32.mrb[157].mxu1  ;;  %v18984_v36 = vshrl.u32 %v8462_v45, 7 }
 0x454   :  { %20003 = vst [vmem:[#allocation49_spill] sm:$0xff] %v18976_v26  ;;  %5627 = vst.msk [vmem:[#allocation3 + $0x2f8] sm:$0xff] %vm636_vm4, %v5531_v16  ;;  %v6375_v44 = vadd.f32 %v18573_v4, %v5719_v22  ;;  %v6845_v10 = vpop.f32.mrb[160].mxu0  ;;  %v6478_v16 = vld [vmem:[#allocation3 + $0x10] sm:$0xff] }
 0x455   :  { %v7132_v43 = vadd.f32 %v6845_v10, %v6476_v62  ;;  %v6847_v46 = vpop.f32.mrb[161].mxu0  ;;  %6474 = vst [vmem:[#allocation3 + $0x2f0] sm:$0xff] %v6378_v13  ;;  %v6479_v13 = vld [vmem:[#allocation3 + $0x18] sm:$0xff]  ;;  %v18994_v45 = vsub.s32 0, %v18984_v36 }
 0x456   :  { %6471 = vst.msk [vmem:[#allocation3 + $0x2d8] sm:$0xff] %vm636_vm4, %v6375_v44  ;;  %v7133_v21 = vadd.f32 %v6847_v46, %v6477_v18  ;;  %v18981_v40 = vpop.f32.mrb[158].mxu1 }
 0x457   :  { %v5721_v39 = vld [vmem:[#allocation3 + $0x2e8] sm:$0xff]  ;;  %v7980_v53 = vadd.f32 %v18609_v33, %v7132_v43  ;;  %v18986_v26 = vpop.f32.mrb[159].mxu1  ;;  %20006 = vst [vmem:[#allocation56_spill] sm:$0xff] %v18994_v45 }
 0x458   :  { %20004 = vst [vmem:[#allocation54_spill] sm:$0xff] %v18986_v26  ;;  %7229 = vst.msk [vmem:[#allocation3 + $0x8] sm:$0xff] %vm636_vm4, %v7133_v21  ;;  %v6377_v4 = vadd.f32 %v18586_v25, %v5721_v39  ;;  %v6851_v22 = vpop.f32.mrb[162].mxu0  ;;  %v6480_v21 = vld [vmem:[#allocation3 + $0x20] sm:$0xff] }
 0x459   :  { %v7134_v62 = vadd.f32 %v6851_v22, %v6478_v16  ;;  %v6853_v10 = vpop.f32.mrb[163].mxu0  ;;  %8076 = vst [vmem:[#allocation3] sm:$0xff] %v7980_v53  ;;  %v6481_v22 = vld [vmem:[#allocation3 + $0x28] sm:$0xff] }
 0x45a   :  { %6473 = vst.msk [vmem:[#allocation3 + $0x2e8] sm:$0xff] %vm636_vm4, %v6377_v4  ;;  %v7135_v44 = vadd.f32 %v6853_v10, %v6479_v13  ;;  %v18991_v18 = vpop.f32.mrb[160].mxu1  ;;  %v19004_v4 = vld [vmem:[%s19785_s2] sm:$0x3] }
 0x45b   :  { %20005 = vst [vmem:[#allocation52_spill] sm:$0xff] %v18991_v18  ;;  %v5723_v33 = vld [vmem:[#allocation3 + $0x2f8] sm:$0xff]  ;;  %v7982_v43 = vadd.f32 %v18622_v58, %v7134_v62  ;;  %v18997_v46 = vpop.f32.mrb[161].mxu1  ;;  %v8172_v62 = vld [vmem:[#allocation2] sm:$0xff] }
 0x45c   :  { %20007 = vst [vmem:[#allocation53_spill] sm:$0xff] %v18997_v46  ;;  %7231 = vst.msk [vmem:[#allocation3 + $0x18] sm:$0xff] %vm636_vm4, %v7135_v44  ;;  %v6379_v25 = vadd.f32 %v18599_v55, %v5723_v33  ;;  %v6857_v39 = vpop.f32.mrb[164].mxu0  ;;  %v8364_v44 = vmax.f32 %v8172_v62, %v7980_v53  ;;  %v19011_v55 = vrot.slane %v19004_v4, %v18994_v45  ;;  %v6483_v18 = vld [vmem:[#allocation3 + $0x38] sm:$0xff]  ;;  %v8174_v45 = vld [vmem:[#allocation2 + $0x10] sm:$0xff] }
 0x45d   :  { %v7136_v16 = vadd.f32 %v6857_v39, %v6480_v21  ;;  %v6859_v13 = vpop.f32.mrb[165].mxu0  ;;  %8078 = vst [vmem:[#allocation3 + $0x10] sm:$0xff] %v7982_v43  ;;  %v6482_v39 = vld [vmem:[#allocation3 + $0x30] sm:$0xff] }
 0x45e   :  { %6475 = vst.msk [vmem:[#allocation3 + $0x2f8] sm:$0xff] %vm636_vm4, %v6379_v25  ;;  %v7137_v58 = vadd.f32 %v6859_v13, %v6481_v22  ;;  %v19007_v10 = vpop.f32.mrb[162].mxu1  ;;  %v8176_v22 = vld [vmem:[#allocation2 + $0x20] sm:$0xff] }
 0x45f   :  { %20008 = vst [vmem:[#allocation58_spill] sm:$0xff] %v19007_v10  ;;  %v7325_v33 = vld [vmem:[#allocation3 + $0x8] sm:$0xff]  ;;  %v7984_v46 = vadd.f32 %v18635_v50, %v7136_v16  ;;  %v19014_v26 = vpop.f32.mrb[163].mxu1  ;;  %v8472_v50 = vadd.f32 %v19011_v55, %v8364_v44  ;;  %v8366_v16 = vmax.f32 %v8174_v45, %v7982_v43 }
 0x460   :  { %20009 = vst [vmem:[#allocation55_spill] sm:$0xff] %v19014_v26  ;;  %7233 = vst.msk [vmem:[#allocation3 + $0x28] sm:$0xff] %vm636_vm4, %v7137_v58  ;;  %v7981_v21 = vadd.f32 %v18612_v9, %v7325_v33  ;;  %v6863_v25 = vpop.f32.mrb[166].mxu0 }
 0x461   :  { %v7138_v13 = vadd.f32 %v6863_v25, %v6482_v39  ;;  %v6865_v10 = vpop.f32.mrb[167].mxu0  ;;  %8080 = vst [vmem:[#allocation3 + $0x20] sm:$0xff] %v7984_v46  ;;  %v8368_v53 = vmax.f32 %v8176_v22, %v7984_v46  ;;  %v6484_v39 = vld [vmem:[#allocation3 + $0x40] sm:$0xff]  ;;  %v6485_v25 = vld [vmem:[#allocation3 + $0x48] sm:$0xff] }
 0x462   :  { %8077 = vst.msk [vmem:[#allocation3 + $0x8] sm:$0xff] %vm636_vm4, %v7981_v21  ;;  %v7139_v62 = vadd.f32 %v6865_v10, %v6483_v18  ;;  %v19019_v35 = vpop.f32.mrb[164].mxu1  ;;  %v8178_v18 = vld [vmem:[#allocation2 + $0x30] sm:$0xff] }
 0x463   :  { %20010 = vst [vmem:[#allocation60_spill] sm:$0xff] %v19019_v35  ;;  %v7327_v58 = vld [vmem:[#allocation3 + $0x18] sm:$0xff]  ;;  %v8476_v9 = vadd.f32 %v19011_v55, %v8368_v53  ;;  %v7986_v33 = vadd.f32 %v18648_v30, %v7138_v13  ;;  %v19024_v26 = vpop.f32.mrb[165].mxu1  ;;  %v8474_v30 = vadd.f32 %v19011_v55, %v8366_v16 }
 0x464   :  { %20011 = vst [vmem:[#allocation57_spill] sm:$0xff] %v19024_v26  ;;  %7235 = vst.msk [vmem:[#allocation3 + $0x38] sm:$0xff] %vm636_vm4, %v7139_v62  ;;  %v7983_v46 = vadd.f32 %v18625_v15, %v7327_v58  ;;  %v6869_v21 = vpop.f32.mrb[168].mxu0  ;;  %v6486_v58 = vld [vmem:[#allocation3 + $0x50] sm:$0xff] }
 0x465   :  { %v7140_v10 = vadd.f32 %v6869_v21, %v6484_v39  ;;  %v6871_v22 = vpop.f32.mrb[169].mxu0  ;;  %v8568_v35 = vmax.f32 %v8472_v50, %v8476_v9  ;;  %8082 = vst [vmem:[#allocation3 + $0x30] sm:$0xff] %v7986_v33  ;;  %v8370_v45 = vmax.f32 %v8178_v18, %v7986_v33 }
 0x466   :  { %8079 = vst.msk [vmem:[#allocation3 + $0x18] sm:$0xff] %vm636_vm4, %v7983_v46  ;;  %v7141_v43 = vadd.f32 %v6871_v22, %v6485_v25  ;;  %v19029_v44 = vpop.f32.mrb[166].mxu1  ;;  %v6487_v46 = vld [vmem:[#allocation3 + $0x58] sm:$0xff] }
 0x467   :  { %v7329_v13 = vld [vmem:[#allocation3 + $0x28] sm:$0xff]  ;;  %v8478_v53 = vadd.f32 %v19011_v55, %v8370_v45  ;;  %v7988_v15 = vadd.f32 %v18661_v0, %v7140_v10  ;;  %v19034_v62 = vpop.f32.mrb[167].mxu1  ;;  %v19041_v25 = vmax.f32 %v8568_v35, 0.0 }
 0x468   :  { %20012 = vst [vmem:[#allocation62_spill] sm:$0xff] %v19034_v62  ;;  %7237 = vst.msk [vmem:[#allocation3 + $0x48] sm:$0xff] %vm636_vm4, %v7141_v43  ;;  %v7985_v50 = vadd.f32 %v18638_v49, %v7329_v13  ;;  %v6875_v9 = vpop.f32.mrb[170].mxu0  ;;  %v6488_v43 = vld [vmem:[#allocation3 + $0x60] sm:$0xff]  ;;  %v6489_v35 = vld [vmem:[#allocation3 + $0x68] sm:$0xff] }
 0x469   :  { %v7142_v33 = vadd.f32 %v6875_v9, %v6486_v58  ;;  %v6877_v39 = vpop.f32.mrb[171].mxu0  ;;  %v8570_v21 = vmax.f32 %v8474_v30, %v8478_v53  ;;  %8084 = vst [vmem:[#allocation3 + $0x40] sm:$0xff] %v7988_v15  ;;  %v19056_v58 = vsub.s32 1, %v18984_v36  ;;  %v8180_v9 = vld [vmem:[#allocation2 + $0x40] sm:$0xff]  ;;  %v6491_v62 = vld [vmem:[#allocation3 + $0x78] sm:$0xff] }
 0x46a   :  { %8081 = vst.msk [vmem:[#allocation3 + $0x28] sm:$0xff] %vm636_vm4, %v7985_v50  ;;  %v7143_v16 = vadd.f32 %v6877_v39, %v6487_v46  ;;  %v19039_v18 = vpop.f32.mrb[168].mxu1  ;;  %v8269_v46 = vld [vmem:[#allocation3 + $0x8] sm:$0xff]  ;;  %v8372_v39 = vmax.f32 %v8180_v9, %v7988_v15 }
 0x46b   :  { %v19043_v0 = vmax.f32 %v8570_v21, 0.0  ;;  %v7331_v10 = vld [vmem:[#allocation3 + $0x38] sm:$0xff]  ;;  %v19046_v22 = vadd.f32 %v18674_v17, %v7142_v33  ;;  %v19048_v49 = vpop.f32.mrb[169].mxu1  ;;  %20014 = vst [vmem:[#allocation61_spill] sm:$0xff] %v19056_v58 }
 0x46c   :  { %20013 = vst [vmem:[#allocation59_spill] sm:$0xff] %v19048_v49  ;;  %7239 = vst.msk [vmem:[#allocation3 + $0x58] sm:$0xff] %vm636_vm4, %v7143_v16  ;;  %v7987_v45 = vadd.f32 %v18651_v38, %v7331_v10  ;;  %v6881_v30 = vpop.f32.mrb[172].mxu0  ;;  %v8173_v38 = vld [vmem:[#allocation2 + $0x8] sm:$0xff]  ;;  %v8480_v26 = vadd.f32 %v19011_v55, %v8372_v39  ;;  %v8179_v39 = vld [vmem:[#allocation2 + $0x38] sm:$0xff] }
 0x46d   :  { %v7144_v53 = vadd.f32 %v6881_v30, %v6488_v43  ;;  %v6883_v50 = vpop.f32.mrb[173].mxu0  ;;  %8086 = vst [vmem:[#allocation3 + $0x50] sm:$0xff] %v19046_v22  ;;  %v8177_v43 = vld [vmem:[#allocation2 + $0x28] sm:$0xff]  ;;  %v6490_v30 = vld [vmem:[#allocation3 + $0x70] sm:$0xff]  ;;  %v8365_v9 = vmax.f32 %v8173_v38, %v8269_v46 }
 0x46e   :  { %8083 = vst.msk [vmem:[#allocation3 + $0x38] sm:$0xff] %vm636_vm4, %v7987_v45  ;;  %v7145_v17 = vadd.f32 %v6883_v50, %v6489_v35  ;;  %v19059_v33 = vpop.f32.mrb[170].mxu1  ;;  %v8184_v45 = vld [vmem:[#allocation2 + $0x60] sm:$0xff]  ;;  %v8271_v35 = vld [vmem:[#allocation3 + $0x18] sm:$0xff] }
 0x46f   :  { %20015 = vst [vmem:[#allocation63_spill] sm:$0xff] %v19059_v33  ;;  %v7333_v21 = vld [vmem:[#allocation3 + $0x48] sm:$0xff]  ;;  %v7992_v16 = vadd.f32 %v18687_v23, %v7144_v53  ;;  %v19062_v10 = vpop.f32.mrb[171].mxu1  ;;  %v19068_v23 = vrot.slane %v19004_v4, %v19056_v58 }
 0x470   :  { %20016 = vst [vmem:[#allocation64_spill] sm:$0xff] %v19062_v10  ;;  %7241 = vst.msk [vmem:[#allocation3 + $0x68] sm:$0xff] %vm636_vm4, %v7145_v17  ;;  %v7989_v36 = vadd.f32 %v18664_v47, %v7333_v21  ;;  %v6887_v13 = vpop.f32.mrb[174].mxu0  ;;  %v8182_v47 = vld [vmem:[#allocation2 + $0x50] sm:$0xff]  ;;  %v8175_v10 = vld [vmem:[#allocation2 + $0x18] sm:$0xff] }
 0x471   :  { %v8273_v50 = vld [vmem:[#allocation3 + $0x28] sm:$0xff]  ;;  %v7146_v49 = vadd.f32 %v6887_v13, %v6490_v30  ;;  %v6889_v33 = vpop.f32.mrb[175].mxu0  ;;  %8088 = vst [vmem:[#allocation3 + $0x60] sm:$0xff] %v7992_v16  ;;  %v8376_v15 = vmax.f32 %v8184_v45, %v7992_v16  ;;  %v8374_v13 = vmax.f32 %v8182_v47, %v19046_v22  ;;  %v8367_v4 = vmax.f32 %v8175_v10, %v8271_v35  ;;  %v8186_v45 = vld [vmem:[#allocation2 + $0x70] sm:$0xff] }
 0x472   :  { %v8369_v53 = vmax.f32 %v8177_v43, %v8273_v50  ;;  %8085 = vst.msk [vmem:[#allocation3 + $0x48] sm:$0xff] %vm636_vm4, %v7989_v36  ;;  %v7147_v17 = vadd.f32 %v6889_v33, %v6491_v62  ;;  %v19071_v21 = vpop.f32.mrb[172].mxu1  ;;  %v6492_v33 = vld [vmem:[#allocation3 + $0x80] sm:$0xff]  ;;  %v6493_v47 = vld [vmem:[#allocation3 + $0x88] sm:$0xff] }
 0x473   :  { %20017 = vst [vmem:[#allocation65_spill] sm:$0xff] %v19071_v21  ;;  %v7335_v30 = vld [vmem:[#allocation3 + $0x58] sm:$0xff]  ;;  %v8484_v16 = vadd.f32 %v19011_v55, %v8376_v15  ;;  %v7994_v38 = vadd.f32 %v18700_v6, %v7146_v49  ;;  %v19077_v46 = vpop.f32.mrb[173].mxu1  ;;  %v8473_v49 = vadd.f32 %v19068_v23, %v8365_v9 }
 0x474   :  { %20018 = vst [vmem:[#allocation15_spill] sm:$0xff] %v19077_v46  ;;  %v8477_v43 = vadd.f32 %v19068_v23, %v8369_v53  ;;  %7243 = vst.msk [vmem:[#allocation3 + $0x78] sm:$0xff] %vm636_vm4, %v7147_v17  ;;  %v7991_v62 = vadd.f32 %v18677_v63, %v7335_v30  ;;  %v6893_v36 = vpop.f32.mrb[176].mxu0  ;;  %v8482_v63 = vadd.f32 %v19011_v55, %v8374_v13 }
 0x475   :  { %v8275_v50 = vld [vmem:[#allocation3 + $0x38] sm:$0xff]  ;;  %v7148_v22 = vadd.f32 %v6893_v36, %v6492_v33  ;;  %v6895_v58 = vpop.f32.mrb[177].mxu0  ;;  %v8572_v15 = vmax.f32 %v8480_v26, %v8484_v16  ;;  %8090 = vst [vmem:[#allocation3 + $0x70] sm:$0xff] %v7994_v38  ;;  %v8378_v6 = vmax.f32 %v8186_v45, %v7994_v38  ;;  %v8475_v26 = vadd.f32 %v19068_v23, %v8367_v4  ;;  %v6494_v38 = vld [vmem:[#allocation3 + $0x90] sm:$0xff] }
 0x476   :  { %v8371_v10 = vmax.f32 %v8179_v39, %v8275_v50  ;;  %8087 = vst.msk [vmem:[#allocation3 + $0x58] sm:$0xff] %vm636_vm4, %v7991_v62  ;;  %v7149_v35 = vadd.f32 %v6895_v58, %v6493_v47  ;;  %v19084_v53 = vpop.f32.mrb[174].mxu1  ;;  %v20021_v16 = vld [vmem:[#allocation26_spill] sm:$0xff]  ;;  %v8569_v45 = vmax.f32 %v8473_v49, %v8477_v43 }
 0x477   :  { %20019 = vst [vmem:[#allocation35_spill] sm:$0xff] %v19084_v53  ;;  %v7337_v17 = vld [vmem:[#allocation3 + $0x68] sm:$0xff]  ;;  %v8486_v30 = vadd.f32 %v19011_v55, %v8378_v6  ;;  %v19089_v33 = vadd.f32 %v18713_v5, %v7148_v22  ;;  %v19091_v36 = vpop.f32.mrb[175].mxu1  ;;  %v6495_v39 = vld [vmem:[#allocation3 + $0x98] sm:$0xff]  ;;  %v8620_v6 = vmax.f32 %v8572_v15, 0.0 }
 0x478   :  { %20020 = vst [vmem:[#allocation18_spill] sm:$0xff] %v19091_v36  ;;  %v8479_v9 = vadd.f32 %v19068_v23, %v8371_v10  ;;  %7245 = vst.msk [vmem:[#allocation3 + $0x88] sm:$0xff] %vm636_vm4, %v7149_v35  ;;  %v7993_v58 = vadd.f32 %v20021_v16, %v7337_v17  ;;  %v6899_v62 = vpop.f32.mrb[178].mxu0  ;;  %v20023_v36 = vld [vmem:[#allocation31_spill] sm:$0xff]  ;;  %v20025_v43 = vld [vmem:[#allocation30_spill] sm:$0xff] }
 0x479   :  { %v7150_v13 = vadd.f32 %v6899_v62, %v6494_v38  ;;  %v6901_v50 = vpop.f32.mrb[179].mxu0  ;;  %v8574_v47 = vmax.f32 %v8482_v63, %v8486_v30  ;;  %8092 = vst [vmem:[#allocation3 + $0x80] sm:$0xff] %v19089_v33  ;;  %v6496_v63 = vld [vmem:[#allocation3 + $0xa0] sm:$0xff]  ;;  %v8617_v38 = vmax.f32 %v8569_v45, 0.0 }
 0x47a   :  { %8089 = vst.msk [vmem:[#allocation3 + $0x68] sm:$0xff] %vm636_vm4, %v7993_v58  ;;  %v7151_v5 = vadd.f32 %v6901_v50, %v6495_v39  ;;  %v8571_v22 = vmax.f32 %v8475_v26, %v8479_v9  ;;  %v19099_v4 = vpop.f32.mrb[176].mxu1  ;;  %v6497_v9 = vld [vmem:[#allocation3 + $0xa8] sm:$0xff] }
 0x47b   :  { %20022 = vst [vmem:[#allocation16_spill] sm:$0xff] %v19099_v4  ;;  %v8622_v10 = vmax.f32 %v8574_v47, 0.0  ;;  %v7339_v35 = vld [vmem:[#allocation3 + $0x78] sm:$0xff]  ;;  %v19102_v17 = vadd.f32 %v20023_v36, %v7150_v13  ;;  %v19104_v16 = vpop.f32.mrb[177].mxu1  ;;  %v8188_v13 = vld [vmem:[#allocation2 + $0x80] sm:$0xff]  ;;  %v8181_v47 = vld [vmem:[#allocation2 + $0x48] sm:$0xff] }
 0x47c   :  { %20024 = vst [vmem:[#allocation17_spill] sm:$0xff] %v19104_v16  ;;  %7247 = vst.msk [vmem:[#allocation3 + $0x98] sm:$0xff] %vm636_vm4, %v7151_v5  ;;  %v7995_v49 = vadd.f32 %v20025_v43, %v7339_v35  ;;  %v6905_v30 = vpop.f32.mrb[180].mxu0  ;;  %v8619_v58 = vmax.f32 %v8571_v22, 0.0  ;;  %v8277_v5 = vld [vmem:[#allocation3 + $0x48] sm:$0xff]  ;;  %v8380_v45 = vmax.f32 %v8188_v13, %v19089_v33 }
 0x47d   :  { %v19108_v62 = vpack.c.bf16 %v8622_v10, %v8620_v6  ;;  %v7152_v26 = vadd.f32 %v6905_v30, %v6496_v63  ;;  %v6907_v15 = vpop.f32.mrb[181].mxu0  ;;  %8094 = vst [vmem:[#allocation3 + $0x90] sm:$0xff] %v19102_v17  ;;  %v20027_v6 = vld [vmem:[#allocation32_spill] sm:$0xff]  ;;  %v6498_v30 = vld [vmem:[#allocation3 + $0xb0] sm:$0xff] }
 0x47e   :  { %8091 = vst.msk [vmem:[#allocation3 + $0x78] sm:$0xff] %vm636_vm4, %v7995_v49  ;;  %v7153_v36 = vadd.f32 %v6907_v15, %v6497_v9  ;;  %v8665_v39 = vpack.c.bf16 %v8619_v58, %v8617_v38  ;;  %v19112_v50 = vpop.f32.mrb[178].mxu1  ;;  %v8185_v43 = vld [vmem:[#allocation2 + $0x68] sm:$0xff]  ;;  %v20029_v49 = vld [vmem:[#allocation33_spill] sm:$0xff]  ;;  %v8192_v58 = vld [vmem:[#allocation2 + $0xa0] sm:$0xff] }
 0x47f   :  { %20026 = vst [vmem:[#allocation38_spill] sm:$0xff] %v19112_v50  ;;  %8690 = vst [vmem:[#allocation4 + $0x10] sm:$0xff] %v19108_v62  ;;  %v7341_v22 = vld [vmem:[#allocation3 + $0x88] sm:$0xff]  ;;  %v8000_v10 = vadd.f32 %v20027_v6, %v7152_v26  ;;  %v19117_v35 = vpop.f32.mrb[179].mxu1  ;;  %v8279_v9 = vld [vmem:[#allocation3 + $0x58] sm:$0xff]  ;;  %v8373_v26 = vmax.f32 %v8181_v47, %v8277_v5 }
 0x480   :  { %20028 = vst [vmem:[#allocation22_spill] sm:$0xff] %v19117_v35  ;;  %7249 = vst.msk [vmem:[#allocation3 + $0xa8] sm:$0xff] %vm636_vm4, %v7153_v36  ;;  %v7997_v63 = vadd.f32 %v20029_v49, %v7341_v22  ;;  %v6911_v38 = vpop.f32.mrb[182].mxu0  ;;  %v6499_v50 = vld [vmem:[#allocation3 + $0xb8] sm:$0xff]  ;;  %v8190_v36 = vld [vmem:[#allocation2 + $0x90] sm:$0xff]  ;;  %v8488_v49 = vadd.f32 %v19011_v55, %v8380_v45 }
 0x481   :  { %8689 = vst.msk [vmem:[#allocation4 + $0x8] sm:$0xff] %vm636_vm4, %v8665_v39  ;;  %v8281_v15 = vld [vmem:[#allocation3 + $0x68] sm:$0xff]  ;;  %v7154_v16 = vadd.f32 %v6911_v38, %v6498_v30  ;;  %v6913_v33 = vpop.f32.mrb[183].mxu0  ;;  %8096 = vst [vmem:[#allocation3 + $0xa0] sm:$0xff] %v8000_v10  ;;  %v8384_v13 = vmax.f32 %v8192_v58, %v8000_v10  ;;  %v8183_v22 = vld [vmem:[#allocation2 + $0x58] sm:$0xff]  ;;  %v8382_v39 = vmax.f32 %v8190_v36, %v19102_v17 }
 0x482   :  { %v8377_v6 = vmax.f32 %v8185_v43, %v8281_v15  ;;  %8093 = vst.msk [vmem:[#allocation3 + $0x88] sm:$0xff] %vm636_vm4, %v7997_v63  ;;  %v7155_v35 = vadd.f32 %v6913_v33, %v6499_v50  ;;  %v19123_v46 = vpop.f32.mrb[180].mxu1  ;;  %v20031_v38 = vld [vmem:[#allocation34_spill] sm:$0xff]  ;;  %v8375_v47 = vmax.f32 %v8183_v22, %v8279_v9  ;;  %v20033_v50 = vld [vmem:[#allocation36_spill] sm:$0xff]  ;;  %v6500_v43 = vld [vmem:[#allocation3 + $0xc0] sm:$0xff] }
 0x483   :  { %20030 = vst [vmem:[#allocation20_spill] sm:$0xff] %v19123_v46  ;;  %v7343_v4 = vld [vmem:[#allocation3 + $0x98] sm:$0xff]  ;;  %v8492_v30 = vadd.f32 %v19011_v55, %v8384_v13  ;;  %v8002_v53 = vadd.f32 %v20031_v38, %v7154_v16  ;;  %v19129_v21 = vpop.f32.mrb[181].mxu1  ;;  %v8194_v58 = vld [vmem:[#allocation2 + $0xb0] sm:$0xff]  ;;  %v6501_v33 = vld [vmem:[#allocation3 + $0xc8] sm:$0xff]  ;;  %v8481_v38 = vadd.f32 %v19068_v23, %v8373_v26 }
 0x484   :  { %20032 = vst [vmem:[#allocation44_spill] sm:$0xff] %v19129_v21  ;;  %v8485_v5 = vadd.f32 %v19068_v23, %v8377_v6  ;;  %7251 = vst.msk [vmem:[#allocation3 + $0xb8] sm:$0xff] %vm636_vm4, %v7155_v35  ;;  %v7999_v10 = vadd.f32 %v20033_v50, %v7343_v4  ;;  %v6917_v63 = vpop.f32.mrb[184].mxu0  ;;  %v8187_v45 = vld [vmem:[#allocation2 + $0x78] sm:$0xff]  ;;  %v14240_v35 = vld [vmem:[#allocation10 + $0xc0] ss:$8 sps:$4 sm:$0xff]   ;;  %v8490_v4 = vadd.f32 %v19011_v55, %v8382_v39 }
 0x485   :  { %v8283_v15 = vld [vmem:[#allocation3 + $0x78] sm:$0xff]  ;;  %v7156_v17 = vadd.f32 %v6917_v63, %v6500_v43  ;;  %v6919_v36 = vpop.f32.mrb[185].mxu0  ;;  %v8576_v13 = vmax.f32 %v8488_v49, %v8492_v30  ;;  %8098 = vst [vmem:[#allocation3 + $0xb0] sm:$0xff] %v8002_v53  ;;  %v8386_v16 = vmax.f32 %v8194_v58, %v8002_v53  ;;  %v20034_v63 = vld [vmem:[#allocation37_spill] sm:$0xff]  ;;  %v8483_v26 = vadd.f32 %v19068_v23, %v8375_v47 }
 0x486   :  { %v8379_v9 = vmax.f32 %v8187_v45, %v8283_v15  ;;  %8095 = vst.msk [vmem:[#allocation3 + $0x98] sm:$0xff] %vm636_vm4, %v7999_v10  ;;  %v7157_v6 = vadd.f32 %v6919_v36, %v6501_v33  ;;  %v19136_v22 = vpop.f32.mrb[182].mxu1  ;;  %v14245_v49 = vld [vmem:[#allocation10 + $0xd4] ss:$8 sps:$4 sm:$0xff]   ;;  %v20036_v10 = vld [vmem:[#allocation39_spill] sm:$0xff]  ;;  %v8573_v15 = vmax.f32 %v8481_v38, %v8485_v5 }
 0x487   :  { %v7345_v50 = vld [vmem:[#allocation3 + $0xa8] sm:$0xff]  ;;  %v8494_v43 = vadd.f32 %v19011_v55, %v8386_v16  ;;  %v19141_v46 = vadd.f32 %v20034_v63, %v7156_v17  ;;  %v19143_v53 = vpop.f32.mrb[183].mxu1  ;;  %v6502_v45 = vld [vmem:[#allocation3 + $0xd0] sm:$0xff]  ;;  %v6503_v36 = vld [vmem:[#allocation3 + $0xd8] sm:$0xff]  ;;  %v20037_v16 = vpack.c.bf16 %v19043_v0, %v19041_v25 }
 0x488   :  { %v8713_v21 = vld [vmem:[#allocation4 + $0x8] sm:$0xff]  ;;  %20035 = vst [vmem:[#allocation41_spill] sm:$0xff] %v19143_v53  ;;  %v8487_v30 = vadd.f32 %v19068_v23, %v8379_v9  ;;  %7253 = vst.msk [vmem:[#allocation3 + $0xc8] sm:$0xff] %vm636_vm4, %v7157_v6  ;;  %v8001_v58 = vadd.f32 %v20036_v10, %v7345_v50  ;;  %v6923_v39 = vpop.f32.mrb[186].mxu0  ;;  %v14243_v6 = vld [vmem:[#allocation10 + $0xd0] ss:$8 sps:$4 sm:$0xff]  }
 0x489   :  { %13504 = vmatprep.mubr.msk.bf16.mxu0 %vm636_vm4, %v8713_v21  ;;  %v7158_v33 = vadd.f32 %v6923_v39, %v6502_v45  ;;  %v6925_v17 = vpop.f32.mrb[187].mxu0  ;;  %v8578_v63 = vmax.f32 %v8490_v4, %v8494_v43  ;;  %8100 = vst [vmem:[#allocation3 + $0xc0] sm:$0xff] %v19141_v46  ;;  %v8624_v21 = vmax.f32 %v8576_v13, 0.0  ;;  %v14248_v25 = vld [vmem:[#allocation10 + $0xe4] ss:$8 sps:$4 sm:$0xff]   ;;  %v20039_v4 = vld [vmem:[#allocation42_spill] sm:$0xff] }
 0x48a   :  { %8929 = vmatmul.mubr.bf16.vlgmr.msra.gmra.mrb[0].mxu0 %v20037_v16  ;;  %8097 = vst.msk [vmem:[#allocation3 + $0xa8] sm:$0xff] %vm636_vm4, %v8001_v58  ;;  %v7159_v47 = vadd.f32 %v6925_v17, %v6503_v36  ;;  %v8575_v9 = vmax.f32 %v8483_v26, %v8487_v30  ;;  %v19155_v50 = vpop.f32.mrb[184].mxu1  ;;  %v6504_v58 = vld [vmem:[#allocation3 + $0xe0] sm:$0xff]  ;;  %v6505_v39 = vld [vmem:[#allocation3 + $0xe8] sm:$0xff] }
 0x48b   :  { %9259 = vmatpush1.bf16.msra.mxu0 %v14240_v35  ;;  %v8626_v5 = vmax.f32 %v8578_v63, 0.0  ;;  %v7347_v38 = vld [vmem:[#allocation3 + $0xb8] sm:$0xff]  ;;  %v19158_v10 = vadd.f32 %v18778_v8, %v7158_v33  ;;  %v19160_v0 = vpop.f32.mrb[185].mxu1  ;;  %v8621_v35 = vmax.f32 %v8573_v15, 0.0  ;;  %v14246_v17 = vld [vmem:[#allocation10 + $0xe0] ss:$8 sps:$4 sm:$0xff]  }
 0x48c   :  { %9260 = vmatprep.subr.bf16.mxu0 %v14245_v49  ;;  %20038 = vst [vmem:[#allocation21_spill] sm:$0xff] %v19160_v0  ;;  %7255 = vst.msk [vmem:[#allocation3 + $0xd8] sm:$0xff] %vm636_vm4, %v7159_v47  ;;  %v8003_v43 = vadd.f32 %v20039_v4, %v7347_v38  ;;  %v6929_v26 = vpop.f32.mrb[188].mxu0  ;;  %v8623_v30 = vmax.f32 %v8575_v9, 0.0  ;;  %v8196_v49 = vld [vmem:[#allocation2 + $0xc0] sm:$0xff]  ;;  %v8189_v63 = vld [vmem:[#allocation2 + $0x88] sm:$0xff] }
 0x48d   :  { %v19164_v45 = vpack.c.bf16 %v8626_v5, %v8624_v21  ;;  %v7160_v13 = vadd.f32 %v6929_v26, %v6504_v58  ;;  %v6931_v36 = vpop.f32.mrb[189].mxu0  ;;  %8102 = vst [vmem:[#allocation3 + $0xd0] sm:$0xff] %v19158_v10  ;;  %v8285_v47 = vld [vmem:[#allocation3 + $0x88] sm:$0xff]  ;;  %v8388_v15 = vmax.f32 %v8196_v49, %v19141_v46  ;;  %v14251_v5 = vld [vmem:[#allocation10 + $0xf4] ss:$8 sps:$4 sm:$0xff]  }
 0x48e   :  { %8099 = vst.msk [vmem:[#allocation3 + $0xb8] sm:$0xff] %vm636_vm4, %v8003_v43  ;;  %v7161_v8 = vadd.f32 %v6931_v36, %v6505_v39  ;;  %v8667_v33 = vpack.c.bf16 %v8623_v30, %v8621_v35  ;;  %v19168_v16 = vpop.f32.mrb[186].mxu1  ;;  %v8193_v4 = vld [vmem:[#allocation2 + $0xa8] sm:$0xff]  ;;  %v6506_v58 = vld [vmem:[#allocation3 + $0xf0] sm:$0xff]  ;;  %v8200_v35 = vld [vmem:[#allocation2 + $0xe0] sm:$0xff] }
 0x48f   :  { %9261 = vmatpush1.bf16.msra.mxu0 %v14243_v6  ;;  %8692 = vst [vmem:[#allocation4 + $0x20] sm:$0xff] %v19164_v45  ;;  %v7349_v9 = vld [vmem:[#allocation3 + $0xc8] sm:$0xff]  ;;  %v8008_v21 = vadd.f32 %v18791_v3, %v7160_v13  ;;  %v19173_v38 = vpop.f32.mrb[187].mxu1  ;;  %v20041_v6 = vld [vmem:[#allocation45_spill] sm:$0xff]  ;;  %v8287_v30 = vld [vmem:[#allocation3 + $0x98] sm:$0xff] }
 0x490   :  { %9262 = vmatprep.subr.bf16.mxu0 %v14248_v25  ;;  %20040 = vst [vmem:[#allocation19_spill] sm:$0xff] %v19173_v38  ;;  %7257 = vst.msk [vmem:[#allocation3 + $0xe8] sm:$0xff] %vm636_vm4, %v7161_v8  ;;  %v8005_v43 = vadd.f32 %v20041_v6, %v7349_v9  ;;  %v6935_v26 = vpop.f32.mrb[190].mxu0  ;;  %v6507_v36 = vld [vmem:[#allocation3 + $0xf8] sm:$0xff]  ;;  %v8381_v25 = vmax.f32 %v8189_v63, %v8285_v47  ;;  %v8198_v8 = vld [vmem:[#allocation2 + $0xd0] sm:$0xff] }
 0x491   :  { %8691 = vst.msk [vmem:[#allocation4 + $0x18] sm:$0xff] %vm636_vm4, %v8667_v33  ;;  %v8289_v39 = vld [vmem:[#allocation3 + $0xa8] sm:$0xff]  ;;  %v7162_v46 = vadd.f32 %v6935_v26, %v6506_v58  ;;  %v6937_v49 = vpop.f32.mrb[191].mxu0  ;;  %8104 = vst [vmem:[#allocation3 + $0xe0] sm:$0xff] %v8008_v21  ;;  %v8392_v3 = vmax.f32 %v8200_v35, %v8008_v21  ;;  %v14249_v9 = vld [vmem:[#allocation10 + $0xf0] ss:$8 sps:$4 sm:$0xff]   ;;  %v8496_v33 = vadd.f32 %v19011_v55, %v8388_v15 }
 0x492   :  { %v8385_v13 = vmax.f32 %v8193_v4, %v8289_v39  ;;  %8101 = vst.msk [vmem:[#allocation3 + $0xc8] sm:$0xff] %vm636_vm4, %v8005_v43  ;;  %v7163_v38 = vadd.f32 %v6937_v49, %v6507_v36  ;;  %v19179_v6 = vpop.f32.mrb[188].mxu1  ;;  %v8191_v0 = vld [vmem:[#allocation2 + $0x98] sm:$0xff]  ;;  %v8390_v53 = vmax.f32 %v8198_v8, %v19158_v10  ;;  %v14254_v63 = vld [vmem:[#allocation10 + $0x104] ss:$8 sps:$4 sm:$0xff]   ;;  %v8202_v36 = vld [vmem:[#allocation2 + $0xf0] sm:$0xff] }
 0x493   :  { %9263 = vmatpush1.bf16.msra.mxu0 %v14246_v17  ;;  %20042 = vst [vmem:[#allocation24_spill] sm:$0xff] %v19179_v6  ;;  %v7351_v58 = vld [vmem:[#allocation3 + $0xd8] sm:$0xff]  ;;  %v8500_v26 = vadd.f32 %v19011_v55, %v8392_v3  ;;  %v8010_v21 = vadd.f32 %v18804_v51, %v7162_v46  ;;  %v19185_v47 = vpop.f32.mrb[189].mxu1  ;;  %v8383_v4 = vmax.f32 %v8191_v0, %v8287_v30  ;;  %v20044_v43 = vld [vmem:[#allocation40_spill] sm:$0xff]  ;;  %v6508_v39 = vld [vmem:[#allocation3 + $0x100] sm:$0xff] }
 0x494   :  { %9264 = vmatprep.subr.bf16.mxu0 %v14251_v5  ;;  %20043 = vst [vmem:[#allocation23_spill] sm:$0xff] %v19185_v47  ;;  %v8493_v17 = vadd.f32 %v19068_v23, %v8385_v13  ;;  %7259 = vst.msk [vmem:[#allocation3 + $0xf8] sm:$0xff] %vm636_vm4, %v7163_v38  ;;  %v8007_v35 = vadd.f32 %v20044_v43, %v7351_v58  ;;  %v6941_v15 = vpop.f32.mrb[192].mxu0  ;;  %v8195_v10 = vld [vmem:[#allocation2 + $0xb8] sm:$0xff]  ;;  %v6509_v3 = vld [vmem:[#allocation3 + $0x108] sm:$0xff]  ;;  %v8489_v46 = vadd.f32 %v19068_v23, %v8381_v25 }
 0x495   :  { %v8291_v49 = vld [vmem:[#allocation3 + $0xb8] sm:$0xff]  ;;  %v7164_v8 = vadd.f32 %v6941_v15, %v6508_v39  ;;  %v6943_v6 = vpop.f32.mrb[193].mxu0  ;;  %v8580_v51 = vmax.f32 %v8496_v33, %v8500_v26  ;;  %8106 = vst [vmem:[#allocation3 + $0xf0] sm:$0xff] %v8010_v21  ;;  %v8394_v5 = vmax.f32 %v8202_v36, %v8010_v21  ;;  %v14252_v38 = vld [vmem:[#allocation10 + $0x100] ss:$8 sps:$4 sm:$0xff]   ;;  %v8498_v58 = vadd.f32 %v19011_v55, %v8390_v53 }
 0x496   :  { %v8387_v0 = vmax.f32 %v8195_v10, %v8291_v49  ;;  %8103 = vst.msk [vmem:[#allocation3 + $0xd8] sm:$0xff] %vm636_vm4, %v8007_v35  ;;  %v7165_v30 = vadd.f32 %v6943_v6, %v6509_v3  ;;  %v19192_v13 = vpop.f32.mrb[190].mxu1  ;;  %v14257_v26 = vld [vmem:[#allocation10 + $0x114] ss:$8 sps:$4 sm:$0xff]   ;;  %v8491_v25 = vadd.f32 %v19068_v23, %v8383_v4  ;;  %v8577_v53 = vmax.f32 %v8489_v46, %v8493_v17  ;;  %v14260_v17 = vld [vmem:[#allocation10 + $0x124] ss:$8 sps:$4 sm:$0xff]  }
 0x497   :  { %9265 = vmatpush1.bf16.msra.mxu0 %v14249_v9  ;;  %v7353_v43 = vld [vmem:[#allocation3 + $0xe8] sm:$0xff]  ;;  %v8502_v39 = vadd.f32 %v19011_v55, %v8394_v5  ;;  %v19197_v33 = vadd.f32 %v18817_v54, %v7164_v8  ;;  %v6510_v35 = vld [vmem:[#allocation3 + $0x110] sm:$0xff]  ;;  %v6511_v10 = vld [vmem:[#allocation3 + $0x118] sm:$0xff]  ;;  %v8628_v3 = vmax.f32 %v8580_v51, 0.0 }
 0x498   :  { %v8715_v47 = vld [vmem:[#allocation4 + $0x18] sm:$0xff]  ;;  %9266 = vmatprep.subr.bf16.mxu0 %v14254_v63  ;;  %v8495_v21 = vadd.f32 %v19068_v23, %v8387_v0  ;;  %7261 = vst.msk [vmem:[#allocation3 + $0x108] sm:$0xff] %vm636_vm4, %v7165_v30  ;;  %v20045_v9 = vld [vmem:[#allocation48_spill] sm:$0xff]  ;;  %v6947_v15 = vpop.f32.mrb[194].mxu0  ;;  %v6512_v30 = vld [vmem:[#allocation3 + $0x120] sm:$0xff] }
 0x499   :  { %v8009_v6 = vadd.f32 %v20045_v9, %v7353_v43  ;;  %13505 = vmatprep.mubr.msk.bf16.mxu0 %vm636_vm4, %v8715_v47  ;;  %v7166_v36 = vadd.f32 %v6947_v15, %v6510_v35  ;;  %v6949_v49 = vpop.f32.mrb[195].mxu0  ;;  %v8582_v54 = vmax.f32 %v8498_v58, %v8502_v39  ;;  %8108 = vst [vmem:[#allocation3 + $0x100] sm:$0xff] %v19197_v33  ;;  %v14255_v8 = vld [vmem:[#allocation10 + $0x110] ss:$8 sps:$4 sm:$0xff]   ;;  %v8625_v43 = vmax.f32 %v8577_v53, 0.0  ;;  %v8197_v15 = vld [vmem:[#allocation2 + $0xc8] sm:$0xff] }
 0x49a   :  { %8939 = vmatmul.mubr.bf16.gmra.mrb[4].mxu0 %v19108_v62  ;;  %v7167_v63 = vadd.f32 %v6949_v49, %v6511_v10  ;;  %v8579_v4 = vmax.f32 %v8491_v25, %v8495_v21  ;;  %v20046_v62 = vld [vmem:[#allocation43_spill] sm:$0xff]  ;;  %v6513_v25 = vld [vmem:[#allocation3 + $0x128] sm:$0xff]  ;;  %v19215_v21 = vpop.f32.mrb[191].mxu1 }
 0x49b   :  { %8105 = vst.msk [vmem:[#allocation3 + $0xe8] sm:$0xff] %vm636_vm4, %v8009_v6  ;;  %9267 = vmatpush1.bf16.msra.mxu0 %v14252_v38  ;;  %v8630_v5 = vmax.f32 %v8582_v54, 0.0  ;;  %v7355_v0 = vld [vmem:[#allocation3 + $0xf8] sm:$0xff]  ;;  %v19208_v47 = vadd.f32 %v18830_v11, %v7166_v36  ;;  %v14258_v35 = vld [vmem:[#allocation10 + $0x120] ss:$8 sps:$4 sm:$0xff]  }
 0x49c   :  { %9268 = vmatprep.subr.bf16.mxu0 %v14257_v26  ;;  %7263 = vst.msk [vmem:[#allocation3 + $0x118] sm:$0xff] %vm636_vm4, %v7167_v63  ;;  %v8011_v46 = vadd.f32 %v20046_v62, %v7355_v0  ;;  %v6953_v58 = vpop.f32.mrb[196].mxu0  ;;  %v8627_v39 = vmax.f32 %v8579_v4, 0.0  ;;  %v8204_v26 = vld [vmem:[#allocation2 + $0x100] sm:$0xff]  ;;  %v8293_v36 = vld [vmem:[#allocation3 + $0xc8] sm:$0xff] }
 0x49d   :  { %v19212_v9 = vpack.c.bf16 %v8630_v5, %v8628_v3  ;;  %v7168_v38 = vadd.f32 %v6953_v58, %v6512_v30  ;;  %v6955_v51 = vpop.f32.mrb[197].mxu0  ;;  %8110 = vst [vmem:[#allocation3 + $0x110] sm:$0xff] %v19208_v47  ;;  %v8396_v53 = vmax.f32 %v8204_v26, %v19197_v33  ;;  %v14263_v54 = vld [vmem:[#allocation10 + $0x134] ss:$8 sps:$4 sm:$0xff]   ;;  %v8201_v63 = vld [vmem:[#allocation2 + $0xe8] sm:$0xff]  ;;  %v20047_v4 = vld [vmem:[#allocation51_spill] sm:$0xff] }
 0x49e   :  { %8107 = vst.msk [vmem:[#allocation3 + $0xf8] sm:$0xff] %vm636_vm4, %v8011_v46  ;;  %v7169_v11 = vadd.f32 %v6955_v51, %v6513_v25  ;;  %v8669_v6 = vpack.c.bf16 %v8627_v39, %v8625_v43  ;;  %v6514_v5 = vld [vmem:[#allocation3 + $0x130] sm:$0xff]  ;;  %v8295_v62 = vld [vmem:[#allocation3 + $0xd8] sm:$0xff] }
 0x49f   :  { %9269 = vmatpush1.bf16.msra.mxu0 %v14255_v8  ;;  %8694 = vst [vmem:[#allocation4 + $0x30] sm:$0xff] %v19212_v9  ;;  %v7357_v10 = vld [vmem:[#allocation3 + $0x108] sm:$0xff]  ;;  %v8016_v49 = vadd.f32 %v18843_v28, %v7168_v38  ;;  %v8208_v8 = vld [vmem:[#allocation2 + $0x120] sm:$0xff]  ;;  %v6515_v58 = vld [vmem:[#allocation3 + $0x138] sm:$0xff]  ;;  %v8389_v28 = vmax.f32 %v8197_v15, %v8293_v36 }
 0x4a0   :  { %9270 = vmatprep.subr.bf16.mxu0 %v14260_v17  ;;  %7265 = vst.msk [vmem:[#allocation3 + $0x128] sm:$0xff] %vm636_vm4, %v7169_v11  ;;  %v8013_v3 = vadd.f32 %v20047_v4, %v7357_v10  ;;  %v6959_v0 = vpop.f32.mrb[198].mxu0  ;;  %8693 = vst.msk [vmem:[#allocation4 + $0x28] sm:$0xff] %vm636_vm4, %v8669_v6  ;;  %v8206_v38 = vld [vmem:[#allocation2 + $0x110] sm:$0xff]  ;;  %v8199_v51 = vld [vmem:[#allocation2 + $0xd8] sm:$0xff]  ;;  %v8504_v11 = vadd.f32 %v19011_v55, %v8396_v53 }
 0x4a1   :  { %v7170_v30 = vadd.f32 %v6959_v0, %v6514_v5  ;;  %v6961_v33 = vpop.f32.mrb[199].mxu0  ;;  %8112 = vst [vmem:[#allocation3 + $0x120] sm:$0xff] %v8016_v49  ;;  %v8400_v43 = vmax.f32 %v8208_v8, %v8016_v49  ;;  %v14261_v25 = vld [vmem:[#allocation10 + $0x130] ss:$8 sps:$4 sm:$0xff]   ;;  %v8398_v26 = vmax.f32 %v8206_v38, %v19208_v47  ;;  %v14266_v49 = vld [vmem:[#allocation10 + $0x144] ss:$8 sps:$4 sm:$0xff]   ;;  %v8391_v15 = vmax.f32 %v8199_v51, %v8295_v62 }
 0x4a2   :  { %v8297_v46 = vld [vmem:[#allocation3 + $0xe8] sm:$0xff]  ;;  %8109 = vst.msk [vmem:[#allocation3 + $0x108] sm:$0xff] %vm636_vm4, %v8013_v3  ;;  %v7171_v39 = vadd.f32 %v6961_v33, %v6515_v58  ;;  %v6516_v3 = vld [vmem:[#allocation3 + $0x140] sm:$0xff]  ;;  %v8210_v0 = vld [vmem:[#allocation2 + $0x130] sm:$0xff] }
 0x4a3   :  { %v8393_v17 = vmax.f32 %v8201_v63, %v8297_v46  ;;  %9271 = vmatpush1.bf16.msra.mxu0 %v14258_v35  ;;  %v7359_v6 = vld [vmem:[#allocation3 + $0x118] sm:$0xff]  ;;  %v8508_v10 = vadd.f32 %v19011_v55, %v8400_v43  ;;  %v8018_v4 = vadd.f32 %v18856_v61, %v7170_v30  ;;  %v6517_v46 = vld [vmem:[#allocation3 + $0x148] sm:$0xff] }
 0x4a4   :  { %9272 = vmatprep.subr.bf16.mxu0 %v14263_v54  ;;  %7267 = vst.msk [vmem:[#allocation3 + $0x138] sm:$0xff] %vm636_vm4, %v7171_v39  ;;  %v20048_v63 = vld [vmem:[#allocation46_spill] sm:$0xff]  ;;  %v6965_v5 = vpop.f32.mrb[200].mxu0  ;;  %v8497_v54 = vadd.f32 %v19068_v23, %v8389_v28  ;;  %v14264_v43 = vld [vmem:[#allocation10 + $0x140] ss:$8 sps:$4 sm:$0xff]  }
 0x4a5   :  { %v8501_v36 = vadd.f32 %v19068_v23, %v8393_v17  ;;  %v8015_v35 = vadd.f32 %v20048_v63, %v7359_v6  ;;  %v8203_v53 = vld [vmem:[#allocation2 + $0xf8] sm:$0xff]  ;;  %v7172_v47 = vadd.f32 %v6965_v5, %v6516_v3  ;;  %v6967_v58 = vpop.f32.mrb[201].mxu0  ;;  %v8584_v33 = vmax.f32 %v8504_v11, %v8508_v10  ;;  %8114 = vst [vmem:[#allocation3 + $0x130] sm:$0xff] %v8018_v4 }
 0x4a6   :  { %v8299_v8 = vld [vmem:[#allocation3 + $0xf8] sm:$0xff]  ;;  %v8402_v61 = vmax.f32 %v8210_v0, %v8018_v4  ;;  %v7173_v30 = vadd.f32 %v6967_v58, %v6517_v46  ;;  %v8506_v17 = vadd.f32 %v19011_v55, %v8398_v26  ;;  %v8499_v10 = vadd.f32 %v19068_v23, %v8391_v15  ;;  %v6518_v4 = vld [vmem:[#allocation3 + $0x150] sm:$0xff]  ;;  %v6520_v46 = vld [vmem:[#allocation3 + $0x160] sm:$0xff] }
 0x4a7   :  { %v8395_v62 = vmax.f32 %v8203_v53, %v8299_v8  ;;  %8111 = vst.msk [vmem:[#allocation3 + $0x118] sm:$0xff] %vm636_vm4, %v8015_v35  ;;  %9273 = vmatpush1.bf16.msra.mxu0 %v14261_v25  ;;  %v7361_v39 = vld [vmem:[#allocation3 + $0x128] sm:$0xff]  ;;  %v19237_v6 = vadd.f32 %v18869_v14, %v7172_v47  ;;  %v14269_v11 = vld [vmem:[#allocation10 + $0x154] ss:$8 sps:$4 sm:$0xff]   ;;  %v8581_v26 = vmax.f32 %v8497_v54, %v8501_v36  ;;  %v14267_v0 = vld [vmem:[#allocation10 + $0x150] ss:$8 sps:$4 sm:$0xff]  }
 0x4a8   :  { %v8717_v38 = vld [vmem:[#allocation4 + $0x28] sm:$0xff]  ;;  %v8510_v51 = vadd.f32 %v19011_v55, %v8402_v61  ;;  %9274 = vmatprep.subr.bf16.mxu0 %v14266_v49  ;;  %7269 = vst.msk [vmem:[#allocation3 + $0x148] sm:$0xff] %vm636_vm4, %v7173_v30  ;;  %v8017_v25 = vadd.f32 %v18846_v48, %v7361_v39  ;;  %v6971_v63 = vpop.f32.mrb[202].mxu0  ;;  %v6519_v3 = vld [vmem:[#allocation3 + $0x158] sm:$0xff]  ;;  %v8632_v48 = vmax.f32 %v8584_v33, 0.0 }
 0x4a9   :  { %v8503_v28 = vadd.f32 %v19068_v23, %v8395_v62  ;;  %13506 = vmatprep.mubr.msk.bf16.mxu0 %vm636_vm4, %v8717_v38  ;;  %v7174_v35 = vadd.f32 %v6971_v63, %v6518_v4  ;;  %v6973_v5 = vpop.f32.mrb[203].mxu0  ;;  %8116 = vst [vmem:[#allocation3 + $0x140] sm:$0xff] %v19237_v6  ;;  %v14272_v36 = vld [vmem:[#allocation10 + $0x164] ss:$8 sps:$4 sm:$0xff]   ;;  %v8629_v61 = vmax.f32 %v8581_v26, 0.0  ;;  %v6522_v26 = vld [vmem:[#allocation3 + $0x170] sm:$0xff] }
 0x4aa   :  { %8949 = vmatmul.mubr.bf16.gmra.mrb[8].mxu0 %v19164_v45  ;;  %v8586_v14 = vmax.f32 %v8506_v17, %v8510_v51  ;;  %8113 = vst.msk [vmem:[#allocation3 + $0x128] sm:$0xff] %vm636_vm4, %v8017_v25  ;;  %v7175_v49 = vadd.f32 %v6973_v5, %v6519_v3  ;;  %v8212_v17 = vld [vmem:[#allocation2 + $0x140] sm:$0xff]  ;;  %v8205_v51 = vld [vmem:[#allocation2 + $0x108] sm:$0xff]  ;;  %v14275_v25 = vld [vmem:[#allocation10 + $0x174] ss:$8 sps:$4 sm:$0xff]  }
 0x4ab   :  { %v8583_v15 = vmax.f32 %v8499_v10, %v8503_v28  ;;  %9275 = vmatpush1.bf16.msra.mxu0 %v14264_v43  ;;  %v7363_v8 = vld [vmem:[#allocation3 + $0x138] sm:$0xff]  ;;  %v19248_v47 = vadd.f32 %v18882_v29, %v7174_v35  ;;  %v6521_v43 = vld [vmem:[#allocation3 + $0x168] sm:$0xff]  ;;  %v8216_v3 = vld [vmem:[#allocation2 + $0x160] sm:$0xff] }
 0x4ac   :  { %v8634_v53 = vmax.f32 %v8586_v14, 0.0  ;;  %9276 = vmatprep.subr.bf16.mxu0 %v14269_v11  ;;  %7271 = vst.msk [vmem:[#allocation3 + $0x158] sm:$0xff] %vm636_vm4, %v7175_v49  ;;  %v8019_v45 = vadd.f32 %v18859_v37, %v7363_v8  ;;  %v6977_v58 = vpop.f32.mrb[204].mxu0  ;;  %v14270_v38 = vld [vmem:[#allocation10 + $0x160] ss:$8 sps:$4 sm:$0xff]   ;;  %v8404_v11 = vmax.f32 %v8212_v17, %v19237_v6  ;;  %v8214_v8 = vld [vmem:[#allocation2 + $0x150] sm:$0xff] }
 0x4ad   :  { %v8631_v54 = vmax.f32 %v8583_v15, 0.0  ;;  %v7176_v30 = vadd.f32 %v6977_v58, %v6520_v46  ;;  %v6979_v33 = vpop.f32.mrb[205].mxu0  ;;  %8118 = vst [vmem:[#allocation3 + $0x150] sm:$0xff] %v19248_v47  ;;  %v8301_v37 = vld [vmem:[#allocation3 + $0x108] sm:$0xff]  ;;  %v6523_v15 = vld [vmem:[#allocation3 + $0x178] sm:$0xff]  ;;  %v8406_v46 = vmax.f32 %v8214_v8, %v19248_v47  ;;  %v6524_v17 = vld [vmem:[#allocation3 + $0x180] sm:$0xff] }
 0x4ae   :  { %v19252_v62 = vpack.c.bf16 %v8634_v53, %v8632_v48  ;;  %8115 = vst.msk [vmem:[#allocation3 + $0x138] sm:$0xff] %vm636_vm4, %v8019_v45  ;;  %v7177_v29 = vadd.f32 %v6979_v33, %v6521_v43  ;;  %v8209_v4 = vld [vmem:[#allocation2 + $0x128] sm:$0xff]  ;;  %v8303_v5 = vld [vmem:[#allocation3 + $0x118] sm:$0xff]  ;;  %v8512_v45 = vadd.f32 %v19011_v55, %v8404_v11 }
 0x4af   :  { %v8671_v39 = vpack.c.bf16 %v8631_v54, %v8629_v61  ;;  %9277 = vmatpush1.bf16.msra.mxu0 %v14267_v0  ;;  %v7365_v10 = vld [vmem:[#allocation3 + $0x148] sm:$0xff]  ;;  %v8024_v28 = vadd.f32 %v18895_v41, %v7176_v30  ;;  %v8397_v41 = vmax.f32 %v8205_v51, %v8301_v37  ;;  %v8211_v51 = vld [vmem:[#allocation2 + $0x138] sm:$0xff] }
 0x4b0   :  { %8696 = vst [vmem:[#allocation4 + $0x40] sm:$0xff] %v19252_v62  ;;  %9278 = vmatprep.subr.bf16.mxu0 %v14272_v36  ;;  %7273 = vst.msk [vmem:[#allocation3 + $0x168] sm:$0xff] %vm636_vm4, %v7177_v29  ;;  %v8021_v63 = vadd.f32 %v18872_v7, %v7365_v10  ;;  %v6983_v35 = vpop.f32.mrb[206].mxu0  ;;  %v14273_v7 = vld [vmem:[#allocation10 + $0x170] ss:$8 sps:$4 sm:$0xff]   ;;  %v6525_v11 = vld [vmem:[#allocation3 + $0x188] sm:$0xff] }
 0x4b1   :  { %8695 = vst.msk [vmem:[#allocation4 + $0x38] sm:$0xff] %vm636_vm4, %v8671_v39  ;;  %v8305_v14 = vld [vmem:[#allocation3 + $0x128] sm:$0xff]  ;;  %v7178_v49 = vadd.f32 %v6983_v35, %v6522_v26  ;;  %v6985_v6 = vpop.f32.mrb[207].mxu0  ;;  %8120 = vst [vmem:[#allocation3 + $0x160] sm:$0xff] %v8024_v28  ;;  %v8408_v0 = vmax.f32 %v8216_v3, %v8024_v28  ;;  %v8207_v36 = vld [vmem:[#allocation2 + $0x118] sm:$0xff] }
 0x4b2   :  { %v8401_v48 = vmax.f32 %v8209_v4, %v8305_v14  ;;  %8117 = vst.msk [vmem:[#allocation3 + $0x148] sm:$0xff] %vm636_vm4, %v8021_v63  ;;  %v7179_v53 = vadd.f32 %v6985_v6, %v6523_v15  ;;  %v14278_v30 = vld [vmem:[#allocation10 + $0x184] ss:$8 sps:$4 sm:$0xff]   ;;  %v8399_v43 = vmax.f32 %v8207_v36, %v8303_v5  ;;  %v6526_v6 = vld [vmem:[#allocation3 + $0x190] sm:$0xff] }
 0x4b3   :  { %9279 = vmatpush1.bf16.msra.mxu0 %v14270_v38  ;;  %v7367_v58 = vld [vmem:[#allocation3 + $0x158] sm:$0xff]  ;;  %v8516_v61 = vadd.f32 %v19011_v55, %v8408_v0  ;;  %v8026_v54 = vadd.f32 %v18908_v20, %v7178_v49  ;;  %v8218_v38 = vld [vmem:[#allocation2 + $0x170] sm:$0xff] }
 0x4b4   :  { %9280 = vmatprep.subr.bf16.mxu0 %v14275_v25  ;;  %v8509_v33 = vadd.f32 %v19068_v23, %v8401_v48  ;;  %7275 = vst.msk [vmem:[#allocation3 + $0x178] sm:$0xff] %vm636_vm4, %v7179_v53  ;;  %v8023_v29 = vadd.f32 %v18885_v27, %v7367_v58  ;;  %v6989_v39 = vpop.f32.mrb[208].mxu0  ;;  %v8505_v25 = vadd.f32 %v19068_v23, %v8397_v41  ;;  %v6527_v53 = vld [vmem:[#allocation3 + $0x198] sm:$0xff] }
 0x4b5   :  { %v8307_v37 = vld [vmem:[#allocation3 + $0x138] sm:$0xff]  ;;  %v7180_v47 = vadd.f32 %v6989_v39, %v6524_v17  ;;  %v6991_v10 = vpop.f32.mrb[209].mxu0  ;;  %v8588_v28 = vmax.f32 %v8512_v45, %v8516_v61  ;;  %8122 = vst [vmem:[#allocation3 + $0x170] sm:$0xff] %v8026_v54  ;;  %v8410_v20 = vmax.f32 %v8218_v38, %v8026_v54  ;;  %v8514_v27 = vadd.f32 %v19011_v55, %v8406_v46  ;;  %v6528_v54 = vld [vmem:[#allocation3 + $0x1a0] sm:$0xff]  ;;  %v6529_v17 = vld [vmem:[#allocation3 + $0x1a8] sm:$0xff] }
 0x4b6   :  { %v8403_v4 = vmax.f32 %v8211_v51, %v8307_v37  ;;  %8119 = vst.msk [vmem:[#allocation3 + $0x158] sm:$0xff] %vm636_vm4, %v8023_v29  ;;  %v7181_v63 = vadd.f32 %v6991_v10, %v6525_v11  ;;  %v8507_v14 = vadd.f32 %v19068_v23, %v8399_v43  ;;  %v8585_v41 = vmax.f32 %v8505_v25, %v8509_v33  ;;  %v8213_v37 = vld [vmem:[#allocation2 + $0x148] sm:$0xff]  ;;  %v6530_v25 = vld [vmem:[#allocation3 + $0x1b0] sm:$0xff] }
 0x4b7   :  { %9281 = vmatpush1.bf16.msra.mxu0 %v14273_v7  ;;  %v7369_v26 = vld [vmem:[#allocation3 + $0x168] sm:$0xff]  ;;  %v8518_v3 = vadd.f32 %v19011_v55, %v8410_v20  ;;  %v19275_v5 = vadd.f32 %v18921_v12, %v7180_v47  ;;  %v8636_v45 = vmax.f32 %v8588_v28, 0.0 }
 0x4b8   :  { %v8719_v35 = vld [vmem:[#allocation4 + $0x38] sm:$0xff]  ;;  %9652 = vmatprep.subr.bf16.mxu0 %v14278_v30  ;;  %v8511_v49 = vadd.f32 %v19068_v23, %v8403_v4  ;;  %7277 = vst.msk [vmem:[#allocation3 + $0x188] sm:$0xff] %vm636_vm4, %v7181_v63  ;;  %v8025_v15 = vadd.f32 %v18898_v42, %v7369_v26  ;;  %v6995_v0 = vpop.f32.mrb[210].mxu0  ;;  %v8217_v28 = vld [vmem:[#allocation2 + $0x168] sm:$0xff]  ;;  %v8224_v63 = vld [vmem:[#allocation2 + $0x1a0] sm:$0xff] }
 0x4b9   :  { %13507 = vmatprep.mubr.msk.bf16.mxu0 %vm636_vm4, %v8719_v35  ;;  %v7182_v48 = vadd.f32 %v6995_v0, %v6526_v6  ;;  %v6997_v8 = vpop.f32.mrb[211].mxu0  ;;  %v8590_v12 = vmax.f32 %v8514_v27, %v8518_v3  ;;  %8124 = vst [vmem:[#allocation3 + $0x180] sm:$0xff] %v19275_v5  ;;  %v8309_v47 = vld [vmem:[#allocation3 + $0x148] sm:$0xff]  ;;  %v6531_v3 = vld [vmem:[#allocation3 + $0x1b8] sm:$0xff]  ;;  %v8222_v6 = vld [vmem:[#allocation2 + $0x190] sm:$0xff] }
 0x4ba   :  { %8959 = vmatmul.mubr.bf16.gmra.mrb[12].mxu0 %v19212_v9  ;;  %8121 = vst.msk [vmem:[#allocation3 + $0x168] sm:$0xff] %vm636_vm4, %v8025_v15  ;;  %v7183_v7 = vadd.f32 %v6997_v8, %v6527_v53  ;;  %v8587_v36 = vmax.f32 %v8507_v14, %v8511_v49  ;;  %v8633_v9 = vmax.f32 %v8585_v41, 0.0  ;;  %v8405_v49 = vmax.f32 %v8213_v37, %v8309_v47  ;;  %v8215_v0 = vld [vmem:[#allocation2 + $0x158] sm:$0xff] }
 0x4bb   :  { %v8638_v46 = vmax.f32 %v8590_v12, 0.0  ;;  %v7371_v42 = vld [vmem:[#allocation3 + $0x178] sm:$0xff]  ;;  %v19286_v58 = vadd.f32 %v18933_v60, %v7182_v48  ;;  %v8220_v60 = vld [vmem:[#allocation2 + $0x180] sm:$0xff] }
 0x4bc   :  { %7279 = vst.msk [vmem:[#allocation3 + $0x198] sm:$0xff] %vm636_vm4, %v7183_v7  ;;  %v8027_v61 = vadd.f32 %v18911_v57, %v7371_v42  ;;  %v7001_v30 = vpop.f32.mrb[212].mxu0  ;;  %v8635_v43 = vmax.f32 %v8587_v36, 0.0  ;;  %v8412_v57 = vmax.f32 %v8220_v60, %v19275_v5  ;;  %v8226_v42 = vld [vmem:[#allocation2 + $0x1b0] sm:$0xff] }
 0x4bd   :  { %v19290_v33 = vpack.c.bf16 %v8638_v46, %v8636_v45  ;;  %v7184_v29 = vadd.f32 %v7001_v30, %v6528_v54  ;;  %v7003_v39 = vpop.f32.mrb[213].mxu0  ;;  %8126 = vst [vmem:[#allocation3 + $0x190] sm:$0xff] %v19286_v58  ;;  %v8311_v27 = vld [vmem:[#allocation3 + $0x158] sm:$0xff]  ;;  %v8414_v41 = vmax.f32 %v8222_v6, %v19286_v58  ;;  %v6532_v45 = vld [vmem:[#allocation3 + $0x1c0] sm:$0xff] }
 0x4be   :  { %8123 = vst.msk [vmem:[#allocation3 + $0x178] sm:$0xff] %vm636_vm4, %v8027_v61  ;;  %v7185_v38 = vadd.f32 %v7003_v39, %v6529_v17  ;;  %v8673_v51 = vpack.c.bf16 %v8635_v43, %v8633_v9  ;;  %v8407_v12 = vmax.f32 %v8215_v0, %v8311_v27  ;;  %v8219_v61 = vld [vmem:[#allocation2 + $0x178] sm:$0xff]  ;;  %v6533_v9 = vld [vmem:[#allocation3 + $0x1c8] sm:$0xff] }
 0x4bf   :  { %8698 = vst [vmem:[#allocation4 + $0x50] sm:$0xff] %v19290_v33  ;;  %v7373_v11 = vld [vmem:[#allocation3 + $0x188] sm:$0xff]  ;;  %v8032_v10 = vadd.f32 %v18941_v1, %v7184_v29 }
 0x4c0   :  { %7281 = vst.msk [vmem:[#allocation3 + $0x1a8] sm:$0xff] %vm636_vm4, %v7185_v38  ;;  %v8029_v20 = vadd.f32 %v18924_v34, %v7373_v11  ;;  %v7007_v4 = vpop.f32.mrb[214].mxu0  ;;  %8697 = vst.msk [vmem:[#allocation4 + $0x48] sm:$0xff] %vm636_vm4, %v8673_v51  ;;  %v8520_v34 = vadd.f32 %v19011_v55, %v8412_v57  ;;  %v8522_v38 = vadd.f32 %v19011_v55, %v8414_v41 }
 0x4c1   :  { %v8313_v26 = vld [vmem:[#allocation3 + $0x168] sm:$0xff]  ;;  %v7186_v35 = vadd.f32 %v7007_v4, %v6530_v25  ;;  %v7009_v14 = vpop.f32.mrb[215].mxu0  ;;  %8128 = vst [vmem:[#allocation3 + $0x1a0] sm:$0xff] %v8032_v10  ;;  %v8416_v5 = vmax.f32 %v8224_v63, %v8032_v10  ;;  %v8515_v47 = vadd.f32 %v19068_v23, %v8407_v12  ;;  %v6534_v10 = vld [vmem:[#allocation3 + $0x1d0] sm:$0xff]  ;;  %v6535_v4 = vld [vmem:[#allocation3 + $0x1d8] sm:$0xff] }
 0x4c2   :  { %v8409_v15 = vmax.f32 %v8217_v28, %v8313_v26  ;;  %8125 = vst.msk [vmem:[#allocation3 + $0x188] sm:$0xff] %vm636_vm4, %v8029_v20  ;;  %v7187_v1 = vadd.f32 %v7009_v14, %v6531_v3 }
 0x4c3   :  { %v7375_v48 = vld [vmem:[#allocation3 + $0x198] sm:$0xff]  ;;  %v8524_v53 = vadd.f32 %v19011_v55, %v8416_v5  ;;  %v8034_v8 = vadd.f32 %v18949_v2, %v7186_v35  ;;  %v8513_v2 = vadd.f32 %v19068_v23, %v8405_v49  ;;  %v6536_v49 = vld [vmem:[#allocation3 + $0x1e0] sm:$0xff] }
 0x4c4   :  { %v8517_v7 = vadd.f32 %v19068_v23, %v8409_v15  ;;  %7283 = vst.msk [vmem:[#allocation3 + $0x1b8] sm:$0xff] %vm636_vm4, %v7187_v1  ;;  %v8031_v36 = vadd.f32 %v18936_v59, %v7375_v48  ;;  %v7013_v46 = vpop.f32.mrb[216].mxu0 }
 0x4c5   :  { %v8315_v54 = vld [vmem:[#allocation3 + $0x178] sm:$0xff]  ;;  %v7188_v30 = vadd.f32 %v7013_v46, %v6532_v45  ;;  %v7015_v58 = vpop.f32.mrb[217].mxu0  ;;  %v8592_v43 = vmax.f32 %v8520_v34, %v8524_v53  ;;  %8130 = vst [vmem:[#allocation3 + $0x1b0] sm:$0xff] %v8034_v8  ;;  %v8418_v29 = vmax.f32 %v8226_v42, %v8034_v8  ;;  %v6537_v34 = vld [vmem:[#allocation3 + $0x1e8] sm:$0xff]  ;;  %v6538_v42 = vld [vmem:[#allocation3 + $0x1f0] sm:$0xff] }
 0x4c6   :  { %v8411_v17 = vmax.f32 %v8219_v61, %v8315_v54  ;;  %8127 = vst.msk [vmem:[#allocation3 + $0x198] sm:$0xff] %vm636_vm4, %v8031_v36  ;;  %v7189_v39 = vadd.f32 %v7015_v58, %v6533_v9  ;;  %v8589_v20 = vmax.f32 %v8513_v2, %v8517_v7  ;;  %v8221_v8 = vld [vmem:[#allocation2 + $0x188] sm:$0xff]  ;;  %v8232_v54 = vld [vmem:[#allocation2 + $0x1e0] sm:$0xff] }
 0x4c7   :  { %v7377_v59 = vld [vmem:[#allocation3 + $0x1a8] sm:$0xff]  ;;  %v8526_v51 = vadd.f32 %v19011_v55, %v8418_v29  ;;  %v19313_v37 = vadd.f32 %v18957_v24, %v7188_v30  ;;  %v8640_v35 = vmax.f32 %v8592_v43, 0.0  ;;  %v6539_v43 = vld [vmem:[#allocation3 + $0x1f8] sm:$0xff] }
 0x4c8   :  { %v8721_v60 = vld [vmem:[#allocation4 + $0x48] sm:$0xff]  ;;  %v8519_v57 = vadd.f32 %v19068_v23, %v8411_v17  ;;  %7285 = vst.msk [vmem:[#allocation3 + $0x1c8] sm:$0xff] %vm636_vm4, %v7189_v39  ;;  %v8033_v11 = vadd.f32 %v18944_v31, %v7377_v59  ;;  %v7019_v28 = vpop.f32.mrb[218].mxu0  ;;  %v8223_v59 = vld [vmem:[#allocation2 + $0x198] sm:$0xff] }
 0x4c9   :  { %13508 = vmatprep.mubr.msk.bf16.mxu0 %vm636_vm4, %v8721_v60  ;;  %v7190_v25 = vadd.f32 %v7019_v28, %v6534_v10  ;;  %v7021_v63 = vpop.f32.mrb[219].mxu0  ;;  %v8594_v24 = vmax.f32 %v8522_v38, %v8526_v51  ;;  %8132 = vst [vmem:[#allocation3 + $0x1c0] sm:$0xff] %v19313_v37  ;;  %v8317_v12 = vld [vmem:[#allocation3 + $0x188] sm:$0xff]  ;;  %v8230_v38 = vld [vmem:[#allocation2 + $0x1d0] sm:$0xff]  ;;  %v20049_v10 = vld [vmem:[#allocation27_spill] sm:$0xff] }
 0x4ca   :  { %8969 = vmatmul.mubr.bf16.gmra.mrb[16].mxu0 %v19252_v62  ;;  %8129 = vst.msk [vmem:[#allocation3 + $0x1a8] sm:$0xff] %vm636_vm4, %v8033_v11  ;;  %v7191_v27 = vadd.f32 %v7021_v63, %v6535_v4  ;;  %v8591_v26 = vmax.f32 %v8515_v47, %v8519_v57  ;;  %v8637_v62 = vmax.f32 %v8589_v20, 0.0  ;;  %v8225_v45 = vld [vmem:[#allocation2 + $0x1a8] sm:$0xff]  ;;  %v8413_v17 = vmax.f32 %v8221_v8, %v8317_v12  ;;  %v6540_v20 = vld [vmem:[#allocation3 + $0x200] sm:$0xff]  ;;  %v8234_v4 = vld [vmem:[#allocation2 + $0x1f0] sm:$0xff] }
 0x4cb   :  { %v8642_v3 = vmax.f32 %v8594_v24, 0.0  ;;  %v7379_v31 = vld [vmem:[#allocation3 + $0x1b8] sm:$0xff]  ;;  %v19324_v14 = vadd.f32 %v18965_v52, %v7190_v25  ;;  %v8228_v52 = vld [vmem:[#allocation2 + $0x1c0] sm:$0xff]  ;;  %v6542_v8 = vld [vmem:[#allocation3 + $0x210] sm:$0xff] }
 0x4cc   :  { %7287 = vst.msk [vmem:[#allocation3 + $0x1d8] sm:$0xff] %vm636_vm4, %v7191_v27  ;;  %v8035_v5 = vadd.f32 %v18952_v56, %v7379_v31  ;;  %v7025_v15 = vpop.f32.mrb[220].mxu0  ;;  %v8639_v1 = vmax.f32 %v8591_v26, 0.0  ;;  %v8420_v56 = vmax.f32 %v8228_v52, %v19313_v37  ;;  %v8227_v63 = vld [vmem:[#allocation2 + $0x1b8] sm:$0xff]  ;;  %v6541_v26 = vld [vmem:[#allocation3 + $0x208] sm:$0xff]  ;;  %v20051_v52 = vld [vmem:[#allocation49_spill] sm:$0xff] }
 0x4cd   :  { %v19328_v6 = vpack.c.bf16 %v8642_v3, %v8640_v35  ;;  %v7192_v0 = vadd.f32 %v7025_v15, %v6536_v49  ;;  %v7027_v41 = vpop.f32.mrb[221].mxu0  ;;  %8134 = vst [vmem:[#allocation3 + $0x1d0] sm:$0xff] %v19324_v14  ;;  %v8319_v30 = vld [vmem:[#allocation3 + $0x198] sm:$0xff]  ;;  %v8422_v60 = vmax.f32 %v8230_v38, %v19324_v14 }
 0x4ce   :  { %8131 = vst.msk [vmem:[#allocation3 + $0x1b8] sm:$0xff] %vm636_vm4, %v8035_v5  ;;  %v7193_v48 = vadd.f32 %v7027_v41, %v6537_v34  ;;  %v8675_v53 = vpack.c.bf16 %v8639_v1, %v8637_v62  ;;  %v8415_v57 = vmax.f32 %v8223_v59, %v8319_v30 }
 0x4cf   :  { %8700 = vst [vmem:[#allocation4 + $0x60] sm:$0xff] %v19328_v6  ;;  %v7381_v7 = vld [vmem:[#allocation3 + $0x1c8] sm:$0xff]  ;;  %v8040_v36 = vadd.f32 %v18973_v19, %v7192_v0  ;;  %v8530_v49 = vadd.f32 %v19011_v55, %v8422_v60 }
 0x4d0   :  { %7289 = vst.msk [vmem:[#allocation3 + $0x1e8] sm:$0xff] %vm636_vm4, %v7193_v48  ;;  %v8037_v46 = vadd.f32 %v18960_v32, %v7381_v7  ;;  %v7031_v61 = vpop.f32.mrb[222].mxu0  ;;  %8699 = vst.msk [vmem:[#allocation4 + $0x58] sm:$0xff] %vm636_vm4, %v8675_v53  ;;  %v8528_v32 = vadd.f32 %v19011_v55, %v8420_v56  ;;  %v20050_v0 = vld [vmem:[#allocation52_spill] sm:$0xff]  ;;  %v8523_v41 = vadd.f32 %v19068_v23, %v8415_v57 }
 0x4d1   :  { %v8321_v9 = vld [vmem:[#allocation3 + $0x1a8] sm:$0xff]  ;;  %v7194_v58 = vadd.f32 %v7031_v61, %v6538_v42  ;;  %v7033_v29 = vpop.f32.mrb[223].mxu0  ;;  %8136 = vst [vmem:[#allocation3 + $0x1e0] sm:$0xff] %v8040_v36  ;;  %v8424_v2 = vmax.f32 %v8232_v54, %v8040_v36  ;;  %v6543_v36 = vld [vmem:[#allocation3 + $0x218] sm:$0xff] }
 0x4d2   :  { %v8417_v39 = vmax.f32 %v8225_v45, %v8321_v9  ;;  %8133 = vst.msk [vmem:[#allocation3 + $0x1c8] sm:$0xff] %vm636_vm4, %v8037_v46  ;;  %v7195_v19 = vadd.f32 %v7033_v29, %v6539_v43  ;;  %v20053_v29 = vld [vmem:[#allocation54_spill] sm:$0xff] }
 0x4d3   :  { %v7383_v51 = vld [vmem:[#allocation3 + $0x1d8] sm:$0xff]  ;;  %v8532_v37 = vadd.f32 %v19011_v55, %v8424_v2  ;;  %v8042_v47 = vadd.f32 %v18981_v40, %v7194_v58  ;;  %v8521_v40 = vadd.f32 %v19068_v23, %v8413_v17  ;;  %v6544_v17 = vld [vmem:[#allocation3 + $0x220] sm:$0xff] }
 0x4d4   :  { %v8525_v11 = vadd.f32 %v19068_v23, %v8417_v39  ;;  %7291 = vst.msk [vmem:[#allocation3 + $0x1f8] sm:$0xff] %vm636_vm4, %v7195_v19  ;;  %v8039_v28 = vadd.f32 %v20049_v10, %v7383_v51  ;;  %v7037_v25 = vpop.f32.mrb[224].mxu0  ;;  %v20052_v58 = vld [vmem:[#allocation58_spill] sm:$0xff] }
 0x4d5   :  { %v8323_v24 = vld [vmem:[#allocation3 + $0x1b8] sm:$0xff]  ;;  %v7196_v27 = vadd.f32 %v7037_v25, %v6540_v20  ;;  %v7039_v35 = vpop.f32.mrb[225].mxu0  ;;  %v8596_v3 = vmax.f32 %v8528_v32, %v8532_v37  ;;  %8138 = vst [vmem:[#allocation3 + $0x1f0] sm:$0xff] %v8042_v47  ;;  %v8426_v31 = vmax.f32 %v8234_v4, %v8042_v47  ;;  %v6545_v32 = vld [vmem:[#allocation3 + $0x228] sm:$0xff]  ;;  %v8236_v37 = vld [vmem:[#allocation2 + $0x200] sm:$0xff] }
 0x4d6   :  { %v8419_v14 = vmax.f32 %v8227_v63, %v8323_v24  ;;  %8135 = vst.msk [vmem:[#allocation3 + $0x1d8] sm:$0xff] %vm636_vm4, %v8039_v28  ;;  %v7197_v5 = vadd.f32 %v7039_v35, %v6541_v26  ;;  %v8593_v56 = vmax.f32 %v8521_v40, %v8525_v11  ;;  %v20054_v28 = vld [vmem:[#allocation60_spill] sm:$0xff]  ;;  %v20055_v63 = vld [vmem:[#allocation53_spill] sm:$0xff]  ;;  %v6547_v40 = vld [vmem:[#allocation3 + $0x238] sm:$0xff] }
 0x4d7   :  { %v7385_v15 = vld [vmem:[#allocation3 + $0x1e8] sm:$0xff]  ;;  %v19349_v62 = vld [vmem:[#allocation4 + $0x58] sm:$0xff]  ;;  %v8534_v1 = vadd.f32 %v19011_v55, %v8426_v31  ;;  %v19353_v34 = vadd.f32 %v20050_v0, %v7196_v27  ;;  %v8644_v54 = vmax.f32 %v8596_v3, 0.0  ;;  %v6546_v27 = vld [vmem:[#allocation3 + $0x230] sm:$0xff] }
 0x4d8   :  { %v8527_v48 = vadd.f32 %v19068_v23, %v8419_v14  ;;  %7293 = vst.msk [vmem:[#allocation3 + $0x208] sm:$0xff] %vm636_vm4, %v7197_v5  ;;  %v8041_v53 = vadd.f32 %v20051_v52, %v7385_v15  ;;  %v7043_v12 = vpop.f32.mrb[226].mxu0  ;;  %13509 = vmatprep.mubr.msk.bf16.mxu0 %vm636_vm4, %v19349_v62  ;;  %v8229_v25 = vld [vmem:[#allocation2 + $0x1c8] sm:$0xff]  ;;  %v14899_v5 = vld [vmem:[#allocation2 + $0x220] sm:$0xff] }
 0x4d9   :  { %v7198_v7 = vadd.f32 %v7043_v12, %v6542_v8  ;;  %v7045_v45 = vpop.f32.mrb[227].mxu0  ;;  %8979 = vmatmul.mubr.bf16.gmra.mrb[20].mxu0 %v19290_v33  ;;  %v8598_v46 = vmax.f32 %v8530_v49, %v8534_v1  ;;  %8140 = vst [vmem:[#allocation3 + $0x200] sm:$0xff] %v19353_v34  ;;  %v8641_v33 = vmax.f32 %v8593_v56, 0.0  ;;  %v8325_v57 = vld [vmem:[#allocation3 + $0x1c8] sm:$0xff]  ;;  %v8428_v11 = vmax.f32 %v8236_v37, %v19353_v34  ;;  %v8238_v34 = vld [vmem:[#allocation2 + $0x210] sm:$0xff] }
 0x4da   :  { %8137 = vst.msk [vmem:[#allocation3 + $0x1e8] sm:$0xff] %vm636_vm4, %v8041_v53  ;;  %v7199_v42 = vadd.f32 %v7045_v45, %v6543_v36  ;;  %v8595_v61 = vmax.f32 %v8523_v41, %v8527_v48  ;;  %v8233_v4 = vld [vmem:[#allocation2 + $0x1e8] sm:$0xff]  ;;  %v8421_v15 = vmax.f32 %v8229_v25, %v8325_v57  ;;  %v8231_v41 = vld [vmem:[#allocation2 + $0x1d8] sm:$0xff]  ;;  %v20056_v36 = vld [vmem:[#allocation55_spill] sm:$0xff] }
 0x4db   :  { %v8646_v30 = vmax.f32 %v8598_v46, 0.0  ;;  %v7387_v9 = vld [vmem:[#allocation3 + $0x1f8] sm:$0xff]  ;;  %v19365_v43 = vadd.f32 %v20052_v58, %v7198_v7  ;;  %v8536_v48 = vadd.f32 %v19011_v55, %v8428_v11  ;;  %v6548_v46 = vld [vmem:[#allocation3 + $0x240] sm:$0xff]  ;;  %v6550_v11 = vld [vmem:[#allocation3 + $0x250] sm:$0xff] }
 0x4dc   :  { %7295 = vst.msk [vmem:[#allocation3 + $0x218] sm:$0xff] %vm636_vm4, %v7199_v42  ;;  %v8043_v2 = vadd.f32 %v20053_v29, %v7387_v9  ;;  %v7049_v39 = vpop.f32.mrb[228].mxu0  ;;  %v8643_v19 = vmax.f32 %v8595_v61, 0.0  ;;  %v8235_v61 = vld [vmem:[#allocation2 + $0x1f8] sm:$0xff]  ;;  %v6549_v9 = vld [vmem:[#allocation3 + $0x248] sm:$0xff]  ;;  %v14900_v29 = vld [vmem:[#allocation2 + $0x230] sm:$0xff] }
 0x4dd   :  { %v19369_v38 = vpack.c.bf16 %v8646_v30, %v8644_v54  ;;  %v7200_v59 = vadd.f32 %v7049_v39, %v6544_v17  ;;  %v7051_v60 = vpop.f32.mrb[229].mxu0  ;;  %8142 = vst [vmem:[#allocation3 + $0x210] sm:$0xff] %v19365_v43  ;;  %v8327_v35 = vld [vmem:[#allocation3 + $0x1d8] sm:$0xff]  ;;  %v8430_v52 = vmax.f32 %v8238_v34, %v19365_v43  ;;  %v6553_v34 = vld [vmem:[#allocation3 + $0x268] sm:$0xff] }
 0x4de   :  { %8139 = vst.msk [vmem:[#allocation3 + $0x1f8] sm:$0xff] %vm636_vm4, %v8043_v2  ;;  %v7201_v51 = vadd.f32 %v7051_v60, %v6545_v32  ;;  %v8677_v47 = vpack.c.bf16 %v8643_v19, %v8641_v33  ;;  %v8423_v56 = vmax.f32 %v8231_v41, %v8327_v35  ;;  %v6551_v25 = vld [vmem:[#allocation3 + $0x258] sm:$0xff] }
 0x4df   :  { %8702 = vst [vmem:[#allocation4 + $0x70] sm:$0xff] %v19369_v38  ;;  %v7389_v10 = vld [vmem:[#allocation3 + $0x208] sm:$0xff]  ;;  %v8048_v20 = vadd.f32 %v20054_v28, %v7200_v59  ;;  %v8538_v33 = vadd.f32 %v19011_v55, %v8430_v52 }
 0x4e0   :  { %7297 = vst.msk [vmem:[#allocation3 + $0x228] sm:$0xff] %vm636_vm4, %v7201_v51  ;;  %v8045_v24 = vadd.f32 %v20055_v63, %v7389_v10  ;;  %v7055_v26 = vpop.f32.mrb[230].mxu0  ;;  %8701 = vst.msk [vmem:[#allocation4 + $0x68] sm:$0xff] %vm636_vm4, %v8677_v47  ;;  %v8531_v51 = vadd.f32 %v19068_v23, %v8423_v56  ;;  %v20057_v47 = vld [vmem:[#allocation57_spill] sm:$0xff] }
 0x4e1   :  { %v8329_v3 = vld [vmem:[#allocation3 + $0x1e8] sm:$0xff]  ;;  %v7202_v31 = vadd.f32 %v7055_v26, %v6546_v27  ;;  %v7057_v14 = vpop.f32.mrb[231].mxu0  ;;  %8144 = vst [vmem:[#allocation3 + $0x220] sm:$0xff] %v8048_v20  ;;  %v8432_v49 = vmax.f32 %v14899_v5, %v8048_v20  ;;  %v6552_v5 = vld [vmem:[#allocation3 + $0x260] sm:$0xff] }
 0x4e2   :  { %v8425_v1 = vmax.f32 %v8233_v4, %v8329_v3  ;;  %8141 = vst.msk [vmem:[#allocation3 + $0x208] sm:$0xff] %vm636_vm4, %v8045_v24  ;;  %v7203_v0 = vadd.f32 %v7057_v14, %v6547_v40  ;;  %v20058_v3 = vld [vmem:[#allocation63_spill] sm:$0xff]  ;;  %v20059_v40 = vld [vmem:[#allocation62_spill] sm:$0xff] }
 0x4e3   :  { %v7391_v53 = vld [vmem:[#allocation3 + $0x218] sm:$0xff]  ;;  %v8540_v8 = vadd.f32 %v19011_v55, %v8432_v49  ;;  %v8050_v12 = vadd.f32 %v19029_v44, %v7202_v31  ;;  %v8529_v44 = vadd.f32 %v19068_v23, %v8421_v15 }
 0x4e4   :  { %v8533_v7 = vadd.f32 %v19068_v23, %v8425_v1  ;;  %7299 = vst.msk [vmem:[#allocation3 + $0x238] sm:$0xff] %vm636_vm4, %v7203_v0  ;;  %v8047_v45 = vadd.f32 %v20056_v36, %v7391_v53  ;;  %v7061_v42 = vpop.f32.mrb[232].mxu0 }
 0x4e5   :  { %v8331_v54 = vld [vmem:[#allocation3 + $0x1f8] sm:$0xff]  ;;  %v7204_v30 = vadd.f32 %v7061_v42, %v6548_v46  ;;  %v7063_v58 = vpop.f32.mrb[233].mxu0  ;;  %v8600_v43 = vmax.f32 %v8536_v48, %v8540_v8  ;;  %8146 = vst [vmem:[#allocation3 + $0x230] sm:$0xff] %v8050_v12  ;;  %v8434_v2 = vmax.f32 %v14900_v29, %v8050_v12  ;;  %v14901_v8 = vld [vmem:[#allocation2 + $0x240] sm:$0xff]  ;;  %v8237_v46 = vld [vmem:[#allocation2 + $0x208] sm:$0xff] }
 0x4e6   :  { %v8427_v17 = vmax.f32 %v8235_v61, %v8331_v54  ;;  %8143 = vst.msk [vmem:[#allocation3 + $0x218] sm:$0xff] %vm636_vm4, %v8047_v45  ;;  %v7205_v39 = vadd.f32 %v7063_v58, %v6549_v9  ;;  %v8597_v28 = vmax.f32 %v8529_v44, %v8533_v7  ;;  %v20060_v7 = vld [vmem:[#allocation65_spill] sm:$0xff]  ;;  %v8241_v45 = vld [vmem:[#allocation2 + $0x228] sm:$0xff]  ;;  %v20061_v42 = vld [vmem:[#allocation59_spill] sm:$0xff] }
 0x4e7   :  { %v7393_v19 = vld [vmem:[#allocation3 + $0x228] sm:$0xff]  ;;  %v8542_v32 = vadd.f32 %v19011_v55, %v8434_v2  ;;  %v19394_v60 = vadd.f32 %v19039_v18, %v7204_v30  ;;  %v8648_v27 = vmax.f32 %v8600_v43, 0.0  ;;  %v6554_v54 = vld [vmem:[#allocation3 + $0x270] sm:$0xff]  ;;  %v6555_v29 = vld [vmem:[#allocation3 + $0x278] sm:$0xff] }
 0x4e8   :  { %v19390_v59 = vld [vmem:[#allocation4 + $0x68] sm:$0xff]  ;;  %v8535_v37 = vadd.f32 %v19068_v23, %v8427_v17  ;;  %7301 = vst.msk [vmem:[#allocation3 + $0x248] sm:$0xff] %vm636_vm4, %v7205_v39  ;;  %v8049_v57 = vadd.f32 %v20057_v47, %v7393_v19  ;;  %v7067_v10 = vpop.f32.mrb[234].mxu0  ;;  %v14902_v44 = vld [vmem:[#allocation2 + $0x260] sm:$0xff] }
 0x4e9   :  { %13510 = vmatprep.mubr.msk.bf16.mxu0 %vm636_vm4, %v19390_v59  ;;  %v7206_v20 = vadd.f32 %v7067_v10, %v6550_v11  ;;  %v7069_v4 = vpop.f32.mrb[235].mxu0  ;;  %v8602_v18 = vmax.f32 %v8538_v33, %v8542_v32  ;;  %8148 = vst [vmem:[#allocation3 + $0x240] sm:$0xff] %v19394_v60  ;;  %v8333_v53 = vld [vmem:[#allocation3 + $0x208] sm:$0xff]  ;;  %v8436_v12 = vmax.f32 %v14901_v8, %v19394_v60  ;;  %v8239_v32 = vld [vmem:[#allocation2 + $0x218] sm:$0xff]  ;;  %v20062_v11 = vld [vmem:[#allocation35_spill] sm:$0xff] }
 0x4ea   :  { %8989 = vmatmul.mubr.bf16.gmra.mrb[24].mxu0 %v19328_v6  ;;  %8145 = vst.msk [vmem:[#allocation3 + $0x228] sm:$0xff] %vm636_vm4, %v8049_v57  ;;  %v7207_v63 = vadd.f32 %v7069_v4, %v6551_v25  ;;  %v8599_v24 = vmax.f32 %v8531_v51, %v8535_v37  ;;  %v8645_v6 = vmax.f32 %v8597_v28, 0.0  ;;  %v8429_v39 = vmax.f32 %v8237_v46, %v8333_v53  ;;  %v14903_v51 = vld [vmem:[#allocation2 + $0x250] sm:$0xff]  ;;  %v20063_v25 = vld [vmem:[#allocation64_spill] sm:$0xff] }
 0x4eb   :  { %v8650_v26 = vmax.f32 %v8602_v18, 0.0  ;;  %v7395_v35 = vld [vmem:[#allocation3 + $0x238] sm:$0xff]  ;;  %v19406_v31 = vadd.f32 %v20058_v3, %v7206_v20  ;;  %v8544_v60 = vadd.f32 %v19011_v55, %v8436_v12  ;;  %v6556_v18 = vld [vmem:[#allocation3 + $0x280] sm:$0xff] }
 0x4ec   :  { %7303 = vst.msk [vmem:[#allocation3 + $0x258] sm:$0xff] %vm636_vm4, %v7207_v63  ;;  %v8051_v14 = vadd.f32 %v20059_v40, %v7395_v35  ;;  %v7073_v49 = vpop.f32.mrb[236].mxu0  ;;  %v8647_v15 = vmax.f32 %v8599_v24, 0.0  ;;  %v8243_v24 = vld [vmem:[#allocation2 + $0x238] sm:$0xff]  ;;  %v6557_v35 = vld [vmem:[#allocation3 + $0x288] sm:$0xff]  ;;  %v14904_v40 = vld [vmem:[#allocation2 + $0x270] sm:$0xff] }
 0x4ed   :  { %v19410_v1 = vpack.c.bf16 %v8650_v26, %v8648_v27  ;;  %v7208_v0 = vadd.f32 %v7073_v49, %v6552_v5  ;;  %v7075_v41 = vpop.f32.mrb[237].mxu0  ;;  %8150 = vst [vmem:[#allocation3 + $0x250] sm:$0xff] %v19406_v31  ;;  %v8335_v9 = vld [vmem:[#allocation3 + $0x218] sm:$0xff]  ;;  %v8438_v37 = vmax.f32 %v14903_v51, %v19406_v31  ;;  %v8537_v5 = vadd.f32 %v19068_v23, %v8429_v39  ;;  %v20065_v12 = vld [vmem:[#allocation15_spill] sm:$0xff] }
 0x4ee   :  { %8147 = vst.msk [vmem:[#allocation3 + $0x238] sm:$0xff] %vm636_vm4, %v8051_v14  ;;  %v7209_v48 = vadd.f32 %v7075_v41, %v6553_v34  ;;  %v8679_v52 = vpack.c.bf16 %v8647_v15, %v8645_v6  ;;  %v8431_v28 = vmax.f32 %v8239_v32, %v8335_v9  ;;  %v20067_v39 = vld [vmem:[#allocation18_spill] sm:$0xff] }
 0x4ef   :  { %8704 = vst [vmem:[#allocation4 + $0x80] sm:$0xff] %v19410_v1  ;;  %v7397_v56 = vld [vmem:[#allocation3 + $0x248] sm:$0xff]  ;;  %v8056_v36 = vadd.f32 %v20060_v7, %v7208_v0  ;;  %v8546_v15 = vadd.f32 %v19011_v55, %v8438_v37  ;;  %v6558_v7 = vld [vmem:[#allocation3 + $0x290] sm:$0xff] }
 0x4f0   :  { %7305 = vst.msk [vmem:[#allocation3 + $0x268] sm:$0xff] %vm636_vm4, %v7209_v48  ;;  %v8053_v61 = vadd.f32 %v20061_v42, %v7397_v56  ;;  %v7079_v30 = vpop.f32.mrb[238].mxu0  ;;  %8703 = vst.msk [vmem:[#allocation4 + $0x78] sm:$0xff] %vm636_vm4, %v8679_v52  ;;  %v20064_v48 = vld [vmem:[#allocation16_spill] sm:$0xff]  ;;  %v8539_v53 = vadd.f32 %v19068_v23, %v8431_v28  ;;  %v6559_v42 = vld [vmem:[#allocation3 + $0x298] sm:$0xff] }
 0x4f1   :  { %v8337_v58 = vld [vmem:[#allocation3 + $0x228] sm:$0xff]  ;;  %v7210_v43 = vadd.f32 %v7079_v30, %v6554_v54  ;;  %v7081_v2 = vpop.f32.mrb[239].mxu0  ;;  %8152 = vst [vmem:[#allocation3 + $0x260] sm:$0xff] %v8056_v36  ;;  %v8440_v17 = vmax.f32 %v14902_v44, %v8056_v36  ;;  %v9074_v30 = vld [vmem:[#allocation4 + $0x18] sm:$0xff] }
 0x4f2   :  { %v8433_v33 = vmax.f32 %v8241_v45, %v8337_v58  ;;  %8149 = vst.msk [vmem:[#allocation3 + $0x248] sm:$0xff] %vm636_vm4, %v8053_v61  ;;  %v7211_v19 = vadd.f32 %v7081_v2, %v6555_v29  ;;  %v20066_v44 = vld [vmem:[#allocation38_spill] sm:$0xff] }
 0x4f3   :  { %v7399_v47 = vld [vmem:[#allocation3 + $0x258] sm:$0xff]  ;;  %v8548_v57 = vadd.f32 %v19011_v55, %v8440_v17  ;;  %v8058_v10 = vadd.f32 %v20062_v11, %v7210_v43 }
 0x4f4   :  { %v8541_v20 = vadd.f32 %v19068_v23, %v8433_v33  ;;  %7307 = vst.msk [vmem:[#allocation3 + $0x278] sm:$0xff] %vm636_vm4, %v7211_v19  ;;  %v8055_v4 = vadd.f32 %v20063_v25, %v7399_v47  ;;  %v7085_v63 = vpop.f32.mrb[240].mxu0  ;;  %v6560_v33 = vld [vmem:[#allocation3 + $0x2a0] sm:$0xff]  ;;  %v6561_v47 = vld [vmem:[#allocation3 + $0x2a8] sm:$0xff] }
 0x4f5   :  { %v8339_v27 = vld [vmem:[#allocation3 + $0x238] sm:$0xff]  ;;  %v7212_v26 = vadd.f32 %v7085_v63, %v6556_v18  ;;  %v7087_v3 = vpop.f32.mrb[241].mxu0  ;;  %v8604_v31 = vmax.f32 %v8544_v60, %v8548_v57  ;;  %8154 = vst [vmem:[#allocation3 + $0x270] sm:$0xff] %v8058_v10  ;;  %v8442_v14 = vmax.f32 %v14904_v40, %v8058_v10  ;;  %v14276_v10 = vld [vmem:[#allocation10 + $0x180] ss:$8 sps:$4 sm:$0xff]   ;;  %v6562_v40 = vld [vmem:[#allocation3 + $0x2b0] sm:$0xff] }
 0x4f6   :  { %v8435_v49 = vmax.f32 %v8243_v24, %v8339_v27  ;;  %8151 = vst.msk [vmem:[#allocation3 + $0x258] sm:$0xff] %vm636_vm4, %v8055_v4  ;;  %v7213_v6 = vadd.f32 %v7087_v3, %v6557_v35  ;;  %v8601_v45 = vmax.f32 %v8537_v5, %v8541_v20  ;;  %v8245_v20 = vld [vmem:[#allocation2 + $0x248] sm:$0xff]  ;;  %v14905_v18 = vld [vmem:[#allocation2 + $0x280] sm:$0xff]  ;;  %v14281_v35 = vld [vmem:[#allocation10 + $0x194] ss:$8 sps:$4 sm:$0xff]  }
 0x4f7   :  { %v7401_v0 = vld [vmem:[#allocation3 + $0x268] sm:$0xff]  ;;  %v19431_v34 = vld [vmem:[#allocation4 + $0x78] sm:$0xff]  ;;  %v8550_v41 = vadd.f32 %v19011_v55, %v8442_v14  ;;  %v19435_v52 = vadd.f32 %v20064_v48, %v7212_v26  ;;  %v8652_v43 = vmax.f32 %v8604_v31, 0.0  ;;  %v20069_v3 = vld [vmem:[#allocation17_spill] sm:$0xff] }
 0x4f8   :  { %v8543_v8 = vadd.f32 %v19068_v23, %v8435_v49  ;;  %7309 = vst.msk [vmem:[#allocation3 + $0x288] sm:$0xff] %vm636_vm4, %v7213_v6  ;;  %v8057_v56 = vadd.f32 %v20065_v12, %v7401_v0  ;;  %v7091_v36 = vpop.f32.mrb[242].mxu0  ;;  %13511 = vmatprep.mubr.msk.bf16.mxu0 %vm636_vm4, %v19431_v34  ;;  %v8649_v32 = vmax.f32 %v8601_v45, 0.0  ;;  %v8249_v25 = vld [vmem:[#allocation2 + $0x268] sm:$0xff]  ;;  %v6563_v5 = vld [vmem:[#allocation3 + $0x2b8] sm:$0xff]  ;;  %v9073_v49 = vld [vmem:[#allocation4 + $0x10] sm:$0xff] }
 0x4f9   :  { %v7214_v46 = vadd.f32 %v7091_v36, %v6558_v7  ;;  %v7093_v61 = vpop.f32.mrb[243].mxu0  ;;  %8999 = vmatmul.mubr.bf16.gmra.mrb[28].mxu0 %v19369_v38  ;;  %v8606_v54 = vmax.f32 %v8546_v15, %v8550_v41  ;;  %8156 = vst [vmem:[#allocation3 + $0x280] sm:$0xff] %v19435_v52  ;;  %v8341_v4 = vld [vmem:[#allocation3 + $0x248] sm:$0xff]  ;;  %v8444_v63 = vmax.f32 %v14905_v18, %v19435_v52  ;;  %v14906_v52 = vld [vmem:[#allocation2 + $0x2a0] sm:$0xff]  ;;  %v14279_v7 = vld [vmem:[#allocation10 + $0x190] ss:$8 sps:$4 sm:$0xff]  }
 0x4fa   :  { %8153 = vst.msk [vmem:[#allocation3 + $0x268] sm:$0xff] %vm636_vm4, %v8057_v56  ;;  %v7215_v9 = vadd.f32 %v7093_v61, %v6559_v42  ;;  %13536 = vmatprep.mubr.msk.bf16.mxu0 %vm636_vm4, %v9074_v30  ;;  %v8603_v58 = vmax.f32 %v8539_v53, %v8543_v8  ;;  %v20068_v27 = vld [vmem:[#allocation20_spill] sm:$0xff]  ;;  %v8437_v8 = vmax.f32 %v8245_v20, %v8341_v4  ;;  %v8247_v36 = vld [vmem:[#allocation2 + $0x258] sm:$0xff] }
 0x4fb   :  { %v8654_v29 = vmax.f32 %v8606_v54, 0.0  ;;  %v7403_v2 = vld [vmem:[#allocation3 + $0x278] sm:$0xff]  ;;  %v19448_v17 = vadd.f32 %v20066_v44, %v7214_v46  ;;  %v19462_v48 = vld [vmem:[#allocation4 + $0x28] sm:$0xff]  ;;  %v8552_v45 = vadd.f32 %v19011_v55, %v8444_v63  ;;  %v14907_v46 = vld [vmem:[#allocation2 + $0x290] sm:$0xff] }
 0x4fc   :  { %7311 = vst.msk [vmem:[#allocation3 + $0x298] sm:$0xff] %vm636_vm4, %v7215_v9  ;;  %v8059_v38 = vadd.f32 %v20067_v39, %v7403_v2  ;;  %v7097_v19 = vpop.f32.mrb[244].mxu0  ;;  %v8651_v60 = vmax.f32 %v8603_v58, 0.0  ;;  %v14284_v9 = vld [vmem:[#allocation10 + $0x1a4] ss:$8 sps:$4 sm:$0xff]  }
 0x4fd   :  { %v19452_v51 = vpack.c.bf16 %v8654_v29, %v8652_v43  ;;  %v7216_v37 = vadd.f32 %v7097_v19, %v6560_v33  ;;  %v7099_v57 = vpop.f32.mrb[245].mxu0  ;;  %8158 = vst [vmem:[#allocation3 + $0x290] sm:$0xff] %v19448_v17  ;;  %v8343_v6 = vld [vmem:[#allocation3 + $0x258] sm:$0xff]  ;;  %v8446_v42 = vmax.f32 %v14907_v46, %v19448_v17  ;;  %v6564_v44 = vld [vmem:[#allocation3 + $0x2c0] sm:$0xff]  ;;  %v6565_v17 = vld [vmem:[#allocation3 + $0x2c8] sm:$0xff] }
 0x4fe   :  { %8155 = vst.msk [vmem:[#allocation3 + $0x278] sm:$0xff] %vm636_vm4, %v8059_v38  ;;  %v7217_v11 = vadd.f32 %v7099_v57, %v6561_v47  ;;  %v8681_v28 = vpack.c.bf16 %v8651_v60, %v8649_v32  ;;  %v8439_v58 = vmax.f32 %v8247_v36, %v8343_v6  ;;  %v20070_v29 = vld [vmem:[#allocation22_spill] sm:$0xff] }
 0x4ff   :  { %8706 = vst [vmem:[#allocation4 + $0x90] sm:$0xff] %v19452_v51  ;;  %v7405_v24 = vld [vmem:[#allocation3 + $0x288] sm:$0xff]  ;;  %v8064_v26 = vadd.f32 %v20068_v27, %v7216_v37  ;;  %v8251_v38 = vld [vmem:[#allocation2 + $0x278] sm:$0xff]  ;;  %v14908_v37 = vld [vmem:[#allocation2 + $0x2b0] sm:$0xff] }
 0x500   :  { %7313 = vst.msk [vmem:[#allocation3 + $0x2a8] sm:$0xff] %vm636_vm4, %v7217_v11  ;;  %v8061_v31 = vadd.f32 %v20069_v3, %v7405_v24  ;;  %v7103_v14 = vpop.f32.mrb[246].mxu0  ;;  %8705 = vst.msk [vmem:[#allocation4 + $0x88] sm:$0xff] %vm636_vm4, %v8681_v28  ;;  %v8554_v28 = vadd.f32 %v19011_v55, %v8446_v42  ;;  %v14287_v18 = vld [vmem:[#allocation10 + $0x1b4] ss:$8 sps:$4 sm:$0xff]   ;;  %v8547_v63 = vadd.f32 %v19068_v23, %v8439_v58  ;;  %v20071_v27 = vld [vmem:[#allocation44_spill] sm:$0xff] }
 0x501   :  { %v8345_v15 = vld [vmem:[#allocation3 + $0x268] sm:$0xff]  ;;  %v7218_v0 = vadd.f32 %v7103_v14, %v6562_v40  ;;  %v7105_v41 = vpop.f32.mrb[247].mxu0  ;;  %9291 = vmatmul.mubr.bf16.vlgmr.msra.gmra.mrb[0].mxu0 %v9073_v49  ;;  %8160 = vst [vmem:[#allocation3 + $0x2a0] sm:$0xff] %v8064_v26  ;;  %v8448_v53 = vmax.f32 %v14906_v52, %v8064_v26  ;;  %v19488_v6 = vld [vmem:[#allocation4 + $0x38] sm:$0xff] }
 0x502   :  { %v8441_v12 = vmax.f32 %v8249_v25, %v8345_v15  ;;  %8157 = vst.msk [vmem:[#allocation3 + $0x288] sm:$0xff] %vm636_vm4, %v8061_v31  ;;  %v7219_v56 = vadd.f32 %v7105_v41, %v6563_v5  ;;  %13537 = vmatprep.mubr.msk.bf16.mxu0 %vm636_vm4, %v19462_v48  ;;  %9653 = vmatpush1.bf16.msra.mxu0 %v14276_v10  ;;  %v14282_v10 = vld [vmem:[#allocation10 + $0x1a0] ss:$8 sps:$4 sm:$0xff]   ;;  %v6567_v5 = vld [vmem:[#allocation3 + $0x2d8] sm:$0xff] }
 0x503   :  { %v7407_v61 = vld [vmem:[#allocation3 + $0x298] sm:$0xff]  ;;  %v8556_v54 = vadd.f32 %v19011_v55, %v8448_v53  ;;  %9654 = vmatprep.subr.bf16.mxu0 %v14281_v35  ;;  %v8066_v30 = vadd.f32 %v19136_v22, %v7218_v0  ;;  %v8545_v22 = vadd.f32 %v19068_v23, %v8437_v8  ;;  %v6566_v35 = vld [vmem:[#allocation3 + $0x2d0] sm:$0xff]  ;;  %v19485_v31 = vld [vmem:[#allocation4 + $0x20] sm:$0xff] }
 0x504   :  { %v8549_v43 = vadd.f32 %v19068_v23, %v8441_v12  ;;  %7315 = vst.msk [vmem:[#allocation3 + $0x2b8] sm:$0xff] %vm636_vm4, %v7219_v56  ;;  %v8063_v2 = vadd.f32 %v20070_v29, %v7407_v61  ;;  %v7109_v39 = vpop.f32.mrb[248].mxu0  ;;  %v14285_v0 = vld [vmem:[#allocation10 + $0x1b0] ss:$8 sps:$4 sm:$0xff]   ;;  %v14290_v56 = vld [vmem:[#allocation10 + $0x1c4] ss:$8 sps:$4 sm:$0xff]  }
 0x505   :  { %v8347_v33 = vld [vmem:[#allocation3 + $0x278] sm:$0xff]  ;;  %v7220_v19 = vadd.f32 %v7109_v39, %v6564_v44  ;;  %v7111_v32 = vpop.f32.mrb[249].mxu0  ;;  %v8608_v60 = vmax.f32 %v8552_v45, %v8556_v54  ;;  %8162 = vst [vmem:[#allocation3 + $0x2b0] sm:$0xff] %v8066_v30  ;;  %v8450_v47 = vmax.f32 %v14908_v37, %v8066_v30  ;;  %v6568_v45 = vld [vmem:[#allocation3 + $0x2e0] sm:$0xff]  ;;  %v8257_v44 = vld [vmem:[#allocation2 + $0x2a8] sm:$0xff] }
 0x506   :  { %v8443_v57 = vmax.f32 %v8251_v38, %v8347_v33  ;;  %8159 = vst.msk [vmem:[#allocation3 + $0x298] sm:$0xff] %vm636_vm4, %v8063_v2  ;;  %v7221_v11 = vadd.f32 %v7111_v32, %v6565_v17  ;;  %9655 = vmatpush1.bf16.msra.mxu0 %v14279_v7  ;;  %v8605_v40 = vmax.f32 %v8545_v22, %v8549_v43  ;;  %v20072_v7 = vld [vmem:[#allocation41_spill] sm:$0xff]  ;;  %v14288_v43 = vld [vmem:[#allocation10 + $0x1c0] ss:$8 sps:$4 sm:$0xff]  }
 0x507   :  { %v7409_v20 = vld [vmem:[#allocation3 + $0x2a8] sm:$0xff]  ;;  %v8558_v25 = vadd.f32 %v19011_v55, %v8450_v47  ;;  %9656 = vmatprep.subr.bf16.mxu0 %v14284_v9  ;;  %v19479_v4 = vadd.f32 %v19155_v50, %v7220_v19  ;;  %v8656_v52 = vmax.f32 %v8608_v60, 0.0  ;;  %v14909_v38 = vld [vmem:[#allocation2 + $0x2c0] sm:$0xff]  ;;  %v14293_v60 = vld [vmem:[#allocation10 + $0x1d4] ss:$8 sps:$4 sm:$0xff]  }
 0x508   :  { %v8551_v24 = vadd.f32 %v19068_v23, %v8443_v57  ;;  %7317 = vst.msk [vmem:[#allocation3 + $0x2c8] sm:$0xff] %vm636_vm4, %v7221_v11  ;;  %v8065_v26 = vadd.f32 %v20071_v27, %v7409_v20  ;;  %v7115_v3 = vpop.f32.mrb[250].mxu0  ;;  %v8653_v42 = vmax.f32 %v8605_v40, 0.0  ;;  %v6569_v9 = vld [vmem:[#allocation3 + $0x2e8] sm:$0xff]  ;;  %v20074_v37 = vld [vmem:[#allocation21_spill] sm:$0xff]  ;;  %v6571_v11 = vld [vmem:[#allocation3 + $0x2f8] sm:$0xff] }
 0x509   :  { %v7222_v14 = vadd.f32 %v7115_v3, %v6566_v35  ;;  %v7117_v49 = vpop.f32.mrb[251].mxu0  ;;  %9301 = vmatmul.mubr.bf16.gmra.mrb[4].mxu0 %v19485_v31  ;;  %v8610_v50 = vmax.f32 %v8554_v28, %v8558_v25  ;;  %8164 = vst [vmem:[#allocation3 + $0x2c0] sm:$0xff] %v19479_v4  ;;  %v8253_v2 = vld [vmem:[#allocation2 + $0x288] sm:$0xff]  ;;  %v8452_v33 = vmax.f32 %v14909_v38, %v19479_v4  ;;  %v6570_v22 = vld [vmem:[#allocation3 + $0x2f0] sm:$0xff]  ;;  %v8255_v40 = vld [vmem:[#allocation2 + $0x298] sm:$0xff] }
 0x50a   :  { %8161 = vst.msk [vmem:[#allocation3 + $0x2a8] sm:$0xff] %vm636_vm4, %v8065_v26  ;;  %v7223_v15 = vadd.f32 %v7117_v49, %v6567_v5  ;;  %13538 = vmatprep.mubr.msk.bf16.mxu0 %vm636_vm4, %v19488_v6  ;;  %9657 = vmatpush1.bf16.msra.mxu0 %v14282_v10  ;;  %v8607_v41 = vmax.f32 %v8547_v63, %v8551_v24  ;;  %v8349_v39 = vld [vmem:[#allocation3 + $0x288] sm:$0xff]  ;;  %v19507_v10 = vld [vmem:[#allocation4 + $0x30] sm:$0xff]  ;;  %v14910_v63 = vld [vmem:[#allocation2 + $0x2e0] sm:$0xff] }
 0x50b   :  { %v8658_v53 = vmax.f32 %v8610_v50, 0.0  ;;  %v7411_v8 = vld [vmem:[#allocation3 + $0x2b8] sm:$0xff]  ;;  %9658 = vmatprep.subr.bf16.mxu0 %v14287_v18  ;;  %v19495_v12 = vadd.f32 %v19168_v16, %v7222_v14  ;;  %v20073_v17 = vld [vmem:[#allocation24_spill] sm:$0xff]  ;;  %v8445_v27 = vmax.f32 %v8253_v2, %v8349_v39  ;;  %v8560_v14 = vadd.f32 %v19011_v55, %v8452_v33  ;;  %v14911_v5 = vld [vmem:[#allocation2 + $0x2d0] sm:$0xff] }
 0x50c   :  { %7319 = vst.msk [vmem:[#allocation3 + $0x2d8] sm:$0xff] %vm636_vm4, %v7223_v15  ;;  %v8067_v36 = vadd.f32 %v20072_v7, %v7411_v8  ;;  %v7121_v46 = vpop.f32.mrb[252].mxu0  ;;  %v8655_v61 = vmax.f32 %v8607_v41, 0.0  ;;  %v19511_v18 = vld [vmem:[#allocation4 + $0x48] sm:$0xff]  ;;  %v14291_v3 = vld [vmem:[#allocation10 + $0x1d0] ss:$8 sps:$4 sm:$0xff]  }
 0x50d   :  { %v19499_v54 = vpack.c.bf16 %v8658_v53, %v8656_v52  ;;  %v7224_v30 = vadd.f32 %v7121_v46, %v6568_v45  ;;  %v7123_v58 = vpop.f32.mrb[253].mxu0  ;;  %8166 = vst [vmem:[#allocation3 + $0x2d0] sm:$0xff] %v19495_v12  ;;  %v8351_v28 = vld [vmem:[#allocation3 + $0x298] sm:$0xff]  ;;  %v8454_v49 = vmax.f32 %v14911_v5, %v19495_v12  ;;  %v14296_v41 = vld [vmem:[#allocation10 + $0x1e4] ss:$8 sps:$4 sm:$0xff]   ;;  %v14912_v46 = vld [vmem:[#allocation2 + $0x2f0] sm:$0xff] }
 0x50e   :  { %8163 = vst.msk [vmem:[#allocation3 + $0x2b8] sm:$0xff] %vm636_vm4, %v8067_v36  ;;  %v7225_v16 = vadd.f32 %v7123_v58, %v6569_v9  ;;  %9659 = vmatpush1.bf16.msra.mxu0 %v14285_v0  ;;  %v8683_v29 = vpack.c.bf16 %v8655_v61, %v8653_v42  ;;  %v8447_v52 = vmax.f32 %v8255_v40, %v8351_v28  ;;  %v20075_v8 = vld [vmem:[#allocation19_spill] sm:$0xff]  ;;  %v8259_v7 = vld [vmem:[#allocation2 + $0x2b8] sm:$0xff] }
 0x50f   :  { %v7413_v19 = vld [vmem:[#allocation3 + $0x2c8] sm:$0xff]  ;;  %v8072_v32 = vadd.f32 %v20073_v17, %v7224_v30  ;;  %9660 = vmatprep.subr.bf16.mxu0 %v14290_v56  ;;  %v8553_v42 = vadd.f32 %v19068_v23, %v8445_v27  ;;  %v8562_v30 = vadd.f32 %v19011_v55, %v8454_v49  ;;  %v20076_v2 = vld [vmem:[#allocation23_spill] sm:$0xff]  ;;  %v8263_v40 = vld [vmem:[#allocation2 + $0x2d8] sm:$0xff] }
 0x510   :  { %7321 = vst.msk [vmem:[#allocation3 + $0x2e8] sm:$0xff] %vm636_vm4, %v7225_v16  ;;  %v8069_v47 = vadd.f32 %v20074_v37, %v7413_v19  ;;  %v7127_v57 = vpop.f32.mrb[254].mxu0  ;;  %8707 = vst.msk [vmem:[#allocation4 + $0x98] sm:$0xff] %vm636_vm4, %v8683_v29  ;;  %v14299_v16 = vld [vmem:[#allocation10 + $0x1f4] ss:$8 sps:$4 sm:$0xff]   ;;  %v19530_v39 = vld [vmem:[#allocation4 + $0x40] sm:$0xff] }
 0x511   :  { %v8353_v20 = vld [vmem:[#allocation3 + $0x2a8] sm:$0xff]  ;;  %v7226_v25 = vadd.f32 %v7127_v57, %v6570_v22  ;;  %v7129_v4 = vpop.f32.mrb[255].mxu0  ;;  %9311 = vmatmul.mubr.bf16.gmra.mrb[8].mxu0 %v19507_v10  ;;  %8168 = vst [vmem:[#allocation3 + $0x2e0] sm:$0xff] %v8072_v32  ;;  %v8456_v24 = vmax.f32 %v14910_v63, %v8072_v32  ;;  %v19544_v63 = vld [vmem:[#allocation4 + $0x50] sm:$0xff] }
 0x512   :  { %v8449_v26 = vmax.f32 %v8257_v44, %v8353_v20  ;;  %8165 = vst.msk [vmem:[#allocation3 + $0x2c8] sm:$0xff] %vm636_vm4, %v8069_v47  ;;  %v7227_v35 = vadd.f32 %v7129_v4, %v6571_v11  ;;  %13539 = vmatprep.mubr.msk.bf16.mxu0 %vm636_vm4, %v19511_v18  ;;  %9661 = vmatpush1.bf16.msra.mxu0 %v14288_v43  ;;  %v14302_v37 = vld [vmem:[#allocation10 + $0x204] ss:$8 sps:$4 sm:$0xff]  }
 0x513   :  { %v7415_v50 = vld [vmem:[#allocation3 + $0x2d8] sm:$0xff]  ;;  %v8564_v15 = vadd.f32 %v19011_v55, %v8456_v24  ;;  %v8074_v0 = vadd.f32 %v19192_v13, %v7226_v25  ;;  %9662 = vmatprep.subr.bf16.mxu0 %v14293_v60  ;;  %v14294_v13 = vld [vmem:[#allocation10 + $0x1e0] ss:$8 sps:$4 sm:$0xff]   ;;  %v8555_v43 = vadd.f32 %v19068_v23, %v8447_v52 }
 0x514   :  { %v8557_v53 = vadd.f32 %v19068_v23, %v8449_v26  ;;  %7323 = vst.msk [vmem:[#allocation3 + $0x2f8] sm:$0xff] %vm636_vm4, %v7227_v35  ;;  %v8071_v56 = vadd.f32 %v20075_v8, %v7415_v50  ;;  %v14305_v25 = vld [vmem:[#allocation10 + $0x214] ss:$8 sps:$4 sm:$0xff]   ;;  %v8261_v4 = vld [vmem:[#allocation2 + $0x2c8] sm:$0xff] }
 0x515   :  { %v8355_v36 = vld [vmem:[#allocation3 + $0x2b8] sm:$0xff]  ;;  %v8612_v45 = vmax.f32 %v8560_v14, %v8564_v15  ;;  %8170 = vst [vmem:[#allocation3 + $0x2f0] sm:$0xff] %v8074_v0  ;;  %v8458_v12 = vmax.f32 %v14912_v46, %v8074_v0  ;;  %v8265_v24 = vld [vmem:[#allocation2 + $0x2e8] sm:$0xff] }
 0x516   :  { %v8451_v61 = vmax.f32 %v8259_v7, %v8355_v36  ;;  %8167 = vst.msk [vmem:[#allocation3 + $0x2d8] sm:$0xff] %vm636_vm4, %v8071_v56  ;;  %9663 = vmatpush1.bf16.msra.mxu0 %v14291_v3  ;;  %v8609_v38 = vmax.f32 %v8553_v42, %v8557_v53  ;;  %v14303_v3 = vld [vmem:[#allocation10 + $0x210] ss:$8 sps:$4 sm:$0xff]   ;;  %v14308_v14 = vld [vmem:[#allocation10 + $0x224] ss:$8 sps:$4 sm:$0xff]  }
 0x517   :  { %v7417_v9 = vld [vmem:[#allocation3 + $0x2e8] sm:$0xff]  ;;  %v8566_v58 = vadd.f32 %v19011_v55, %v8458_v12  ;;  %9664 = vmatprep.subr.bf16.mxu0 %v14296_v41  ;;  %v14297_v55 = vld [vmem:[#allocation10 + $0x1f0] ss:$8 sps:$4 sm:$0xff]   ;;  %v19536_v17 = vmax.f32 %v8612_v45, 0.0  ;;  %v14311_v53 = vld [vmem:[#allocation10 + $0x234] ss:$8 sps:$4 sm:$0xff]  }
 0x518   :  { %v8559_v29 = vadd.f32 %v19068_v23, %v8451_v61  ;;  %v8073_v44 = vadd.f32 %v20076_v2, %v7417_v9  ;;  %v8657_v22 = vmax.f32 %v8609_v38, 0.0  ;;  %v8267_v50 = vld [vmem:[#allocation2 + $0x2f8] sm:$0xff]  ;;  %v14306_v52 = vld [vmem:[#allocation10 + $0x220] ss:$8 sps:$4 sm:$0xff]   ;;  %v14314_v12 = vld [vmem:[#allocation10 + $0x244] ss:$8 sps:$4 sm:$0xff]  }
 0x519   :  { %9321 = vmatmul.mubr.bf16.gmra.mrb[12].mxu0 %v19530_v39  ;;  %v8614_v33 = vmax.f32 %v8562_v30, %v8566_v58  ;;  %v8357_v20 = vld [vmem:[#allocation3 + $0x2c8] sm:$0xff]  ;;  %v19554_v7 = vld [vmem:[#allocation4 + $0x60] sm:$0xff]  ;;  %v14309_v45 = vld [vmem:[#allocation10 + $0x230] ss:$8 sps:$4 sm:$0xff]  }
 0x51a   :  { %8169 = vst.msk [vmem:[#allocation3 + $0x2e8] sm:$0xff] %vm636_vm4, %v8073_v44  ;;  %13540 = vmatprep.mubr.msk.bf16.mxu0 %vm636_vm4, %v19349_v62  ;;  %9665 = vmatpush1.bf16.msra.mxu0 %v14294_v13  ;;  %v8611_v19 = vmax.f32 %v8555_v43, %v8559_v29  ;;  %v14300_v62 = vld [vmem:[#allocation10 + $0x200] ss:$8 sps:$4 sm:$0xff]   ;;  %v8453_v26 = vmax.f32 %v8261_v4, %v8357_v20  ;;  %v19559_v30 = vld [vmem:[#allocation4 + $0x70] sm:$0xff]  ;;  %v14320_v43 = vld [vmem:[#allocation10 + $0x264] ss:$8 sps:$4 sm:$0xff]  }
 0x51b   :  { %v19538_v32 = vmax.f32 %v8614_v33, 0.0  ;;  %v7419_v60 = vld [vmem:[#allocation3 + $0x2f8] sm:$0xff]  ;;  %9666 = vmatprep.subr.bf16.mxu0 %v14299_v16  ;;  %v14312_v9 = vld [vmem:[#allocation10 + $0x240] ss:$8 sps:$4 sm:$0xff]  }
 0x51c   :  { %v8075_v47 = vadd.f32 %v19215_v21, %v7419_v60  ;;  %v8659_v57 = vmax.f32 %v8611_v19, 0.0  ;;  %v8561_v0 = vadd.f32 %v19068_v23, %v8453_v26  ;;  %v14317_v58 = vld [vmem:[#allocation10 + $0x254] ss:$8 sps:$4 sm:$0xff]   ;;  %v14315_v16 = vld [vmem:[#allocation10 + $0x250] ss:$8 sps:$4 sm:$0xff]  }
 0x51d   :  { %v8686_v11 = vpack.c.bf16 %v19538_v32, %v19536_v17  ;;  %v8359_v21 = vld [vmem:[#allocation3 + $0x2d8] sm:$0xff]  ;;  %v14318_v29 = vld [vmem:[#allocation10 + $0x260] ss:$8 sps:$4 sm:$0xff]   ;;  %v14332_v19 = vld [vmem:[#allocation10 + $0x2a4] ss:$8 sps:$4 sm:$0xff]  }
 0x51e   :  { %8171 = vst.msk [vmem:[#allocation3 + $0x2f8] sm:$0xff] %vm636_vm4, %v8075_v47  ;;  %9667 = vmatpush1.bf16.msra.mxu0 %v14297_v55  ;;  %v8685_v28 = vpack.c.bf16 %v8659_v57, %v8657_v22  ;;  %v8455_v5 = vmax.f32 %v8263_v40, %v8359_v21  ;;  %v14323_v2 = vld [vmem:[#allocation10 + $0x274] ss:$8 sps:$4 sm:$0xff]   ;;  %v14324_v44 = vld [vmem:[#allocation10 + $0x280] ss:$8 sps:$4 sm:$0xff]  }
 0x51f   :  { %9668 = vmatprep.subr.bf16.mxu0 %v14302_v37  ;;  %v14329_v38 = vld [vmem:[#allocation10 + $0x294] ss:$8 sps:$4 sm:$0xff]   ;;  %v14327_v55 = vld [vmem:[#allocation10 + $0x290] ss:$8 sps:$4 sm:$0xff]   ;;  %v14330_v60 = vld [vmem:[#allocation10 + $0x2a0] ss:$8 sps:$4 sm:$0xff]  }
 0x520   :  { %8709 = vst.msk [vmem:[#allocation4 + $0xa8] sm:$0xff] %vm636_vm4, %v8685_v28  ;;  %v8563_v8 = vadd.f32 %v19068_v23, %v8455_v5  ;;  %v19577_v33 = vld [vmem:[#allocation4 + $0x58] sm:$0xff]  ;;  %v14384_v22 = vld [vmem:[#allocation12] ss:$8 sps:$4 sm:$0xff]   ;;  %v14386_v57 = vld [vmem:[#allocation12 + $0x4] ss:$8 sps:$4 sm:$0xff]  }
 0x521   :  { %v8361_v27 = vld [vmem:[#allocation3 + $0x2e8] sm:$0xff]  ;;  %9331 = vmatmul.mubr.bf16.gmra.mrb[16].mxu0 %v19544_v63  ;;  %v14335_v37 = vld [vmem:[#allocation10 + $0x2b4] ss:$8 sps:$4 sm:$0xff]   ;;  %v14333_v47 = vld [vmem:[#allocation10 + $0x2b0] ss:$8 sps:$4 sm:$0xff]   ;;  %10951 = vmatprep.subr.bf16.mxu1 %v14386_v57 }
 0x522   :  { %v8457_v35 = vmax.f32 %v8265_v24, %v8361_v27  ;;  %13541 = vmatprep.mubr.msk.bf16.mxu0 %vm636_vm4, %v19390_v59  ;;  %9669 = vmatpush1.bf16.msra.mxu0 %v14300_v62  ;;  %v14338_v62 = vld [vmem:[#allocation10 + $0x2c4] ss:$8 sps:$4 sm:$0xff]   ;;  %v14336_v28 = vld [vmem:[#allocation10 + $0x2c0] ss:$8 sps:$4 sm:$0xff]   ;;  %v14341_v20 = vld [vmem:[#allocation10 + $0x2d4] ss:$8 sps:$4 sm:$0xff]  }
 0x523   :  { %9670 = vmatprep.subr.bf16.mxu0 %v14305_v25  ;;  %10952 = vmatpush1.bf16.msra.mxu1 %v14384_v22  ;;  %v14339_v25 = vld [vmem:[#allocation10 + $0x2d0] ss:$8 sps:$4 sm:$0xff]   ;;  %v14342_v4 = vld [vmem:[#allocation10 + $0x2e0] ss:$8 sps:$4 sm:$0xff]   ;;  %v14347_v24 = vld [vmem:[#allocation10 + $0x2f4] ss:$8 sps:$4 sm:$0xff]  }
 0x524   :  { %v8565_v49 = vadd.f32 %v19068_v23, %v8457_v35  ;;  %v14345_v21 = vld [vmem:[#allocation10 + $0x2f0] ss:$8 sps:$4 sm:$0xff]   ;;  %v14389_v26 = vld [vmem:[#allocation12 + $0x14] ss:$8 sps:$4 sm:$0xff]   ;;  %v14350_v35 = vld [vmem:[#allocation10 + $0x304] ss:$8 sps:$4 sm:$0xff]  }
 0x525   :  { %v8363_v15 = vld [vmem:[#allocation3 + $0x2f8] sm:$0xff]  ;;  %10953 = vmatprep.subr.bf16.mxu1 %v14389_v26  ;;  %v14390_v40 = vld [vmem:[#allocation12 + $0x20] ss:$8 sps:$4 sm:$0xff]   ;;  %v14374_v22 = vld [vmem:[#allocation10 + $0x384] ss:$8 sps:$4 sm:$0xff]  }
 0x526   :  { %v8459_v41 = vmax.f32 %v8267_v50, %v8363_v15  ;;  %9671 = vmatpush1.bf16.msra.mxu0 %v14303_v3  ;;  %v8613_v36 = vmax.f32 %v8561_v0, %v8565_v49  ;;  %v14387_v27 = vld [vmem:[#allocation12 + $0x10] ss:$8 sps:$4 sm:$0xff]   ;;  %v14395_v49 = vld [vmem:[#allocation12 + $0x34] ss:$8 sps:$4 sm:$0xff]   ;;  %v14398_v50 = vld [vmem:[#allocation12 + $0x44] ss:$8 sps:$4 sm:$0xff]  }
 0x527   :  { %9672 = vmatprep.subr.bf16.mxu0 %v14308_v14  ;;  %10954 = vmatpush1.bf16.msra.mxu1 %v14387_v27  ;;  %v19591_v3 = vld [vmem:[#allocation4 + $0x98] sm:$0xff]  ;;  %v14392_v14 = vld [vmem:[#allocation12 + $0x24] ss:$8 sps:$4 sm:$0xff]   ;;  %v14348_v0 = vld [vmem:[#allocation10 + $0x300] ss:$8 sps:$4 sm:$0xff]  }
 0x528   :  { %v8567_v56 = vadd.f32 %v19068_v23, %v8459_v41  ;;  %v8661_v42 = vmax.f32 %v8613_v36, 0.0  ;;  %v19563_v23 = vld [vmem:[#allocation4 + $0x88] sm:$0xff]  ;;  %10955 = vmatprep.subr.bf16.mxu1 %v14392_v14  ;;  %v14393_v5 = vld [vmem:[#allocation12 + $0x30] ss:$8 sps:$4 sm:$0xff]   ;;  %v14401_v15 = vld [vmem:[#allocation12 + $0x54] ss:$8 sps:$4 sm:$0xff]  }
 0x529   :  { %9341 = vmatmul.mubr.bf16.gmra.mrb[20].mxu0 %v19554_v7  ;;  %v14353_v41 = vld [vmem:[#allocation10 + $0x314] ss:$8 sps:$4 sm:$0xff]   ;;  %v14420_v57 = vld [vmem:[#allocation12 + $0xc0] ss:$8 sps:$4 sm:$0xff]   ;;  %v14381_v14 = vld [vmem:[#allocation10 + $0x3b0] ss:$8 sps:$4 sm:$0xff]  }
 0x52a   :  { %13542 = vmatprep.mubr.msk.bf16.mxu0 %vm636_vm4, %v19431_v34  ;;  %9673 = vmatpush1.bf16.msra.mxu0 %v14306_v52  ;;  %v8615_v46 = vmax.f32 %v8563_v8, %v8567_v56  ;;  %v14399_v52 = vld [vmem:[#allocation12 + $0x50] ss:$8 sps:$4 sm:$0xff]   ;;  %v14402_v56 = vld [vmem:[#allocation12 + $0x60] ss:$8 sps:$4 sm:$0xff]   ;;  %v14407_v36 = vld [vmem:[#allocation12 + $0x74] ss:$8 sps:$4 sm:$0xff]  }
 0x52b   :  { %9674 = vmatprep.subr.bf16.mxu0 %v14311_v53  ;;  %10956 = vmatpush1.bf16.msra.mxu1 %v14390_v40  ;;  %v14404_v53 = vld [vmem:[#allocation12 + $0x64] ss:$8 sps:$4 sm:$0xff]   ;;  %v14351_v8 = vld [vmem:[#allocation10 + $0x310] ss:$8 sps:$4 sm:$0xff]   ;;  %v14378_v27 = vld [vmem:[#allocation10 + $0x3a0] ss:$8 sps:$4 sm:$0xff]  }
 0x52c   :  { %v8663_v61 = vmax.f32 %v8615_v46, 0.0  ;;  %10957 = vmatprep.subr.bf16.mxu1 %v14395_v49  ;;  %v14359_v46 = vld [vmem:[#allocation10 + $0x334] ss:$8 sps:$4 sm:$0xff]   ;;  %v14429_v40 = vld [vmem:[#allocation12 + $0xf0] ss:$8 sps:$4 sm:$0xff]  }
 0x52d   :  { %v14383_v26 = vld [vmem:[#allocation10 + $0x3b4] ss:$8 sps:$4 sm:$0xff]  }
 0x52e   :  { %9675 = vmatpush1.bf16.msra.mxu0 %v14309_v45  ;;  %v8687_v13 = vpack.c.bf16 %v8663_v61, %v8661_v42  ;;  %v14354_v45 = vld [vmem:[#allocation10 + $0x320] ss:$8 sps:$4 sm:$0xff]   ;;  %v14357_v42 = vld [vmem:[#allocation10 + $0x330] ss:$8 sps:$4 sm:$0xff]   ;;  %v14362_v61 = vld [vmem:[#allocation10 + $0x344] ss:$8 sps:$4 sm:$0xff]  }
 0x52f   :  { %10046 = vmatprep.subr.bf16.mxu0 %v14314_v12  ;;  %10958 = vmatpush1.bf16.msra.mxu1 %v14393_v5  ;;  %v14405_v12 = vld [vmem:[#allocation12 + $0x70] ss:$8 sps:$4 sm:$0xff]   ;;  %v9876_v5 = vld [vmem:[#allocation4 + $0xa8] sm:$0xff] }
 0x530   :  { %8711 = vst.msk [vmem:[#allocation4 + $0xb8] sm:$0xff] %vm636_vm4, %v8687_v13  ;;  %10959 = vmatprep.subr.bf16.mxu1 %v14398_v50  ;;  %v14408_v13 = vld [vmem:[#allocation12 + $0x80] ss:$8 sps:$4 sm:$0xff]  }
 0x531   :  { %9351 = vmatmul.mubr.bf16.gmra.mrb[24].mxu0 %v19559_v30 }
 0x532   :  { %13543 = vmatprep.mubr.msk.bf16.mxu0 %vm636_vm4, %v19563_v23 }
 0x539   :  { %9361 = vmatmul.mubr.bf16.gmra.mrb[28].mxu0 %v19410_v1 }
 0x53a   :  { %13568 = vmatprep.mubr.msk.bf16.mxu0 %vm636_vm4, %v19462_v48  ;;  %v14321_v48 = vld [vmem:[#allocation10 + $0x270] ss:$8 sps:$4 sm:$0xff]  }
 0x541   :  { %9685 = vmatmul.mubr.bf16.vlgmr.msra.gmra.mrb[0].mxu0 %v19485_v31  ;;  %v14326_v31 = vld [vmem:[#allocation10 + $0x284] ss:$8 sps:$4 sm:$0xff]  }
 0x542   :  { %13569 = vmatprep.mubr.msk.bf16.mxu0 %vm636_vm4, %v19488_v6  ;;  %10047 = vmatpush1.bf16.msra.mxu0 %v14312_v9  ;;  %v14413_v9 = vld [vmem:[#allocation12 + $0x94] ss:$8 sps:$4 sm:$0xff]  }
 0x543   :  { %10048 = vmatprep.subr.bf16.mxu0 %v14317_v58  ;;  %v14360_v58 = vld [vmem:[#allocation10 + $0x340] ss:$8 sps:$4 sm:$0xff]  }
 0x546   :  { %10049 = vmatpush1.bf16.msra.mxu0 %v14315_v16  ;;  %v14365_v16 = vld [vmem:[#allocation10 + $0x354] ss:$8 sps:$4 sm:$0xff]  }
 0x547   :  { %10050 = vmatprep.subr.bf16.mxu0 %v14320_v43  ;;  %v14411_v43 = vld [vmem:[#allocation12 + $0x90] ss:$8 sps:$4 sm:$0xff]  }
 0x549   :  { %9695 = vmatmul.mubr.bf16.gmra.mrb[4].mxu0 %v19507_v10 }
 0x54a   :  { %13570 = vmatprep.mubr.msk.bf16.mxu0 %vm636_vm4, %v19511_v18  ;;  %10051 = vmatpush1.bf16.msra.mxu0 %v14318_v29  ;;  %v19605_v29 = vld [vmem:[#allocation4 + $0x68] sm:$0xff] }
 0x54b   :  { %10052 = vmatprep.subr.bf16.mxu0 %v14323_v2  ;;  %v14416_v2 = vld [vmem:[#allocation12 + $0xa4] ss:$8 sps:$4 sm:$0xff]  }
 0x54e   :  { %10053 = vmatpush1.bf16.msra.mxu0 %v14321_v48  ;;  %v14363_v48 = vld [vmem:[#allocation10 + $0x350] ss:$8 sps:$4 sm:$0xff]  }
 0x54f   :  { %10054 = vmatprep.subr.bf16.mxu0 %v14326_v31  ;;  %v14368_v31 = vld [vmem:[#allocation10 + $0x364] ss:$8 sps:$4 sm:$0xff]  }
 0x551   :  { %9705 = vmatmul.mubr.bf16.gmra.mrb[8].mxu0 %v19530_v39 }
 0x552   :  { %13571 = vmatprep.mubr.msk.bf16.mxu0 %vm636_vm4, %v19577_v33  ;;  %10055 = vmatpush1.bf16.msra.mxu0 %v14324_v44  ;;  %v14414_v44 = vld [vmem:[#allocation12 + $0xa0] ss:$8 sps:$4 sm:$0xff]  }
 0x553   :  { %10056 = vmatprep.subr.bf16.mxu0 %v14329_v38  ;;  %v14419_v38 = vld [vmem:[#allocation12 + $0xb4] ss:$8 sps:$4 sm:$0xff]  }
 0x556   :  { %10057 = vmatpush1.bf16.msra.mxu0 %v14327_v55  ;;  %v14366_v55 = vld [vmem:[#allocation10 + $0x360] ss:$8 sps:$4 sm:$0xff]  }
 0x557   :  { %10058 = vmatprep.subr.bf16.mxu0 %v14332_v19  ;;  %v14371_v19 = vld [vmem:[#allocation10 + $0x374] ss:$8 sps:$4 sm:$0xff]  }
 0x559   :  { %9715 = vmatmul.mubr.bf16.gmra.mrb[12].mxu0 %v19544_v63 }
 0x55a   :  { %13572 = vmatprep.mubr.msk.bf16.mxu0 %vm636_vm4, %v19390_v59  ;;  %10059 = vmatpush1.bf16.msra.mxu0 %v14330_v60  ;;  %v14344_v59 = vld [vmem:[#allocation10 + $0x2e4] ss:$8 sps:$4 sm:$0xff]   ;;  %v14417_v60 = vld [vmem:[#allocation12 + $0xb0] ss:$8 sps:$4 sm:$0xff]  }
 0x55b   :  { %10060 = vmatprep.subr.bf16.mxu0 %v14335_v37  ;;  %v14422_v37 = vld [vmem:[#allocation12 + $0xc4] ss:$8 sps:$4 sm:$0xff]  }
 0x55e   :  { %10061 = vmatpush1.bf16.msra.mxu0 %v14333_v47  ;;  %v14369_v47 = vld [vmem:[#allocation10 + $0x370] ss:$8 sps:$4 sm:$0xff]  }
 0x55f   :  { %10062 = vmatprep.subr.bf16.mxu0 %v14338_v62  ;;  %v14425_v62 = vld [vmem:[#allocation12 + $0xd4] ss:$8 sps:$4 sm:$0xff]  }
 0x561   :  { %9725 = vmatmul.mubr.bf16.gmra.mrb[16].mxu0 %v19554_v7 }
 0x562   :  { %13573 = vmatprep.mubr.msk.bf16.mxu0 %vm636_vm4, %v19431_v34  ;;  %10063 = vmatpush1.bf16.msra.mxu0 %v14336_v28  ;;  %v14372_v28 = vld [vmem:[#allocation10 + $0x380] ss:$8 sps:$4 sm:$0xff]  }
 0x563   :  { %10064 = vmatprep.subr.bf16.mxu0 %v14341_v20  ;;  %v14377_v20 = vld [vmem:[#allocation10 + $0x394] ss:$8 sps:$4 sm:$0xff]  }
 0x566   :  { %10065 = vmatpush1.bf16.msra.mxu0 %v14339_v25  ;;  %v14423_v25 = vld [vmem:[#allocation12 + $0xd0] ss:$8 sps:$4 sm:$0xff]  }
 0x567   :  { %10066 = vmatprep.subr.bf16.mxu0 %v14344_v59  ;;  %v14428_v59 = vld [vmem:[#allocation12 + $0xe4] ss:$8 sps:$4 sm:$0xff]  }
 0x569   :  { %9735 = vmatmul.mubr.bf16.gmra.mrb[20].mxu0 %v19559_v30 }
 0x56a   :  { %13574 = vmatprep.mubr.msk.bf16.mxu0 %vm636_vm4, %v19563_v23  ;;  %10067 = vmatpush1.bf16.msra.mxu0 %v14342_v4  ;;  %v14380_v4 = vld [vmem:[#allocation10 + $0x3a4] ss:$8 sps:$4 sm:$0xff]  }
 0x56b   :  { %10068 = vmatprep.subr.bf16.mxu0 %v14347_v24  ;;  %v14426_v24 = vld [vmem:[#allocation12 + $0xe0] ss:$8 sps:$4 sm:$0xff]  }
 0x56e   :  { %10069 = vmatpush1.bf16.msra.mxu0 %v14345_v21  ;;  %v14431_v21 = vld [vmem:[#allocation12 + $0xf4] ss:$8 sps:$4 sm:$0xff]  }
 0x56f   :  { %10440 = vmatprep.subr.bf16.mxu0 %v14350_v35  ;;  %v9871_v35 = vld [vmem:[#allocation4 + $0x80] sm:$0xff] }
 0x571   :  { %9745 = vmatmul.mubr.bf16.gmra.mrb[24].mxu0 %v19410_v1  ;;  %v14396_v1 = vld [vmem:[#allocation12 + $0x40] ss:$8 sps:$4 sm:$0xff]  }
 0x572   :  { %13575 = vmatprep.mubr.msk.bf16.mxu0 %vm636_vm4, %v19591_v3  ;;  %10960 = vmatpush1.bf16.msra.mxu1 %v14396_v1 }
 0x573   :  { %10961 = vmatprep.subr.bf16.mxu1 %v14401_v15 }
 0x576   :  { %10962 = vmatpush1.bf16.msra.mxu1 %v14399_v52 }
 0x577   :  { %10963 = vmatprep.subr.bf16.mxu1 %v14404_v53 }
 0x579   :  { %9755 = vmatmul.mubr.bf16.gmra.mrb[28].mxu0 %v19452_v51 }
 0x57a   :  { %13600 = vmatprep.mubr.msk.bf16.mxu0 %vm636_vm4, %v19488_v6  ;;  %v14356_v6 = vld [vmem:[#allocation10 + $0x324] ss:$8 sps:$4 sm:$0xff]   ;;  %10964 = vmatpush1.bf16.msra.mxu1 %v14402_v56 }
 0x57b   :  { %10965 = vmatprep.subr.bf16.mxu1 %v14407_v36  ;;  %v14432_v36 = vld [vmem:[#allocation12 + $0x100] ss:$8 sps:$4 sm:$0xff]  }
 0x57e   :  { %10966 = vmatpush1.bf16.msra.mxu1 %v14405_v12  ;;  %v14437_v12 = vld [vmem:[#allocation12 + $0x114] ss:$8 sps:$4 sm:$0xff]  }
 0x581   :  { %10079 = vmatmul.mubr.bf16.vlgmr.msra.gmra.mrb[0].mxu0 %v19507_v10  ;;  %v14410_v10 = vld [vmem:[#allocation12 + $0x84] ss:$8 sps:$4 sm:$0xff]  }
 0x582   :  { %13601 = vmatprep.mubr.msk.bf16.mxu0 %vm636_vm4, %v19511_v18  ;;  %10441 = vmatpush1.bf16.msra.mxu0 %v14348_v0 }
 0x583   :  { %10442 = vmatprep.subr.bf16.mxu0 %v14353_v41  ;;  %10967 = vmatprep.subr.bf16.mxu1 %v14410_v10 }
 0x584   :  { %10968 = vmatpush1.bf16.msra.mxu1 %v14408_v13 }
 0x585   :  { %10969 = vmatprep.subr.bf16.mxu1 %v14413_v9 }
 0x586   :  { %10443 = vmatpush1.bf16.msra.mxu0 %v14351_v8 }
 0x587   :  { %10444 = vmatprep.subr.bf16.mxu0 %v14356_v6 }
 0x588   :  { %10970 = vmatpush1.bf16.msra.mxu1 %v14411_v43 }
 0x589   :  { %10089 = vmatmul.mubr.bf16.gmra.mrb[4].mxu0 %v19530_v39  ;;  %10971 = vmatprep.subr.bf16.mxu1 %v14416_v2 }
 0x58a   :  { %13602 = vmatprep.mubr.msk.bf16.mxu0 %vm636_vm4, %v19577_v33  ;;  %10445 = vmatpush1.bf16.msra.mxu0 %v14354_v45 }
 0x58b   :  { %10446 = vmatprep.subr.bf16.mxu0 %v14359_v46 }
 0x58c   :  { %10972 = vmatpush1.bf16.msra.mxu1 %v14414_v44 }
 0x58d   :  { %10973 = vmatprep.subr.bf16.mxu1 %v14419_v38 }
 0x58e   :  { %10447 = vmatpush1.bf16.msra.mxu0 %v14357_v42 }
 0x58f   :  { %10448 = vmatprep.subr.bf16.mxu0 %v14362_v61 }
 0x590   :  { %10974 = vmatpush1.bf16.msra.mxu1 %v14417_v60 }
 0x591   :  { %10099 = vmatmul.mubr.bf16.gmra.mrb[8].mxu0 %v19544_v63  ;;  %10975 = vmatprep.subr.bf16.mxu1 %v14422_v37  ;;  %v14443_v37 = vld [vmem:[#allocation12 + $0x134] ss:$8 sps:$4 sm:$0xff]  }
 0x592   :  { %13603 = vmatprep.mubr.msk.bf16.mxu0 %vm636_vm4, %v19605_v29  ;;  %10449 = vmatpush1.bf16.msra.mxu0 %v14360_v58  ;;  %v14435_v58 = vld [vmem:[#allocation12 + $0x110] ss:$8 sps:$4 sm:$0xff]  }
 0x593   :  { %10450 = vmatprep.subr.bf16.mxu0 %v14365_v16 }
 0x594   :  { %10976 = vmatpush1.bf16.msra.mxu1 %v14420_v57 }
 0x595   :  { %10977 = vmatprep.subr.bf16.mxu1 %v14425_v62 }
 0x596   :  { %10451 = vmatpush1.bf16.msra.mxu0 %v14363_v48 }
 0x597   :  { %10452 = vmatprep.subr.bf16.mxu0 %v14368_v31 }
 0x598   :  { %10978 = vmatpush1.bf16.msra.mxu1 %v14423_v25 }
 0x599   :  { %10109 = vmatmul.mubr.bf16.gmra.mrb[12].mxu0 %v19554_v7  ;;  %10979 = vmatprep.subr.bf16.mxu1 %v14428_v59 }
 0x59a   :  { %13604 = vmatprep.mubr.msk.bf16.mxu0 %vm636_vm4, %v19431_v34  ;;  %10453 = vmatpush1.bf16.msra.mxu0 %v14366_v55  ;;  %v14375_v34 = vld [vmem:[#allocation10 + $0x390] ss:$8 sps:$4 sm:$0xff]   ;;  %v14438_v55 = vld [vmem:[#allocation12 + $0x120] ss:$8 sps:$4 sm:$0xff]  }
 0x59b   :  { %10454 = vmatprep.subr.bf16.mxu0 %v14371_v19 }
 0x59c   :  { %10980 = vmatpush1.bf16.msra.mxu1 %v14426_v24 }
 0x59d   :  { %10981 = vmatprep.subr.bf16.mxu1 %v14431_v21 }
 0x59e   :  { %10455 = vmatpush1.bf16.msra.mxu0 %v14369_v47 }
 0x59f   :  { %10456 = vmatprep.subr.bf16.mxu0 %v14374_v22 }
 0x5a0   :  { %10982 = vmatpush1.bf16.msra.mxu1 %v14429_v40 }
 0x5a1   :  { %10119 = vmatmul.mubr.bf16.gmra.mrb[16].mxu0 %v19559_v30 }
 0x5a2   :  { %13605 = vmatprep.mubr.msk.bf16.mxu0 %vm636_vm4, %v19563_v23  ;;  %10457 = vmatpush1.bf16.msra.mxu0 %v14372_v28 }
 0x5a3   :  { %10458 = vmatprep.subr.bf16.mxu0 %v14377_v20  ;;  %v14441_v20 = vld [vmem:[#allocation12 + $0x130] ss:$8 sps:$4 sm:$0xff]  }
 0x5a6   :  { %10459 = vmatpush1.bf16.msra.mxu0 %v14375_v34  ;;  %v14446_v34 = vld [vmem:[#allocation12 + $0x144] ss:$8 sps:$4 sm:$0xff]  }
 0x5a7   :  { %10460 = vmatprep.subr.bf16.mxu0 %v14380_v4 }
 0x5a9   :  { %10129 = vmatmul.mubr.bf16.gmra.mrb[20].mxu0 %v9871_v35 }
 0x5aa   :  { %13606 = vmatprep.mubr.msk.bf16.mxu0 %vm636_vm4, %v19591_v3  ;;  %10461 = vmatpush1.bf16.msra.mxu0 %v14378_v27 }
 0x5ab   :  { %10462 = vmatprep.subr.bf16.mxu0 %v14383_v26 }
 0x5ae   :  { %10463 = vmatpush1.bf16.msra.mxu0 %v14381_v14 }
 0x5b1   :  { %10139 = vmatmul.mubr.bf16.gmra.mrb[24].mxu0 %v19452_v51  ;;  %v10262_v51 = vld [vmem:[#allocation4 + $0x78] sm:$0xff] }
 0x5b2   :  { %13607 = vmatprep.mubr.msk.bf16.mxu0 %vm636_vm4, %v9876_v5 }
 0x5b9   :  { %10149 = vmatmul.mubr.bf16.gmra.mrb[28].mxu0 %v19499_v54 }
 0x5ba   :  { %13632 = vmatprep.mubr.msk.bf16.mxu0 %vm636_vm4, %v19511_v18  ;;  %v10265_v18 = vld [vmem:[#allocation4 + $0x90] sm:$0xff] }
 0x5c1   :  { %10473 = vmatmul.mubr.bf16.vlgmr.msra.gmra.mrb[0].mxu0 %v19530_v39  ;;  %v10270_v39 = vld [vmem:[#allocation4 + $0xb8] sm:$0xff] }
 0x5c2   :  { %13633 = vmatprep.mubr.msk.bf16.mxu0 %vm636_vm4, %v19577_v33  ;;  %v20078_v33 = vld [vmem:[#allocation61_spill] sm:$0xff] }
 0x5c9   :  { %10483 = vmatmul.mubr.bf16.gmra.mrb[4].mxu0 %v19544_v63  ;;  %v14434_v63 = vld [vmem:[#allocation12 + $0x104] ss:$8 sps:$4 sm:$0xff]  }
 0x5ca   :  { %13634 = vmatprep.mubr.msk.bf16.mxu0 %vm636_vm4, %v19605_v29  ;;  %11197 = vmatprep.subr.bf16.mxu1 %v14434_v63  ;;  %v14440_v29 = vld [vmem:[#allocation12 + $0x124] ss:$8 sps:$4 sm:$0xff]  }
 0x5d1   :  { %10493 = vmatmul.mubr.bf16.gmra.mrb[8].mxu0 %v19554_v7  ;;  %v10649_v7 = vld [vmem:[%s19787_s4] sm:$0x3] }
 0x5d2   :  { %13635 = vmatprep.mubr.msk.bf16.mxu0 %vm636_vm4, %v10262_v51 }
 0x5d9   :  { %10503 = vmatmul.mubr.bf16.gmra.mrb[12].mxu0 %v19559_v30  ;;  %v20077_v30 = vld [vmem:[#allocation56_spill] sm:$0xff] }
 0x5da   :  { %13636 = vmatprep.mubr.msk.bf16.mxu0 %vm636_vm4, %v19563_v23  ;;  %v19645_v23 = vrot.slane %v10649_v7, %v20077_v30 }
 0x5e1   :  { %10513 = vmatmul.mubr.bf16.gmra.mrb[16].mxu0 %v9871_v35  ;;  %v14444_v35 = vld [vmem:[#allocation12 + $0x140] ss:$8 sps:$4 sm:$0xff]  }
 0x5e2   :  { %13637 = vmatprep.mubr.msk.bf16.mxu0 %vm636_vm4, %v19591_v3  ;;  %v19648_v3 = vrot.slane %v10649_v7, %v20078_v33 }
 0x5e9   :  { %10523 = vmatmul.mubr.bf16.gmra.mrb[20].mxu0 %v10265_v18 }
 0x5ea   :  { %13638 = vmatprep.mubr.msk.bf16.mxu0 %vm636_vm4, %v9876_v5  ;;  %v14449_v5 = vld [vmem:[#allocation12 + $0x154] ss:$8 sps:$4 sm:$0xff]  }
 0x5f1   :  { %10533 = vmatmul.mubr.bf16.gmra.mrb[24].mxu0 %v19499_v54 }
 0x5f2   :  { %13639 = vmatprep.mubr.msk.bf16.mxu0 %vm636_vm4, %v10270_v39 }
 0x5f9   :  { %10543 = vmatmul.mubr.bf16.gmra.mrb[28].mxu0 %v8686_v11 }
 0x694   :  { %v10474_v54 = vpop.f32.mrb[0].mxu0 }
 0x695   :  { %v10661_v49 = vadd.f32 %v19645_v23, %v10474_v54  ;;  %v10476_v50 = vpop.f32.mrb[1].mxu0  ;;  %v14447_v54 = vld [vmem:[#allocation12 + $0x150] ss:$8 sps:$4 sm:$0xff]  }
 0x696   :  { %v10662_v1 = vadd.f32 %v19648_v3, %v10476_v50  ;;  %v10478_v17 = vpop.f32.mrb[2].mxu0 }
 0x697   :  { %v10663_v32 = vadd.f32 %v19645_v23, %v10478_v17  ;;  %v10480_v11 = vpop.f32.mrb[3].mxu0  ;;  %v10693_v0 = vmax.f32 %v10661_v49, 0.0 }
 0x698   :  { %v10664_v15 = vadd.f32 %v19648_v3, %v10480_v11  ;;  %v10694_v52 = vmax.f32 %v10662_v1, 0.0  ;;  %v14452_v1 = vld [vmem:[#allocation12 + $0x164] ss:$8 sps:$4 sm:$0xff]  }
 0x699   :  { %v10695_v41 = vmax.f32 %v10663_v32, 0.0 }
 0x69a   :  { %v10696_v53 = vmax.f32 %v10664_v15, 0.0 }
 0x69b   :  { %v10725_v8 = vpack.c.bf16 %v10695_v41, %v10693_v0  ;;  %v14450_v41 = vld [vmem:[#allocation12 + $0x160] ss:$8 sps:$4 sm:$0xff]  }
 0x69c   :  { %v10726_v6 = vpack.c.bf16 %v10696_v53, %v10694_v52  ;;  %v10484_v56 = vpop.f32.mrb[4].mxu0 }
 0x69d   :  { %v10665_v45 = vadd.f32 %v19645_v23, %v10484_v56  ;;  %v10486_v46 = vpop.f32.mrb[5].mxu0 }
 0x69e   :  { %v10666_v10 = vadd.f32 %v19648_v3, %v10486_v46  ;;  %v10488_v42 = vpop.f32.mrb[6].mxu0  ;;  %10983 = vmatprep.mubr.bf16.mxu1 %v10726_v6 }
 0x69f   :  { %v10667_v61 = vadd.f32 %v19645_v23, %v10488_v42  ;;  %v10490_v13 = vpop.f32.mrb[7].mxu0  ;;  %10984 = vmatmul.mubr.bf16.vlgmr.msra.gmra.mrb[192].mxu1 %v10725_v8  ;;  %v10697_v16 = vmax.f32 %v10665_v45, 0.0  ;;  %v14455_v8 = vld [vmem:[#allocation12 + $0x174] ss:$8 sps:$4 sm:$0xff]  }
 0x6a0   :  { %v10668_v9 = vadd.f32 %v19648_v3, %v10490_v13  ;;  %11198 = vmatpush1.bf16.msra.mxu1 %v14432_v36  ;;  %v10698_v2 = vmax.f32 %v10666_v10, 0.0 }
 0x6a1   :  { %v10699_v43 = vmax.f32 %v10667_v61, 0.0  ;;  %11199 = vmatprep.subr.bf16.mxu1 %v14437_v12  ;;  %v14453_v12 = vld [vmem:[#allocation12 + $0x170] ss:$8 sps:$4 sm:$0xff]   ;;  %v14458_v61 = vld [vmem:[#allocation12 + $0x184] ss:$8 sps:$4 sm:$0xff]  }
 0x6a2   :  { %v10700_v48 = vmax.f32 %v10668_v9, 0.0 }
 0x6a3   :  { %v19658_v31 = vpack.c.bf16 %v10699_v43, %v10697_v16 }
 0x6a4   :  { %v10728_v44 = vpack.c.bf16 %v10700_v48, %v10698_v2  ;;  %11200 = vmatpush1.bf16.msra.mxu1 %v14435_v58  ;;  %v10494_v38 = vpop.f32.mrb[8].mxu0 }
 0x6a5   :  { %v10669_v19 = vadd.f32 %v19645_v23, %v10494_v38  ;;  %v10496_v60 = vpop.f32.mrb[9].mxu0  ;;  %11201 = vmatprep.subr.bf16.mxu1 %v14440_v29  ;;  %v14456_v29 = vld [vmem:[#allocation12 + $0x180] ss:$8 sps:$4 sm:$0xff]  }
 0x6a6   :  { %v10670_v47 = vadd.f32 %v19648_v3, %v10496_v60  ;;  %v10498_v22 = vpop.f32.mrb[10].mxu0  ;;  %11229 = vmatprep.mubr.bf16.mxu1 %v10728_v44  ;;  %v14461_v44 = vld [vmem:[#allocation12 + $0x194] ss:$8 sps:$4 sm:$0xff]  }
 0x6a7   :  { %v10671_v57 = vadd.f32 %v19645_v23, %v10498_v22  ;;  %v10500_v62 = vpop.f32.mrb[11].mxu0  ;;  %v10701_v25 = vmax.f32 %v10669_v19, 0.0 }
 0x6a8   :  { %v10672_v28 = vadd.f32 %v19648_v3, %v10500_v62  ;;  %11202 = vmatpush1.bf16.msra.mxu1 %v14438_v55  ;;  %v10702_v4 = vmax.f32 %v10670_v47, 0.0  ;;  %v14459_v47 = vld [vmem:[#allocation12 + $0x190] ss:$8 sps:$4 sm:$0xff]   ;;  %v14464_v62 = vld [vmem:[#allocation12 + $0x1a4] ss:$8 sps:$4 sm:$0xff]  }
 0x6a9   :  { %v10703_v59 = vmax.f32 %v10671_v57, 0.0  ;;  %11203 = vmatprep.subr.bf16.mxu1 %v14443_v37 }
 0x6aa   :  { %v10704_v24 = vmax.f32 %v10672_v28, 0.0 }
 0x6ab   :  { %v19664_v21 = vpack.c.bf16 %v10703_v59, %v10701_v25 }
 0x6ac   :  { %v19666_v27 = vpack.c.bf16 %v10704_v24, %v10702_v4  ;;  %11204 = vmatpush1.bf16.msra.mxu1 %v14441_v20  ;;  %v10504_v26 = vpop.f32.mrb[12].mxu0  ;;  %v14462_v4 = vld [vmem:[#allocation12 + $0x1a0] ss:$8 sps:$4 sm:$0xff]  }
 0x6ad   :  { %v10673_v40 = vadd.f32 %v19645_v23, %v10504_v26  ;;  %v10506_v14 = vpop.f32.mrb[13].mxu0  ;;  %11205 = vmatprep.subr.bf16.mxu1 %v14446_v34 }
 0x6ae   :  { %v10674_v51 = vadd.f32 %v19648_v3, %v10506_v14  ;;  %v10508_v18 = vpop.f32.mrb[14].mxu0 }
 0x6af   :  { %v10675_v39 = vadd.f32 %v19645_v23, %v10508_v18  ;;  %v10510_v63 = vpop.f32.mrb[15].mxu0  ;;  %v10705_v49 = vmax.f32 %v10673_v40, 0.0 }
 0x6b0   :  { %v10676_v7 = vadd.f32 %v19648_v3, %v10510_v63  ;;  %11206 = vmatpush1.bf16.msra.mxu1 %v14444_v35  ;;  %v10706_v17 = vmax.f32 %v10674_v51, 0.0  ;;  %v14467_v35 = vld [vmem:[#allocation12 + $0x1b4] ss:$8 sps:$4 sm:$0xff]  }
 0x6b1   :  { %v10707_v50 = vmax.f32 %v10675_v39, 0.0  ;;  %11207 = vmatprep.subr.bf16.mxu1 %v14449_v5  ;;  %v14465_v39 = vld [vmem:[#allocation12 + $0x1b0] ss:$8 sps:$4 sm:$0xff]  }
 0x6b2   :  { %v10708_v32 = vmax.f32 %v10676_v7, 0.0 }
 0x6b3   :  { %v19672_v11 = vpack.c.bf16 %v10707_v50, %v10705_v49 }
 0x6b4   :  { %v19674_v15 = vpack.c.bf16 %v10708_v32, %v10706_v17  ;;  %11208 = vmatpush1.bf16.msra.mxu1 %v14447_v54  ;;  %v10514_v0 = vpop.f32.mrb[16].mxu0  ;;  %v14470_v54 = vld [vmem:[#allocation12 + $0x1c4] ss:$8 sps:$4 sm:$0xff]  }
 0x6b5   :  { %v10677_v52 = vadd.f32 %v19645_v23, %v10514_v0  ;;  %v10516_v53 = vpop.f32.mrb[17].mxu0  ;;  %11209 = vmatprep.subr.bf16.mxu1 %v14452_v1  ;;  %v14468_v0 = vld [vmem:[#allocation12 + $0x1c0] ss:$8 sps:$4 sm:$0xff]  }
 0x6b6   :  { %v10678_v6 = vadd.f32 %v19648_v3, %v10516_v53  ;;  %v10518_v56 = vpop.f32.mrb[18].mxu0  ;;  %v14473_v53 = vld [vmem:[#allocation12 + $0x1d4] ss:$8 sps:$4 sm:$0xff]  }
 0x6b7   :  { %v10679_v36 = vadd.f32 %v19645_v23, %v10518_v56  ;;  %v10520_v45 = vpop.f32.mrb[19].mxu0  ;;  %v10709_v10 = vmax.f32 %v10677_v52, 0.0 }
 0x6b8   :  { %v10680_v46 = vadd.f32 %v19648_v3, %v10520_v45  ;;  %11210 = vmatpush1.bf16.msra.mxu1 %v14450_v41  ;;  %v10710_v13 = vmax.f32 %v10678_v6, 0.0 }
 0x6b9   :  { %v10711_v42 = vmax.f32 %v10679_v36, 0.0  ;;  %11211 = vmatprep.subr.bf16.mxu1 %v14455_v8 }
 0x6ba   :  { %v10712_v9 = vmax.f32 %v10680_v46, 0.0  ;;  %v14471_v46 = vld [vmem:[#allocation12 + $0x1d0] ss:$8 sps:$4 sm:$0xff]  }
 0x6bb   :  { %v19680_v58 = vpack.c.bf16 %v10711_v42, %v10709_v10  ;;  %v14476_v42 = vld [vmem:[#allocation12 + $0x1e4] ss:$8 sps:$4 sm:$0xff]  }
 0x6bc   :  { %v19682_v16 = vpack.c.bf16 %v10712_v9, %v10710_v13  ;;  %11212 = vmatpush1.bf16.msra.mxu1 %v14453_v12  ;;  %v10524_v43 = vpop.f32.mrb[20].mxu0 }
 0x6bd   :  { %v10681_v2 = vadd.f32 %v19645_v23, %v10524_v43  ;;  %v10526_v48 = vpop.f32.mrb[21].mxu0  ;;  %11213 = vmatprep.subr.bf16.mxu1 %v14458_v61 }
 0x6be   :  { %v10682_v38 = vadd.f32 %v19648_v3, %v10526_v48  ;;  %v10528_v55 = vpop.f32.mrb[22].mxu0  ;;  %v14480_v48 = vld [vmem:[#allocation12 + $0x200] ss:$8 sps:$4 sm:$0xff]  }
 0x6bf   :  { %v10683_v19 = vadd.f32 %v19645_v23, %v10528_v55  ;;  %v10530_v60 = vpop.f32.mrb[23].mxu0  ;;  %v10713_v22 = vmax.f32 %v10681_v2, 0.0  ;;  %v14479_v2 = vld [vmem:[#allocation12 + $0x1f4] ss:$8 sps:$4 sm:$0xff]   ;;  %v14488_v55 = vld [vmem:[#allocation12 + $0x224] ss:$8 sps:$4 sm:$0xff]  }
 0x6c0   :  { %v10684_v37 = vadd.f32 %v19648_v3, %v10530_v60  ;;  %11214 = vmatpush1.bf16.msra.mxu1 %v14456_v29  ;;  %v10714_v28 = vmax.f32 %v10682_v38, 0.0  ;;  %v14474_v29 = vld [vmem:[#allocation12 + $0x1e0] ss:$8 sps:$4 sm:$0xff]   ;;  %v14483_v38 = vld [vmem:[#allocation12 + $0x210] ss:$8 sps:$4 sm:$0xff]  }
 0x6c1   :  { %v10715_v57 = vmax.f32 %v10683_v19, 0.0  ;;  %11215 = vmatprep.subr.bf16.mxu1 %v14461_v44  ;;  %v14485_v44 = vld [vmem:[#allocation12 + $0x214] ss:$8 sps:$4 sm:$0xff]   ;;  %v14486_v19 = vld [vmem:[#allocation12 + $0x220] ss:$8 sps:$4 sm:$0xff]  }
 0x6c2   :  { %v10716_v20 = vmax.f32 %v10684_v37, 0.0  ;;  %v14491_v60 = vld [vmem:[#allocation12 + $0x234] ss:$8 sps:$4 sm:$0xff]   ;;  %v14489_v37 = vld [vmem:[#allocation12 + $0x230] ss:$8 sps:$4 sm:$0xff]  }
 0x6c3   :  { %v19688_v25 = vpack.c.bf16 %v10715_v57, %v10713_v22  ;;  %v14492_v22 = vld [vmem:[#allocation12 + $0x240] ss:$8 sps:$4 sm:$0xff]   ;;  %v14497_v57 = vld [vmem:[#allocation12 + $0x254] ss:$8 sps:$4 sm:$0xff]  }
 0x6c4   :  { %v19690_v59 = vpack.c.bf16 %v10716_v20, %v10714_v28  ;;  %11216 = vmatpush1.bf16.msra.mxu1 %v14459_v47  ;;  %v10534_v34 = vpop.f32.mrb[24].mxu0  ;;  %v14494_v47 = vld [vmem:[#allocation12 + $0x244] ss:$8 sps:$4 sm:$0xff]   ;;  %v14503_v28 = vld [vmem:[#allocation12 + $0x274] ss:$8 sps:$4 sm:$0xff]  }
 0x6c5   :  { %v10685_v24 = vadd.f32 %v19645_v23, %v10534_v34  ;;  %v10536_v26 = vpop.f32.mrb[25].mxu0  ;;  %11217 = vmatprep.subr.bf16.mxu1 %v14464_v62  ;;  %v14500_v62 = vld [vmem:[#allocation12 + $0x264] ss:$8 sps:$4 sm:$0xff]   ;;  %v14501_v20 = vld [vmem:[#allocation12 + $0x270] ss:$8 sps:$4 sm:$0xff]  }
 0x6c6   :  { %v10686_v40 = vadd.f32 %v19648_v3, %v10536_v26  ;;  %v10538_v14 = vpop.f32.mrb[26].mxu0  ;;  %v14506_v34 = vld [vmem:[#allocation12 + $0x284] ss:$8 sps:$4 sm:$0xff]   ;;  %v14507_v26 = vld [vmem:[#allocation12 + $0x290] ss:$8 sps:$4 sm:$0xff]  }
 0x6c7   :  { %v10687_v5 = vadd.f32 %v19645_v23, %v10538_v14  ;;  %v10540_v51 = vpop.f32.mrb[27].mxu0  ;;  %v10717_v63 = vmax.f32 %v10685_v24, 0.0  ;;  %v14509_v24 = vld [vmem:[#allocation12 + $0x294] ss:$8 sps:$4 sm:$0xff]  }
 0x6c8   :  { %v10688_v18 = vadd.f32 %v19648_v3, %v10540_v51  ;;  %11218 = vmatpush1.bf16.msra.mxu1 %v14462_v4  ;;  %v10718_v49 = vmax.f32 %v10686_v40, 0.0  ;;  %v14504_v4 = vld [vmem:[#allocation12 + $0x280] ss:$8 sps:$4 sm:$0xff]   ;;  %v14515_v14 = vld [vmem:[#allocation12 + $0x2b4] ss:$8 sps:$4 sm:$0xff]  }
 0x6c9   :  { %v10719_v7 = vmax.f32 %v10687_v5, 0.0  ;;  %11219 = vmatprep.subr.bf16.mxu1 %v14467_v35  ;;  %v14512_v35 = vld [vmem:[#allocation12 + $0x2a4] ss:$8 sps:$4 sm:$0xff]   ;;  %v14510_v40 = vld [vmem:[#allocation12 + $0x2a0] ss:$8 sps:$4 sm:$0xff]  }
 0x6ca   :  { %v10720_v50 = vmax.f32 %v10688_v18, 0.0  ;;  %v14513_v5 = vld [vmem:[#allocation12 + $0x2b0] ss:$8 sps:$4 sm:$0xff]   ;;  %v14518_v51 = vld [vmem:[#allocation12 + $0x2c4] ss:$8 sps:$4 sm:$0xff]  }
 0x6cb   :  { %v19696_v1 = vpack.c.bf16 %v10719_v7, %v10717_v63  ;;  %v14516_v18 = vld [vmem:[#allocation12 + $0x2c0] ss:$8 sps:$4 sm:$0xff]   ;;  %v14519_v63 = vld [vmem:[#allocation12 + $0x2d0] ss:$8 sps:$4 sm:$0xff]   ;;  %v14524_v7 = vld [vmem:[#allocation12 + $0x2e4] ss:$8 sps:$4 sm:$0xff]  }
 0x6cc   :  { %v19698_v17 = vpack.c.bf16 %v10720_v50, %v10718_v49  ;;  %11220 = vmatpush1.bf16.msra.mxu1 %v14465_v39  ;;  %v10544_v32 = vpop.f32.mrb[28].mxu0  ;;  %v14521_v39 = vld [vmem:[#allocation12 + $0x2d4] ss:$8 sps:$4 sm:$0xff]   ;;  %v14525_v50 = vld [vmem:[#allocation12 + $0x2f0] ss:$8 sps:$4 sm:$0xff]  }
 0x6cd   :  { %v10689_v41 = vadd.f32 %v19645_v23, %v10544_v32  ;;  %v10546_v52 = vpop.f32.mrb[29].mxu0  ;;  %11221 = vmatprep.subr.bf16.mxu1 %v14470_v54  ;;  %v14522_v54 = vld [vmem:[#allocation12 + $0x2e0] ss:$8 sps:$4 sm:$0xff]   ;;  %v14527_v49 = vld [vmem:[#allocation12 + $0x2f4] ss:$8 sps:$4 sm:$0xff]  }
 0x6ce   :  { %v10690_v8 = vadd.f32 %v19648_v3, %v10546_v52  ;;  %v10548_v6 = vpop.f32.mrb[30].mxu0  ;;  %v14530_v32 = vld [vmem:[#allocation12 + $0x304] ss:$8 sps:$4 sm:$0xff]   ;;  %v14531_v52 = vld [vmem:[#allocation12 + $0x310] ss:$8 sps:$4 sm:$0xff]  }
 0x6cf   :  { %v10691_v56 = vadd.f32 %v19645_v23, %v10548_v6  ;;  %v10550_v36 = vpop.f32.mrb[31].mxu0  ;;  %v10721_v12 = vmax.f32 %v10689_v41, 0.0  ;;  %v14477_v23 = vld [vmem:[#allocation12 + $0x1f0] ss:$8 sps:$4 sm:$0xff]   ;;  %v14533_v41 = vld [vmem:[#allocation12 + $0x314] ss:$8 sps:$4 sm:$0xff]  }
 0x6d0   :  { %v10692_v45 = vadd.f32 %v19648_v3, %v10550_v36  ;;  %11222 = vmatpush1.bf16.msra.mxu1 %v14468_v0  ;;  %v10722_v61 = vmax.f32 %v10690_v8, 0.0  ;;  %v14482_v3 = vld [vmem:[#allocation12 + $0x204] ss:$8 sps:$4 sm:$0xff]   ;;  %v14528_v0 = vld [vmem:[#allocation12 + $0x300] ss:$8 sps:$4 sm:$0xff]  }
 0x6d1   :  { %v10723_v10 = vmax.f32 %v10691_v56, 0.0  ;;  %11223 = vmatprep.subr.bf16.mxu1 %v14473_v53  ;;  %v14536_v53 = vld [vmem:[#allocation12 + $0x324] ss:$8 sps:$4 sm:$0xff]   ;;  %v14534_v8 = vld [vmem:[#allocation12 + $0x320] ss:$8 sps:$4 sm:$0xff]  }
 0x6d2   :  { %v10724_v13 = vmax.f32 %v10692_v45, 0.0  ;;  %v14539_v6 = vld [vmem:[#allocation12 + $0x334] ss:$8 sps:$4 sm:$0xff]   ;;  %v14537_v56 = vld [vmem:[#allocation12 + $0x330] ss:$8 sps:$4 sm:$0xff]  }
 0x6d3   :  { %v19704_v9 = vpack.c.bf16 %v10723_v10, %v10721_v12  ;;  %v14542_v36 = vld [vmem:[#allocation12 + $0x344] ss:$8 sps:$4 sm:$0xff]   ;;  %v14540_v45 = vld [vmem:[#allocation12 + $0x340] ss:$8 sps:$4 sm:$0xff]   ;;  %v14551_v10 = vld [vmem:[#allocation12 + $0x374] ss:$8 sps:$4 sm:$0xff]  }
 0x6d4   :  { %v19706_v43 = vpack.c.bf16 %v10724_v13, %v10722_v61  ;;  %11224 = vmatpush1.bf16.msra.mxu1 %v14471_v46  ;;  %v14545_v46 = vld [vmem:[#allocation12 + $0x354] ss:$8 sps:$4 sm:$0xff]   ;;  %v14548_v12 = vld [vmem:[#allocation12 + $0x364] ss:$8 sps:$4 sm:$0xff]   ;;  %v14552_v13 = vld [vmem:[#allocation12 + $0x380] ss:$8 sps:$4 sm:$0xff]  }
 0x6d5   :  { %11225 = vmatprep.subr.bf16.mxu1 %v14476_v42  ;;  %v14549_v42 = vld [vmem:[#allocation12 + $0x370] ss:$8 sps:$4 sm:$0xff]   ;;  %v14554_v61 = vld [vmem:[#allocation12 + $0x384] ss:$8 sps:$4 sm:$0xff]  }
 0x6d8   :  { %11226 = vmatpush1.bf16.msra.mxu1 %v14474_v29  ;;  %v14557_v29 = vld [vmem:[#allocation12 + $0x394] ss:$8 sps:$4 sm:$0xff]  }
 0x6d9   :  { %11227 = vmatprep.subr.bf16.mxu1 %v14479_v2  ;;  %v14555_v2 = vld [vmem:[#allocation12 + $0x390] ss:$8 sps:$4 sm:$0xff]  }
 0x6dc   :  { %11228 = vmatpush1.bf16.msra.mxu1 %v14477_v23  ;;  %v14560_v23 = vld [vmem:[#allocation12 + $0x3a4] ss:$8 sps:$4 sm:$0xff]  }
 0x6dd   :  { %11447 = vmatprep.subr.bf16.mxu1 %v14482_v3  ;;  %v14558_v3 = vld [vmem:[#allocation12 + $0x3a0] ss:$8 sps:$4 sm:$0xff]  }
 0x6df   :  { %11230 = vmatmul.mubr.bf16.vlgmr.msra.gmra.mrb[192].mxu1 %v19658_v31  ;;  %v14495_v31 = vld [vmem:[#allocation12 + $0x250] ss:$8 sps:$4 sm:$0xff]  }
 0x6e0   :  { %11448 = vmatpush1.bf16.msra.mxu1 %v14480_v48  ;;  %11479 = vmatprep.mubr.bf16.mxu1 %v19666_v27  ;;  %v14498_v27 = vld [vmem:[#allocation12 + $0x260] ss:$8 sps:$4 sm:$0xff]   ;;  %v14563_v48 = vld [vmem:[#allocation12 + $0x3b4] ss:$8 sps:$4 sm:$0xff]  }
 0x6e1   :  { %11449 = vmatprep.subr.bf16.mxu1 %v14485_v44  ;;  %v14561_v44 = vld [vmem:[#allocation12 + $0x3b0] ss:$8 sps:$4 sm:$0xff]  }
 0x6e4   :  { %11450 = vmatpush1.bf16.msra.mxu1 %v14483_v38  ;;  %v14566_v38 = vld [vmem:[#allocation12 + $0x3c4] ss:$8 sps:$4 sm:$0xff]  }
 0x6e5   :  { %11451 = vmatprep.subr.bf16.mxu1 %v14488_v55  ;;  %v14564_v55 = vld [vmem:[#allocation12 + $0x3c0] ss:$8 sps:$4 sm:$0xff]  }
 0x6e8   :  { %11452 = vmatpush1.bf16.msra.mxu1 %v14486_v19  ;;  %v14569_v19 = vld [vmem:[#allocation12 + $0x3d4] ss:$8 sps:$4 sm:$0xff]  }
 0x6e9   :  { %11453 = vmatprep.subr.bf16.mxu1 %v14491_v60  ;;  %v14567_v60 = vld [vmem:[#allocation12 + $0x3d0] ss:$8 sps:$4 sm:$0xff]  }
 0x6ec   :  { %11454 = vmatpush1.bf16.msra.mxu1 %v14489_v37  ;;  %v14572_v37 = vld [vmem:[#allocation12 + $0x3e4] ss:$8 sps:$4 sm:$0xff]  }
 0x6ed   :  { %11455 = vmatprep.subr.bf16.mxu1 %v14494_v47  ;;  %v14570_v47 = vld [vmem:[#allocation12 + $0x3e0] ss:$8 sps:$4 sm:$0xff]  }
 0x6f0   :  { %11456 = vmatpush1.bf16.msra.mxu1 %v14492_v22  ;;  %v14575_v22 = vld [vmem:[#allocation12 + $0x3f4] ss:$8 sps:$4 sm:$0xff]  }
 0x6f1   :  { %11457 = vmatprep.subr.bf16.mxu1 %v14497_v57  ;;  %v14573_v57 = vld [vmem:[#allocation12 + $0x3f0] ss:$8 sps:$4 sm:$0xff]  }
 0x6f4   :  { %11458 = vmatpush1.bf16.msra.mxu1 %v14495_v31  ;;  %v14578_v31 = vld [vmem:[#allocation12 + $0x404] ss:$8 sps:$4 sm:$0xff]  }
 0x6f5   :  { %11459 = vmatprep.subr.bf16.mxu1 %v14500_v62  ;;  %v14576_v62 = vld [vmem:[#allocation12 + $0x400] ss:$8 sps:$4 sm:$0xff]  }
 0x6f8   :  { %11460 = vmatpush1.bf16.msra.mxu1 %v14498_v27  ;;  %v14581_v27 = vld [vmem:[#allocation12 + $0x414] ss:$8 sps:$4 sm:$0xff]  }
 0x6f9   :  { %11461 = vmatprep.subr.bf16.mxu1 %v14503_v28  ;;  %v14579_v28 = vld [vmem:[#allocation12 + $0x410] ss:$8 sps:$4 sm:$0xff]  }
 0x6fc   :  { %11462 = vmatpush1.bf16.msra.mxu1 %v14501_v20  ;;  %v14584_v20 = vld [vmem:[#allocation12 + $0x424] ss:$8 sps:$4 sm:$0xff]  }
 0x6fd   :  { %11463 = vmatprep.subr.bf16.mxu1 %v14506_v34  ;;  %v14582_v34 = vld [vmem:[#allocation12 + $0x420] ss:$8 sps:$4 sm:$0xff]  }
 0x700   :  { %11464 = vmatpush1.bf16.msra.mxu1 %v14504_v4  ;;  %v14587_v4 = vld [vmem:[#allocation12 + $0x434] ss:$8 sps:$4 sm:$0xff]  }
 0x701   :  { %11465 = vmatprep.subr.bf16.mxu1 %v14509_v24  ;;  %v14585_v24 = vld [vmem:[#allocation12 + $0x430] ss:$8 sps:$4 sm:$0xff]  }
 0x704   :  { %11466 = vmatpush1.bf16.msra.mxu1 %v14507_v26  ;;  %v14590_v26 = vld [vmem:[#allocation12 + $0x444] ss:$8 sps:$4 sm:$0xff]  }
 0x705   :  { %11467 = vmatprep.subr.bf16.mxu1 %v14512_v35  ;;  %v14588_v35 = vld [vmem:[#allocation12 + $0x440] ss:$8 sps:$4 sm:$0xff]  }
 0x708   :  { %11468 = vmatpush1.bf16.msra.mxu1 %v14510_v40  ;;  %v14593_v40 = vld [vmem:[#allocation12 + $0x454] ss:$8 sps:$4 sm:$0xff]  }
 0x709   :  { %11469 = vmatprep.subr.bf16.mxu1 %v14515_v14  ;;  %v14596_v14 = vld [vmem:[#allocation12 + $0x464] ss:$8 sps:$4 sm:$0xff]  }
 0x70c   :  { %11470 = vmatpush1.bf16.msra.mxu1 %v14513_v5  ;;  %v14599_v5 = vld [vmem:[#allocation12 + $0x474] ss:$8 sps:$4 sm:$0xff]  }
 0x70d   :  { %11471 = vmatprep.subr.bf16.mxu1 %v14518_v51  ;;  %v14597_v51 = vld [vmem:[#allocation12 + $0x470] ss:$8 sps:$4 sm:$0xff]  }
 0x710   :  { %11472 = vmatpush1.bf16.msra.mxu1 %v14516_v18  ;;  %v14602_v18 = vld [vmem:[#allocation12 + $0x484] ss:$8 sps:$4 sm:$0xff]  }
 0x711   :  { %11473 = vmatprep.subr.bf16.mxu1 %v14521_v39  ;;  %v14600_v39 = vld [vmem:[#allocation12 + $0x480] ss:$8 sps:$4 sm:$0xff]  }
 0x714   :  { %11474 = vmatpush1.bf16.msra.mxu1 %v14519_v63  ;;  %v14605_v63 = vld [vmem:[#allocation12 + $0x494] ss:$8 sps:$4 sm:$0xff]  }
 0x715   :  { %11475 = vmatprep.subr.bf16.mxu1 %v14524_v7  ;;  %v14603_v7 = vld [vmem:[#allocation12 + $0x490] ss:$8 sps:$4 sm:$0xff]  }
 0x718   :  { %11476 = vmatpush1.bf16.msra.mxu1 %v14522_v54  ;;  %v14608_v54 = vld [vmem:[#allocation12 + $0x4a4] ss:$8 sps:$4 sm:$0xff]  }
 0x719   :  { %11477 = vmatprep.subr.bf16.mxu1 %v14527_v49  ;;  %v14606_v49 = vld [vmem:[#allocation12 + $0x4a0] ss:$8 sps:$4 sm:$0xff]  }
 0x71c   :  { %11478 = vmatpush1.bf16.msra.mxu1 %v14525_v50  ;;  %v14611_v50 = vld [vmem:[#allocation12 + $0x4b4] ss:$8 sps:$4 sm:$0xff]  }
 0x71d   :  { %11697 = vmatprep.subr.bf16.mxu1 %v14530_v32  ;;  %v14609_v32 = vld [vmem:[#allocation12 + $0x4b0] ss:$8 sps:$4 sm:$0xff]  }
 0x71f   :  { %11480 = vmatmul.mubr.bf16.vlgmr.msra.gmra.mrb[192].mxu1 %v19664_v21  ;;  %v14543_v21 = vld [vmem:[#allocation12 + $0x350] ss:$8 sps:$4 sm:$0xff]  }
 0x720   :  { %11698 = vmatpush1.bf16.msra.mxu1 %v14528_v0  ;;  %11729 = vmatprep.mubr.bf16.mxu1 %v19674_v15  ;;  %v14546_v15 = vld [vmem:[#allocation12 + $0x360] ss:$8 sps:$4 sm:$0xff]   ;;  %v14614_v0 = vld [vmem:[#allocation12 + $0x4c4] ss:$8 sps:$4 sm:$0xff]  }
 0x721   :  { %11699 = vmatprep.subr.bf16.mxu1 %v14533_v41  ;;  %v14612_v41 = vld [vmem:[#allocation12 + $0x4c0] ss:$8 sps:$4 sm:$0xff]  }
 0x724   :  { %11700 = vmatpush1.bf16.msra.mxu1 %v14531_v52  ;;  %v14617_v52 = vld [vmem:[#allocation12 + $0x4d4] ss:$8 sps:$4 sm:$0xff]  }
 0x725   :  { %11701 = vmatprep.subr.bf16.mxu1 %v14536_v53  ;;  %v14615_v53 = vld [vmem:[#allocation12 + $0x4d0] ss:$8 sps:$4 sm:$0xff]  }
 0x728   :  { %11702 = vmatpush1.bf16.msra.mxu1 %v14534_v8  ;;  %v14620_v8 = vld [vmem:[#allocation12 + $0x4e4] ss:$8 sps:$4 sm:$0xff]  }
 0x729   :  { %11703 = vmatprep.subr.bf16.mxu1 %v14539_v6  ;;  %v14618_v6 = vld [vmem:[#allocation12 + $0x4e0] ss:$8 sps:$4 sm:$0xff]  }
 0x72c   :  { %11704 = vmatpush1.bf16.msra.mxu1 %v14537_v56  ;;  %v14623_v56 = vld [vmem:[#allocation12 + $0x4f4] ss:$8 sps:$4 sm:$0xff]  }
 0x72d   :  { %11705 = vmatprep.subr.bf16.mxu1 %v14542_v36  ;;  %v14621_v36 = vld [vmem:[#allocation12 + $0x4f0] ss:$8 sps:$4 sm:$0xff]  }
 0x730   :  { %11706 = vmatpush1.bf16.msra.mxu1 %v14540_v45  ;;  %v14626_v45 = vld [vmem:[#allocation12 + $0x504] ss:$8 sps:$4 sm:$0xff]  }
 0x731   :  { %11707 = vmatprep.subr.bf16.mxu1 %v14545_v46  ;;  %v14624_v46 = vld [vmem:[#allocation12 + $0x500] ss:$8 sps:$4 sm:$0xff]  }
 0x734   :  { %11708 = vmatpush1.bf16.msra.mxu1 %v14543_v21  ;;  %v14629_v21 = vld [vmem:[#allocation12 + $0x514] ss:$8 sps:$4 sm:$0xff]  }
 0x735   :  { %11709 = vmatprep.subr.bf16.mxu1 %v14548_v12  ;;  %v14627_v12 = vld [vmem:[#allocation12 + $0x510] ss:$8 sps:$4 sm:$0xff]  }
 0x738   :  { %11710 = vmatpush1.bf16.msra.mxu1 %v14546_v15  ;;  %v14632_v15 = vld [vmem:[#allocation12 + $0x524] ss:$8 sps:$4 sm:$0xff]  }
 0x739   :  { %11711 = vmatprep.subr.bf16.mxu1 %v14551_v10  ;;  %v14630_v10 = vld [vmem:[#allocation12 + $0x520] ss:$8 sps:$4 sm:$0xff]  }
 0x73c   :  { %11712 = vmatpush1.bf16.msra.mxu1 %v14549_v42  ;;  %v14635_v42 = vld [vmem:[#allocation12 + $0x534] ss:$8 sps:$4 sm:$0xff]  }
 0x73d   :  { %11713 = vmatprep.subr.bf16.mxu1 %v14554_v61  ;;  %v14633_v61 = vld [vmem:[#allocation12 + $0x530] ss:$8 sps:$4 sm:$0xff]  }
 0x740   :  { %11714 = vmatpush1.bf16.msra.mxu1 %v14552_v13  ;;  %v14638_v13 = vld [vmem:[#allocation12 + $0x544] ss:$8 sps:$4 sm:$0xff]  }
 0x741   :  { %11715 = vmatprep.subr.bf16.mxu1 %v14557_v29  ;;  %v14636_v29 = vld [vmem:[#allocation12 + $0x540] ss:$8 sps:$4 sm:$0xff]  }
 0x744   :  { %11716 = vmatpush1.bf16.msra.mxu1 %v14555_v2  ;;  %v14641_v2 = vld [vmem:[#allocation12 + $0x554] ss:$8 sps:$4 sm:$0xff]  }
 0x745   :  { %11717 = vmatprep.subr.bf16.mxu1 %v14560_v23  ;;  %v14644_v23 = vld [vmem:[#allocation12 + $0x564] ss:$8 sps:$4 sm:$0xff]  }
 0x748   :  { %11718 = vmatpush1.bf16.msra.mxu1 %v14558_v3  ;;  %v14647_v3 = vld [vmem:[#allocation12 + $0x574] ss:$8 sps:$4 sm:$0xff]  }
 0x749   :  { %11719 = vmatprep.subr.bf16.mxu1 %v14563_v48  ;;  %v14645_v48 = vld [vmem:[#allocation12 + $0x570] ss:$8 sps:$4 sm:$0xff]  }
 0x74c   :  { %11720 = vmatpush1.bf16.msra.mxu1 %v14561_v44  ;;  %v14650_v44 = vld [vmem:[#allocation12 + $0x584] ss:$8 sps:$4 sm:$0xff]  }
 0x74d   :  { %11721 = vmatprep.subr.bf16.mxu1 %v14566_v38  ;;  %v14648_v38 = vld [vmem:[#allocation12 + $0x580] ss:$8 sps:$4 sm:$0xff]  }
 0x750   :  { %11722 = vmatpush1.bf16.msra.mxu1 %v14564_v55  ;;  %v14653_v55 = vld [vmem:[#allocation12 + $0x594] ss:$8 sps:$4 sm:$0xff]  }
 0x751   :  { %11723 = vmatprep.subr.bf16.mxu1 %v14569_v19  ;;  %v14651_v19 = vld [vmem:[#allocation12 + $0x590] ss:$8 sps:$4 sm:$0xff]  }
 0x754   :  { %11724 = vmatpush1.bf16.msra.mxu1 %v14567_v60  ;;  %v14656_v60 = vld [vmem:[#allocation12 + $0x5a4] ss:$8 sps:$4 sm:$0xff]  }
 0x755   :  { %11725 = vmatprep.subr.bf16.mxu1 %v14572_v37  ;;  %v14654_v37 = vld [vmem:[#allocation12 + $0x5a0] ss:$8 sps:$4 sm:$0xff]  }
 0x758   :  { %11726 = vmatpush1.bf16.msra.mxu1 %v14570_v47  ;;  %v14659_v47 = vld [vmem:[#allocation12 + $0x5b4] ss:$8 sps:$4 sm:$0xff]  }
 0x759   :  { %11727 = vmatprep.subr.bf16.mxu1 %v14575_v22  ;;  %v14657_v22 = vld [vmem:[#allocation12 + $0x5b0] ss:$8 sps:$4 sm:$0xff]  }
 0x75c   :  { %11728 = vmatpush1.bf16.msra.mxu1 %v14573_v57  ;;  %v14662_v57 = vld [vmem:[#allocation12 + $0x5c4] ss:$8 sps:$4 sm:$0xff]  }
 0x75d   :  { %11947 = vmatprep.subr.bf16.mxu1 %v14578_v31  ;;  %v14660_v31 = vld [vmem:[#allocation12 + $0x5c0] ss:$8 sps:$4 sm:$0xff]  }
 0x75f   :  { %11730 = vmatmul.mubr.bf16.vlgmr.msra.gmra.mrb[192].mxu1 %v19672_v11  ;;  %v14591_v11 = vld [vmem:[#allocation12 + $0x450] ss:$8 sps:$4 sm:$0xff]  }
 0x760   :  { %11948 = vmatpush1.bf16.msra.mxu1 %v14576_v62  ;;  %11979 = vmatprep.mubr.bf16.mxu1 %v19682_v16  ;;  %v14594_v16 = vld [vmem:[#allocation12 + $0x460] ss:$8 sps:$4 sm:$0xff]   ;;  %v14665_v62 = vld [vmem:[#allocation12 + $0x5d4] ss:$8 sps:$4 sm:$0xff]  }
 0x761   :  { %11949 = vmatprep.subr.bf16.mxu1 %v14581_v27  ;;  %v14663_v27 = vld [vmem:[#allocation12 + $0x5d0] ss:$8 sps:$4 sm:$0xff]  }
 0x764   :  { %11950 = vmatpush1.bf16.msra.mxu1 %v14579_v28  ;;  %v14668_v28 = vld [vmem:[#allocation12 + $0x5e4] ss:$8 sps:$4 sm:$0xff]  }
 0x765   :  { %11951 = vmatprep.subr.bf16.mxu1 %v14584_v20  ;;  %v14666_v20 = vld [vmem:[#allocation12 + $0x5e0] ss:$8 sps:$4 sm:$0xff]  }
 0x768   :  { %11952 = vmatpush1.bf16.msra.mxu1 %v14582_v34  ;;  %v14671_v34 = vld [vmem:[#allocation12 + $0x5f4] ss:$8 sps:$4 sm:$0xff]  }
 0x769   :  { %11953 = vmatprep.subr.bf16.mxu1 %v14587_v4  ;;  %v14669_v4 = vld [vmem:[#allocation12 + $0x5f0] ss:$8 sps:$4 sm:$0xff]  }
 0x76c   :  { %11954 = vmatpush1.bf16.msra.mxu1 %v14585_v24  ;;  %v14674_v24 = vld [vmem:[#allocation12 + $0x604] ss:$8 sps:$4 sm:$0xff]  }
 0x76d   :  { %11955 = vmatprep.subr.bf16.mxu1 %v14590_v26  ;;  %v14672_v26 = vld [vmem:[#allocation12 + $0x600] ss:$8 sps:$4 sm:$0xff]  }
 0x770   :  { %11956 = vmatpush1.bf16.msra.mxu1 %v14588_v35  ;;  %v14677_v35 = vld [vmem:[#allocation12 + $0x614] ss:$8 sps:$4 sm:$0xff]  }
 0x771   :  { %11957 = vmatprep.subr.bf16.mxu1 %v14593_v40  ;;  %v14768_v40 = vld [vmem:[%s19790_s7 + $0x40] sm:$0xff]  }
 0x772   :  { %13913 = vmatprep.subr.bf16.mxu0 %v14768_v40  ;;  %v14749_v40 = vld [vmem:[#allocation12 + $0x794] ss:$8 sps:$4 sm:$0xff]  }
 0x774   :  { %11958 = vmatpush1.bf16.msra.mxu1 %v14591_v11  ;;  %v14769_v11 = vld [vmem:[%s19790_s7] sm:$0xff]  }
 0x775   :  { %11959 = vmatprep.subr.bf16.mxu1 %v14596_v14  ;;  %v14770_v14 = vld [vmem:[%s19790_s7 + $0x48] sm:$0xff]   ;;  %13914 = vmatpush3.bf16.msra.mxu0 %v14769_v11  ;;  %v14747_v11 = vld [vmem:[#allocation12 + $0x790] ss:$8 sps:$4 sm:$0xff]  }
 0x776   :  { %13915 = vmatprep.subr.bf16.mxu0 %v14770_v14  ;;  %v14752_v14 = vld [vmem:[#allocation12 + $0x7a4] ss:$8 sps:$4 sm:$0xff]  }
 0x778   :  { %11960 = vmatpush1.bf16.msra.mxu1 %v14594_v16  ;;  %v14675_v16 = vld [vmem:[#allocation12 + $0x610] ss:$8 sps:$4 sm:$0xff]  }
 0x779   :  { %11961 = vmatprep.subr.bf16.mxu1 %v14599_v5  ;;  %v14680_v5 = vld [vmem:[#allocation12 + $0x624] ss:$8 sps:$4 sm:$0xff]  }
 0x77c   :  { %11962 = vmatpush1.bf16.msra.mxu1 %v14597_v51  ;;  %v14772_v51 = vld [vmem:[%s19790_s7 + $0x50] sm:$0xff]  }
 0x77d   :  { %11963 = vmatprep.subr.bf16.mxu1 %v14602_v18  ;;  %v14678_v18 = vld [vmem:[#allocation12 + $0x620] ss:$8 sps:$4 sm:$0xff]  }
 0x780   :  { %11964 = vmatpush1.bf16.msra.mxu1 %v14600_v39  ;;  %v14683_v39 = vld [vmem:[#allocation12 + $0x634] ss:$8 sps:$4 sm:$0xff]  }
 0x781   :  { %11965 = vmatprep.subr.bf16.mxu1 %v14605_v63  ;;  %v14774_v63 = vld [vmem:[%s19790_s7 + $0x58] sm:$0xff]  }
 0x784   :  { %11966 = vmatpush1.bf16.msra.mxu1 %v14603_v7  ;;  %v14681_v7 = vld [vmem:[#allocation12 + $0x630] ss:$8 sps:$4 sm:$0xff]  }
 0x785   :  { %11967 = vmatprep.subr.bf16.mxu1 %v14608_v54  ;;  %v14686_v54 = vld [vmem:[#allocation12 + $0x644] ss:$8 sps:$4 sm:$0xff]  }
 0x788   :  { %11968 = vmatpush1.bf16.msra.mxu1 %v14606_v49  ;;  %v14775_v49 = vld [vmem:[%s19790_s7 + $0x18] sm:$0xff]  }
 0x789   :  { %11969 = vmatprep.subr.bf16.mxu1 %v14611_v50  ;;  %v14776_v50 = vld [vmem:[%s19790_s7 + $0x60] sm:$0xff]  }
 0x78c   :  { %11970 = vmatpush1.bf16.msra.mxu1 %v14609_v32  ;;  %v14684_v32 = vld [vmem:[#allocation12 + $0x640] ss:$8 sps:$4 sm:$0xff]  }
 0x78d   :  { %11971 = vmatprep.subr.bf16.mxu1 %v14614_v0  ;;  %v14689_v0 = vld [vmem:[#allocation12 + $0x654] ss:$8 sps:$4 sm:$0xff]  }
 0x790   :  { %11972 = vmatpush1.bf16.msra.mxu1 %v14612_v41  ;;  %v14777_v41 = vld [vmem:[%s19790_s7 + $0x20] sm:$0xff]  }
 0x791   :  { %11973 = vmatprep.subr.bf16.mxu1 %v14617_v52  ;;  %v14778_v52 = vld [vmem:[%s19790_s7 + $0x68] sm:$0xff]  }
 0x794   :  { %11974 = vmatpush1.bf16.msra.mxu1 %v14615_v53  ;;  %v14687_v53 = vld [vmem:[#allocation12 + $0x650] ss:$8 sps:$4 sm:$0xff]  }
 0x795   :  { %11975 = vmatprep.subr.bf16.mxu1 %v14620_v8  ;;  %v14692_v8 = vld [vmem:[#allocation12 + $0x664] ss:$8 sps:$4 sm:$0xff]  }
 0x798   :  { %11976 = vmatpush1.bf16.msra.mxu1 %v14618_v6  ;;  %v14779_v6 = vld [vmem:[%s19790_s7 + $0x28] sm:$0xff]  }
 0x799   :  { %11977 = vmatprep.subr.bf16.mxu1 %v14623_v56  ;;  %v14780_v56 = vld [vmem:[%s19790_s7 + $0x70] sm:$0xff]  }
 0x79c   :  { %11978 = vmatpush1.bf16.msra.mxu1 %v14621_v36  ;;  %v14690_v36 = vld [vmem:[#allocation12 + $0x660] ss:$8 sps:$4 sm:$0xff]  }
 0x79d   :  { %12197 = vmatprep.subr.bf16.mxu1 %v14626_v45  ;;  %v14695_v45 = vld [vmem:[#allocation12 + $0x674] ss:$8 sps:$4 sm:$0xff]  }
 0x79f   :  { %11980 = vmatmul.mubr.bf16.vlgmr.msra.gmra.mrb[192].mxu1 %v19680_v58  ;;  %v14639_v58 = vld [vmem:[#allocation12 + $0x550] ss:$8 sps:$4 sm:$0xff]  }
 0x7a0   :  { %12198 = vmatpush1.bf16.msra.mxu1 %v14624_v46  ;;  %12229 = vmatprep.mubr.bf16.mxu1 %v19690_v59  ;;  %v14642_v59 = vld [vmem:[#allocation12 + $0x560] ss:$8 sps:$4 sm:$0xff]   ;;  %v14781_v46 = vld [vmem:[%s19790_s7 + $0x30] sm:$0xff]  }
 0x7a1   :  { %12199 = vmatprep.subr.bf16.mxu1 %v14629_v21  ;;  %v14693_v21 = vld [vmem:[#allocation12 + $0x670] ss:$8 sps:$4 sm:$0xff]  }
 0x7a4   :  { %12200 = vmatpush1.bf16.msra.mxu1 %v14627_v12  ;;  %v14698_v12 = vld [vmem:[#allocation12 + $0x684] ss:$8 sps:$4 sm:$0xff]  }
 0x7a5   :  { %12201 = vmatprep.subr.bf16.mxu1 %v14632_v15  ;;  %v14696_v15 = vld [vmem:[#allocation12 + $0x680] ss:$8 sps:$4 sm:$0xff]  }
 0x7a8   :  { %12202 = vmatpush1.bf16.msra.mxu1 %v14630_v10  ;;  %v14701_v10 = vld [vmem:[#allocation12 + $0x694] ss:$8 sps:$4 sm:$0xff]  }
 0x7a9   :  { %12203 = vmatprep.subr.bf16.mxu1 %v14635_v42  ;;  %v14699_v42 = vld [vmem:[#allocation12 + $0x690] ss:$8 sps:$4 sm:$0xff]  }
 0x7ac   :  { %12204 = vmatpush1.bf16.msra.mxu1 %v14633_v61  ;;  %v14704_v61 = vld [vmem:[#allocation12 + $0x6a4] ss:$8 sps:$4 sm:$0xff]  }
 0x7ad   :  { %12205 = vmatprep.subr.bf16.mxu1 %v14638_v13  ;;  %v14702_v13 = vld [vmem:[#allocation12 + $0x6a0] ss:$8 sps:$4 sm:$0xff]  }
 0x7b0   :  { %12206 = vmatpush1.bf16.msra.mxu1 %v14636_v29  ;;  %v14707_v29 = vld [vmem:[#allocation12 + $0x6b4] ss:$8 sps:$4 sm:$0xff]  }
 0x7b1   :  { %12207 = vmatprep.subr.bf16.mxu1 %v14641_v2  ;;  %v14705_v2 = vld [vmem:[#allocation12 + $0x6b0] ss:$8 sps:$4 sm:$0xff]  }
 0x7b4   :  { %12208 = vmatpush1.bf16.msra.mxu1 %v14639_v58  ;;  %v14710_v58 = vld [vmem:[#allocation12 + $0x6c4] ss:$8 sps:$4 sm:$0xff]  }
 0x7b5   :  { %12209 = vmatprep.subr.bf16.mxu1 %v14644_v23  ;;  %v14708_v23 = vld [vmem:[#allocation12 + $0x6c0] ss:$8 sps:$4 sm:$0xff]  }
 0x7b8   :  { %12210 = vmatpush1.bf16.msra.mxu1 %v14642_v59  ;;  %v14713_v59 = vld [vmem:[#allocation12 + $0x6d4] ss:$8 sps:$4 sm:$0xff]  }
 0x7b9   :  { %12211 = vmatprep.subr.bf16.mxu1 %v14647_v3  ;;  %v14711_v3 = vld [vmem:[#allocation12 + $0x6d0] ss:$8 sps:$4 sm:$0xff]  }
 0x7bc   :  { %12212 = vmatpush1.bf16.msra.mxu1 %v14645_v48  ;;  %v14716_v48 = vld [vmem:[#allocation12 + $0x6e4] ss:$8 sps:$4 sm:$0xff]  }
 0x7bd   :  { %12213 = vmatprep.subr.bf16.mxu1 %v14650_v44  ;;  %v14714_v44 = vld [vmem:[#allocation12 + $0x6e0] ss:$8 sps:$4 sm:$0xff]  }
 0x7c0   :  { %12214 = vmatpush1.bf16.msra.mxu1 %v14648_v38  ;;  %v14719_v38 = vld [vmem:[#allocation12 + $0x6f4] ss:$8 sps:$4 sm:$0xff]  }
 0x7c1   :  { %12215 = vmatprep.subr.bf16.mxu1 %v14653_v55  ;;  %v14717_v55 = vld [vmem:[#allocation12 + $0x6f0] ss:$8 sps:$4 sm:$0xff]  }
 0x7c4   :  { %12216 = vmatpush1.bf16.msra.mxu1 %v14651_v19  ;;  %v14722_v19 = vld [vmem:[#allocation12 + $0x704] ss:$8 sps:$4 sm:$0xff]  }
 0x7c5   :  { %12217 = vmatprep.subr.bf16.mxu1 %v14656_v60  ;;  %v14720_v60 = vld [vmem:[#allocation12 + $0x700] ss:$8 sps:$4 sm:$0xff]  }
 0x7c8   :  { %12218 = vmatpush1.bf16.msra.mxu1 %v14654_v37  ;;  %v14725_v37 = vld [vmem:[#allocation12 + $0x714] ss:$8 sps:$4 sm:$0xff]  }
 0x7c9   :  { %12219 = vmatprep.subr.bf16.mxu1 %v14659_v47  ;;  %v14723_v47 = vld [vmem:[#allocation12 + $0x710] ss:$8 sps:$4 sm:$0xff]  }
 0x7cc   :  { %12220 = vmatpush1.bf16.msra.mxu1 %v14657_v22  ;;  %v14728_v22 = vld [vmem:[#allocation12 + $0x724] ss:$8 sps:$4 sm:$0xff]  }
 0x7cd   :  { %12221 = vmatprep.subr.bf16.mxu1 %v14662_v57  ;;  %v14726_v57 = vld [vmem:[#allocation12 + $0x720] ss:$8 sps:$4 sm:$0xff]  }
 0x7d0   :  { %12222 = vmatpush1.bf16.msra.mxu1 %v14660_v31  ;;  %v14731_v31 = vld [vmem:[#allocation12 + $0x734] ss:$8 sps:$4 sm:$0xff]  }
 0x7d1   :  { %12223 = vmatprep.subr.bf16.mxu1 %v14665_v62  ;;  %v14729_v62 = vld [vmem:[#allocation12 + $0x730] ss:$8 sps:$4 sm:$0xff]  }
 0x7d4   :  { %12224 = vmatpush1.bf16.msra.mxu1 %v14663_v27  ;;  %v14734_v27 = vld [vmem:[#allocation12 + $0x744] ss:$8 sps:$4 sm:$0xff]  }
 0x7d5   :  { %12225 = vmatprep.subr.bf16.mxu1 %v14668_v28  ;;  %v14732_v28 = vld [vmem:[#allocation12 + $0x740] ss:$8 sps:$4 sm:$0xff]  }
 0x7d8   :  { %12226 = vmatpush1.bf16.msra.mxu1 %v14666_v20  ;;  %v14737_v20 = vld [vmem:[#allocation12 + $0x754] ss:$8 sps:$4 sm:$0xff]  }
 0x7d9   :  { %12227 = vmatprep.subr.bf16.mxu1 %v14671_v34  ;;  %v14740_v34 = vld [vmem:[#allocation12 + $0x764] ss:$8 sps:$4 sm:$0xff]  }
 0x7dc   :  { %12228 = vmatpush1.bf16.msra.mxu1 %v14669_v4  ;;  %v14743_v4 = vld [vmem:[#allocation12 + $0x774] ss:$8 sps:$4 sm:$0xff]  }
 0x7dd   :  { %12447 = vmatprep.subr.bf16.mxu1 %v14674_v24  ;;  %v14741_v24 = vld [vmem:[#allocation12 + $0x770] ss:$8 sps:$4 sm:$0xff]  }
 0x7df   :  { %12230 = vmatmul.mubr.bf16.vlgmr.msra.gmra.mrb[192].mxu1 %v19688_v25  ;;  %v14771_v25 = vld [vmem:[%s19790_s7 + $0x8] sm:$0xff]  }
 0x7e0   :  { %12448 = vmatpush1.bf16.msra.mxu1 %v14672_v26  ;;  %12479 = vmatprep.mubr.bf16.mxu1 %v19698_v17  ;;  %v14773_v17 = vld [vmem:[%s19790_s7 + $0x10] sm:$0xff]   ;;  %v14746_v26 = vld [vmem:[#allocation12 + $0x784] ss:$8 sps:$4 sm:$0xff]  }
 0x7e1   :  { %12449 = vmatprep.subr.bf16.mxu1 %v14677_v35  ;;  %13916 = vmatpush3.bf16.msra.mxu0 %v14771_v25  ;;  %v14744_v35 = vld [vmem:[#allocation12 + $0x780] ss:$8 sps:$4 sm:$0xff]   ;;  %v14753_v25 = vld [vmem:[#allocation12 + $0x7b0] ss:$8 sps:$4 sm:$0xff]  }
 0x7e2   :  { %13917 = vmatprep.subr.bf16.mxu0 %v14772_v51  ;;  %v14758_v51 = vld [vmem:[#allocation12 + $0x7c4] ss:$8 sps:$4 sm:$0xff]  }
 0x7e4   :  { %12450 = vmatpush1.bf16.msra.mxu1 %v14675_v16  ;;  %v14750_v16 = vld [vmem:[#allocation12 + $0x7a0] ss:$8 sps:$4 sm:$0xff]  }
 0x7e5   :  { %12451 = vmatprep.subr.bf16.mxu1 %v14680_v5  ;;  %13918 = vmatpush3.bf16.msra.mxu0 %v14773_v17  ;;  %v14755_v5 = vld [vmem:[#allocation12 + $0x7b4] ss:$8 sps:$4 sm:$0xff]   ;;  %v14759_v17 = vld [vmem:[#allocation12 + $0x7d0] ss:$8 sps:$4 sm:$0xff]  }
 0x7e6   :  { %13919 = vmatprep.subr.bf16.mxu0 %v14774_v63  ;;  %v14764_v63 = vld [vmem:[#allocation12 + $0x7e4] ss:$8 sps:$4 sm:$0xff]  }
 0x7e8   :  { %12452 = vmatpush1.bf16.msra.mxu1 %v14678_v18  ;;  %v14756_v18 = vld [vmem:[#allocation12 + $0x7c0] ss:$8 sps:$4 sm:$0xff]  }
 0x7e9   :  { %12453 = vmatprep.subr.bf16.mxu1 %v14683_v39  ;;  %13920 = vmatpush3.bf16.msra.mxu0 %v14775_v49  ;;  %v14761_v39 = vld [vmem:[#allocation12 + $0x7d4] ss:$8 sps:$4 sm:$0xff]   ;;  %v14765_v49 = vld [vmem:[#allocation12 + $0x7f0] ss:$8 sps:$4 sm:$0xff]  }
 0x7ea   :  { %13921 = vmatprep.subr.bf16.mxu0 %v14776_v50  ;;  %v14782_v50 = vld [vmem:[%s19790_s7 + $0x78] sm:$0xff]  }
 0x7ec   :  { %12454 = vmatpush1.bf16.msra.mxu1 %v14681_v7  ;;  %v14762_v7 = vld [vmem:[#allocation12 + $0x7e0] ss:$8 sps:$4 sm:$0xff]  }
 0x7ed   :  { %12455 = vmatprep.subr.bf16.mxu1 %v14686_v54  ;;  %13922 = vmatpush3.bf16.msra.mxu0 %v14777_v41  ;;  %v14767_v54 = vld [vmem:[#allocation12 + $0x7f4] ss:$8 sps:$4 sm:$0xff]  }
 0x7ee   :  { %13923 = vmatprep.subr.bf16.mxu0 %v14778_v52 }
 0x7f0   :  { %12456 = vmatpush1.bf16.msra.mxu1 %v14684_v32  ;;  %v14783_v32 = vld [vmem:[%s19790_s7 + $0x38] sm:$0xff]  }
 0x7f1   :  { %12457 = vmatprep.subr.bf16.mxu1 %v14689_v0  ;;  %13924 = vmatpush3.bf16.msra.mxu0 %v14779_v6  ;;  %v12752_v0 = vld [vmem:[%s19789_s6] sm:$0x3] }
 0x7f2   :  { %13925 = vmatprep.subr.bf16.mxu0 %v14780_v56  ;;  %v12757_v41 = vrot.slane %v12752_v0, %v20077_v30  ;;  %v12761_v52 = vrot.slane %v12752_v0, %v20078_v33  ;;  %v13896_v30 = vld [vmem:[%s19791_s8] ss:$0 sm:$0xff] }
 0x7f4   :  { %12458 = vmatpush1.bf16.msra.mxu1 %v14687_v53 }
 0x7f5   :  { %12459 = vmatprep.subr.bf16.mxu1 %v14692_v8  ;;  %13926 = vmatpush3.bf16.msra.mxu0 %v14781_v46 }
 0x7f6   :  { %13927 = vmatprep.subr.bf16.mxu0 %v14782_v50 }
 0x7f8   :  { %12460 = vmatpush1.bf16.msra.mxu1 %v14690_v36 }
 0x7f9   :  { %12461 = vmatprep.subr.bf16.mxu1 %v14695_v45  ;;  %13928 = vmatpush3.bf16.msra.mxu0 %v14783_v32 }
 0x7fc   :  { %12462 = vmatpush1.bf16.msra.mxu1 %v14693_v21 }
 0x7fd   :  { %12463 = vmatprep.subr.bf16.mxu1 %v14698_v12 }
 0x800   :  { %12464 = vmatpush1.bf16.msra.mxu1 %v14696_v15 }
 0x801   :  { %12465 = vmatprep.subr.bf16.mxu1 %v14701_v10 }
 0x804   :  { %12466 = vmatpush1.bf16.msra.mxu1 %v14699_v42 }
 0x805   :  { %12467 = vmatprep.subr.bf16.mxu1 %v14704_v61 }
 0x808   :  { %12468 = vmatpush1.bf16.msra.mxu1 %v14702_v13 }
 0x809   :  { %12469 = vmatprep.subr.bf16.mxu1 %v14707_v29 }
 0x80c   :  { %12470 = vmatpush1.bf16.msra.mxu1 %v14705_v2 }
 0x80d   :  { %12471 = vmatprep.subr.bf16.mxu1 %v14710_v58 }
 0x810   :  { %12472 = vmatpush1.bf16.msra.mxu1 %v14708_v23 }
 0x811   :  { %12473 = vmatprep.subr.bf16.mxu1 %v14713_v59 }
 0x814   :  { %12474 = vmatpush1.bf16.msra.mxu1 %v14711_v3 }
 0x815   :  { %12475 = vmatprep.subr.bf16.mxu1 %v14716_v48 }
 0x818   :  { %12476 = vmatpush1.bf16.msra.mxu1 %v14714_v44 }
 0x819   :  { %12477 = vmatprep.subr.bf16.mxu1 %v14719_v38 }
 0x81c   :  { %12478 = vmatpush1.bf16.msra.mxu1 %v14717_v55 }
 0x81d   :  { %12697 = vmatprep.subr.bf16.mxu1 %v14722_v19 }
 0x81f   :  { %12480 = vmatmul.mubr.bf16.vlgmr.msra.gmra.mrb[192].mxu1 %v19696_v1  ;;  %v14735_v1 = vld [vmem:[#allocation12 + $0x750] ss:$8 sps:$4 sm:$0xff]  }
 0x820   :  { %12698 = vmatpush1.bf16.msra.mxu1 %v14720_v60  ;;  %12729 = vmatprep.mubr.bf16.mxu1 %v19706_v43  ;;  %v14738_v43 = vld [vmem:[#allocation12 + $0x760] ss:$8 sps:$4 sm:$0xff]  }
 0x821   :  { %12699 = vmatprep.subr.bf16.mxu1 %v14725_v37 }
 0x824   :  { %12700 = vmatpush1.bf16.msra.mxu1 %v14723_v47 }
 0x825   :  { %12701 = vmatprep.subr.bf16.mxu1 %v14728_v22 }
 0x828   :  { %12702 = vmatpush1.bf16.msra.mxu1 %v14726_v57 }
 0x829   :  { %12703 = vmatprep.subr.bf16.mxu1 %v14731_v31 }
 0x82c   :  { %12704 = vmatpush1.bf16.msra.mxu1 %v14729_v62 }
 0x82d   :  { %12705 = vmatprep.subr.bf16.mxu1 %v14734_v27 }
 0x830   :  { %12706 = vmatpush1.bf16.msra.mxu1 %v14732_v28 }
 0x831   :  { %12707 = vmatprep.subr.bf16.mxu1 %v14737_v20 }
 0x834   :  { %12708 = vmatpush1.bf16.msra.mxu1 %v14735_v1 }
 0x835   :  { %12709 = vmatprep.subr.bf16.mxu1 %v14740_v34 }
 0x838   :  { %12710 = vmatpush1.bf16.msra.mxu1 %v14738_v43 }
 0x839   :  { %12711 = vmatprep.subr.bf16.mxu1 %v14743_v4 }
 0x83c   :  { %12712 = vmatpush1.bf16.msra.mxu1 %v14741_v24 }
 0x83d   :  { %12713 = vmatprep.subr.bf16.mxu1 %v14746_v26 }
 0x840   :  { %12714 = vmatpush1.bf16.msra.mxu1 %v14744_v35 }
 0x841   :  { %12715 = vmatprep.subr.bf16.mxu1 %v14749_v40 }
 0x844   :  { %12716 = vmatpush1.bf16.msra.mxu1 %v14747_v11 }
 0x845   :  { %12717 = vmatprep.subr.bf16.mxu1 %v14752_v14 }
 0x848   :  { %12718 = vmatpush1.bf16.msra.mxu1 %v14750_v16 }
 0x849   :  { %12719 = vmatprep.subr.bf16.mxu1 %v14755_v5 }
 0x84c   :  { %12720 = vmatpush1.bf16.msra.mxu1 %v14753_v25 }
 0x84d   :  { %12721 = vmatprep.subr.bf16.mxu1 %v14758_v51 }
 0x850   :  { %12722 = vmatpush1.bf16.msra.mxu1 %v14756_v18 }
 0x851   :  { %12723 = vmatprep.subr.bf16.mxu1 %v14761_v39 }
 0x854   :  { %12724 = vmatpush1.bf16.msra.mxu1 %v14759_v17 }
 0x855   :  { %12725 = vmatprep.subr.bf16.mxu1 %v14764_v63 }
 0x858   :  { %12726 = vmatpush1.bf16.msra.mxu1 %v14762_v7 }
 0x859   :  { %12727 = vmatprep.subr.bf16.mxu1 %v14767_v54 }
 0x85c   :  { %12728 = vmatpush1.bf16.msra.mxu1 %v14765_v49 }
 0x85f   :  { %12730 = vmatmul.mubr.bf16.vlgmr.msra.gmra.mrb[192].mxu1 %v19704_v9 }
 0x932   :  { %v12731_v53 = vpop.f32.mrb[192].mxu1 }
 0x933   :  { %v12764_v9 = vadd.f32 %v12757_v41, %v12731_v53  ;;  %v12733_v8 = vpop.f32.mrb[193].mxu1 }
 0x934   :  { %v12765_v6 = vadd.f32 %v12761_v52, %v12733_v8  ;;  %v12735_v56 = vpop.f32.mrb[194].mxu1 }
 0x935   :  { %v12766_v36 = vadd.f32 %v12757_v41, %v12735_v56  ;;  %v12737_v45 = vpop.f32.mrb[195].mxu1  ;;  %v12768_v21 = vmax.f32 %v12764_v9, 0.0 }
 0x936   :  { %v12767_v46 = vadd.f32 %v12761_v52, %v12737_v45  ;;  %v12769_v15 = vmax.f32 %v12765_v6, 0.0 }
 0x937   :  { %v12770_v12 = vmax.f32 %v12766_v36, 0.0 }
 0x938   :  { %v12771_v10 = vmax.f32 %v12767_v46, 0.0 }
 0x939   :  { %v12772_v42 = vpack.c.bf16 %v12770_v12, %v12768_v21 }
 0x93a   :  { %v12773_v61 = vpack.c.bf16 %v12771_v10, %v12769_v15 }
 0x93c   :  { %12941 = vmatprep.mubr.bf16.mxu0 %v12773_v61 }
 0x93d   :  { %12942 = vmatmul.mubr.bf16.vlgmr.msra.gmra.mrb[32].mxu0 %v12772_v42 }
 0xa10   :  { %v13929_v13 = vpop.f32.mrb[32].mxu0 }
 0xa11   :  { %v13930_v33 = vpop.f32.mrb[33].mxu0 }
 0xa12   :  { %v13931_v29 = vadd.f32 %v13930_v33, %v13929_v13  ;;  %v13932_v2 = vpop.f32.mrb[34].mxu0 }
 0xa13   :  { %v13933_v58 = vpop.f32.mrb[35].mxu0 }
 0xa14   :  { %v12944_v23 = vadd.f32 %v13931_v29, %v13896_v30  ;;  %v13934_v59 = vadd.f32 %v13933_v58, %v13932_v2 }
 0xa16   :  { %12950 = vmax.xlane.f32.xlu0 %v12944_v23  ;;  %v12947_v3 = vadd.f32 %v13934_v59, %v13896_v30 }
 0xa1a   :  { %12952 = vmax.xlane.f32.xlu0 %v12947_v3 }
 0xaa3   :  { %v12951_v48 = vpop.xlane.xlu0 %12950 }
 0xaa4   :  { %v12954_v44 = vsub.f32 %v12944_v23, %v12951_v48 }
 0xaa6   :  { %v12956_v38 = vmul.f32 1.442695, %v12954_v44 }
 0xaa7   :  { %v12953_v55 = vpop.xlane.xlu0 %12952 }
 0xaa8   :  { %v12955_v19 = vsub.f32 %v12947_v3, %v12953_v55  ;;  %14784 = vpow2.f32 %v12956_v38 }
 0xaaa   :  { %v12958_v60 = vmul.f32 1.442695, %v12955_v19 }
 0xaac   :  { %14786 = vpow2.f32 %v12958_v60 }
 0xab2   :  { %v14785_v37 = vpop.eup %14784 }
 0xab3   :  { %12960 = vadd.xlane.f32.xlu1 %v14785_v37 }
 0xab6   :  { %v14787_v47 = vpop.eup %14786 }
 0xab7   :  { %12962 = vadd.xlane.f32.xlu1 %v14787_v47 }
 0xb40   :  { %v12961_v22 = vpop.xlane.xlu1 %12960 }
 0xb41   :  { %14788 = vlog2.f32 %v12961_v22 }
 0xb44   :  { %v12963_v57 = vpop.xlane.xlu1 %12962 }
 0xb45   :  { %14790 = vlog2.f32 %v12963_v57 }
 0xb4b   :  { %v14789_v31 = vpop.eup %14788 }
 0xb4c   :  { %v12965_v62 = vmul.f32 0.6931472, %v14789_v31 }
 0xb4e   :  { %v12968_v27 = vadd.f32 %v12965_v62, %v12951_v48 }
 0xb4f   :  { %v14791_v28 = vpop.eup %14790 }
 0xb50   :  { %v12970_v20 = vsub.f32 %v12944_v23, %v12968_v27  ;;  %v12967_v1 = vmul.f32 0.6931472, %v14791_v28 }
 0xb52   :  { %12972 = vst [vmem:[%s19792_s9] sm:$0xff] %v12970_v20  ;;  %v12969_v34 = vadd.f32 %v12967_v1, %v12953_v55 }
 0xb54   :  { %v12971_v43 = vsub.f32 %v12947_v3, %v12969_v34 }
 0xb56   :  { %12973 = vst [vmem:[%s19792_s9 + $0x8] sm:$0xff] %v12971_v43 }
 0xb57   :  { %12978 = vsyncpa [#allocation9], 1 }
 0xb58   :  { %12979 = vsyncpa [#allocation11], 1 }

</bundles_post_ra>
